<compile_context>
chip_gen: v7x
topology: tpu7x:2x2x1
jax: 0.10.0
libtpu: 0.0.40
codegen_flags: <defaults>
</compile_context>

<pallas_src>
import functools

import jax
import jax.numpy as jnp
from jax.experimental import pallas as pl
from jax.experimental.pallas import tpu as pltpu

# ---- fixed geometry implied by the module (28x28x1 input, fc1 fan-in 64*7*7)
IMG = 28                       # conv1 spatial size
PIX = IMG * IMG                # 784
MID = 14                       # spatial size after pool1
MIDP = MID + 2                 # 16: conv2 padded spatial size
LROWS = (MID - 1) * MIDP + MID # 222: implicit-GEMM rows (incl. junk halo cols)
FIN = 7                        # spatial size after pool2
S = FIN * FIN                  # 49
CO1, CO2 = 32, 64              # conv output channels
NH, NC = 128, 10               # fc1 hidden width, #classes
K2 = 9 * CO1                   # 288: conv2 taps folded into the contraction dim


# ---------------------------------------------------------------------------
# The fused kernel: one grid step = one batch tile of `bt` images.
# ---------------------------------------------------------------------------
def _fused_cnn_kernel(x1_ref, w1_ref, b1_ref, w2_ref, b2_ref, w3_ref, b3_ref,
                      w4_ref, b4_ref, out_ref,
                      acc1_ref, x2p_ref, p2_ref, acc2_ref, pool2_ref, *, bt):
    """Refs:
      x1_ref   : (bt, 784, 9)   bf16  conv1 im2col (input-layer, taps last)
      w1_ref   : (9, 32)        bf16  conv1 weights, taps folded into K
      w2_ref   : (288, 64)      bf16  conv2 weights, taps folded into K
      w3_ref   : (49, 64, 128)  bf16  fc1 weights, rows in NHWC flatten order
      w4_ref   : (128, 10)      bf16  fc2 weights
      b*_ref   : (1, N)         f32   biases
      out_ref  : (1, bt, 10)    f32   logits
    Scratch:
      acc1_ref : (784, 32)  f32   conv1 pre-pool accumulator
      x2p_ref  : (256, 32)  bf16  conv2 padded input (16x16 flattened)
      p2_ref   : (222, 288) bf16  conv2 im2col patches (taps folded into K)
      acc2_ref : (222, 64)  f32   conv2 pre-pool accumulator (junk halo cols
                                  at w in {14,15} are never read back)
      pool2_ref: (bt, 49, 64) bf16  pooled conv2 activations (fc1 input)
    """
    # Zero conv2's padded image once per grid step: the halo is never written
    # and the interior rows are fully overwritten for every image.
    x2p_ref[...] = jnp.zeros(x2p_ref.shape, x2p_ref.dtype)

    b1 = b1_ref[...]                                   # (1, 32) f32
    b2 = b2_ref[...]                                   # (1, 64) f32

    for b in range(bt):
        # ---- conv1: one K=9 implicit-GEMM matmul (784,9)@(9,32) ------------
        acc1_ref[...] = jnp.dot(x1_ref[b], w1_ref[...],
                                preferred_element_type=jnp.float32)

        # ---- 2x2/2 max-pool + bias + ReLU, written straight into the -------
        # ---- interior of conv2's padded input (in-kernel halo pad) ---------
        # relu(x + b) is monotone, so bias/ReLU commute with max.
        for i in range(MID):
            base = 2 * i * IMG
            q00 = acc1_ref[pl.ds(base,           MID, stride=2), :]
            q01 = acc1_ref[pl.ds(base + 1,       MID, stride=2), :]
            q10 = acc1_ref[pl.ds(base + IMG,     MID, stride=2), :]
            q11 = acc1_ref[pl.ds(base + IMG + 1, MID, stride=2), :]
            m = jnp.maximum(jnp.maximum(q00, q01), jnp.maximum(q10, q11))
            x2p_ref[pl.ds((i + 1) * MIDP + 1, MID), :] = (
                jnp.maximum(m + b1, 0.0).astype(x2p_ref.dtype))

        # ---- conv2 im2col: fold the 9 taps into K=288 (VMEM->VMEM copies) --
        for k in range(9):
            kh, kw = divmod(k, 3)
            p2_ref[:, pl.ds(k * CO1, CO1)] = (
                x2p_ref[pl.ds(kh * MIDP + kw, LROWS), :])

        # ---- conv2: ONE K=288 matmul (222,288)@(288,64) --------------------
        acc2_ref[...] = jnp.dot(p2_ref[...], w2_ref[...],
                                preferred_element_type=jnp.float32)

        # ---- 2x2/2 max-pool + bias + ReLU -> fc1 input tile ----------------
        for i in range(FIN):
            base = 2 * i * MIDP
            q00 = acc2_ref[pl.ds(base,            FIN, stride=2), :]
            q01 = acc2_ref[pl.ds(base + 1,        FIN, stride=2), :]
            q10 = acc2_ref[pl.ds(base + MIDP,     FIN, stride=2), :]
            q11 = acc2_ref[pl.ds(base + MIDP + 1, FIN, stride=2), :]
            m = jnp.maximum(jnp.maximum(q00, q01), jnp.maximum(q10, q11))
            pool2_ref[b, pl.ds(i * FIN, FIN), :] = (
                jnp.maximum(m + b2, 0.0).astype(pool2_ref.dtype))

    # ---- fc1: 49 accumulated (bt,64)@(64,128) MXU dots (no flatten relayout,
    # ---- the (bt,128) f32 accumulator lives in registers) -------------------
    hid = jnp.zeros((bt, NH), jnp.float32)
    for s in range(S):
        hid = hid + jnp.dot(pool2_ref[:, s, :], w3_ref[s],
                            preferred_element_type=jnp.float32)
    hid = jnp.maximum(hid + b3_ref[...], 0.0).astype(jnp.bfloat16)

    # ---- fc2 fused into the same epilogue -----------------------------------
    logits = jnp.dot(hid, w4_ref[...],
                     preferred_element_type=jnp.float32) + b4_ref[...]
    out_ref[...] = logits[None, :, :].astype(out_ref.dtype)


def _pick_bt(batch):
    """Images per grid step: amortize per-step overhead, but keep >=2 grid
    steps whenever batch >= 2 so both v7x TensorCores get work."""
    if batch <= 1:
        return 1
    bt = min(8, batch)
    while bt > 1 and -(-batch // bt) < 2:
        bt //= 2
    return bt


def _nbytes(shape, dtype):
    n = 1
    for s in shape:
        n *= s
    return n * jnp.dtype(dtype).itemsize


# ---------------------------------------------------------------------------
# Forward pass (single pallas_call)
# ---------------------------------------------------------------------------
def simple_cnn_forward(x_nchw, kp):
    B = x_nchw.shape[0]
    assert x_nchw.shape[1:] == (1, IMG, IMG)
    bt = _pick_bt(B)
    grid_n = -(-B // bt)
    Bp = grid_n * bt

    # Input-layer im2col (taps last), built once in XLA on the input path.
    x = x_nchw.reshape(B, IMG, IMG).astype(jnp.bfloat16)
    if Bp != B:
        x = jnp.pad(x, ((0, Bp - B), (0, 0), (0, 0)))
    xp = jnp.pad(x, ((0, 0), (1, 1), (1, 1)))                      # (Bp,30,30)
    taps = [xp[:, kh:kh + IMG, kw:kw + IMG]
            for kh in range(3) for kw in range(3)]
    x1 = jnp.stack(taps, axis=-1).reshape(Bp, PIX, 9)              # (Bp,784,9)

    kernel = functools.partial(_fused_cnn_kernel, bt=bt)
    flops = 2 * Bp * (PIX * 9 * CO1 + LROWS * K2 * CO2 + S * CO2 * NH + NH * NC)
    bytes_accessed = (_nbytes((Bp, PIX, 9), jnp.bfloat16)
                      + _nbytes((9, CO1), jnp.bfloat16)
                      + _nbytes((K2, CO2), jnp.bfloat16)
                      + _nbytes((S, CO2, NH), jnp.bfloat16)
                      + _nbytes((NH, NC), jnp.bfloat16)
                      + (CO1 + CO2 + NH + NC) * 4
                      + _nbytes((Bp, NC), jnp.float32))

    out = pl.pallas_call(
        kernel,
        out_shape=jax.ShapeDtypeStruct((grid_n, bt, NC), jnp.float32),
        grid=(grid_n,),
        in_specs=[
            pl.BlockSpec((bt, PIX, 9), lambda i: (i, 0, 0)),       # im2col input
            pl.BlockSpec((9, CO1), lambda i: (0, 0)),              # conv1 w (resident)
            pl.BlockSpec((1, CO1), lambda i: (0, 0)),              # conv1 b
            pl.BlockSpec((K2, CO2), lambda i: (0, 0)),             # conv2 w (resident)
            pl.BlockSpec((1, CO2), lambda i: (0, 0)),              # conv2 b
            pl.BlockSpec((S, CO2, NH), lambda i: (0, 0, 0)),       # fc1 w (resident)
            pl.BlockSpec((1, NH), lambda i: (0, 0)),               # fc1 b
            pl.BlockSpec((NH, NC), lambda i: (0, 0)),              # fc2 w (resident)
            pl.BlockSpec((1, NC), lambda i: (0, 0)),               # fc2 b
        ],
        out_specs=pl.BlockSpec((1, bt, NC), lambda i: (i, 0, 0)),
        scratch_shapes=[
            pltpu.VMEM((PIX, CO1), jnp.float32),                   # acc1
            pltpu.VMEM((MIDP * MIDP, CO1), jnp.bfloat16),          # x2p (padded)
            pltpu.VMEM((LROWS, K2), jnp.bfloat16),                 # p2 (im2col)
            pltpu.VMEM((LROWS, CO2), jnp.float32),                 # acc2
            pltpu.VMEM((bt, S, CO2), jnp.bfloat16),                # pooled conv2
        ],
        compiler_params=pltpu.CompilerParams(
            dimension_semantics=("parallel",)),
        cost_estimate=pl.CostEstimate(flops=flops, transcendentals=0,
                                      bytes_accessed=bytes_accessed),
    )(x1, kp["conv1_w"], kp["conv1_b"], kp["conv2_w"], kp["conv2_b"],
      kp["fc1_w"], kp["fc1_b"], kp["fc2_w"], kp["fc2_b"])

    return out.reshape(Bp, NC)[:B]


# ---------------------------------------------------------------------------
# Parameters: PyTorch layouts -> kernel layouts (offline, once)
# ---------------------------------------------------------------------------
def init_torch_params(key):
    """Random params in PyTorch's native layouts (OIHW convs, (out,in) FCs)."""
    ks = jax.random.split(key, 8)
    return {
        "conv1_w": 0.1 * jax.random.normal(ks[0], (32, 1, 3, 3), jnp.float32),
        "conv1_b": 0.1 * jax.random.normal(ks[1], (32,), jnp.float32),
        "conv2_w": 0.05 * jax.random.normal(ks[2], (64, 32, 3, 3), jnp.float32),
        "conv2_b": 0.05 * jax.random.normal(ks[3], (64,), jnp.float32),
        "fc1_w": 0.02 * jax.random.normal(ks[4], (128, 64 * 7 * 7), jnp.float32),
        "fc1_b": 0.02 * jax.random.normal(ks[5], (128,), jnp.float32),
        "fc2_w": 0.05 * jax.random.normal(ks[6], (10, 128), jnp.float32),
        "fc2_b": 0.05 * jax.random.normal(ks[7], (10,), jnp.float32),
    }


def prepare_params(p):
    """One-time offline re-layout so the forward pass has zero transposes:
    conv OIHW -> tap-folded (9*Cin, Cout) bf16; fc1 -> (49, 64, 128) bf16 with
    rows in NHWC-flatten order; fc2 -> (128, 10) bf16; biases -> (1, N) f32."""
    w1 = jnp.transpose(p["conv1_w"], (2, 3, 1, 0)).reshape(9, CO1)
    w2 = jnp.transpose(p["conv2_w"], (2, 3, 1, 0)).reshape(9 * CO1, CO2)
    w3 = (p["fc1_w"].reshape(NH, CO2, FIN, FIN)       # (n, c, h, w)
          .transpose(2, 3, 1, 0)                      # (h, w, c, n)
          .reshape(S, CO2, NH))                       # rows in NHWC order
    w4 = p["fc2_w"].T                                 # (128, 10)
    return {
        "conv1_w": w1.astype(jnp.bfloat16),
        "conv1_b": p["conv1_b"].reshape(1, CO1).astype(jnp.float32),
        "conv2_w": w2.astype(jnp.bfloat16),
        "conv2_b": p["conv2_b"].reshape(1, CO2).astype(jnp.float32),
        "fc1_w": w3.astype(jnp.bfloat16),
        "fc1_b": p["fc1_b"].reshape(1, NH).astype(jnp.float32),
        "fc2_w": w4.astype(jnp.bfloat16),
        "fc2_b": p["fc2_b"].reshape(1, NC).astype(jnp.float32),
    }


# ---------------------------------------------------------------------------
# Pure-JAX reference (mirrors the kernel's mixed precision: bf16 operands,
# f32 accumulation) for a tight numerical cross-check.
# ---------------------------------------------------------------------------
def reference_forward(x_nchw, kp):
    B = x_nchw.shape[0]
    x = x_nchw.reshape(B, IMG, IMG).astype(jnp.bfloat16)
    xp = jnp.pad(x, ((0, 0), (1, 1), (1, 1)))

    w1 = kp["conv1_w"]                                            # (9, 32)
    acc1 = jnp.zeros((B, IMG, IMG, CO1), jnp.float32)
    for k in range(9):
        kh, kw = divmod(k, 3)
        acc1 = acc1 + (xp[:, kh:kh + IMG, kw:kw + IMG, None].astype(jnp.float32)
                       * w1[k].astype(jnp.float32))
    y1 = jnp.maximum(acc1 + kp["conv1_b"].reshape(1, 1, 1, CO1), 0.0)
    y1 = y1.reshape(B, MID, 2, MID, 2, CO1).max(axis=(2, 4)).astype(jnp.bfloat16)

    w2 = kp["conv2_w"].reshape(9, CO1, CO2)
    xp2 = jnp.pad(y1, ((0, 0), (1, 1), (1, 1), (0, 0)))
    acc2 = jnp.zeros((B, MID, MID, CO2), jnp.float32)
    for k in range(9):
        kh, kw = divmod(k, 3)
        acc2 = acc2 + jnp.einsum("bhwc,cd->bhwd",
                                 xp2[:, kh:kh + MID, kw:kw + MID, :], w2[k],
                                 preferred_element_type=jnp.float32)
    y2 = jnp.maximum(acc2 + kp["conv2_b"].reshape(1, 1, 1, CO2), 0.0)
    y2 = y2.reshape(B, FIN, 2, FIN, 2, CO2).max(axis=(2, 4)).astype(jnp.bfloat16)

    h = jnp.einsum("bsc,scn->bn", y2.reshape(B, S, CO2), kp["fc1_w"],
                   preferred_element_type=jnp.float32) + kp["fc1_b"]
    h = jnp.maximum(h, 0.0).astype(jnp.bfloat16)
    return jnp.einsum("bk,kn->bn", h, kp["fc2_w"],
                      preferred_element_type=jnp.float32) + kp["fc2_b"]


if __name__ == "__main__":
    key = jax.random.PRNGKey(0)
    k_x, k_p = jax.random.split(key)
    # 28x28x1 input is implied by fc1's 64*7*7 fan-in (two 2x2 pools of 28).
    x = jax.random.normal(k_x, (2, 1, 28, 28), jnp.float32)
    params = prepare_params(init_torch_params(k_p))

    fwd = jax.jit(simple_cnn_forward)
    logits = fwd(x, params)
    jax.block_until_ready(logits)
    assert logits.shape == (2, 10) and logits.dtype == jnp.float32

    ref = jax.jit(reference_forward)(x, params)
    jax.block_until_ready(ref)
    assert jnp.allclose(logits, ref, atol=5e-2, rtol=5e-2), (
        f"max abs diff {jnp.max(jnp.abs(logits - ref))}")

    print("KERNEL_OK")
</pallas_src>

<mosaic_0001>
module attributes {stable_mosaic.version = 11 : i64} {
  func.func @_fused_cnn_kernel(%arg0: i32, %arg1: memref<1x784x9xbf16, #tpu.memory_space<vmem>>, %arg2: memref<9x32xbf16, #tpu.memory_space<vmem>>, %arg3: memref<1x32xf32, #tpu.memory_space<vmem>>, %arg4: memref<288x64xbf16, #tpu.memory_space<vmem>>, %arg5: memref<1x64xf32, #tpu.memory_space<vmem>>, %arg6: memref<49x64x128xbf16, #tpu.memory_space<vmem>>, %arg7: memref<1x128xf32, #tpu.memory_space<vmem>>, %arg8: memref<128x10xbf16, #tpu.memory_space<vmem>>, %arg9: memref<1x10xf32, #tpu.memory_space<vmem>>, %arg10: memref<1x1x10xf32, #tpu.memory_space<vmem>>, %arg11: memref<784x32xf32, #tpu.memory_space<vmem>>, %arg12: memref<256x32xbf16, #tpu.memory_space<vmem>>, %arg13: memref<222x288xbf16, #tpu.memory_space<vmem>>, %arg14: memref<222x64xf32, #tpu.memory_space<vmem>>, %arg15: memref<1x49x64xbf16, #tpu.memory_space<vmem>>) attributes {dimension_semantics = [#tpu.dimension_semantics<parallel>], iteration_bounds = array<i64: 2>, scalar_prefetch = 0 : i64, scratch_operands = 5 : i64, tpu.core_type = #tpu.core_type<tc>, window_params = [{transform_indices = @transform_0, window_bounds = array<i64: 1, 784, 9>}, {pipeline_mode = #tpu.pipeline_mode<synchronous>, transform_indices = @transform_1, window_bounds = array<i64: 9, 32>}, {pipeline_mode = #tpu.pipeline_mode<synchronous>, transform_indices = @transform_2, window_bounds = array<i64: 1, 32>}, {pipeline_mode = #tpu.pipeline_mode<synchronous>, transform_indices = @transform_3, window_bounds = array<i64: 288, 64>}, {pipeline_mode = #tpu.pipeline_mode<synchronous>, transform_indices = @transform_4, window_bounds = array<i64: 1, 64>}, {pipeline_mode = #tpu.pipeline_mode<synchronous>, transform_indices = @transform_5, window_bounds = array<i64: 49, 64, 128>}, {pipeline_mode = #tpu.pipeline_mode<synchronous>, transform_indices = @transform_6, window_bounds = array<i64: 1, 128>}, {pipeline_mode = #tpu.pipeline_mode<synchronous>, transform_indices = @transform_7, window_bounds = array<i64: 128, 10>}, {pipeline_mode = #tpu.pipeline_mode<synchronous>, transform_indices = @transform_8, window_bounds = array<i64: 1, 10>}, {transform_indices = @transform_9, window_bounds = array<i64: 1, 1, 10>}]} {
    %cst = arith.constant 0.000000e+00 : bf16
    %0 = vector.broadcast %cst : bf16 to vector<256x32xbf16>
    %c0 = arith.constant 0 : index
    %c0_0 = arith.constant 0 : index
    %1 = vector.load %arg12[%c0, %c0_0] : memref<256x32xbf16, #tpu.memory_space<vmem>>, vector<256x32xbf16>
    tpu.vector_store %arg12[%c0, %c0_0], %0 {strides = array<i32>} : memref<256x32xbf16, #tpu.memory_space<vmem>>, vector<256x32xbf16>,
    %c0_1 = arith.constant 0 : index
    %c0_2 = arith.constant 0 : index
    %2 = vector.load %arg3[%c0_1, %c0_2] : memref<1x32xf32, #tpu.memory_space<vmem>>, vector<1x32xf32>
    %c0_3 = arith.constant 0 : index
    %c0_4 = arith.constant 0 : index
    %3 = vector.load %arg5[%c0_3, %c0_4] : memref<1x64xf32, #tpu.memory_space<vmem>>, vector<1x64xf32>
    %c0_5 = arith.constant 0 : index
    %c0_6 = arith.constant 0 : index
    %c0_7 = arith.constant 0 : index
    %4 = vector.load %arg1[%c0_5, %c0_6, %c0_7] : memref<1x784x9xbf16, #tpu.memory_space<vmem>>, vector<1x784x9xbf16>
    %5 = vector.shape_cast %4 : vector<1x784x9xbf16> to vector<784x9xbf16>
    %c0_8 = arith.constant 0 : index
    %c0_9 = arith.constant 0 : index
    %6 = vector.load %arg2[%c0_8, %c0_9] : memref<9x32xbf16, #tpu.memory_space<vmem>>, vector<9x32xbf16>
    %cst_10 = arith.constant dense<0.000000e+00> : vector<784x32xf32>
    %7 = tpu.matmul %5, %6, %cst_10 {dimension_numbers = #tpu.dot_dimension_numbers<[1], [0], [0], [1], [0, 0, 1, 1], [], []>} : vector<784x9xbf16>, vector<9x32xbf16>, vector<784x32xf32> -> vector<784x32xf32>
    %c0_11 = arith.constant 0 : index
    %c0_12 = arith.constant 0 : index
    %8 = vector.load %arg11[%c0_11, %c0_12] : memref<784x32xf32, #tpu.memory_space<vmem>>, vector<784x32xf32>
    tpu.vector_store %arg11[%c0_11, %c0_12], %7 {strides = array<i32>} : memref<784x32xf32, #tpu.memory_space<vmem>>, vector<784x32xf32>,
    %c0_13 = arith.constant 0 : index
    %c0_14 = arith.constant 0 : index
    %9 = tpu.strided_load %arg11[%c0_13, %c0_14] {strides = array<i32: 2, 1>} : memref<784x32xf32, #tpu.memory_space<vmem>>, vector<14x32xf32>
    %c1 = arith.constant 1 : index
    %c0_15 = arith.constant 0 : index
    %10 = tpu.strided_load %arg11[%c1, %c0_15] {strides = array<i32: 2, 1>} : memref<784x32xf32, #tpu.memory_space<vmem>>, vector<14x32xf32>
    %c28 = arith.constant 28 : index
    %c0_16 = arith.constant 0 : index
    %11 = tpu.strided_load %arg11[%c28, %c0_16] {strides = array<i32: 2, 1>} : memref<784x32xf32, #tpu.memory_space<vmem>>, vector<14x32xf32>
    %c29 = arith.constant 29 : index
    %c0_17 = arith.constant 0 : index
    %12 = tpu.strided_load %arg11[%c29, %c0_17] {strides = array<i32: 2, 1>} : memref<784x32xf32, #tpu.memory_space<vmem>>, vector<14x32xf32>
    %13 = arith.maximumf %9, %10 : vector<14x32xf32>
    %14 = arith.maximumf %11, %12 : vector<14x32xf32>
    %15 = arith.maximumf %13, %14 : vector<14x32xf32>
    %16 = vector.broadcast %2 : vector<1x32xf32> to vector<14x32xf32>
    %17 = arith.addf %15, %16 : vector<14x32xf32>
    %cst_18 = arith.constant 0.000000e+00 : f32
    %18 = vector.broadcast %cst_18 : f32 to vector<14x32xf32>
    %19 = arith.maximumf %17, %18 : vector<14x32xf32>
    %20 = arith.truncf %19 : vector<14x32xf32> to vector<14x32xbf16>
    %c17 = arith.constant 17 : index
    %c0_19 = arith.constant 0 : index
    %21 = vector.load %arg12[%c17, %c0_19] : memref<256x32xbf16, #tpu.memory_space<vmem>>, vector<14x32xbf16>
    tpu.vector_store %arg12[%c17, %c0_19], %20 {strides = array<i32>} : memref<256x32xbf16, #tpu.memory_space<vmem>>, vector<14x32xbf16>,
    %c56 = arith.constant 56 : index
    %c0_20 = arith.constant 0 : index
    %22 = tpu.strided_load %arg11[%c56, %c0_20] {strides = array<i32: 2, 1>} : memref<784x32xf32, #tpu.memory_space<vmem>>, vector<14x32xf32>
    %c57 = arith.constant 57 : index
    %c0_21 = arith.constant 0 : index
    %23 = tpu.strided_load %arg11[%c57, %c0_21] {strides = array<i32: 2, 1>} : memref<784x32xf32, #tpu.memory_space<vmem>>, vector<14x32xf32>
    %c84 = arith.constant 84 : index
    %c0_22 = arith.constant 0 : index
    %24 = tpu.strided_load %arg11[%c84, %c0_22] {strides = array<i32: 2, 1>} : memref<784x32xf32, #tpu.memory_space<vmem>>, vector<14x32xf32>
    %c85 = arith.constant 85 : index
    %c0_23 = arith.constant 0 : index
    %25 = tpu.strided_load %arg11[%c85, %c0_23] {strides = array<i32: 2, 1>} : memref<784x32xf32, #tpu.memory_space<vmem>>, vector<14x32xf32>
    %26 = arith.maximumf %22, %23 : vector<14x32xf32>
    %27 = arith.maximumf %24, %25 : vector<14x32xf32>
    %28 = arith.maximumf %26, %27 : vector<14x32xf32>
    %29 = vector.broadcast %2 : vector<1x32xf32> to vector<14x32xf32>
    %30 = arith.addf %28, %29 : vector<14x32xf32>
    %cst_24 = arith.constant 0.000000e+00 : f32
    %31 = vector.broadcast %cst_24 : f32 to vector<14x32xf32>
    %32 = arith.maximumf %30, %31 : vector<14x32xf32>
    %33 = arith.truncf %32 : vector<14x32xf32> to vector<14x32xbf16>
    %c33 = arith.constant 33 : index
    %c0_25 = arith.constant 0 : index
    %34 = vector.load %arg12[%c33, %c0_25] : memref<256x32xbf16, #tpu.memory_space<vmem>>, vector<14x32xbf16>
    tpu.vector_store %arg12[%c33, %c0_25], %33 {strides = array<i32>} : memref<256x32xbf16, #tpu.memory_space<vmem>>, vector<14x32xbf16>,
    %c112 = arith.constant 112 : index
    %c0_26 = arith.constant 0 : index
    %35 = tpu.strided_load %arg11[%c112, %c0_26] {strides = array<i32: 2, 1>} : memref<784x32xf32, #tpu.memory_space<vmem>>, vector<14x32xf32>
    %c113 = arith.constant 113 : index
    %c0_27 = arith.constant 0 : index
    %36 = tpu.strided_load %arg11[%c113, %c0_27] {strides = array<i32: 2, 1>} : memref<784x32xf32, #tpu.memory_space<vmem>>, vector<14x32xf32>
    %c140 = arith.constant 140 : index
    %c0_28 = arith.constant 0 : index
    %37 = tpu.strided_load %arg11[%c140, %c0_28] {strides = array<i32: 2, 1>} : memref<784x32xf32, #tpu.memory_space<vmem>>, vector<14x32xf32>
    %c141 = arith.constant 141 : index
    %c0_29 = arith.constant 0 : index
    %38 = tpu.strided_load %arg11[%c141, %c0_29] {strides = array<i32: 2, 1>} : memref<784x32xf32, #tpu.memory_space<vmem>>, vector<14x32xf32>
    %39 = arith.maximumf %35, %36 : vector<14x32xf32>
    %40 = arith.maximumf %37, %38 : vector<14x32xf32>
    %41 = arith.maximumf %39, %40 : vector<14x32xf32>
    %42 = vector.broadcast %2 : vector<1x32xf32> to vector<14x32xf32>
    %43 = arith.addf %41, %42 : vector<14x32xf32>
    %cst_30 = arith.constant 0.000000e+00 : f32
    %44 = vector.broadcast %cst_30 : f32 to vector<14x32xf32>
    %45 = arith.maximumf %43, %44 : vector<14x32xf32>
    %46 = arith.truncf %45 : vector<14x32xf32> to vector<14x32xbf16>
    %c49 = arith.constant 49 : index
    %c0_31 = arith.constant 0 : index
    %47 = vector.load %arg12[%c49, %c0_31] : memref<256x32xbf16, #tpu.memory_space<vmem>>, vector<14x32xbf16>
    tpu.vector_store %arg12[%c49, %c0_31], %46 {strides = array<i32>} : memref<256x32xbf16, #tpu.memory_space<vmem>>, vector<14x32xbf16>,
    %c168 = arith.constant 168 : index
    %c0_32 = arith.constant 0 : index
    %48 = tpu.strided_load %arg11[%c168, %c0_32] {strides = array<i32: 2, 1>} : memref<784x32xf32, #tpu.memory_space<vmem>>, vector<14x32xf32>
    %c169 = arith.constant 169 : index
    %c0_33 = arith.constant 0 : index
    %49 = tpu.strided_load %arg11[%c169, %c0_33] {strides = array<i32: 2, 1>} : memref<784x32xf32, #tpu.memory_space<vmem>>, vector<14x32xf32>
    %c196 = arith.constant 196 : index
    %c0_34 = arith.constant 0 : index
    %50 = tpu.strided_load %arg11[%c196, %c0_34] {strides = array<i32: 2, 1>} : memref<784x32xf32, #tpu.memory_space<vmem>>, vector<14x32xf32>
    %c197 = arith.constant 197 : index
    %c0_35 = arith.constant 0 : index
    %51 = tpu.strided_load %arg11[%c197, %c0_35] {strides = array<i32: 2, 1>} : memref<784x32xf32, #tpu.memory_space<vmem>>, vector<14x32xf32>
    %52 = arith.maximumf %48, %49 : vector<14x32xf32>
    %53 = arith.maximumf %50, %51 : vector<14x32xf32>
    %54 = arith.maximumf %52, %53 : vector<14x32xf32>
    %55 = vector.broadcast %2 : vector<1x32xf32> to vector<14x32xf32>
    %56 = arith.addf %54, %55 : vector<14x32xf32>
    %cst_36 = arith.constant 0.000000e+00 : f32
    %57 = vector.broadcast %cst_36 : f32 to vector<14x32xf32>
    %58 = arith.maximumf %56, %57 : vector<14x32xf32>
    %59 = arith.truncf %58 : vector<14x32xf32> to vector<14x32xbf16>
    %c65 = arith.constant 65 : index
    %c0_37 = arith.constant 0 : index
    %60 = vector.load %arg12[%c65, %c0_37] : memref<256x32xbf16, #tpu.memory_space<vmem>>, vector<14x32xbf16>
    tpu.vector_store %arg12[%c65, %c0_37], %59 {strides = array<i32>} : memref<256x32xbf16, #tpu.memory_space<vmem>>, vector<14x32xbf16>,
    %c224 = arith.constant 224 : index
    %c0_38 = arith.constant 0 : index
    %61 = tpu.strided_load %arg11[%c224, %c0_38] {strides = array<i32: 2, 1>} : memref<784x32xf32, #tpu.memory_space<vmem>>, vector<14x32xf32>
    %c225 = arith.constant 225 : index
    %c0_39 = arith.constant 0 : index
    %62 = tpu.strided_load %arg11[%c225, %c0_39] {strides = array<i32: 2, 1>} : memref<784x32xf32, #tpu.memory_space<vmem>>, vector<14x32xf32>
    %c252 = arith.constant 252 : index
    %c0_40 = arith.constant 0 : index
    %63 = tpu.strided_load %arg11[%c252, %c0_40] {strides = array<i32: 2, 1>} : memref<784x32xf32, #tpu.memory_space<vmem>>, vector<14x32xf32>
    %c253 = arith.constant 253 : index
    %c0_41 = arith.constant 0 : index
    %64 = tpu.strided_load %arg11[%c253, %c0_41] {strides = array<i32: 2, 1>} : memref<784x32xf32, #tpu.memory_space<vmem>>, vector<14x32xf32>
    %65 = arith.maximumf %61, %62 : vector<14x32xf32>
    %66 = arith.maximumf %63, %64 : vector<14x32xf32>
    %67 = arith.maximumf %65, %66 : vector<14x32xf32>
    %68 = vector.broadcast %2 : vector<1x32xf32> to vector<14x32xf32>
    %69 = arith.addf %67, %68 : vector<14x32xf32>
    %cst_42 = arith.constant 0.000000e+00 : f32
    %70 = vector.broadcast %cst_42 : f32 to vector<14x32xf32>
    %71 = arith.maximumf %69, %70 : vector<14x32xf32>
    %72 = arith.truncf %71 : vector<14x32xf32> to vector<14x32xbf16>
    %c81 = arith.constant 81 : index
    %c0_43 = arith.constant 0 : index
    %73 = vector.load %arg12[%c81, %c0_43] : memref<256x32xbf16, #tpu.memory_space<vmem>>, vector<14x32xbf16>
    tpu.vector_store %arg12[%c81, %c0_43], %72 {strides = array<i32>} : memref<256x32xbf16, #tpu.memory_space<vmem>>, vector<14x32xbf16>,
    %c280 = arith.constant 280 : index
    %c0_44 = arith.constant 0 : index
    %74 = tpu.strided_load %arg11[%c280, %c0_44] {strides = array<i32: 2, 1>} : memref<784x32xf32, #tpu.memory_space<vmem>>, vector<14x32xf32>
    %c281 = arith.constant 281 : index
    %c0_45 = arith.constant 0 : index
    %75 = tpu.strided_load %arg11[%c281, %c0_45] {strides = array<i32: 2, 1>} : memref<784x32xf32, #tpu.memory_space<vmem>>, vector<14x32xf32>
    %c308 = arith.constant 308 : index
    %c0_46 = arith.constant 0 : index
    %76 = tpu.strided_load %arg11[%c308, %c0_46] {strides = array<i32: 2, 1>} : memref<784x32xf32, #tpu.memory_space<vmem>>, vector<14x32xf32>
    %c309 = arith.constant 309 : index
    %c0_47 = arith.constant 0 : index
    %77 = tpu.strided_load %arg11[%c309, %c0_47] {strides = array<i32: 2, 1>} : memref<784x32xf32, #tpu.memory_space<vmem>>, vector<14x32xf32>
    %78 = arith.maximumf %74, %75 : vector<14x32xf32>
    %79 = arith.maximumf %76, %77 : vector<14x32xf32>
    %80 = arith.maximumf %78, %79 : vector<14x32xf32>
    %81 = vector.broadcast %2 : vector<1x32xf32> to vector<14x32xf32>
    %82 = arith.addf %80, %81 : vector<14x32xf32>
    %cst_48 = arith.constant 0.000000e+00 : f32
    %83 = vector.broadcast %cst_48 : f32 to vector<14x32xf32>
    %84 = arith.maximumf %82, %83 : vector<14x32xf32>
    %85 = arith.truncf %84 : vector<14x32xf32> to vector<14x32xbf16>
    %c97 = arith.constant 97 : index
    %c0_49 = arith.constant 0 : index
    %86 = vector.load %arg12[%c97, %c0_49] : memref<256x32xbf16, #tpu.memory_space<vmem>>, vector<14x32xbf16>
    tpu.vector_store %arg12[%c97, %c0_49], %85 {strides = array<i32>} : memref<256x32xbf16, #tpu.memory_space<vmem>>, vector<14x32xbf16>,
    %c336 = arith.constant 336 : index
    %c0_50 = arith.constant 0 : index
    %87 = tpu.strided_load %arg11[%c336, %c0_50] {strides = array<i32: 2, 1>} : memref<784x32xf32, #tpu.memory_space<vmem>>, vector<14x32xf32>
    %c337 = arith.constant 337 : index
    %c0_51 = arith.constant 0 : index
    %88 = tpu.strided_load %arg11[%c337, %c0_51] {strides = array<i32: 2, 1>} : memref<784x32xf32, #tpu.memory_space<vmem>>, vector<14x32xf32>
    %c364 = arith.constant 364 : index
    %c0_52 = arith.constant 0 : index
    %89 = tpu.strided_load %arg11[%c364, %c0_52] {strides = array<i32: 2, 1>} : memref<784x32xf32, #tpu.memory_space<vmem>>, vector<14x32xf32>
    %c365 = arith.constant 365 : index
    %c0_53 = arith.constant 0 : index
    %90 = tpu.strided_load %arg11[%c365, %c0_53] {strides = array<i32: 2, 1>} : memref<784x32xf32, #tpu.memory_space<vmem>>, vector<14x32xf32>
    %91 = arith.maximumf %87, %88 : vector<14x32xf32>
    %92 = arith.maximumf %89, %90 : vector<14x32xf32>
    %93 = arith.maximumf %91, %92 : vector<14x32xf32>
    %94 = vector.broadcast %2 : vector<1x32xf32> to vector<14x32xf32>
    %95 = arith.addf %93, %94 : vector<14x32xf32>
    %cst_54 = arith.constant 0.000000e+00 : f32
    %96 = vector.broadcast %cst_54 : f32 to vector<14x32xf32>
    %97 = arith.maximumf %95, %96 : vector<14x32xf32>
    %98 = arith.truncf %97 : vector<14x32xf32> to vector<14x32xbf16>
    %c113_55 = arith.constant 113 : index
    %c0_56 = arith.constant 0 : index
    %99 = vector.load %arg12[%c113_55, %c0_56] : memref<256x32xbf16, #tpu.memory_space<vmem>>, vector<14x32xbf16>
    tpu.vector_store %arg12[%c113_55, %c0_56], %98 {strides = array<i32>} : memref<256x32xbf16, #tpu.memory_space<vmem>>, vector<14x32xbf16>,
    %c392 = arith.constant 392 : index
    %c0_57 = arith.constant 0 : index
    %100 = tpu.strided_load %arg11[%c392, %c0_57] {strides = array<i32: 2, 1>} : memref<784x32xf32, #tpu.memory_space<vmem>>, vector<14x32xf32>
    %c393 = arith.constant 393 : index
    %c0_58 = arith.constant 0 : index
    %101 = tpu.strided_load %arg11[%c393, %c0_58] {strides = array<i32: 2, 1>} : memref<784x32xf32, #tpu.memory_space<vmem>>, vector<14x32xf32>
    %c420 = arith.constant 420 : index
    %c0_59 = arith.constant 0 : index
    %102 = tpu.strided_load %arg11[%c420, %c0_59] {strides = array<i32: 2, 1>} : memref<784x32xf32, #tpu.memory_space<vmem>>, vector<14x32xf32>
    %c421 = arith.constant 421 : index
    %c0_60 = arith.constant 0 : index
    %103 = tpu.strided_load %arg11[%c421, %c0_60] {strides = array<i32: 2, 1>} : memref<784x32xf32, #tpu.memory_space<vmem>>, vector<14x32xf32>
    %104 = arith.maximumf %100, %101 : vector<14x32xf32>
    %105 = arith.maximumf %102, %103 : vector<14x32xf32>
    %106 = arith.maximumf %104, %105 : vector<14x32xf32>
    %107 = vector.broadcast %2 : vector<1x32xf32> to vector<14x32xf32>
    %108 = arith.addf %106, %107 : vector<14x32xf32>
    %cst_61 = arith.constant 0.000000e+00 : f32
    %109 = vector.broadcast %cst_61 : f32 to vector<14x32xf32>
    %110 = arith.maximumf %108, %109 : vector<14x32xf32>
    %111 = arith.truncf %110 : vector<14x32xf32> to vector<14x32xbf16>
    %c129 = arith.constant 129 : index
    %c0_62 = arith.constant 0 : index
    %112 = vector.load %arg12[%c129, %c0_62] : memref<256x32xbf16, #tpu.memory_space<vmem>>, vector<14x32xbf16>
    tpu.vector_store %arg12[%c129, %c0_62], %111 {strides = array<i32>} : memref<256x32xbf16, #tpu.memory_space<vmem>>, vector<14x32xbf16>,
    %c448 = arith.constant 448 : index
    %c0_63 = arith.constant 0 : index
    %113 = tpu.strided_load %arg11[%c448, %c0_63] {strides = array<i32: 2, 1>} : memref<784x32xf32, #tpu.memory_space<vmem>>, vector<14x32xf32>
    %c449 = arith.constant 449 : index
    %c0_64 = arith.constant 0 : index
    %114 = tpu.strided_load %arg11[%c449, %c0_64] {strides = array<i32: 2, 1>} : memref<784x32xf32, #tpu.memory_space<vmem>>, vector<14x32xf32>
    %c476 = arith.constant 476 : index
    %c0_65 = arith.constant 0 : index
    %115 = tpu.strided_load %arg11[%c476, %c0_65] {strides = array<i32: 2, 1>} : memref<784x32xf32, #tpu.memory_space<vmem>>, vector<14x32xf32>
    %c477 = arith.constant 477 : index
    %c0_66 = arith.constant 0 : index
    %116 = tpu.strided_load %arg11[%c477, %c0_66] {strides = array<i32: 2, 1>} : memref<784x32xf32, #tpu.memory_space<vmem>>, vector<14x32xf32>
    %117 = arith.maximumf %113, %114 : vector<14x32xf32>
    %118 = arith.maximumf %115, %116 : vector<14x32xf32>
    %119 = arith.maximumf %117, %118 : vector<14x32xf32>
    %120 = vector.broadcast %2 : vector<1x32xf32> to vector<14x32xf32>
    %121 = arith.addf %119, %120 : vector<14x32xf32>
    %cst_67 = arith.constant 0.000000e+00 : f32
    %122 = vector.broadcast %cst_67 : f32 to vector<14x32xf32>
    %123 = arith.maximumf %121, %122 : vector<14x32xf32>
    %124 = arith.truncf %123 : vector<14x32xf32> to vector<14x32xbf16>
    %c145 = arith.constant 145 : index
    %c0_68 = arith.constant 0 : index
    %125 = vector.load %arg12[%c145, %c0_68] : memref<256x32xbf16, #tpu.memory_space<vmem>>, vector<14x32xbf16>
    tpu.vector_store %arg12[%c145, %c0_68], %124 {strides = array<i32>} : memref<256x32xbf16, #tpu.memory_space<vmem>>, vector<14x32xbf16>,
    %c504 = arith.constant 504 : index
    %c0_69 = arith.constant 0 : index
    %126 = tpu.strided_load %arg11[%c504, %c0_69] {strides = array<i32: 2, 1>} : memref<784x32xf32, #tpu.memory_space<vmem>>, vector<14x32xf32>
    %c505 = arith.constant 505 : index
    %c0_70 = arith.constant 0 : index
    %127 = tpu.strided_load %arg11[%c505, %c0_70] {strides = array<i32: 2, 1>} : memref<784x32xf32, #tpu.memory_space<vmem>>, vector<14x32xf32>
    %c532 = arith.constant 532 : index
    %c0_71 = arith.constant 0 : index
    %128 = tpu.strided_load %arg11[%c532, %c0_71] {strides = array<i32: 2, 1>} : memref<784x32xf32, #tpu.memory_space<vmem>>, vector<14x32xf32>
    %c533 = arith.constant 533 : index
    %c0_72 = arith.constant 0 : index
    %129 = tpu.strided_load %arg11[%c533, %c0_72] {strides = array<i32: 2, 1>} : memref<784x32xf32, #tpu.memory_space<vmem>>, vector<14x32xf32>
    %130 = arith.maximumf %126, %127 : vector<14x32xf32>
    %131 = arith.maximumf %128, %129 : vector<14x32xf32>
    %132 = arith.maximumf %130, %131 : vector<14x32xf32>
    %133 = vector.broadcast %2 : vector<1x32xf32> to vector<14x32xf32>
    %134 = arith.addf %132, %133 : vector<14x32xf32>
    %cst_73 = arith.constant 0.000000e+00 : f32
    %135 = vector.broadcast %cst_73 : f32 to vector<14x32xf32>
    %136 = arith.maximumf %134, %135 : vector<14x32xf32>
    %137 = arith.truncf %136 : vector<14x32xf32> to vector<14x32xbf16>
    %c161 = arith.constant 161 : index
    %c0_74 = arith.constant 0 : index
    %138 = vector.load %arg12[%c161, %c0_74] : memref<256x32xbf16, #tpu.memory_space<vmem>>, vector<14x32xbf16>
    tpu.vector_store %arg12[%c161, %c0_74], %137 {strides = array<i32>} : memref<256x32xbf16, #tpu.memory_space<vmem>>, vector<14x32xbf16>,
    %c560 = arith.constant 560 : index
    %c0_75 = arith.constant 0 : index
    %139 = tpu.strided_load %arg11[%c560, %c0_75] {strides = array<i32: 2, 1>} : memref<784x32xf32, #tpu.memory_space<vmem>>, vector<14x32xf32>
    %c561 = arith.constant 561 : index
    %c0_76 = arith.constant 0 : index
    %140 = tpu.strided_load %arg11[%c561, %c0_76] {strides = array<i32: 2, 1>} : memref<784x32xf32, #tpu.memory_space<vmem>>, vector<14x32xf32>
    %c588 = arith.constant 588 : index
    %c0_77 = arith.constant 0 : index
    %141 = tpu.strided_load %arg11[%c588, %c0_77] {strides = array<i32: 2, 1>} : memref<784x32xf32, #tpu.memory_space<vmem>>, vector<14x32xf32>
    %c589 = arith.constant 589 : index
    %c0_78 = arith.constant 0 : index
    %142 = tpu.strided_load %arg11[%c589, %c0_78] {strides = array<i32: 2, 1>} : memref<784x32xf32, #tpu.memory_space<vmem>>, vector<14x32xf32>
    %143 = arith.maximumf %139, %140 : vector<14x32xf32>
    %144 = arith.maximumf %141, %142 : vector<14x32xf32>
    %145 = arith.maximumf %143, %144 : vector<14x32xf32>
    %146 = vector.broadcast %2 : vector<1x32xf32> to vector<14x32xf32>
    %147 = arith.addf %145, %146 : vector<14x32xf32>
    %cst_79 = arith.constant 0.000000e+00 : f32
    %148 = vector.broadcast %cst_79 : f32 to vector<14x32xf32>
    %149 = arith.maximumf %147, %148 : vector<14x32xf32>
    %150 = arith.truncf %149 : vector<14x32xf32> to vector<14x32xbf16>
    %c177 = arith.constant 177 : index
    %c0_80 = arith.constant 0 : index
    %151 = vector.load %arg12[%c177, %c0_80] : memref<256x32xbf16, #tpu.memory_space<vmem>>, vector<14x32xbf16>
    tpu.vector_store %arg12[%c177, %c0_80], %150 {strides = array<i32>} : memref<256x32xbf16, #tpu.memory_space<vmem>>, vector<14x32xbf16>,
    %c616 = arith.constant 616 : index
    %c0_81 = arith.constant 0 : index
    %152 = tpu.strided_load %arg11[%c616, %c0_81] {strides = array<i32: 2, 1>} : memref<784x32xf32, #tpu.memory_space<vmem>>, vector<14x32xf32>
    %c617 = arith.constant 617 : index
    %c0_82 = arith.constant 0 : index
    %153 = tpu.strided_load %arg11[%c617, %c0_82] {strides = array<i32: 2, 1>} : memref<784x32xf32, #tpu.memory_space<vmem>>, vector<14x32xf32>
    %c644 = arith.constant 644 : index
    %c0_83 = arith.constant 0 : index
    %154 = tpu.strided_load %arg11[%c644, %c0_83] {strides = array<i32: 2, 1>} : memref<784x32xf32, #tpu.memory_space<vmem>>, vector<14x32xf32>
    %c645 = arith.constant 645 : index
    %c0_84 = arith.constant 0 : index
    %155 = tpu.strided_load %arg11[%c645, %c0_84] {strides = array<i32: 2, 1>} : memref<784x32xf32, #tpu.memory_space<vmem>>, vector<14x32xf32>
    %156 = arith.maximumf %152, %153 : vector<14x32xf32>
    %157 = arith.maximumf %154, %155 : vector<14x32xf32>
    %158 = arith.maximumf %156, %157 : vector<14x32xf32>
    %159 = vector.broadcast %2 : vector<1x32xf32> to vector<14x32xf32>
    %160 = arith.addf %158, %159 : vector<14x32xf32>
    %cst_85 = arith.constant 0.000000e+00 : f32
    %161 = vector.broadcast %cst_85 : f32 to vector<14x32xf32>
    %162 = arith.maximumf %160, %161 : vector<14x32xf32>
    %163 = arith.truncf %162 : vector<14x32xf32> to vector<14x32xbf16>
    %c193 = arith.constant 193 : index
    %c0_86 = arith.constant 0 : index
    %164 = vector.load %arg12[%c193, %c0_86] : memref<256x32xbf16, #tpu.memory_space<vmem>>, vector<14x32xbf16>
    tpu.vector_store %arg12[%c193, %c0_86], %163 {strides = array<i32>} : memref<256x32xbf16, #tpu.memory_space<vmem>>, vector<14x32xbf16>,
    %c672 = arith.constant 672 : index
    %c0_87 = arith.constant 0 : index
    %165 = tpu.strided_load %arg11[%c672, %c0_87] {strides = array<i32: 2, 1>} : memref<784x32xf32, #tpu.memory_space<vmem>>, vector<14x32xf32>
    %c673 = arith.constant 673 : index
    %c0_88 = arith.constant 0 : index
    %166 = tpu.strided_load %arg11[%c673, %c0_88] {strides = array<i32: 2, 1>} : memref<784x32xf32, #tpu.memory_space<vmem>>, vector<14x32xf32>
    %c700 = arith.constant 700 : index
    %c0_89 = arith.constant 0 : index
    %167 = tpu.strided_load %arg11[%c700, %c0_89] {strides = array<i32: 2, 1>} : memref<784x32xf32, #tpu.memory_space<vmem>>, vector<14x32xf32>
    %c701 = arith.constant 701 : index
    %c0_90 = arith.constant 0 : index
    %168 = tpu.strided_load %arg11[%c701, %c0_90] {strides = array<i32: 2, 1>} : memref<784x32xf32, #tpu.memory_space<vmem>>, vector<14x32xf32>
    %169 = arith.maximumf %165, %166 : vector<14x32xf32>
    %170 = arith.maximumf %167, %168 : vector<14x32xf32>
    %171 = arith.maximumf %169, %170 : vector<14x32xf32>
    %172 = vector.broadcast %2 : vector<1x32xf32> to vector<14x32xf32>
    %173 = arith.addf %171, %172 : vector<14x32xf32>
    %cst_91 = arith.constant 0.000000e+00 : f32
    %174 = vector.broadcast %cst_91 : f32 to vector<14x32xf32>
    %175 = arith.maximumf %173, %174 : vector<14x32xf32>
    %176 = arith.truncf %175 : vector<14x32xf32> to vector<14x32xbf16>
    %c209 = arith.constant 209 : index
    %c0_92 = arith.constant 0 : index
    %177 = vector.load %arg12[%c209, %c0_92] : memref<256x32xbf16, #tpu.memory_space<vmem>>, vector<14x32xbf16>
    tpu.vector_store %arg12[%c209, %c0_92], %176 {strides = array<i32>} : memref<256x32xbf16, #tpu.memory_space<vmem>>, vector<14x32xbf16>,
    %c728 = arith.constant 728 : index
    %c0_93 = arith.constant 0 : index
    %178 = tpu.strided_load %arg11[%c728, %c0_93] {strides = array<i32: 2, 1>} : memref<784x32xf32, #tpu.memory_space<vmem>>, vector<14x32xf32>
    %c729 = arith.constant 729 : index
    %c0_94 = arith.constant 0 : index
    %179 = tpu.strided_load %arg11[%c729, %c0_94] {strides = array<i32: 2, 1>} : memref<784x32xf32, #tpu.memory_space<vmem>>, vector<14x32xf32>
    %c756 = arith.constant 756 : index
    %c0_95 = arith.constant 0 : index
    %180 = tpu.strided_load %arg11[%c756, %c0_95] {strides = array<i32: 2, 1>} : memref<784x32xf32, #tpu.memory_space<vmem>>, vector<14x32xf32>
    %c757 = arith.constant 757 : index
    %c0_96 = arith.constant 0 : index
    %181 = tpu.strided_load %arg11[%c757, %c0_96] {strides = array<i32: 2, 1>} : memref<784x32xf32, #tpu.memory_space<vmem>>, vector<14x32xf32>
    %182 = arith.maximumf %178, %179 : vector<14x32xf32>
    %183 = arith.maximumf %180, %181 : vector<14x32xf32>
    %184 = arith.maximumf %182, %183 : vector<14x32xf32>
    %185 = vector.broadcast %2 : vector<1x32xf32> to vector<14x32xf32>
    %186 = arith.addf %184, %185 : vector<14x32xf32>
    %cst_97 = arith.constant 0.000000e+00 : f32
    %187 = vector.broadcast %cst_97 : f32 to vector<14x32xf32>
    %188 = arith.maximumf %186, %187 : vector<14x32xf32>
    %189 = arith.truncf %188 : vector<14x32xf32> to vector<14x32xbf16>
    %c225_98 = arith.constant 225 : index
    %c0_99 = arith.constant 0 : index
    %190 = vector.load %arg12[%c225_98, %c0_99] : memref<256x32xbf16, #tpu.memory_space<vmem>>, vector<14x32xbf16>
    tpu.vector_store %arg12[%c225_98, %c0_99], %189 {strides = array<i32>} : memref<256x32xbf16, #tpu.memory_space<vmem>>, vector<14x32xbf16>,
    %c0_100 = arith.constant 0 : index
    %c0_101 = arith.constant 0 : index
    %191 = vector.load %arg12[%c0_100, %c0_101] : memref<256x32xbf16, #tpu.memory_space<vmem>>, vector<222x32xbf16>
    %c0_102 = arith.constant 0 : index
    %c0_103 = arith.constant 0 : index
    %192 = vector.load %arg13[%c0_102, %c0_103] : memref<222x288xbf16, #tpu.memory_space<vmem>>, vector<222x32xbf16>
    tpu.vector_store %arg13[%c0_102, %c0_103], %191 {strides = array<i32>} : memref<222x288xbf16, #tpu.memory_space<vmem>>, vector<222x32xbf16>,
    %c1_104 = arith.constant 1 : index
    %c0_105 = arith.constant 0 : index
    %193 = vector.load %arg12[%c1_104, %c0_105] : memref<256x32xbf16, #tpu.memory_space<vmem>>, vector<222x32xbf16>
    %c0_106 = arith.constant 0 : index
    %c32 = arith.constant 32 : index
    %194 = vector.load %arg13[%c0_106, %c32] : memref<222x288xbf16, #tpu.memory_space<vmem>>, vector<222x32xbf16>
    tpu.vector_store %arg13[%c0_106, %c32], %193 {strides = array<i32>} : memref<222x288xbf16, #tpu.memory_space<vmem>>, vector<222x32xbf16>,
    %c2 = arith.constant 2 : index
    %c0_107 = arith.constant 0 : index
    %195 = vector.load %arg12[%c2, %c0_107] : memref<256x32xbf16, #tpu.memory_space<vmem>>, vector<222x32xbf16>
    %c0_108 = arith.constant 0 : index
    %c64 = arith.constant 64 : index
    %196 = vector.load %arg13[%c0_108, %c64] : memref<222x288xbf16, #tpu.memory_space<vmem>>, vector<222x32xbf16>
    tpu.vector_store %arg13[%c0_108, %c64], %195 {strides = array<i32>} : memref<222x288xbf16, #tpu.memory_space<vmem>>, vector<222x32xbf16>,
    %c16 = arith.constant 16 : index
    %c0_109 = arith.constant 0 : index
    %197 = vector.load %arg12[%c16, %c0_109] : memref<256x32xbf16, #tpu.memory_space<vmem>>, vector<222x32xbf16>
    %c0_110 = arith.constant 0 : index
    %c96 = arith.constant 96 : index
    %198 = vector.load %arg13[%c0_110, %c96] : memref<222x288xbf16, #tpu.memory_space<vmem>>, vector<222x32xbf16>
    tpu.vector_store %arg13[%c0_110, %c96], %197 {strides = array<i32>} : memref<222x288xbf16, #tpu.memory_space<vmem>>, vector<222x32xbf16>,
    %c17_111 = arith.constant 17 : index
    %c0_112 = arith.constant 0 : index
    %199 = vector.load %arg12[%c17_111, %c0_112] : memref<256x32xbf16, #tpu.memory_space<vmem>>, vector<222x32xbf16>
    %c0_113 = arith.constant 0 : index
    %c128 = arith.constant 128 : index
    %200 = vector.load %arg13[%c0_113, %c128] : memref<222x288xbf16, #tpu.memory_space<vmem>>, vector<222x32xbf16>
    tpu.vector_store %arg13[%c0_113, %c128], %199 {strides = array<i32>} : memref<222x288xbf16, #tpu.memory_space<vmem>>, vector<222x32xbf16>,
    %c18 = arith.constant 18 : index
    %c0_114 = arith.constant 0 : index
    %201 = vector.load %arg12[%c18, %c0_114] : memref<256x32xbf16, #tpu.memory_space<vmem>>, vector<222x32xbf16>
    %c0_115 = arith.constant 0 : index
    %c160 = arith.constant 160 : index
    %202 = vector.load %arg13[%c0_115, %c160] : memref<222x288xbf16, #tpu.memory_space<vmem>>, vector<222x32xbf16>
    tpu.vector_store %arg13[%c0_115, %c160], %201 {strides = array<i32>} : memref<222x288xbf16, #tpu.memory_space<vmem>>, vector<222x32xbf16>,
    %c32_116 = arith.constant 32 : index
    %c0_117 = arith.constant 0 : index
    %203 = vector.load %arg12[%c32_116, %c0_117] : memref<256x32xbf16, #tpu.memory_space<vmem>>, vector<222x32xbf16>
    %c0_118 = arith.constant 0 : index
    %c192 = arith.constant 192 : index
    %204 = vector.load %arg13[%c0_118, %c192] : memref<222x288xbf16, #tpu.memory_space<vmem>>, vector<222x32xbf16>
    tpu.vector_store %arg13[%c0_118, %c192], %203 {strides = array<i32>} : memref<222x288xbf16, #tpu.memory_space<vmem>>, vector<222x32xbf16>,
    %c33_119 = arith.constant 33 : index
    %c0_120 = arith.constant 0 : index
    %205 = vector.load %arg12[%c33_119, %c0_120] : memref<256x32xbf16, #tpu.memory_space<vmem>>, vector<222x32xbf16>
    %c0_121 = arith.constant 0 : index
    %c224_122 = arith.constant 224 : index
    %206 = vector.load %arg13[%c0_121, %c224_122] : memref<222x288xbf16, #tpu.memory_space<vmem>>, vector<222x32xbf16>
    tpu.vector_store %arg13[%c0_121, %c224_122], %205 {strides = array<i32>} : memref<222x288xbf16, #tpu.memory_space<vmem>>, vector<222x32xbf16>,
    %c34 = arith.constant 34 : index
    %c0_123 = arith.constant 0 : index
    %207 = vector.load %arg12[%c34, %c0_123] : memref<256x32xbf16, #tpu.memory_space<vmem>>, vector<222x32xbf16>
    %c0_124 = arith.constant 0 : index
    %c256 = arith.constant 256 : index
    %208 = vector.load %arg13[%c0_124, %c256] : memref<222x288xbf16, #tpu.memory_space<vmem>>, vector<222x32xbf16>
    tpu.vector_store %arg13[%c0_124, %c256], %207 {strides = array<i32>} : memref<222x288xbf16, #tpu.memory_space<vmem>>, vector<222x32xbf16>,
    %c0_125 = arith.constant 0 : index
    %c0_126 = arith.constant 0 : index
    %209 = vector.load %arg13[%c0_125, %c0_126] : memref<222x288xbf16, #tpu.memory_space<vmem>>, vector<222x288xbf16>
    %c0_127 = arith.constant 0 : index
    %c0_128 = arith.constant 0 : index
    %210 = vector.load %arg4[%c0_127, %c0_128] : memref<288x64xbf16, #tpu.memory_space<vmem>>, vector<288x64xbf16>
    %cst_129 = arith.constant dense<0.000000e+00> : vector<222x64xf32>
    %211 = tpu.matmul %209, %210, %cst_129 {dimension_numbers = #tpu.dot_dimension_numbers<[1], [0], [0], [1], [0, 0, 1, 1], [], []>} : vector<222x288xbf16>, vector<288x64xbf16>, vector<222x64xf32> -> vector<222x64xf32>
    %c0_130 = arith.constant 0 : index
    %c0_131 = arith.constant 0 : index
    %212 = vector.load %arg14[%c0_130, %c0_131] : memref<222x64xf32, #tpu.memory_space<vmem>>, vector<222x64xf32>
    tpu.vector_store %arg14[%c0_130, %c0_131], %211 {strides = array<i32>} : memref<222x64xf32, #tpu.memory_space<vmem>>, vector<222x64xf32>,
    %c0_132 = arith.constant 0 : index
    %c0_133 = arith.constant 0 : index
    %213 = tpu.strided_load %arg14[%c0_132, %c0_133] {strides = array<i32: 2, 1>} : memref<222x64xf32, #tpu.memory_space<vmem>>, vector<7x64xf32>
    %c1_134 = arith.constant 1 : index
    %c0_135 = arith.constant 0 : index
    %214 = tpu.strided_load %arg14[%c1_134, %c0_135] {strides = array<i32: 2, 1>} : memref<222x64xf32, #tpu.memory_space<vmem>>, vector<7x64xf32>
    %c16_136 = arith.constant 16 : index
    %c0_137 = arith.constant 0 : index
    %215 = tpu.strided_load %arg14[%c16_136, %c0_137] {strides = array<i32: 2, 1>} : memref<222x64xf32, #tpu.memory_space<vmem>>, vector<7x64xf32>
    %c17_138 = arith.constant 17 : index
    %c0_139 = arith.constant 0 : index
    %216 = tpu.strided_load %arg14[%c17_138, %c0_139] {strides = array<i32: 2, 1>} : memref<222x64xf32, #tpu.memory_space<vmem>>, vector<7x64xf32>
    %217 = arith.maximumf %213, %214 : vector<7x64xf32>
    %218 = arith.maximumf %215, %216 : vector<7x64xf32>
    %219 = arith.maximumf %217, %218 : vector<7x64xf32>
    %220 = vector.broadcast %3 : vector<1x64xf32> to vector<7x64xf32>
    %221 = arith.addf %219, %220 : vector<7x64xf32>
    %cst_140 = arith.constant 0.000000e+00 : f32
    %222 = vector.broadcast %cst_140 : f32 to vector<7x64xf32>
    %223 = arith.maximumf %221, %222 : vector<7x64xf32>
    %224 = arith.truncf %223 : vector<7x64xf32> to vector<7x64xbf16>
    %c0_141 = arith.constant 0 : index
    %c0_142 = arith.constant 0 : index
    %c0_143 = arith.constant 0 : index
    %225 = vector.load %arg15[%c0_141, %c0_142, %c0_143] : memref<1x49x64xbf16, #tpu.memory_space<vmem>>, vector<1x7x64xbf16>
    %226 = vector.shape_cast %225 : vector<1x7x64xbf16> to vector<7x64xbf16>
    %227 = vector.shape_cast %224 : vector<7x64xbf16> to vector<1x7x64xbf16>
    tpu.vector_store %arg15[%c0_141, %c0_142, %c0_143], %227 {strides = array<i32>} : memref<1x49x64xbf16, #tpu.memory_space<vmem>>, vector<1x7x64xbf16>,
    %c32_144 = arith.constant 32 : index
    %c0_145 = arith.constant 0 : index
    %228 = tpu.strided_load %arg14[%c32_144, %c0_145] {strides = array<i32: 2, 1>} : memref<222x64xf32, #tpu.memory_space<vmem>>, vector<7x64xf32>
    %c33_146 = arith.constant 33 : index
    %c0_147 = arith.constant 0 : index
    %229 = tpu.strided_load %arg14[%c33_146, %c0_147] {strides = array<i32: 2, 1>} : memref<222x64xf32, #tpu.memory_space<vmem>>, vector<7x64xf32>
    %c48 = arith.constant 48 : index
    %c0_148 = arith.constant 0 : index
    %230 = tpu.strided_load %arg14[%c48, %c0_148] {strides = array<i32: 2, 1>} : memref<222x64xf32, #tpu.memory_space<vmem>>, vector<7x64xf32>
    %c49_149 = arith.constant 49 : index
    %c0_150 = arith.constant 0 : index
    %231 = tpu.strided_load %arg14[%c49_149, %c0_150] {strides = array<i32: 2, 1>} : memref<222x64xf32, #tpu.memory_space<vmem>>, vector<7x64xf32>
    %232 = arith.maximumf %228, %229 : vector<7x64xf32>
    %233 = arith.maximumf %230, %231 : vector<7x64xf32>
    %234 = arith.maximumf %232, %233 : vector<7x64xf32>
    %235 = vector.broadcast %3 : vector<1x64xf32> to vector<7x64xf32>
    %236 = arith.addf %234, %235 : vector<7x64xf32>
    %cst_151 = arith.constant 0.000000e+00 : f32
    %237 = vector.broadcast %cst_151 : f32 to vector<7x64xf32>
    %238 = arith.maximumf %236, %237 : vector<7x64xf32>
    %239 = arith.truncf %238 : vector<7x64xf32> to vector<7x64xbf16>
    %c0_152 = arith.constant 0 : index
    %c7 = arith.constant 7 : index
    %c0_153 = arith.constant 0 : index
    %240 = vector.load %arg15[%c0_152, %c7, %c0_153] : memref<1x49x64xbf16, #tpu.memory_space<vmem>>, vector<1x7x64xbf16>
    %241 = vector.shape_cast %240 : vector<1x7x64xbf16> to vector<7x64xbf16>
    %242 = vector.shape_cast %239 : vector<7x64xbf16> to vector<1x7x64xbf16>
    tpu.vector_store %arg15[%c0_152, %c7, %c0_153], %242 {strides = array<i32>} : memref<1x49x64xbf16, #tpu.memory_space<vmem>>, vector<1x7x64xbf16>,
    %c64_154 = arith.constant 64 : index
    %c0_155 = arith.constant 0 : index
    %243 = tpu.strided_load %arg14[%c64_154, %c0_155] {strides = array<i32: 2, 1>} : memref<222x64xf32, #tpu.memory_space<vmem>>, vector<7x64xf32>
    %c65_156 = arith.constant 65 : index
    %c0_157 = arith.constant 0 : index
    %244 = tpu.strided_load %arg14[%c65_156, %c0_157] {strides = array<i32: 2, 1>} : memref<222x64xf32, #tpu.memory_space<vmem>>, vector<7x64xf32>
    %c80 = arith.constant 80 : index
    %c0_158 = arith.constant 0 : index
    %245 = tpu.strided_load %arg14[%c80, %c0_158] {strides = array<i32: 2, 1>} : memref<222x64xf32, #tpu.memory_space<vmem>>, vector<7x64xf32>
    %c81_159 = arith.constant 81 : index
    %c0_160 = arith.constant 0 : index
    %246 = tpu.strided_load %arg14[%c81_159, %c0_160] {strides = array<i32: 2, 1>} : memref<222x64xf32, #tpu.memory_space<vmem>>, vector<7x64xf32>
    %247 = arith.maximumf %243, %244 : vector<7x64xf32>
    %248 = arith.maximumf %245, %246 : vector<7x64xf32>
    %249 = arith.maximumf %247, %248 : vector<7x64xf32>
    %250 = vector.broadcast %3 : vector<1x64xf32> to vector<7x64xf32>
    %251 = arith.addf %249, %250 : vector<7x64xf32>
    %cst_161 = arith.constant 0.000000e+00 : f32
    %252 = vector.broadcast %cst_161 : f32 to vector<7x64xf32>
    %253 = arith.maximumf %251, %252 : vector<7x64xf32>
    %254 = arith.truncf %253 : vector<7x64xf32> to vector<7x64xbf16>
    %c0_162 = arith.constant 0 : index
    %c14 = arith.constant 14 : index
    %c0_163 = arith.constant 0 : index
    %255 = vector.load %arg15[%c0_162, %c14, %c0_163] : memref<1x49x64xbf16, #tpu.memory_space<vmem>>, vector<1x7x64xbf16>
    %256 = vector.shape_cast %255 : vector<1x7x64xbf16> to vector<7x64xbf16>
    %257 = vector.shape_cast %254 : vector<7x64xbf16> to vector<1x7x64xbf16>
    tpu.vector_store %arg15[%c0_162, %c14, %c0_163], %257 {strides = array<i32>} : memref<1x49x64xbf16, #tpu.memory_space<vmem>>, vector<1x7x64xbf16>,
    %c96_164 = arith.constant 96 : index
    %c0_165 = arith.constant 0 : index
    %258 = tpu.strided_load %arg14[%c96_164, %c0_165] {strides = array<i32: 2, 1>} : memref<222x64xf32, #tpu.memory_space<vmem>>, vector<7x64xf32>
    %c97_166 = arith.constant 97 : index
    %c0_167 = arith.constant 0 : index
    %259 = tpu.strided_load %arg14[%c97_166, %c0_167] {strides = array<i32: 2, 1>} : memref<222x64xf32, #tpu.memory_space<vmem>>, vector<7x64xf32>
    %c112_168 = arith.constant 112 : index
    %c0_169 = arith.constant 0 : index
    %260 = tpu.strided_load %arg14[%c112_168, %c0_169] {strides = array<i32: 2, 1>} : memref<222x64xf32, #tpu.memory_space<vmem>>, vector<7x64xf32>
    %c113_170 = arith.constant 113 : index
    %c0_171 = arith.constant 0 : index
    %261 = tpu.strided_load %arg14[%c113_170, %c0_171] {strides = array<i32: 2, 1>} : memref<222x64xf32, #tpu.memory_space<vmem>>, vector<7x64xf32>
    %262 = arith.maximumf %258, %259 : vector<7x64xf32>
    %263 = arith.maximumf %260, %261 : vector<7x64xf32>
    %264 = arith.maximumf %262, %263 : vector<7x64xf32>
    %265 = vector.broadcast %3 : vector<1x64xf32> to vector<7x64xf32>
    %266 = arith.addf %264, %265 : vector<7x64xf32>
    %cst_172 = arith.constant 0.000000e+00 : f32
    %267 = vector.broadcast %cst_172 : f32 to vector<7x64xf32>
    %268 = arith.maximumf %266, %267 : vector<7x64xf32>
    %269 = arith.truncf %268 : vector<7x64xf32> to vector<7x64xbf16>
    %c0_173 = arith.constant 0 : index
    %c21 = arith.constant 21 : index
    %c0_174 = arith.constant 0 : index
    %270 = vector.load %arg15[%c0_173, %c21, %c0_174] : memref<1x49x64xbf16, #tpu.memory_space<vmem>>, vector<1x7x64xbf16>
    %271 = vector.shape_cast %270 : vector<1x7x64xbf16> to vector<7x64xbf16>
    %272 = vector.shape_cast %269 : vector<7x64xbf16> to vector<1x7x64xbf16>
    tpu.vector_store %arg15[%c0_173, %c21, %c0_174], %272 {strides = array<i32>} : memref<1x49x64xbf16, #tpu.memory_space<vmem>>, vector<1x7x64xbf16>,
    %c128_175 = arith.constant 128 : index
    %c0_176 = arith.constant 0 : index
    %273 = tpu.strided_load %arg14[%c128_175, %c0_176] {strides = array<i32: 2, 1>} : memref<222x64xf32, #tpu.memory_space<vmem>>, vector<7x64xf32>
    %c129_177 = arith.constant 129 : index
    %c0_178 = arith.constant 0 : index
    %274 = tpu.strided_load %arg14[%c129_177, %c0_178] {strides = array<i32: 2, 1>} : memref<222x64xf32, #tpu.memory_space<vmem>>, vector<7x64xf32>
    %c144 = arith.constant 144 : index
    %c0_179 = arith.constant 0 : index
    %275 = tpu.strided_load %arg14[%c144, %c0_179] {strides = array<i32: 2, 1>} : memref<222x64xf32, #tpu.memory_space<vmem>>, vector<7x64xf32>
    %c145_180 = arith.constant 145 : index
    %c0_181 = arith.constant 0 : index
    %276 = tpu.strided_load %arg14[%c145_180, %c0_181] {strides = array<i32: 2, 1>} : memref<222x64xf32, #tpu.memory_space<vmem>>, vector<7x64xf32>
    %277 = arith.maximumf %273, %274 : vector<7x64xf32>
    %278 = arith.maximumf %275, %276 : vector<7x64xf32>
    %279 = arith.maximumf %277, %278 : vector<7x64xf32>
    %280 = vector.broadcast %3 : vector<1x64xf32> to vector<7x64xf32>
    %281 = arith.addf %279, %280 : vector<7x64xf32>
    %cst_182 = arith.constant 0.000000e+00 : f32
    %282 = vector.broadcast %cst_182 : f32 to vector<7x64xf32>
    %283 = arith.maximumf %281, %282 : vector<7x64xf32>
    %284 = arith.truncf %283 : vector<7x64xf32> to vector<7x64xbf16>
    %c0_183 = arith.constant 0 : index
    %c28_184 = arith.constant 28 : index
    %c0_185 = arith.constant 0 : index
    %285 = vector.load %arg15[%c0_183, %c28_184, %c0_185] : memref<1x49x64xbf16, #tpu.memory_space<vmem>>, vector<1x7x64xbf16>
    %286 = vector.shape_cast %285 : vector<1x7x64xbf16> to vector<7x64xbf16>
    %287 = vector.shape_cast %284 : vector<7x64xbf16> to vector<1x7x64xbf16>
    tpu.vector_store %arg15[%c0_183, %c28_184, %c0_185], %287 {strides = array<i32>} : memref<1x49x64xbf16, #tpu.memory_space<vmem>>, vector<1x7x64xbf16>,
    %c160_186 = arith.constant 160 : index
    %c0_187 = arith.constant 0 : index
    %288 = tpu.strided_load %arg14[%c160_186, %c0_187] {strides = array<i32: 2, 1>} : memref<222x64xf32, #tpu.memory_space<vmem>>, vector<7x64xf32>
    %c161_188 = arith.constant 161 : index
    %c0_189 = arith.constant 0 : index
    %289 = tpu.strided_load %arg14[%c161_188, %c0_189] {strides = array<i32: 2, 1>} : memref<222x64xf32, #tpu.memory_space<vmem>>, vector<7x64xf32>
    %c176 = arith.constant 176 : index
    %c0_190 = arith.constant 0 : index
    %290 = tpu.strided_load %arg14[%c176, %c0_190] {strides = array<i32: 2, 1>} : memref<222x64xf32, #tpu.memory_space<vmem>>, vector<7x64xf32>
    %c177_191 = arith.constant 177 : index
    %c0_192 = arith.constant 0 : index
    %291 = tpu.strided_load %arg14[%c177_191, %c0_192] {strides = array<i32: 2, 1>} : memref<222x64xf32, #tpu.memory_space<vmem>>, vector<7x64xf32>
    %292 = arith.maximumf %288, %289 : vector<7x64xf32>
    %293 = arith.maximumf %290, %291 : vector<7x64xf32>
    %294 = arith.maximumf %292, %293 : vector<7x64xf32>
    %295 = vector.broadcast %3 : vector<1x64xf32> to vector<7x64xf32>
    %296 = arith.addf %294, %295 : vector<7x64xf32>
    %cst_193 = arith.constant 0.000000e+00 : f32
    %297 = vector.broadcast %cst_193 : f32 to vector<7x64xf32>
    %298 = arith.maximumf %296, %297 : vector<7x64xf32>
    %299 = arith.truncf %298 : vector<7x64xf32> to vector<7x64xbf16>
    %c0_194 = arith.constant 0 : index
    %c35 = arith.constant 35 : index
    %c0_195 = arith.constant 0 : index
    %300 = vector.load %arg15[%c0_194, %c35, %c0_195] : memref<1x49x64xbf16, #tpu.memory_space<vmem>>, vector<1x7x64xbf16>
    %301 = vector.shape_cast %300 : vector<1x7x64xbf16> to vector<7x64xbf16>
    %302 = vector.shape_cast %299 : vector<7x64xbf16> to vector<1x7x64xbf16>
    tpu.vector_store %arg15[%c0_194, %c35, %c0_195], %302 {strides = array<i32>} : memref<1x49x64xbf16, #tpu.memory_space<vmem>>, vector<1x7x64xbf16>,
    %c192_196 = arith.constant 192 : index
    %c0_197 = arith.constant 0 : index
    %303 = tpu.strided_load %arg14[%c192_196, %c0_197] {strides = array<i32: 2, 1>} : memref<222x64xf32, #tpu.memory_space<vmem>>, vector<7x64xf32>
    %c193_198 = arith.constant 193 : index
    %c0_199 = arith.constant 0 : index
    %304 = tpu.strided_load %arg14[%c193_198, %c0_199] {strides = array<i32: 2, 1>} : memref<222x64xf32, #tpu.memory_space<vmem>>, vector<7x64xf32>
    %c208 = arith.constant 208 : index
    %c0_200 = arith.constant 0 : index
    %305 = tpu.strided_load %arg14[%c208, %c0_200] {strides = array<i32: 2, 1>} : memref<222x64xf32, #tpu.memory_space<vmem>>, vector<7x64xf32>
    %c209_201 = arith.constant 209 : index
    %c0_202 = arith.constant 0 : index
    %306 = tpu.strided_load %arg14[%c209_201, %c0_202] {strides = array<i32: 2, 1>} : memref<222x64xf32, #tpu.memory_space<vmem>>, vector<7x64xf32>
    %307 = arith.maximumf %303, %304 : vector<7x64xf32>
    %308 = arith.maximumf %305, %306 : vector<7x64xf32>
    %309 = arith.maximumf %307, %308 : vector<7x64xf32>
    %310 = vector.broadcast %3 : vector<1x64xf32> to vector<7x64xf32>
    %311 = arith.addf %309, %310 : vector<7x64xf32>
    %cst_203 = arith.constant 0.000000e+00 : f32
    %312 = vector.broadcast %cst_203 : f32 to vector<7x64xf32>
    %313 = arith.maximumf %311, %312 : vector<7x64xf32>
    %314 = arith.truncf %313 : vector<7x64xf32> to vector<7x64xbf16>
    %c0_204 = arith.constant 0 : index
    %c42 = arith.constant 42 : index
    %c0_205 = arith.constant 0 : index
    %315 = vector.load %arg15[%c0_204, %c42, %c0_205] : memref<1x49x64xbf16, #tpu.memory_space<vmem>>, vector<1x7x64xbf16>
    %316 = vector.shape_cast %315 : vector<1x7x64xbf16> to vector<7x64xbf16>
    %317 = vector.shape_cast %314 : vector<7x64xbf16> to vector<1x7x64xbf16>
    tpu.vector_store %arg15[%c0_204, %c42, %c0_205], %317 {strides = array<i32>} : memref<1x49x64xbf16, #tpu.memory_space<vmem>>, vector<1x7x64xbf16>,
    %cst_206 = arith.constant 0.000000e+00 : f32
    %318 = vector.broadcast %cst_206 : f32 to vector<1x128xf32>
    %c0_207 = arith.constant 0 : index
    %c0_208 = arith.constant 0 : index
    %c0_209 = arith.constant 0 : index
    %319 = vector.load %arg15[%c0_207, %c0_208, %c0_209] : memref<1x49x64xbf16, #tpu.memory_space<vmem>>, vector<1x1x64xbf16>
    %320 = vector.shape_cast %319 : vector<1x1x64xbf16> to vector<1x64xbf16>
    %c0_210 = arith.constant 0 : index
    %c0_211 = arith.constant 0 : index
    %c0_212 = arith.constant 0 : index
    %321 = vector.load %arg6[%c0_210, %c0_211, %c0_212] : memref<49x64x128xbf16, #tpu.memory_space<vmem>>, vector<1x64x128xbf16>
    %322 = vector.shape_cast %321 : vector<1x64x128xbf16> to vector<64x128xbf16>
    %cst_213 = arith.constant dense<0.000000e+00> : vector<1x128xf32>
    %323 = tpu.matmul %320, %322, %cst_213 {dimension_numbers = #tpu.dot_dimension_numbers<[1], [0], [0], [1], [0, 0, 1, 1], [], []>} : vector<1x64xbf16>, vector<64x128xbf16>, vector<1x128xf32> -> vector<1x128xf32>
    %324 = arith.addf %318, %323 : vector<1x128xf32>
    %c0_214 = arith.constant 0 : index
    %c1_215 = arith.constant 1 : index
    %c0_216 = arith.constant 0 : index
    %325 = vector.load %arg15[%c0_214, %c1_215, %c0_216] : memref<1x49x64xbf16, #tpu.memory_space<vmem>>, vector<1x1x64xbf16>
    %326 = vector.shape_cast %325 : vector<1x1x64xbf16> to vector<1x64xbf16>
    %c1_217 = arith.constant 1 : index
    %c0_218 = arith.constant 0 : index
    %c0_219 = arith.constant 0 : index
    %327 = vector.load %arg6[%c1_217, %c0_218, %c0_219] : memref<49x64x128xbf16, #tpu.memory_space<vmem>>, vector<1x64x128xbf16>
    %328 = vector.shape_cast %327 : vector<1x64x128xbf16> to vector<64x128xbf16>
    %cst_220 = arith.constant dense<0.000000e+00> : vector<1x128xf32>
    %329 = tpu.matmul %326, %328, %cst_220 {dimension_numbers = #tpu.dot_dimension_numbers<[1], [0], [0], [1], [0, 0, 1, 1], [], []>} : vector<1x64xbf16>, vector<64x128xbf16>, vector<1x128xf32> -> vector<1x128xf32>
    %330 = arith.addf %324, %329 : vector<1x128xf32>
    %c0_221 = arith.constant 0 : index
    %c2_222 = arith.constant 2 : index
    %c0_223 = arith.constant 0 : index
    %331 = vector.load %arg15[%c0_221, %c2_222, %c0_223] : memref<1x49x64xbf16, #tpu.memory_space<vmem>>, vector<1x1x64xbf16>
    %332 = vector.shape_cast %331 : vector<1x1x64xbf16> to vector<1x64xbf16>
    %c2_224 = arith.constant 2 : index
    %c0_225 = arith.constant 0 : index
    %c0_226 = arith.constant 0 : index
    %333 = vector.load %arg6[%c2_224, %c0_225, %c0_226] : memref<49x64x128xbf16, #tpu.memory_space<vmem>>, vector<1x64x128xbf16>
    %334 = vector.shape_cast %333 : vector<1x64x128xbf16> to vector<64x128xbf16>
    %cst_227 = arith.constant dense<0.000000e+00> : vector<1x128xf32>
    %335 = tpu.matmul %332, %334, %cst_227 {dimension_numbers = #tpu.dot_dimension_numbers<[1], [0], [0], [1], [0, 0, 1, 1], [], []>} : vector<1x64xbf16>, vector<64x128xbf16>, vector<1x128xf32> -> vector<1x128xf32>
    %336 = arith.addf %330, %335 : vector<1x128xf32>
    %c0_228 = arith.constant 0 : index
    %c3 = arith.constant 3 : index
    %c0_229 = arith.constant 0 : index
    %337 = vector.load %arg15[%c0_228, %c3, %c0_229] : memref<1x49x64xbf16, #tpu.memory_space<vmem>>, vector<1x1x64xbf16>
    %338 = vector.shape_cast %337 : vector<1x1x64xbf16> to vector<1x64xbf16>
    %c3_230 = arith.constant 3 : index
    %c0_231 = arith.constant 0 : index
    %c0_232 = arith.constant 0 : index
    %339 = vector.load %arg6[%c3_230, %c0_231, %c0_232] : memref<49x64x128xbf16, #tpu.memory_space<vmem>>, vector<1x64x128xbf16>
    %340 = vector.shape_cast %339 : vector<1x64x128xbf16> to vector<64x128xbf16>
    %cst_233 = arith.constant dense<0.000000e+00> : vector<1x128xf32>
    %341 = tpu.matmul %338, %340, %cst_233 {dimension_numbers = #tpu.dot_dimension_numbers<[1], [0], [0], [1], [0, 0, 1, 1], [], []>} : vector<1x64xbf16>, vector<64x128xbf16>, vector<1x128xf32> -> vector<1x128xf32>
    %342 = arith.addf %336, %341 : vector<1x128xf32>
    %c0_234 = arith.constant 0 : index
    %c4 = arith.constant 4 : index
    %c0_235 = arith.constant 0 : index
    %343 = vector.load %arg15[%c0_234, %c4, %c0_235] : memref<1x49x64xbf16, #tpu.memory_space<vmem>>, vector<1x1x64xbf16>
    %344 = vector.shape_cast %343 : vector<1x1x64xbf16> to vector<1x64xbf16>
    %c4_236 = arith.constant 4 : index
    %c0_237 = arith.constant 0 : index
    %c0_238 = arith.constant 0 : index
    %345 = vector.load %arg6[%c4_236, %c0_237, %c0_238] : memref<49x64x128xbf16, #tpu.memory_space<vmem>>, vector<1x64x128xbf16>
    %346 = vector.shape_cast %345 : vector<1x64x128xbf16> to vector<64x128xbf16>
    %cst_239 = arith.constant dense<0.000000e+00> : vector<1x128xf32>
    %347 = tpu.matmul %344, %346, %cst_239 {dimension_numbers = #tpu.dot_dimension_numbers<[1], [0], [0], [1], [0, 0, 1, 1], [], []>} : vector<1x64xbf16>, vector<64x128xbf16>, vector<1x128xf32> -> vector<1x128xf32>
    %348 = arith.addf %342, %347 : vector<1x128xf32>
    %c0_240 = arith.constant 0 : index
    %c5 = arith.constant 5 : index
    %c0_241 = arith.constant 0 : index
    %349 = vector.load %arg15[%c0_240, %c5, %c0_241] : memref<1x49x64xbf16, #tpu.memory_space<vmem>>, vector<1x1x64xbf16>
    %350 = vector.shape_cast %349 : vector<1x1x64xbf16> to vector<1x64xbf16>
    %c5_242 = arith.constant 5 : index
    %c0_243 = arith.constant 0 : index
    %c0_244 = arith.constant 0 : index
    %351 = vector.load %arg6[%c5_242, %c0_243, %c0_244] : memref<49x64x128xbf16, #tpu.memory_space<vmem>>, vector<1x64x128xbf16>
    %352 = vector.shape_cast %351 : vector<1x64x128xbf16> to vector<64x128xbf16>
    %cst_245 = arith.constant dense<0.000000e+00> : vector<1x128xf32>
    %353 = tpu.matmul %350, %352, %cst_245 {dimension_numbers = #tpu.dot_dimension_numbers<[1], [0], [0], [1], [0, 0, 1, 1], [], []>} : vector<1x64xbf16>, vector<64x128xbf16>, vector<1x128xf32> -> vector<1x128xf32>
    %354 = arith.addf %348, %353 : vector<1x128xf32>
    %c0_246 = arith.constant 0 : index
    %c6 = arith.constant 6 : index
    %c0_247 = arith.constant 0 : index
    %355 = vector.load %arg15[%c0_246, %c6, %c0_247] : memref<1x49x64xbf16, #tpu.memory_space<vmem>>, vector<1x1x64xbf16>
    %356 = vector.shape_cast %355 : vector<1x1x64xbf16> to vector<1x64xbf16>
    %c6_248 = arith.constant 6 : index
    %c0_249 = arith.constant 0 : index
    %c0_250 = arith.constant 0 : index
    %357 = vector.load %arg6[%c6_248, %c0_249, %c0_250] : memref<49x64x128xbf16, #tpu.memory_space<vmem>>, vector<1x64x128xbf16>
    %358 = vector.shape_cast %357 : vector<1x64x128xbf16> to vector<64x128xbf16>
    %cst_251 = arith.constant dense<0.000000e+00> : vector<1x128xf32>
    %359 = tpu.matmul %356, %358, %cst_251 {dimension_numbers = #tpu.dot_dimension_numbers<[1], [0], [0], [1], [0, 0, 1, 1], [], []>} : vector<1x64xbf16>, vector<64x128xbf16>, vector<1x128xf32> -> vector<1x128xf32>
    %360 = arith.addf %354, %359 : vector<1x128xf32>
    %c0_252 = arith.constant 0 : index
    %c7_253 = arith.constant 7 : index
    %c0_254 = arith.constant 0 : index
    %361 = vector.load %arg15[%c0_252, %c7_253, %c0_254] : memref<1x49x64xbf16, #tpu.memory_space<vmem>>, vector<1x1x64xbf16>
    %362 = vector.shape_cast %361 : vector<1x1x64xbf16> to vector<1x64xbf16>
    %c7_255 = arith.constant 7 : index
    %c0_256 = arith.constant 0 : index
    %c0_257 = arith.constant 0 : index
    %363 = vector.load %arg6[%c7_255, %c0_256, %c0_257] : memref<49x64x128xbf16, #tpu.memory_space<vmem>>, vector<1x64x128xbf16>
    %364 = vector.shape_cast %363 : vector<1x64x128xbf16> to vector<64x128xbf16>
    %cst_258 = arith.constant dense<0.000000e+00> : vector<1x128xf32>
    %365 = tpu.matmul %362, %364, %cst_258 {dimension_numbers = #tpu.dot_dimension_numbers<[1], [0], [0], [1], [0, 0, 1, 1], [], []>} : vector<1x64xbf16>, vector<64x128xbf16>, vector<1x128xf32> -> vector<1x128xf32>
    %366 = arith.addf %360, %365 : vector<1x128xf32>
    %c0_259 = arith.constant 0 : index
    %c8 = arith.constant 8 : index
    %c0_260 = arith.constant 0 : index
    %367 = vector.load %arg15[%c0_259, %c8, %c0_260] : memref<1x49x64xbf16, #tpu.memory_space<vmem>>, vector<1x1x64xbf16>
    %368 = vector.shape_cast %367 : vector<1x1x64xbf16> to vector<1x64xbf16>
    %c8_261 = arith.constant 8 : index
    %c0_262 = arith.constant 0 : index
    %c0_263 = arith.constant 0 : index
    %369 = vector.load %arg6[%c8_261, %c0_262, %c0_263] : memref<49x64x128xbf16, #tpu.memory_space<vmem>>, vector<1x64x128xbf16>
    %370 = vector.shape_cast %369 : vector<1x64x128xbf16> to vector<64x128xbf16>
    %cst_264 = arith.constant dense<0.000000e+00> : vector<1x128xf32>
    %371 = tpu.matmul %368, %370, %cst_264 {dimension_numbers = #tpu.dot_dimension_numbers<[1], [0], [0], [1], [0, 0, 1, 1], [], []>} : vector<1x64xbf16>, vector<64x128xbf16>, vector<1x128xf32> -> vector<1x128xf32>
    %372 = arith.addf %366, %371 : vector<1x128xf32>
    %c0_265 = arith.constant 0 : index
    %c9 = arith.constant 9 : index
    %c0_266 = arith.constant 0 : index
    %373 = vector.load %arg15[%c0_265, %c9, %c0_266] : memref<1x49x64xbf16, #tpu.memory_space<vmem>>, vector<1x1x64xbf16>
    %374 = vector.shape_cast %373 : vector<1x1x64xbf16> to vector<1x64xbf16>
    %c9_267 = arith.constant 9 : index
    %c0_268 = arith.constant 0 : index
    %c0_269 = arith.constant 0 : index
    %375 = vector.load %arg6[%c9_267, %c0_268, %c0_269] : memref<49x64x128xbf16, #tpu.memory_space<vmem>>, vector<1x64x128xbf16>
    %376 = vector.shape_cast %375 : vector<1x64x128xbf16> to vector<64x128xbf16>
    %cst_270 = arith.constant dense<0.000000e+00> : vector<1x128xf32>
    %377 = tpu.matmul %374, %376, %cst_270 {dimension_numbers = #tpu.dot_dimension_numbers<[1], [0], [0], [1], [0, 0, 1, 1], [], []>} : vector<1x64xbf16>, vector<64x128xbf16>, vector<1x128xf32> -> vector<1x128xf32>
    %378 = arith.addf %372, %377 : vector<1x128xf32>
    %c0_271 = arith.constant 0 : index
    %c10 = arith.constant 10 : index
    %c0_272 = arith.constant 0 : index
    %379 = vector.load %arg15[%c0_271, %c10, %c0_272] : memref<1x49x64xbf16, #tpu.memory_space<vmem>>, vector<1x1x64xbf16>
    %380 = vector.shape_cast %379 : vector<1x1x64xbf16> to vector<1x64xbf16>
    %c10_273 = arith.constant 10 : index
    %c0_274 = arith.constant 0 : index
    %c0_275 = arith.constant 0 : index
    %381 = vector.load %arg6[%c10_273, %c0_274, %c0_275] : memref<49x64x128xbf16, #tpu.memory_space<vmem>>, vector<1x64x128xbf16>
    %382 = vector.shape_cast %381 : vector<1x64x128xbf16> to vector<64x128xbf16>
    %cst_276 = arith.constant dense<0.000000e+00> : vector<1x128xf32>
    %383 = tpu.matmul %380, %382, %cst_276 {dimension_numbers = #tpu.dot_dimension_numbers<[1], [0], [0], [1], [0, 0, 1, 1], [], []>} : vector<1x64xbf16>, vector<64x128xbf16>, vector<1x128xf32> -> vector<1x128xf32>
    %384 = arith.addf %378, %383 : vector<1x128xf32>
    %c0_277 = arith.constant 0 : index
    %c11 = arith.constant 11 : index
    %c0_278 = arith.constant 0 : index
    %385 = vector.load %arg15[%c0_277, %c11, %c0_278] : memref<1x49x64xbf16, #tpu.memory_space<vmem>>, vector<1x1x64xbf16>
    %386 = vector.shape_cast %385 : vector<1x1x64xbf16> to vector<1x64xbf16>
    %c11_279 = arith.constant 11 : index
    %c0_280 = arith.constant 0 : index
    %c0_281 = arith.constant 0 : index
    %387 = vector.load %arg6[%c11_279, %c0_280, %c0_281] : memref<49x64x128xbf16, #tpu.memory_space<vmem>>, vector<1x64x128xbf16>
    %388 = vector.shape_cast %387 : vector<1x64x128xbf16> to vector<64x128xbf16>
    %cst_282 = arith.constant dense<0.000000e+00> : vector<1x128xf32>
    %389 = tpu.matmul %386, %388, %cst_282 {dimension_numbers = #tpu.dot_dimension_numbers<[1], [0], [0], [1], [0, 0, 1, 1], [], []>} : vector<1x64xbf16>, vector<64x128xbf16>, vector<1x128xf32> -> vector<1x128xf32>
    %390 = arith.addf %384, %389 : vector<1x128xf32>
    %c0_283 = arith.constant 0 : index
    %c12 = arith.constant 12 : index
    %c0_284 = arith.constant 0 : index
    %391 = vector.load %arg15[%c0_283, %c12, %c0_284] : memref<1x49x64xbf16, #tpu.memory_space<vmem>>, vector<1x1x64xbf16>
    %392 = vector.shape_cast %391 : vector<1x1x64xbf16> to vector<1x64xbf16>
    %c12_285 = arith.constant 12 : index
    %c0_286 = arith.constant 0 : index
    %c0_287 = arith.constant 0 : index
    %393 = vector.load %arg6[%c12_285, %c0_286, %c0_287] : memref<49x64x128xbf16, #tpu.memory_space<vmem>>, vector<1x64x128xbf16>
    %394 = vector.shape_cast %393 : vector<1x64x128xbf16> to vector<64x128xbf16>
    %cst_288 = arith.constant dense<0.000000e+00> : vector<1x128xf32>
    %395 = tpu.matmul %392, %394, %cst_288 {dimension_numbers = #tpu.dot_dimension_numbers<[1], [0], [0], [1], [0, 0, 1, 1], [], []>} : vector<1x64xbf16>, vector<64x128xbf16>, vector<1x128xf32> -> vector<1x128xf32>
    %396 = arith.addf %390, %395 : vector<1x128xf32>
    %c0_289 = arith.constant 0 : index
    %c13 = arith.constant 13 : index
    %c0_290 = arith.constant 0 : index
    %397 = vector.load %arg15[%c0_289, %c13, %c0_290] : memref<1x49x64xbf16, #tpu.memory_space<vmem>>, vector<1x1x64xbf16>
    %398 = vector.shape_cast %397 : vector<1x1x64xbf16> to vector<1x64xbf16>
    %c13_291 = arith.constant 13 : index
    %c0_292 = arith.constant 0 : index
    %c0_293 = arith.constant 0 : index
    %399 = vector.load %arg6[%c13_291, %c0_292, %c0_293] : memref<49x64x128xbf16, #tpu.memory_space<vmem>>, vector<1x64x128xbf16>
    %400 = vector.shape_cast %399 : vector<1x64x128xbf16> to vector<64x128xbf16>
    %cst_294 = arith.constant dense<0.000000e+00> : vector<1x128xf32>
    %401 = tpu.matmul %398, %400, %cst_294 {dimension_numbers = #tpu.dot_dimension_numbers<[1], [0], [0], [1], [0, 0, 1, 1], [], []>} : vector<1x64xbf16>, vector<64x128xbf16>, vector<1x128xf32> -> vector<1x128xf32>
    %402 = arith.addf %396, %401 : vector<1x128xf32>
    %c0_295 = arith.constant 0 : index
    %c14_296 = arith.constant 14 : index
    %c0_297 = arith.constant 0 : index
    %403 = vector.load %arg15[%c0_295, %c14_296, %c0_297] : memref<1x49x64xbf16, #tpu.memory_space<vmem>>, vector<1x1x64xbf16>
    %404 = vector.shape_cast %403 : vector<1x1x64xbf16> to vector<1x64xbf16>
    %c14_298 = arith.constant 14 : index
    %c0_299 = arith.constant 0 : index
    %c0_300 = arith.constant 0 : index
    %405 = vector.load %arg6[%c14_298, %c0_299, %c0_300] : memref<49x64x128xbf16, #tpu.memory_space<vmem>>, vector<1x64x128xbf16>
    %406 = vector.shape_cast %405 : vector<1x64x128xbf16> to vector<64x128xbf16>
    %cst_301 = arith.constant dense<0.000000e+00> : vector<1x128xf32>
    %407 = tpu.matmul %404, %406, %cst_301 {dimension_numbers = #tpu.dot_dimension_numbers<[1], [0], [0], [1], [0, 0, 1, 1], [], []>} : vector<1x64xbf16>, vector<64x128xbf16>, vector<1x128xf32> -> vector<1x128xf32>
    %408 = arith.addf %402, %407 : vector<1x128xf32>
    %c0_302 = arith.constant 0 : index
    %c15 = arith.constant 15 : index
    %c0_303 = arith.constant 0 : index
    %409 = vector.load %arg15[%c0_302, %c15, %c0_303] : memref<1x49x64xbf16, #tpu.memory_space<vmem>>, vector<1x1x64xbf16>
    %410 = vector.shape_cast %409 : vector<1x1x64xbf16> to vector<1x64xbf16>
    %c15_304 = arith.constant 15 : index
    %c0_305 = arith.constant 0 : index
    %c0_306 = arith.constant 0 : index
    %411 = vector.load %arg6[%c15_304, %c0_305, %c0_306] : memref<49x64x128xbf16, #tpu.memory_space<vmem>>, vector<1x64x128xbf16>
    %412 = vector.shape_cast %411 : vector<1x64x128xbf16> to vector<64x128xbf16>
    %cst_307 = arith.constant dense<0.000000e+00> : vector<1x128xf32>
    %413 = tpu.matmul %410, %412, %cst_307 {dimension_numbers = #tpu.dot_dimension_numbers<[1], [0], [0], [1], [0, 0, 1, 1], [], []>} : vector<1x64xbf16>, vector<64x128xbf16>, vector<1x128xf32> -> vector<1x128xf32>
    %414 = arith.addf %408, %413 : vector<1x128xf32>
    %c0_308 = arith.constant 0 : index
    %c16_309 = arith.constant 16 : index
    %c0_310 = arith.constant 0 : index
    %415 = vector.load %arg15[%c0_308, %c16_309, %c0_310] : memref<1x49x64xbf16, #tpu.memory_space<vmem>>, vector<1x1x64xbf16>
    %416 = vector.shape_cast %415 : vector<1x1x64xbf16> to vector<1x64xbf16>
    %c16_311 = arith.constant 16 : index
    %c0_312 = arith.constant 0 : index
    %c0_313 = arith.constant 0 : index
    %417 = vector.load %arg6[%c16_311, %c0_312, %c0_313] : memref<49x64x128xbf16, #tpu.memory_space<vmem>>, vector<1x64x128xbf16>
    %418 = vector.shape_cast %417 : vector<1x64x128xbf16> to vector<64x128xbf16>
    %cst_314 = arith.constant dense<0.000000e+00> : vector<1x128xf32>
    %419 = tpu.matmul %416, %418, %cst_314 {dimension_numbers = #tpu.dot_dimension_numbers<[1], [0], [0], [1], [0, 0, 1, 1], [], []>} : vector<1x64xbf16>, vector<64x128xbf16>, vector<1x128xf32> -> vector<1x128xf32>
    %420 = arith.addf %414, %419 : vector<1x128xf32>
    %c0_315 = arith.constant 0 : index
    %c17_316 = arith.constant 17 : index
    %c0_317 = arith.constant 0 : index
    %421 = vector.load %arg15[%c0_315, %c17_316, %c0_317] : memref<1x49x64xbf16, #tpu.memory_space<vmem>>, vector<1x1x64xbf16>
    %422 = vector.shape_cast %421 : vector<1x1x64xbf16> to vector<1x64xbf16>
    %c17_318 = arith.constant 17 : index
    %c0_319 = arith.constant 0 : index
    %c0_320 = arith.constant 0 : index
    %423 = vector.load %arg6[%c17_318, %c0_319, %c0_320] : memref<49x64x128xbf16, #tpu.memory_space<vmem>>, vector<1x64x128xbf16>
    %424 = vector.shape_cast %423 : vector<1x64x128xbf16> to vector<64x128xbf16>
    %cst_321 = arith.constant dense<0.000000e+00> : vector<1x128xf32>
    %425 = tpu.matmul %422, %424, %cst_321 {dimension_numbers = #tpu.dot_dimension_numbers<[1], [0], [0], [1], [0, 0, 1, 1], [], []>} : vector<1x64xbf16>, vector<64x128xbf16>, vector<1x128xf32> -> vector<1x128xf32>
    %426 = arith.addf %420, %425 : vector<1x128xf32>
    %c0_322 = arith.constant 0 : index
    %c18_323 = arith.constant 18 : index
    %c0_324 = arith.constant 0 : index
    %427 = vector.load %arg15[%c0_322, %c18_323, %c0_324] : memref<1x49x64xbf16, #tpu.memory_space<vmem>>, vector<1x1x64xbf16>
    %428 = vector.shape_cast %427 : vector<1x1x64xbf16> to vector<1x64xbf16>
    %c18_325 = arith.constant 18 : index
    %c0_326 = arith.constant 0 : index
    %c0_327 = arith.constant 0 : index
    %429 = vector.load %arg6[%c18_325, %c0_326, %c0_327] : memref<49x64x128xbf16, #tpu.memory_space<vmem>>, vector<1x64x128xbf16>
    %430 = vector.shape_cast %429 : vector<1x64x128xbf16> to vector<64x128xbf16>
    %cst_328 = arith.constant dense<0.000000e+00> : vector<1x128xf32>
    %431 = tpu.matmul %428, %430, %cst_328 {dimension_numbers = #tpu.dot_dimension_numbers<[1], [0], [0], [1], [0, 0, 1, 1], [], []>} : vector<1x64xbf16>, vector<64x128xbf16>, vector<1x128xf32> -> vector<1x128xf32>
    %432 = arith.addf %426, %431 : vector<1x128xf32>
    %c0_329 = arith.constant 0 : index
    %c19 = arith.constant 19 : index
    %c0_330 = arith.constant 0 : index
    %433 = vector.load %arg15[%c0_329, %c19, %c0_330] : memref<1x49x64xbf16, #tpu.memory_space<vmem>>, vector<1x1x64xbf16>
    %434 = vector.shape_cast %433 : vector<1x1x64xbf16> to vector<1x64xbf16>
    %c19_331 = arith.constant 19 : index
    %c0_332 = arith.constant 0 : index
    %c0_333 = arith.constant 0 : index
    %435 = vector.load %arg6[%c19_331, %c0_332, %c0_333] : memref<49x64x128xbf16, #tpu.memory_space<vmem>>, vector<1x64x128xbf16>
    %436 = vector.shape_cast %435 : vector<1x64x128xbf16> to vector<64x128xbf16>
    %cst_334 = arith.constant dense<0.000000e+00> : vector<1x128xf32>
    %437 = tpu.matmul %434, %436, %cst_334 {dimension_numbers = #tpu.dot_dimension_numbers<[1], [0], [0], [1], [0, 0, 1, 1], [], []>} : vector<1x64xbf16>, vector<64x128xbf16>, vector<1x128xf32> -> vector<1x128xf32>
    %438 = arith.addf %432, %437 : vector<1x128xf32>
    %c0_335 = arith.constant 0 : index
    %c20 = arith.constant 20 : index
    %c0_336 = arith.constant 0 : index
    %439 = vector.load %arg15[%c0_335, %c20, %c0_336] : memref<1x49x64xbf16, #tpu.memory_space<vmem>>, vector<1x1x64xbf16>
    %440 = vector.shape_cast %439 : vector<1x1x64xbf16> to vector<1x64xbf16>
    %c20_337 = arith.constant 20 : index
    %c0_338 = arith.constant 0 : index
    %c0_339 = arith.constant 0 : index
    %441 = vector.load %arg6[%c20_337, %c0_338, %c0_339] : memref<49x64x128xbf16, #tpu.memory_space<vmem>>, vector<1x64x128xbf16>
    %442 = vector.shape_cast %441 : vector<1x64x128xbf16> to vector<64x128xbf16>
    %cst_340 = arith.constant dense<0.000000e+00> : vector<1x128xf32>
    %443 = tpu.matmul %440, %442, %cst_340 {dimension_numbers = #tpu.dot_dimension_numbers<[1], [0], [0], [1], [0, 0, 1, 1], [], []>} : vector<1x64xbf16>, vector<64x128xbf16>, vector<1x128xf32> -> vector<1x128xf32>
    %444 = arith.addf %438, %443 : vector<1x128xf32>
    %c0_341 = arith.constant 0 : index
    %c21_342 = arith.constant 21 : index
    %c0_343 = arith.constant 0 : index
    %445 = vector.load %arg15[%c0_341, %c21_342, %c0_343] : memref<1x49x64xbf16, #tpu.memory_space<vmem>>, vector<1x1x64xbf16>
    %446 = vector.shape_cast %445 : vector<1x1x64xbf16> to vector<1x64xbf16>
    %c21_344 = arith.constant 21 : index
    %c0_345 = arith.constant 0 : index
    %c0_346 = arith.constant 0 : index
    %447 = vector.load %arg6[%c21_344, %c0_345, %c0_346] : memref<49x64x128xbf16, #tpu.memory_space<vmem>>, vector<1x64x128xbf16>
    %448 = vector.shape_cast %447 : vector<1x64x128xbf16> to vector<64x128xbf16>
    %cst_347 = arith.constant dense<0.000000e+00> : vector<1x128xf32>
    %449 = tpu.matmul %446, %448, %cst_347 {dimension_numbers = #tpu.dot_dimension_numbers<[1], [0], [0], [1], [0, 0, 1, 1], [], []>} : vector<1x64xbf16>, vector<64x128xbf16>, vector<1x128xf32> -> vector<1x128xf32>
    %450 = arith.addf %444, %449 : vector<1x128xf32>
    %c0_348 = arith.constant 0 : index
    %c22 = arith.constant 22 : index
    %c0_349 = arith.constant 0 : index
    %451 = vector.load %arg15[%c0_348, %c22, %c0_349] : memref<1x49x64xbf16, #tpu.memory_space<vmem>>, vector<1x1x64xbf16>
    %452 = vector.shape_cast %451 : vector<1x1x64xbf16> to vector<1x64xbf16>
    %c22_350 = arith.constant 22 : index
    %c0_351 = arith.constant 0 : index
    %c0_352 = arith.constant 0 : index
    %453 = vector.load %arg6[%c22_350, %c0_351, %c0_352] : memref<49x64x128xbf16, #tpu.memory_space<vmem>>, vector<1x64x128xbf16>
    %454 = vector.shape_cast %453 : vector<1x64x128xbf16> to vector<64x128xbf16>
    %cst_353 = arith.constant dense<0.000000e+00> : vector<1x128xf32>
    %455 = tpu.matmul %452, %454, %cst_353 {dimension_numbers = #tpu.dot_dimension_numbers<[1], [0], [0], [1], [0, 0, 1, 1], [], []>} : vector<1x64xbf16>, vector<64x128xbf16>, vector<1x128xf32> -> vector<1x128xf32>
    %456 = arith.addf %450, %455 : vector<1x128xf32>
    %c0_354 = arith.constant 0 : index
    %c23 = arith.constant 23 : index
    %c0_355 = arith.constant 0 : index
    %457 = vector.load %arg15[%c0_354, %c23, %c0_355] : memref<1x49x64xbf16, #tpu.memory_space<vmem>>, vector<1x1x64xbf16>
    %458 = vector.shape_cast %457 : vector<1x1x64xbf16> to vector<1x64xbf16>
    %c23_356 = arith.constant 23 : index
    %c0_357 = arith.constant 0 : index
    %c0_358 = arith.constant 0 : index
    %459 = vector.load %arg6[%c23_356, %c0_357, %c0_358] : memref<49x64x128xbf16, #tpu.memory_space<vmem>>, vector<1x64x128xbf16>
    %460 = vector.shape_cast %459 : vector<1x64x128xbf16> to vector<64x128xbf16>
    %cst_359 = arith.constant dense<0.000000e+00> : vector<1x128xf32>
    %461 = tpu.matmul %458, %460, %cst_359 {dimension_numbers = #tpu.dot_dimension_numbers<[1], [0], [0], [1], [0, 0, 1, 1], [], []>} : vector<1x64xbf16>, vector<64x128xbf16>, vector<1x128xf32> -> vector<1x128xf32>
    %462 = arith.addf %456, %461 : vector<1x128xf32>
    %c0_360 = arith.constant 0 : index
    %c24 = arith.constant 24 : index
    %c0_361 = arith.constant 0 : index
    %463 = vector.load %arg15[%c0_360, %c24, %c0_361] : memref<1x49x64xbf16, #tpu.memory_space<vmem>>, vector<1x1x64xbf16>
    %464 = vector.shape_cast %463 : vector<1x1x64xbf16> to vector<1x64xbf16>
    %c24_362 = arith.constant 24 : index
    %c0_363 = arith.constant 0 : index
    %c0_364 = arith.constant 0 : index
    %465 = vector.load %arg6[%c24_362, %c0_363, %c0_364] : memref<49x64x128xbf16, #tpu.memory_space<vmem>>, vector<1x64x128xbf16>
    %466 = vector.shape_cast %465 : vector<1x64x128xbf16> to vector<64x128xbf16>
    %cst_365 = arith.constant dense<0.000000e+00> : vector<1x128xf32>
    %467 = tpu.matmul %464, %466, %cst_365 {dimension_numbers = #tpu.dot_dimension_numbers<[1], [0], [0], [1], [0, 0, 1, 1], [], []>} : vector<1x64xbf16>, vector<64x128xbf16>, vector<1x128xf32> -> vector<1x128xf32>
    %468 = arith.addf %462, %467 : vector<1x128xf32>
    %c0_366 = arith.constant 0 : index
    %c25 = arith.constant 25 : index
    %c0_367 = arith.constant 0 : index
    %469 = vector.load %arg15[%c0_366, %c25, %c0_367] : memref<1x49x64xbf16, #tpu.memory_space<vmem>>, vector<1x1x64xbf16>
    %470 = vector.shape_cast %469 : vector<1x1x64xbf16> to vector<1x64xbf16>
    %c25_368 = arith.constant 25 : index
    %c0_369 = arith.constant 0 : index
    %c0_370 = arith.constant 0 : index
    %471 = vector.load %arg6[%c25_368, %c0_369, %c0_370] : memref<49x64x128xbf16, #tpu.memory_space<vmem>>, vector<1x64x128xbf16>
    %472 = vector.shape_cast %471 : vector<1x64x128xbf16> to vector<64x128xbf16>
    %cst_371 = arith.constant dense<0.000000e+00> : vector<1x128xf32>
    %473 = tpu.matmul %470, %472, %cst_371 {dimension_numbers = #tpu.dot_dimension_numbers<[1], [0], [0], [1], [0, 0, 1, 1], [], []>} : vector<1x64xbf16>, vector<64x128xbf16>, vector<1x128xf32> -> vector<1x128xf32>
    %474 = arith.addf %468, %473 : vector<1x128xf32>
    %c0_372 = arith.constant 0 : index
    %c26 = arith.constant 26 : index
    %c0_373 = arith.constant 0 : index
    %475 = vector.load %arg15[%c0_372, %c26, %c0_373] : memref<1x49x64xbf16, #tpu.memory_space<vmem>>, vector<1x1x64xbf16>
    %476 = vector.shape_cast %475 : vector<1x1x64xbf16> to vector<1x64xbf16>
    %c26_374 = arith.constant 26 : index
    %c0_375 = arith.constant 0 : index
    %c0_376 = arith.constant 0 : index
    %477 = vector.load %arg6[%c26_374, %c0_375, %c0_376] : memref<49x64x128xbf16, #tpu.memory_space<vmem>>, vector<1x64x128xbf16>
    %478 = vector.shape_cast %477 : vector<1x64x128xbf16> to vector<64x128xbf16>
    %cst_377 = arith.constant dense<0.000000e+00> : vector<1x128xf32>
    %479 = tpu.matmul %476, %478, %cst_377 {dimension_numbers = #tpu.dot_dimension_numbers<[1], [0], [0], [1], [0, 0, 1, 1], [], []>} : vector<1x64xbf16>, vector<64x128xbf16>, vector<1x128xf32> -> vector<1x128xf32>
    %480 = arith.addf %474, %479 : vector<1x128xf32>
    %c0_378 = arith.constant 0 : index
    %c27 = arith.constant 27 : index
    %c0_379 = arith.constant 0 : index
    %481 = vector.load %arg15[%c0_378, %c27, %c0_379] : memref<1x49x64xbf16, #tpu.memory_space<vmem>>, vector<1x1x64xbf16>
    %482 = vector.shape_cast %481 : vector<1x1x64xbf16> to vector<1x64xbf16>
    %c27_380 = arith.constant 27 : index
    %c0_381 = arith.constant 0 : index
    %c0_382 = arith.constant 0 : index
    %483 = vector.load %arg6[%c27_380, %c0_381, %c0_382] : memref<49x64x128xbf16, #tpu.memory_space<vmem>>, vector<1x64x128xbf16>
    %484 = vector.shape_cast %483 : vector<1x64x128xbf16> to vector<64x128xbf16>
    %cst_383 = arith.constant dense<0.000000e+00> : vector<1x128xf32>
    %485 = tpu.matmul %482, %484, %cst_383 {dimension_numbers = #tpu.dot_dimension_numbers<[1], [0], [0], [1], [0, 0, 1, 1], [], []>} : vector<1x64xbf16>, vector<64x128xbf16>, vector<1x128xf32> -> vector<1x128xf32>
    %486 = arith.addf %480, %485 : vector<1x128xf32>
    %c0_384 = arith.constant 0 : index
    %c28_385 = arith.constant 28 : index
    %c0_386 = arith.constant 0 : index
    %487 = vector.load %arg15[%c0_384, %c28_385, %c0_386] : memref<1x49x64xbf16, #tpu.memory_space<vmem>>, vector<1x1x64xbf16>
    %488 = vector.shape_cast %487 : vector<1x1x64xbf16> to vector<1x64xbf16>
    %c28_387 = arith.constant 28 : index
    %c0_388 = arith.constant 0 : index
    %c0_389 = arith.constant 0 : index
    %489 = vector.load %arg6[%c28_387, %c0_388, %c0_389] : memref<49x64x128xbf16, #tpu.memory_space<vmem>>, vector<1x64x128xbf16>
    %490 = vector.shape_cast %489 : vector<1x64x128xbf16> to vector<64x128xbf16>
    %cst_390 = arith.constant dense<0.000000e+00> : vector<1x128xf32>
    %491 = tpu.matmul %488, %490, %cst_390 {dimension_numbers = #tpu.dot_dimension_numbers<[1], [0], [0], [1], [0, 0, 1, 1], [], []>} : vector<1x64xbf16>, vector<64x128xbf16>, vector<1x128xf32> -> vector<1x128xf32>
    %492 = arith.addf %486, %491 : vector<1x128xf32>
    %c0_391 = arith.constant 0 : index
    %c29_392 = arith.constant 29 : index
    %c0_393 = arith.constant 0 : index
    %493 = vector.load %arg15[%c0_391, %c29_392, %c0_393] : memref<1x49x64xbf16, #tpu.memory_space<vmem>>, vector<1x1x64xbf16>
    %494 = vector.shape_cast %493 : vector<1x1x64xbf16> to vector<1x64xbf16>
    %c29_394 = arith.constant 29 : index
    %c0_395 = arith.constant 0 : index
    %c0_396 = arith.constant 0 : index
    %495 = vector.load %arg6[%c29_394, %c0_395, %c0_396] : memref<49x64x128xbf16, #tpu.memory_space<vmem>>, vector<1x64x128xbf16>
    %496 = vector.shape_cast %495 : vector<1x64x128xbf16> to vector<64x128xbf16>
    %cst_397 = arith.constant dense<0.000000e+00> : vector<1x128xf32>
    %497 = tpu.matmul %494, %496, %cst_397 {dimension_numbers = #tpu.dot_dimension_numbers<[1], [0], [0], [1], [0, 0, 1, 1], [], []>} : vector<1x64xbf16>, vector<64x128xbf16>, vector<1x128xf32> -> vector<1x128xf32>
    %498 = arith.addf %492, %497 : vector<1x128xf32>
    %c0_398 = arith.constant 0 : index
    %c30 = arith.constant 30 : index
    %c0_399 = arith.constant 0 : index
    %499 = vector.load %arg15[%c0_398, %c30, %c0_399] : memref<1x49x64xbf16, #tpu.memory_space<vmem>>, vector<1x1x64xbf16>
    %500 = vector.shape_cast %499 : vector<1x1x64xbf16> to vector<1x64xbf16>
    %c30_400 = arith.constant 30 : index
    %c0_401 = arith.constant 0 : index
    %c0_402 = arith.constant 0 : index
    %501 = vector.load %arg6[%c30_400, %c0_401, %c0_402] : memref<49x64x128xbf16, #tpu.memory_space<vmem>>, vector<1x64x128xbf16>
    %502 = vector.shape_cast %501 : vector<1x64x128xbf16> to vector<64x128xbf16>
    %cst_403 = arith.constant dense<0.000000e+00> : vector<1x128xf32>
    %503 = tpu.matmul %500, %502, %cst_403 {dimension_numbers = #tpu.dot_dimension_numbers<[1], [0], [0], [1], [0, 0, 1, 1], [], []>} : vector<1x64xbf16>, vector<64x128xbf16>, vector<1x128xf32> -> vector<1x128xf32>
    %504 = arith.addf %498, %503 : vector<1x128xf32>
    %c0_404 = arith.constant 0 : index
    %c31 = arith.constant 31 : index
    %c0_405 = arith.constant 0 : index
    %505 = vector.load %arg15[%c0_404, %c31, %c0_405] : memref<1x49x64xbf16, #tpu.memory_space<vmem>>, vector<1x1x64xbf16>
    %506 = vector.shape_cast %505 : vector<1x1x64xbf16> to vector<1x64xbf16>
    %c31_406 = arith.constant 31 : index
    %c0_407 = arith.constant 0 : index
    %c0_408 = arith.constant 0 : index
    %507 = vector.load %arg6[%c31_406, %c0_407, %c0_408] : memref<49x64x128xbf16, #tpu.memory_space<vmem>>, vector<1x64x128xbf16>
    %508 = vector.shape_cast %507 : vector<1x64x128xbf16> to vector<64x128xbf16>
    %cst_409 = arith.constant dense<0.000000e+00> : vector<1x128xf32>
    %509 = tpu.matmul %506, %508, %cst_409 {dimension_numbers = #tpu.dot_dimension_numbers<[1], [0], [0], [1], [0, 0, 1, 1], [], []>} : vector<1x64xbf16>, vector<64x128xbf16>, vector<1x128xf32> -> vector<1x128xf32>
    %510 = arith.addf %504, %509 : vector<1x128xf32>
    %c0_410 = arith.constant 0 : index
    %c32_411 = arith.constant 32 : index
    %c0_412 = arith.constant 0 : index
    %511 = vector.load %arg15[%c0_410, %c32_411, %c0_412] : memref<1x49x64xbf16, #tpu.memory_space<vmem>>, vector<1x1x64xbf16>
    %512 = vector.shape_cast %511 : vector<1x1x64xbf16> to vector<1x64xbf16>
    %c32_413 = arith.constant 32 : index
    %c0_414 = arith.constant 0 : index
    %c0_415 = arith.constant 0 : index
    %513 = vector.load %arg6[%c32_413, %c0_414, %c0_415] : memref<49x64x128xbf16, #tpu.memory_space<vmem>>, vector<1x64x128xbf16>
    %514 = vector.shape_cast %513 : vector<1x64x128xbf16> to vector<64x128xbf16>
    %cst_416 = arith.constant dense<0.000000e+00> : vector<1x128xf32>
    %515 = tpu.matmul %512, %514, %cst_416 {dimension_numbers = #tpu.dot_dimension_numbers<[1], [0], [0], [1], [0, 0, 1, 1], [], []>} : vector<1x64xbf16>, vector<64x128xbf16>, vector<1x128xf32> -> vector<1x128xf32>
    %516 = arith.addf %510, %515 : vector<1x128xf32>
    %c0_417 = arith.constant 0 : index
    %c33_418 = arith.constant 33 : index
    %c0_419 = arith.constant 0 : index
    %517 = vector.load %arg15[%c0_417, %c33_418, %c0_419] : memref<1x49x64xbf16, #tpu.memory_space<vmem>>, vector<1x1x64xbf16>
    %518 = vector.shape_cast %517 : vector<1x1x64xbf16> to vector<1x64xbf16>
    %c33_420 = arith.constant 33 : index
    %c0_421 = arith.constant 0 : index
    %c0_422 = arith.constant 0 : index
    %519 = vector.load %arg6[%c33_420, %c0_421, %c0_422] : memref<49x64x128xbf16, #tpu.memory_space<vmem>>, vector<1x64x128xbf16>
    %520 = vector.shape_cast %519 : vector<1x64x128xbf16> to vector<64x128xbf16>
    %cst_423 = arith.constant dense<0.000000e+00> : vector<1x128xf32>
    %521 = tpu.matmul %518, %520, %cst_423 {dimension_numbers = #tpu.dot_dimension_numbers<[1], [0], [0], [1], [0, 0, 1, 1], [], []>} : vector<1x64xbf16>, vector<64x128xbf16>, vector<1x128xf32> -> vector<1x128xf32>
    %522 = arith.addf %516, %521 : vector<1x128xf32>
    %c0_424 = arith.constant 0 : index
    %c34_425 = arith.constant 34 : index
    %c0_426 = arith.constant 0 : index
    %523 = vector.load %arg15[%c0_424, %c34_425, %c0_426] : memref<1x49x64xbf16, #tpu.memory_space<vmem>>, vector<1x1x64xbf16>
    %524 = vector.shape_cast %523 : vector<1x1x64xbf16> to vector<1x64xbf16>
    %c34_427 = arith.constant 34 : index
    %c0_428 = arith.constant 0 : index
    %c0_429 = arith.constant 0 : index
    %525 = vector.load %arg6[%c34_427, %c0_428, %c0_429] : memref<49x64x128xbf16, #tpu.memory_space<vmem>>, vector<1x64x128xbf16>
    %526 = vector.shape_cast %525 : vector<1x64x128xbf16> to vector<64x128xbf16>
    %cst_430 = arith.constant dense<0.000000e+00> : vector<1x128xf32>
    %527 = tpu.matmul %524, %526, %cst_430 {dimension_numbers = #tpu.dot_dimension_numbers<[1], [0], [0], [1], [0, 0, 1, 1], [], []>} : vector<1x64xbf16>, vector<64x128xbf16>, vector<1x128xf32> -> vector<1x128xf32>
    %528 = arith.addf %522, %527 : vector<1x128xf32>
    %c0_431 = arith.constant 0 : index
    %c35_432 = arith.constant 35 : index
    %c0_433 = arith.constant 0 : index
    %529 = vector.load %arg15[%c0_431, %c35_432, %c0_433] : memref<1x49x64xbf16, #tpu.memory_space<vmem>>, vector<1x1x64xbf16>
    %530 = vector.shape_cast %529 : vector<1x1x64xbf16> to vector<1x64xbf16>
    %c35_434 = arith.constant 35 : index
    %c0_435 = arith.constant 0 : index
    %c0_436 = arith.constant 0 : index
    %531 = vector.load %arg6[%c35_434, %c0_435, %c0_436] : memref<49x64x128xbf16, #tpu.memory_space<vmem>>, vector<1x64x128xbf16>
    %532 = vector.shape_cast %531 : vector<1x64x128xbf16> to vector<64x128xbf16>
    %cst_437 = arith.constant dense<0.000000e+00> : vector<1x128xf32>
    %533 = tpu.matmul %530, %532, %cst_437 {dimension_numbers = #tpu.dot_dimension_numbers<[1], [0], [0], [1], [0, 0, 1, 1], [], []>} : vector<1x64xbf16>, vector<64x128xbf16>, vector<1x128xf32> -> vector<1x128xf32>
    %534 = arith.addf %528, %533 : vector<1x128xf32>
    %c0_438 = arith.constant 0 : index
    %c36 = arith.constant 36 : index
    %c0_439 = arith.constant 0 : index
    %535 = vector.load %arg15[%c0_438, %c36, %c0_439] : memref<1x49x64xbf16, #tpu.memory_space<vmem>>, vector<1x1x64xbf16>
    %536 = vector.shape_cast %535 : vector<1x1x64xbf16> to vector<1x64xbf16>
    %c36_440 = arith.constant 36 : index
    %c0_441 = arith.constant 0 : index
    %c0_442 = arith.constant 0 : index
    %537 = vector.load %arg6[%c36_440, %c0_441, %c0_442] : memref<49x64x128xbf16, #tpu.memory_space<vmem>>, vector<1x64x128xbf16>
    %538 = vector.shape_cast %537 : vector<1x64x128xbf16> to vector<64x128xbf16>
    %cst_443 = arith.constant dense<0.000000e+00> : vector<1x128xf32>
    %539 = tpu.matmul %536, %538, %cst_443 {dimension_numbers = #tpu.dot_dimension_numbers<[1], [0], [0], [1], [0, 0, 1, 1], [], []>} : vector<1x64xbf16>, vector<64x128xbf16>, vector<1x128xf32> -> vector<1x128xf32>
    %540 = arith.addf %534, %539 : vector<1x128xf32>
    %c0_444 = arith.constant 0 : index
    %c37 = arith.constant 37 : index
    %c0_445 = arith.constant 0 : index
    %541 = vector.load %arg15[%c0_444, %c37, %c0_445] : memref<1x49x64xbf16, #tpu.memory_space<vmem>>, vector<1x1x64xbf16>
    %542 = vector.shape_cast %541 : vector<1x1x64xbf16> to vector<1x64xbf16>
    %c37_446 = arith.constant 37 : index
    %c0_447 = arith.constant 0 : index
    %c0_448 = arith.constant 0 : index
    %543 = vector.load %arg6[%c37_446, %c0_447, %c0_448] : memref<49x64x128xbf16, #tpu.memory_space<vmem>>, vector<1x64x128xbf16>
    %544 = vector.shape_cast %543 : vector<1x64x128xbf16> to vector<64x128xbf16>
    %cst_449 = arith.constant dense<0.000000e+00> : vector<1x128xf32>
    %545 = tpu.matmul %542, %544, %cst_449 {dimension_numbers = #tpu.dot_dimension_numbers<[1], [0], [0], [1], [0, 0, 1, 1], [], []>} : vector<1x64xbf16>, vector<64x128xbf16>, vector<1x128xf32> -> vector<1x128xf32>
    %546 = arith.addf %540, %545 : vector<1x128xf32>
    %c0_450 = arith.constant 0 : index
    %c38 = arith.constant 38 : index
    %c0_451 = arith.constant 0 : index
    %547 = vector.load %arg15[%c0_450, %c38, %c0_451] : memref<1x49x64xbf16, #tpu.memory_space<vmem>>, vector<1x1x64xbf16>
    %548 = vector.shape_cast %547 : vector<1x1x64xbf16> to vector<1x64xbf16>
    %c38_452 = arith.constant 38 : index
    %c0_453 = arith.constant 0 : index
    %c0_454 = arith.constant 0 : index
    %549 = vector.load %arg6[%c38_452, %c0_453, %c0_454] : memref<49x64x128xbf16, #tpu.memory_space<vmem>>, vector<1x64x128xbf16>
    %550 = vector.shape_cast %549 : vector<1x64x128xbf16> to vector<64x128xbf16>
    %cst_455 = arith.constant dense<0.000000e+00> : vector<1x128xf32>
    %551 = tpu.matmul %548, %550, %cst_455 {dimension_numbers = #tpu.dot_dimension_numbers<[1], [0], [0], [1], [0, 0, 1, 1], [], []>} : vector<1x64xbf16>, vector<64x128xbf16>, vector<1x128xf32> -> vector<1x128xf32>
    %552 = arith.addf %546, %551 : vector<1x128xf32>
    %c0_456 = arith.constant 0 : index
    %c39 = arith.constant 39 : index
    %c0_457 = arith.constant 0 : index
    %553 = vector.load %arg15[%c0_456, %c39, %c0_457] : memref<1x49x64xbf16, #tpu.memory_space<vmem>>, vector<1x1x64xbf16>
    %554 = vector.shape_cast %553 : vector<1x1x64xbf16> to vector<1x64xbf16>
    %c39_458 = arith.constant 39 : index
    %c0_459 = arith.constant 0 : index
    %c0_460 = arith.constant 0 : index
    %555 = vector.load %arg6[%c39_458, %c0_459, %c0_460] : memref<49x64x128xbf16, #tpu.memory_space<vmem>>, vector<1x64x128xbf16>
    %556 = vector.shape_cast %555 : vector<1x64x128xbf16> to vector<64x128xbf16>
    %cst_461 = arith.constant dense<0.000000e+00> : vector<1x128xf32>
    %557 = tpu.matmul %554, %556, %cst_461 {dimension_numbers = #tpu.dot_dimension_numbers<[1], [0], [0], [1], [0, 0, 1, 1], [], []>} : vector<1x64xbf16>, vector<64x128xbf16>, vector<1x128xf32> -> vector<1x128xf32>
    %558 = arith.addf %552, %557 : vector<1x128xf32>
    %c0_462 = arith.constant 0 : index
    %c40 = arith.constant 40 : index
    %c0_463 = arith.constant 0 : index
    %559 = vector.load %arg15[%c0_462, %c40, %c0_463] : memref<1x49x64xbf16, #tpu.memory_space<vmem>>, vector<1x1x64xbf16>
    %560 = vector.shape_cast %559 : vector<1x1x64xbf16> to vector<1x64xbf16>
    %c40_464 = arith.constant 40 : index
    %c0_465 = arith.constant 0 : index
    %c0_466 = arith.constant 0 : index
    %561 = vector.load %arg6[%c40_464, %c0_465, %c0_466] : memref<49x64x128xbf16, #tpu.memory_space<vmem>>, vector<1x64x128xbf16>
    %562 = vector.shape_cast %561 : vector<1x64x128xbf16> to vector<64x128xbf16>
    %cst_467 = arith.constant dense<0.000000e+00> : vector<1x128xf32>
    %563 = tpu.matmul %560, %562, %cst_467 {dimension_numbers = #tpu.dot_dimension_numbers<[1], [0], [0], [1], [0, 0, 1, 1], [], []>} : vector<1x64xbf16>, vector<64x128xbf16>, vector<1x128xf32> -> vector<1x128xf32>
    %564 = arith.addf %558, %563 : vector<1x128xf32>
    %c0_468 = arith.constant 0 : index
    %c41 = arith.constant 41 : index
    %c0_469 = arith.constant 0 : index
    %565 = vector.load %arg15[%c0_468, %c41, %c0_469] : memref<1x49x64xbf16, #tpu.memory_space<vmem>>, vector<1x1x64xbf16>
    %566 = vector.shape_cast %565 : vector<1x1x64xbf16> to vector<1x64xbf16>
    %c41_470 = arith.constant 41 : index
    %c0_471 = arith.constant 0 : index
    %c0_472 = arith.constant 0 : index
    %567 = vector.load %arg6[%c41_470, %c0_471, %c0_472] : memref<49x64x128xbf16, #tpu.memory_space<vmem>>, vector<1x64x128xbf16>
    %568 = vector.shape_cast %567 : vector<1x64x128xbf16> to vector<64x128xbf16>
    %cst_473 = arith.constant dense<0.000000e+00> : vector<1x128xf32>
    %569 = tpu.matmul %566, %568, %cst_473 {dimension_numbers = #tpu.dot_dimension_numbers<[1], [0], [0], [1], [0, 0, 1, 1], [], []>} : vector<1x64xbf16>, vector<64x128xbf16>, vector<1x128xf32> -> vector<1x128xf32>
    %570 = arith.addf %564, %569 : vector<1x128xf32>
    %c0_474 = arith.constant 0 : index
    %c42_475 = arith.constant 42 : index
    %c0_476 = arith.constant 0 : index
    %571 = vector.load %arg15[%c0_474, %c42_475, %c0_476] : memref<1x49x64xbf16, #tpu.memory_space<vmem>>, vector<1x1x64xbf16>
    %572 = vector.shape_cast %571 : vector<1x1x64xbf16> to vector<1x64xbf16>
    %c42_477 = arith.constant 42 : index
    %c0_478 = arith.constant 0 : index
    %c0_479 = arith.constant 0 : index
    %573 = vector.load %arg6[%c42_477, %c0_478, %c0_479] : memref<49x64x128xbf16, #tpu.memory_space<vmem>>, vector<1x64x128xbf16>
    %574 = vector.shape_cast %573 : vector<1x64x128xbf16> to vector<64x128xbf16>
    %cst_480 = arith.constant dense<0.000000e+00> : vector<1x128xf32>
    %575 = tpu.matmul %572, %574, %cst_480 {dimension_numbers = #tpu.dot_dimension_numbers<[1], [0], [0], [1], [0, 0, 1, 1], [], []>} : vector<1x64xbf16>, vector<64x128xbf16>, vector<1x128xf32> -> vector<1x128xf32>
    %576 = arith.addf %570, %575 : vector<1x128xf32>
    %c0_481 = arith.constant 0 : index
    %c43 = arith.constant 43 : index
    %c0_482 = arith.constant 0 : index
    %577 = vector.load %arg15[%c0_481, %c43, %c0_482] : memref<1x49x64xbf16, #tpu.memory_space<vmem>>, vector<1x1x64xbf16>
    %578 = vector.shape_cast %577 : vector<1x1x64xbf16> to vector<1x64xbf16>
    %c43_483 = arith.constant 43 : index
    %c0_484 = arith.constant 0 : index
    %c0_485 = arith.constant 0 : index
    %579 = vector.load %arg6[%c43_483, %c0_484, %c0_485] : memref<49x64x128xbf16, #tpu.memory_space<vmem>>, vector<1x64x128xbf16>
    %580 = vector.shape_cast %579 : vector<1x64x128xbf16> to vector<64x128xbf16>
    %cst_486 = arith.constant dense<0.000000e+00> : vector<1x128xf32>
    %581 = tpu.matmul %578, %580, %cst_486 {dimension_numbers = #tpu.dot_dimension_numbers<[1], [0], [0], [1], [0, 0, 1, 1], [], []>} : vector<1x64xbf16>, vector<64x128xbf16>, vector<1x128xf32> -> vector<1x128xf32>
    %582 = arith.addf %576, %581 : vector<1x128xf32>
    %c0_487 = arith.constant 0 : index
    %c44 = arith.constant 44 : index
    %c0_488 = arith.constant 0 : index
    %583 = vector.load %arg15[%c0_487, %c44, %c0_488] : memref<1x49x64xbf16, #tpu.memory_space<vmem>>, vector<1x1x64xbf16>
    %584 = vector.shape_cast %583 : vector<1x1x64xbf16> to vector<1x64xbf16>
    %c44_489 = arith.constant 44 : index
    %c0_490 = arith.constant 0 : index
    %c0_491 = arith.constant 0 : index
    %585 = vector.load %arg6[%c44_489, %c0_490, %c0_491] : memref<49x64x128xbf16, #tpu.memory_space<vmem>>, vector<1x64x128xbf16>
    %586 = vector.shape_cast %585 : vector<1x64x128xbf16> to vector<64x128xbf16>
    %cst_492 = arith.constant dense<0.000000e+00> : vector<1x128xf32>
    %587 = tpu.matmul %584, %586, %cst_492 {dimension_numbers = #tpu.dot_dimension_numbers<[1], [0], [0], [1], [0, 0, 1, 1], [], []>} : vector<1x64xbf16>, vector<64x128xbf16>, vector<1x128xf32> -> vector<1x128xf32>
    %588 = arith.addf %582, %587 : vector<1x128xf32>
    %c0_493 = arith.constant 0 : index
    %c45 = arith.constant 45 : index
    %c0_494 = arith.constant 0 : index
    %589 = vector.load %arg15[%c0_493, %c45, %c0_494] : memref<1x49x64xbf16, #tpu.memory_space<vmem>>, vector<1x1x64xbf16>
    %590 = vector.shape_cast %589 : vector<1x1x64xbf16> to vector<1x64xbf16>
    %c45_495 = arith.constant 45 : index
    %c0_496 = arith.constant 0 : index
    %c0_497 = arith.constant 0 : index
    %591 = vector.load %arg6[%c45_495, %c0_496, %c0_497] : memref<49x64x128xbf16, #tpu.memory_space<vmem>>, vector<1x64x128xbf16>
    %592 = vector.shape_cast %591 : vector<1x64x128xbf16> to vector<64x128xbf16>
    %cst_498 = arith.constant dense<0.000000e+00> : vector<1x128xf32>
    %593 = tpu.matmul %590, %592, %cst_498 {dimension_numbers = #tpu.dot_dimension_numbers<[1], [0], [0], [1], [0, 0, 1, 1], [], []>} : vector<1x64xbf16>, vector<64x128xbf16>, vector<1x128xf32> -> vector<1x128xf32>
    %594 = arith.addf %588, %593 : vector<1x128xf32>
    %c0_499 = arith.constant 0 : index
    %c46 = arith.constant 46 : index
    %c0_500 = arith.constant 0 : index
    %595 = vector.load %arg15[%c0_499, %c46, %c0_500] : memref<1x49x64xbf16, #tpu.memory_space<vmem>>, vector<1x1x64xbf16>
    %596 = vector.shape_cast %595 : vector<1x1x64xbf16> to vector<1x64xbf16>
    %c46_501 = arith.constant 46 : index
    %c0_502 = arith.constant 0 : index
    %c0_503 = arith.constant 0 : index
    %597 = vector.load %arg6[%c46_501, %c0_502, %c0_503] : memref<49x64x128xbf16, #tpu.memory_space<vmem>>, vector<1x64x128xbf16>
    %598 = vector.shape_cast %597 : vector<1x64x128xbf16> to vector<64x128xbf16>
    %cst_504 = arith.constant dense<0.000000e+00> : vector<1x128xf32>
    %599 = tpu.matmul %596, %598, %cst_504 {dimension_numbers = #tpu.dot_dimension_numbers<[1], [0], [0], [1], [0, 0, 1, 1], [], []>} : vector<1x64xbf16>, vector<64x128xbf16>, vector<1x128xf32> -> vector<1x128xf32>
    %600 = arith.addf %594, %599 : vector<1x128xf32>
    %c0_505 = arith.constant 0 : index
    %c47 = arith.constant 47 : index
    %c0_506 = arith.constant 0 : index
    %601 = vector.load %arg15[%c0_505, %c47, %c0_506] : memref<1x49x64xbf16, #tpu.memory_space<vmem>>, vector<1x1x64xbf16>
    %602 = vector.shape_cast %601 : vector<1x1x64xbf16> to vector<1x64xbf16>
    %c47_507 = arith.constant 47 : index
    %c0_508 = arith.constant 0 : index
    %c0_509 = arith.constant 0 : index
    %603 = vector.load %arg6[%c47_507, %c0_508, %c0_509] : memref<49x64x128xbf16, #tpu.memory_space<vmem>>, vector<1x64x128xbf16>
    %604 = vector.shape_cast %603 : vector<1x64x128xbf16> to vector<64x128xbf16>
    %cst_510 = arith.constant dense<0.000000e+00> : vector<1x128xf32>
    %605 = tpu.matmul %602, %604, %cst_510 {dimension_numbers = #tpu.dot_dimension_numbers<[1], [0], [0], [1], [0, 0, 1, 1], [], []>} : vector<1x64xbf16>, vector<64x128xbf16>, vector<1x128xf32> -> vector<1x128xf32>
    %606 = arith.addf %600, %605 : vector<1x128xf32>
    %c0_511 = arith.constant 0 : index
    %c48_512 = arith.constant 48 : index
    %c0_513 = arith.constant 0 : index
    %607 = vector.load %arg15[%c0_511, %c48_512, %c0_513] : memref<1x49x64xbf16, #tpu.memory_space<vmem>>, vector<1x1x64xbf16>
    %608 = vector.shape_cast %607 : vector<1x1x64xbf16> to vector<1x64xbf16>
    %c48_514 = arith.constant 48 : index
    %c0_515 = arith.constant 0 : index
    %c0_516 = arith.constant 0 : index
    %609 = vector.load %arg6[%c48_514, %c0_515, %c0_516] : memref<49x64x128xbf16, #tpu.memory_space<vmem>>, vector<1x64x128xbf16>
    %610 = vector.shape_cast %609 : vector<1x64x128xbf16> to vector<64x128xbf16>
    %cst_517 = arith.constant dense<0.000000e+00> : vector<1x128xf32>
    %611 = tpu.matmul %608, %610, %cst_517 {dimension_numbers = #tpu.dot_dimension_numbers<[1], [0], [0], [1], [0, 0, 1, 1], [], []>} : vector<1x64xbf16>, vector<64x128xbf16>, vector<1x128xf32> -> vector<1x128xf32>
    %612 = arith.addf %606, %611 : vector<1x128xf32>
    %c0_518 = arith.constant 0 : index
    %c0_519 = arith.constant 0 : index
    %613 = vector.load %arg7[%c0_518, %c0_519] : memref<1x128xf32, #tpu.memory_space<vmem>>, vector<1x128xf32>
    %614 = arith.addf %612, %613 : vector<1x128xf32>
    %cst_520 = arith.constant 0.000000e+00 : f32
    %615 = vector.broadcast %cst_520 : f32 to vector<1x128xf32>
    %616 = arith.maximumf %614, %615 : vector<1x128xf32>
    %617 = arith.truncf %616 : vector<1x128xf32> to vector<1x128xbf16>
    %c0_521 = arith.constant 0 : index
    %c0_522 = arith.constant 0 : index
    %618 = vector.load %arg8[%c0_521, %c0_522] : memref<128x10xbf16, #tpu.memory_space<vmem>>, vector<128x10xbf16>
    %cst_523 = arith.constant dense<0.000000e+00> : vector<1x10xf32>
    %619 = tpu.matmul %617, %618, %cst_523 {dimension_numbers = #tpu.dot_dimension_numbers<[1], [0], [0], [1], [0, 0, 1, 1], [], []>} : vector<1x128xbf16>, vector<128x10xbf16>, vector<1x10xf32> -> vector<1x10xf32>
    %c0_524 = arith.constant 0 : index
    %c0_525 = arith.constant 0 : index
    %620 = vector.load %arg9[%c0_524, %c0_525] : memref<1x10xf32, #tpu.memory_space<vmem>>, vector<1x10xf32>
    %621 = arith.addf %619, %620 : vector<1x10xf32>
    %622 = vector.shape_cast %621 : vector<1x10xf32> to vector<1x1x10xf32>
    %c0_526 = arith.constant 0 : index
    %c0_527 = arith.constant 0 : index
    %c0_528 = arith.constant 0 : index
    %623 = vector.load %arg10[%c0_526, %c0_527, %c0_528] : memref<1x1x10xf32, #tpu.memory_space<vmem>>, vector<1x1x10xf32>
    tpu.vector_store %arg10[%c0_526, %c0_527, %c0_528], %622 {strides = array<i32>} : memref<1x1x10xf32, #tpu.memory_space<vmem>>, vector<1x1x10xf32>,
    return
  }
  func.func @transform_0(%arg0: i32) -> (i32, i32, i32) {
    %c0_i32 = arith.constant 0 : i32
    %c0_i32_0 = arith.constant 0 : i32
    %c0_i32_1 = arith.constant 0 : i32
    return %arg0, %c0_i32, %c0_i32_0 : i32, i32, i32
  }
  func.func @transform_1(%arg0: i32) -> (i32, i32) {
    %c0_i32 = arith.constant 0 : i32
    %c0_i32_0 = arith.constant 0 : i32
    %c0_i32_1 = arith.constant 0 : i32
    return %c0_i32, %c0_i32_0 : i32, i32
  }
  func.func @transform_2(%arg0: i32) -> (i32, i32) {
    %c0_i32 = arith.constant 0 : i32
    %c0_i32_0 = arith.constant 0 : i32
    %c0_i32_1 = arith.constant 0 : i32
    return %c0_i32, %c0_i32_0 : i32, i32
  }
  func.func @transform_3(%arg0: i32) -> (i32, i32) {
    %c0_i32 = arith.constant 0 : i32
    %c0_i32_0 = arith.constant 0 : i32
    %c0_i32_1 = arith.constant 0 : i32
    return %c0_i32, %c0_i32_0 : i32, i32
  }
  func.func @transform_4(%arg0: i32) -> (i32, i32) {
    %c0_i32 = arith.constant 0 : i32
    %c0_i32_0 = arith.constant 0 : i32
    %c0_i32_1 = arith.constant 0 : i32
    return %c0_i32, %c0_i32_0 : i32, i32
  }
  func.func @transform_5(%arg0: i32) -> (i32, i32, i32) {
    %c0_i32 = arith.constant 0 : i32
    %c0_i32_0 = arith.constant 0 : i32
    %c0_i32_1 = arith.constant 0 : i32
    %c0_i32_2 = arith.constant 0 : i32
    return %c0_i32, %c0_i32_0, %c0_i32_1 : i32, i32, i32
  }
  func.func @transform_6(%arg0: i32) -> (i32, i32) {
    %c0_i32 = arith.constant 0 : i32
    %c0_i32_0 = arith.constant 0 : i32
    %c0_i32_1 = arith.constant 0 : i32
    return %c0_i32, %c0_i32_0 : i32, i32
  }
  func.func @transform_7(%arg0: i32) -> (i32, i32) {
    %c0_i32 = arith.constant 0 : i32
    %c0_i32_0 = arith.constant 0 : i32
    %c0_i32_1 = arith.constant 0 : i32
    return %c0_i32, %c0_i32_0 : i32, i32
  }
  func.func @transform_8(%arg0: i32) -> (i32, i32) {
    %c0_i32 = arith.constant 0 : i32
    %c0_i32_0 = arith.constant 0 : i32
    %c0_i32_1 = arith.constant 0 : i32
    return %c0_i32, %c0_i32_0 : i32, i32
  }
  func.func @transform_9(%arg0: i32) -> (i32, i32, i32) {
    %c0_i32 = arith.constant 0 : i32
    %c0_i32_0 = arith.constant 0 : i32
    %c0_i32_1 = arith.constant 0 : i32
    return %arg0, %c0_i32, %c0_i32_0 : i32, i32, i32
  }
}

</mosaic_0001>

<bundles_post_ra>
// kernel: simple_cnn_forward.1
= control target key start
LH: loop header
LB: loop body
LE: loop exit
PB: predicated region body
PF: predicated region fallthrough
CT: control target
= control target key end

     0   :  { %14 = vsyncpa [#allocation8], 0  ;;  %s15640_s0 = inlined_call_operand.vmem [shape: bf16[2,784,9], index: 0, kind: input, shape index: {}]   ;;  %s15641_s1 = inlined_call_operand.vmem [shape: bf16[9,32], index: 1, kind: input, shape index: {}]   ;;  %s15642_s2 = inlined_call_operand.vmem [shape: f32[1,32], index: 2, kind: input, shape index: {}]   ;;  %s15643_s3 = inlined_call_operand.vmem [shape: bf16[288,64], index: 3, kind: input, shape index: {}]   ;;  %s15644_s4 = inlined_call_operand.vmem [shape: f32[1,64], index: 4, kind: input, shape index: {}]   ;;  %s15645_s5 = inlined_call_operand.vmem [shape: bf16[49,64,128], index: 5, kind: input, shape index: {}]   ;;  %s15646_s6 = inlined_call_operand.vmem [shape: f32[1,128], index: 6, kind: input, shape index: {}]   ;;  %s15647_s7 = inlined_call_operand.vmem [shape: bf16[128,10], index: 7, kind: input, shape index: {}]   ;;  %s15648_s8 = inlined_call_operand.vmem [shape: f32[1,10], index: 8, kind: input, shape index: {}]   ;;  %s15649_s9 = inlined_call_operand.hbm [shape: f32[2,1,10], index: 9, kind: output, shape index: {}]  }
   0x1   :  { %16 = vsyncpa [#allocation8 + $0x1], 0  ;;  %s12690_s30 = smov 0   ;;  %s12692_s10 = smov 0  }
   0x2   :  { %s12694_s11 = smov 0   ;;  %s12696_s12 = smov 0  }
   0x3 LB: > { %s12711_s13 = sadd.s32 4294967295, %s12630_s12   ;;  %s9759_s14 = sadd.s32 4294967294, %s12630_s12   ;;  %s12630_s12 = sphi %s12696_s12, %s15671_s12   ;;  %s12626_s11 = sphi %s12694_s11, %s15670_s11   ;;  %s12622_s10 = sphi %s12692_s10, %s15669_s10   ;;  %s12618_s30 = sphi %s12690_s30, %s15668_s30  }
   0x4   : > { %s12715_s15 = sadd.s32 1, %s12630_s12   ;;  %s223_s16 = sadd.s32 1, %s12626_s11 }
   0x5   : > { %s220_s17 = ssub.s32 %s12630_s12, %s12715_s15  ;;  %p233_p0 = scmp.ne.s32.totalorder %s12626_s11, %s12622_s10 }
   0x6   : > { %p221_p1 = scmp.eq.s32.totalorder %s220_s17, 0  ;;  %p234_p2 = scmp.eq.s32.totalorder %s12711_s13, 1 }
   0x7   : > { %p239_p3 = scmp.ne.s32.totalorder %s12622_s10, %s12618_s30  ;;  %p240_p4 = scmp.eq.s32.totalorder %s9759_s14, 1 }
   0x8   : > { %s12726_s18 = scalar_select %p221_p1, %s12626_s11, %s223_s16  }
   0x9   : > { %p12728_p5 = por %p234_p2, %p233_p0  ;;  %p12732_p6 = por %p240_p4, %p239_p3 }
   0xa   : > { %p9762_p7 = scmp.ge.s32.totalorder %s12630_s12, 1  ;;  %p290_p8 = scmp.lt.s32.totalorder %s12630_s12, 3 }
   0xc   : > { %p291_p9 = pnand %p9762_p7, %p290_p8 }
   0xd   : > { %vm848_vm0 = vcmask (!%p291_p9), 1043456   ;;  %v12632_v0 = vmov (!%p291_p9), 0.0   ;;  %v12175_v1 = vld [vmem:[%s15641_s1] sm:$0x1f] (!%p291_p9)   ;;  %vm849_vm1 = vcmask (!%p291_p9), 1044480   ;;  %p325_p10 = scmp.lt.s32.totalorder (!%p291_p9), %s12711_s13, 1 }
   0xe   : > { %294 = sbr.rel (%p291_p9) target bundleno = 2013 (0x7dd), region = 56  ;;  %11290 = vmatprep.subr.bf16.mxu0 (!%p291_p9), %v12632_v0  ;;  %v12633_v2 = vmov (!%p291_p9), 65535   ;;  %vm12634_vm2 = vmmov (!%p291_p9), 0   ;;  %vm700_vm3 = vcmask (!%p291_p9), 72704   ;;  %vm331_vm4 = vcmask (!%p291_p9), 261120   ;;  %s12636_s28 = smov (!%p291_p9), 64  }
   0xf   : > { %v850_v3 = vsel (!%p291_p9), %vm848_vm0, 4294967295, %v12633_v2  ;;  %11292 = vmatprep.mubr.msk.bf16.mxu0 (!%p291_p9), %vm12634_vm2, %v12632_v0  ;;  %v12635_v21 = vmov (!%p291_p9), 0   ;;  %vm2624_vm5 = vcmask (!%p291_p9), 1042432   ;;  %vm2625_vm6 = vcmask (!%p291_p9), 1046532   ;;  %s12637_s29 = smov (!%p291_p9), 32   ;;  %s12638_s17 = smov (!%p291_p9), 96  }
  0x10   : > { %v851_v4 = vsel (!%p291_p9), %vm849_vm1, %v850_v3, 0  ;;  %347 = vst.msk [vmem:[#allocation3 + $0x78] sm:$0xff] (!%p291_p9), %vm331_vm4, %v12635_v21  ;;  %332 = vst.msk [vmem:[#allocation3] sm:$0xff] (!%p291_p9), %vm331_vm4, %v12635_v21  ;;  %vm2144_vm8 = vsmask.f32 (!%p291_p9), 3328  ;;  %vm2030_vm12 = vcmask (!%p291_p9), 257024  }
  0x11   : > { %v853_v5 = vand.u32 (!%p291_p9), %v12175_v1, %v851_v4  ;;  %333 = vst.msk [vmem:[#allocation3 + $0x8] sm:$0xff] (!%p291_p9), %vm331_vm4, %v12635_v21  ;;  %334 = vst.msk [vmem:[#allocation3 + $0x10] sm:$0xff] (!%p291_p9), %vm331_vm4, %v12635_v21  ;;  %vm2145_vm9 = vsmask.f32 (!%p291_p9), 7440  ;;  %vm1419_vm11 = vsmask.f32 (!%p291_p9), 7426 }
  0x12   : > { %335 = vst.msk [vmem:[#allocation3 + $0x18] sm:$0xff] (!%p291_p9), %vm331_vm4, %v12635_v21  ;;  %336 = vst.msk [vmem:[#allocation3 + $0x20] sm:$0xff] (!%p291_p9), %vm331_vm4, %v12635_v21  ;;  %vm2510_vm13 = vcmask (!%p291_p9), 519424   ;;  %vm2794_vm15 = vcmask (!%p291_p9), 781824   ;;  %vm2992_vm0 = vcmask (!%p291_p9), 1044224   ;;  %vm2058_vm1 = vcmask (!%p291_p9), 256000  }
  0x13   : > { %11291 = vmatpush3.bf16.msra.mxu0 (!%p291_p9), %v853_v5  ;;  %337 = vst.msk [vmem:[#allocation3 + $0x28] sm:$0xff] (!%p291_p9), %vm331_vm4, %v12635_v21  ;;  %338 = vst.msk [vmem:[#allocation3 + $0x30] sm:$0xff] (!%p291_p9), %vm331_vm4, %v12635_v21  ;;  %s10861_s25 = sshll.u32 (!%p291_p9), %s12711_s13, 4 }
  0x14   : > { %11700 = vmatprep.subr.bf16.mxu0 (!%p291_p9), %v12632_v0  ;;  %339 = vst.msk [vmem:[#allocation3 + $0x38] sm:$0xff] (!%p291_p9), %vm331_vm4, %v12635_v21  ;;  %340 = vst.msk [vmem:[#allocation3 + $0x40] sm:$0xff] (!%p291_p9), %vm331_vm4, %v12635_v21 }
  0x15   : > { %s326_s23 = scalar_select %p325_p10, %s12711_s13, 1  ;;  %341 = vst.msk [vmem:[#allocation3 + $0x48] sm:$0xff] %vm331_vm4, %v12635_v21  ;;  %342 = vst.msk [vmem:[#allocation3 + $0x50] sm:$0xff] %vm331_vm4, %v12635_v21 }
  0x16   : > { %343 = vst.msk [vmem:[#allocation3 + $0x58] sm:$0xff] %vm331_vm4, %v12635_v21  ;;  %344 = vst.msk [vmem:[#allocation3 + $0x60] sm:$0xff] %vm331_vm4, %v12635_v21 }
  0x17   : > { %s12128_s24 = smul.u32 392, %s326_s23  ;;  %345 = vst.msk [vmem:[#allocation3 + $0x68] sm:$0xff] %vm331_vm4, %v12635_v21  ;;  %346 = vst.msk [vmem:[#allocation3 + $0x70] sm:$0xff] %vm331_vm4, %v12635_v21  ;;  %v2060_v23 = vld [vmem:[#allocation3] sm:$0xff]  ;;  %v3733_v24 = vld [vmem:[#allocation3 + $0x78] sm:$0x7f] }
  0x18   : > { %v9892_v25 = vcombine.low %v2060_v23, %v2060_v23  ;;  %v10060_v26 = vcombine.low %v3733_v24, %v3733_v24  ;;  %v2540_v27 = vld [vmem:[#allocation3] sm:$0xfe]  ;;  %vm12836_vm7 = vmor %vm2624_vm5, %vm2625_vm6  ;;  %v9893_v36 = vcombine.high %v2060_v23, %v2060_v23  ;;  %v12929_v24 = vld [vmem:[%s15642_s2] ss:$0 sm:$0xff]  ;;  %vm2822_vm5 = vcmask 780800  }
  0x19   : > { %s12749_s27 = scalar_lea.vmem %s15640_s0, %s12128_s24  ;;  %v9920_v29 = vcombine.low %v2540_v27, %v2540_v27  ;;  %v9921_v30 = vcombine.high %v2540_v27, %v2540_v27  ;;  %vm12848_vm10 = vmor %vm2144_vm8, %vm2145_vm9  ;;  %vm3020_vm6 = vcmask 1043200  }
  0x1a   : > { %v12176_v6 = vld [vmem:[%s12749_s27] sm:$0xff]   ;;  %v12177_v7 = vld [vmem:[%s12749_s27 + $0x8] sm:$0xff]   ;;  %v12178_v8 = vld [vmem:[%s12749_s27 + $0x10] sm:$0xff]   ;;  %v2148_v31 = vshrl.u32 %v9892_v25, 16  ;;  %v2151_v32 = vshll.u32 %v9892_v25, 16  ;;  %3856 = vrot.lane.b32.xlu0 %v10060_v26, %s12636_s28  ;;  %v2157_v41 = vshll.u32 %v9893_v36, 16 }
  0x1b   : > { %11293 = vmatmul.mubr.msk.bf16.vlgmr.msra.gmra.mrb[0].mxu0 %vm700_vm3, %v12176_v6  ;;  %v12179_v9 = vld [vmem:[%s12749_s27 + $0x18] sm:$0xff]   ;;  %v12180_v10 = vld [vmem:[%s12749_s27 + $0x20] sm:$0xff]   ;;  %v12181_v11 = vld [vmem:[%s12749_s27 + $0x28] sm:$0xff]   ;;  %v9948_v33 = vrot.slane %v9920_v29, 9  ;;  %v12834_v34 = vrot.slane %v9921_v30, 5  ;;  %v2161_v47 = vshrl.u32 %v9893_v36, 16 }
  0x1c   : > { %11296 = vmatprep.mubr.msk.bf16.mxu0 %vm12634_vm2, %v12632_v0  ;;  %v12182_v12 = vld [vmem:[%s12749_s27 + $0x30] sm:$0xff]   ;;  %v12183_v13 = vld [vmem:[%s12749_s27 + $0x38] sm:$0xff]   ;;  %v12184_v14 = vld [vmem:[%s12749_s27 + $0x40] sm:$0xff]   ;;  %v2150_v37 = vrot.slane %v2148_v31, 4  ;;  %v2153_v38 = vrot.slane %v2151_v32, 5  ;;  %v12852_v44 = vrot.slane %v2157_v41, 5 }
  0x1d   : > { %v12185_v15 = vld [vmem:[%s12749_s27 + $0x48] sm:$0xff]   ;;  %v12186_v16 = vld [vmem:[%s12749_s27 + $0x50] sm:$0xff]   ;;  %v12187_v17 = vld [vmem:[%s12749_s27 + $0x58] sm:$0xff]   ;;  %v2630_v39 = vsel %vm12836_vm7, %v9948_v33, %v12834_v34  ;;  %v12859_v48 = vrot.slane %v2161_v47, 4 }
  0x1e   : > { %v12188_v18 = vld [vmem:[%s12749_s27 + $0x60] sm:$0xff]   ;;  %v12189_v19 = vld [vmem:[%s12749_s27 + $0x68] sm:$0xff]   ;;  %v12190_v20 = vld [vmem:[%s12749_s27 + $0x70] sm:$0xff]   ;;  %2710 = vrot.lane.b32.xlu0 %v2630_v39, %s12636_s28  ;;  %v2154_v40 = vor.u32 %v2153_v38, %v2150_v37 }
  0x1f   : > { %v12191_v22 = vld [vmem:[%s12749_s27 + $0x78] sm:$0xff]   ;;  %v12192_v28 = vld [vmem:[%s12749_s27 + $0x80] sm:$0xff]   ;;  %v12193_v45 = vld [vmem:[%s12749_s27 + $0x88] sm:$0xff]   ;;  %v2164_v49 = vor.u32 %v12859_v48, %v12852_v44 }
  0x20   : > { %v2155_v43 = vrot.slane %v2154_v40, 4  ;;  %v12194_v50 = vld [vmem:[%s12749_s27 + $0x90] sm:$0xff]   ;;  %v12195_v51 = vld [vmem:[%s12749_s27 + $0x98] sm:$0xff]   ;;  %v12196_v52 = vld [vmem:[%s12749_s27 + $0xa0] sm:$0xff]  }
  0x21   : > { %v12197_v53 = vld [vmem:[%s12749_s27 + $0xa8] sm:$0xff]   ;;  %v12198_v54 = vld [vmem:[%s12749_s27 + $0xb0] sm:$0xff]   ;;  %v12199_v55 = vld [vmem:[%s12749_s27 + $0xb8] sm:$0xff]  }
  0x22   : > { %v2160_v46 = vsel %vm12848_vm10, %v2155_v43, %v12852_v44  ;;  %v12200_v56 = vld [vmem:[%s12749_s27 + $0xc0] sm:$0xff]   ;;  %v12201_v57 = vld [vmem:[%s12749_s27 + $0xc8] sm:$0xff]   ;;  %v12202_v58 = vld [vmem:[%s12749_s27 + $0xd0] sm:$0xff]  }
  0x23   : > { %11297 = vmatmul.mubr.msk.bf16.gmra.mrb[4].mxu0 %vm700_vm3, %v12177_v7  ;;  %2426 = vrot.lane.b32.xlu0 %v2160_v46, %s12637_s29  ;;  %v12203_v61 = vld [vmem:[%s12749_s27 + $0xd8] sm:$0xff]   ;;  %v12204_v3 = vld [vmem:[%s12749_s27 + $0xe0] sm:$0xff]   ;;  %vm12949_vm14 = vmand %vm331_vm4, %vm1419_vm11 }
  0x24   : > { %11300 = vmatprep.mubr.msk.bf16.mxu0 %vm12634_vm2, %v12632_v0  ;;  %v12207_v31 = vld [vmem:[%s12749_s27 + $0xf8] sm:$0xff]   ;;  %v12216_v44 = vld [vmem:[%s12749_s27 + $0x110] sm:$0xff]  }
  0x2b   : > { %11301 = vmatmul.mubr.msk.bf16.gmra.mrb[8].mxu0 %vm700_vm3, %v12178_v8  ;;  %v12205_v8 = vld [vmem:[%s12749_s27 + $0xe8] sm:$0xff]  }
  0x2c   : > { %11304 = vmatprep.mubr.msk.bf16.mxu0 %vm12634_vm2, %v12632_v0 }
  0x33   : > { %11305 = vmatmul.mubr.msk.bf16.gmra.mrb[12].mxu0 %vm700_vm3, %v12179_v9 }
  0x34   : > { %11308 = vmatprep.mubr.msk.bf16.mxu0 %vm12634_vm2, %v12632_v0 }
  0x3b   : > { %11309 = vmatmul.mubr.msk.bf16.gmra.mrb[16].mxu0 %vm700_vm3, %v12180_v10 }
  0x3c   : > { %11312 = vmatprep.mubr.msk.bf16.mxu0 %vm12634_vm2, %v12632_v0 }
  0x43   : > { %11313 = vmatmul.mubr.msk.bf16.gmra.mrb[20].mxu0 %vm700_vm3, %v12181_v11 }
  0x44   : > { %11316 = vmatprep.mubr.msk.bf16.mxu0 %vm12634_vm2, %v12632_v0 }
  0x4b   : > { %11317 = vmatmul.mubr.msk.bf16.gmra.mrb[24].mxu0 %vm700_vm3, %v12182_v12 }
  0x4c   : > { %11320 = vmatprep.mubr.msk.bf16.mxu0 %vm12634_vm2, %v12632_v0 }
  0x53   : > { %11321 = vmatmul.mubr.msk.bf16.gmra.mrb[28].mxu0 %vm700_vm3, %v12183_v13  ;;  %v12206_v13 = vld [vmem:[%s12749_s27 + $0xf0] sm:$0xff]  }
  0x54   : > { %11324 = vmatprep.mubr.msk.bf16.mxu0 %vm12634_vm2, %v12632_v0 }
  0x5b   : > { %11325 = vmatmul.mubr.msk.bf16.gmra.mrb[32].mxu0 %vm700_vm3, %v12184_v14 }
  0x5c   : > { %11328 = vmatprep.mubr.msk.bf16.mxu0 %vm12634_vm2, %v12632_v0 }
  0x63   : > { %11329 = vmatmul.mubr.msk.bf16.gmra.mrb[36].mxu0 %vm700_vm3, %v12185_v15 }
  0x64   : > { %11332 = vmatprep.mubr.msk.bf16.mxu0 %vm12634_vm2, %v12632_v0 }
  0x6b   : > { %11333 = vmatmul.mubr.msk.bf16.gmra.mrb[40].mxu0 %vm700_vm3, %v12186_v16 }
  0x6c   : > { %11336 = vmatprep.mubr.msk.bf16.mxu0 %vm12634_vm2, %v12632_v0 }
  0x73   : > { %11337 = vmatmul.mubr.msk.bf16.gmra.mrb[44].mxu0 %vm700_vm3, %v12187_v17 }
  0x74   : > { %11340 = vmatprep.mubr.msk.bf16.mxu0 %vm12634_vm2, %v12632_v0 }
  0x7b   : > { %11341 = vmatmul.mubr.msk.bf16.gmra.mrb[48].mxu0 %vm700_vm3, %v12188_v18 }
  0x7c   : > { %11344 = vmatprep.mubr.msk.bf16.mxu0 %vm12634_vm2, %v12632_v0 }
  0x83   : > { %11345 = vmatmul.mubr.msk.bf16.gmra.mrb[52].mxu0 %vm700_vm3, %v12189_v19 }
  0x84   : > { %11348 = vmatprep.mubr.msk.bf16.mxu0 %vm12634_vm2, %v12632_v0 }
  0x8b   : > { %11349 = vmatmul.mubr.msk.bf16.gmra.mrb[56].mxu0 %vm700_vm3, %v12190_v20 }
  0x8c   : > { %11352 = vmatprep.mubr.msk.bf16.mxu0 %vm12634_vm2, %v12632_v0  ;;  %v12934_v38 = vpop.permute.xlu0 %3856 }
  0x93   : > { %11353 = vmatmul.mubr.msk.bf16.gmra.mrb[60].mxu0 %vm700_vm3, %v12191_v22 }
  0x94   : > { %11356 = vmatprep.mubr.msk.bf16.mxu0 %vm12634_vm2, %v12632_v0 }
  0x9b   : > { %11357 = vmatmul.mubr.msk.bf16.gmra.mrb[64].mxu0 %vm700_vm3, %v12192_v28 }
  0x9c   : > { %11360 = vmatprep.mubr.msk.bf16.mxu0 %vm12634_vm2, %v12632_v0 }
  0xa3   : > { %11361 = vmatmul.mubr.msk.bf16.gmra.mrb[68].mxu0 %vm700_vm3, %v12193_v45  ;;  %v2711_v45 = vpop.permute.xlu0 %2710 }
  0xa4   : > { %11364 = vmatprep.mubr.msk.bf16.mxu0 %vm12634_vm2, %v12632_v0 }
  0xab   : > { %11365 = vmatmul.mubr.msk.bf16.gmra.mrb[72].mxu0 %vm700_vm3, %v12194_v50 }
  0xac   : > { %11368 = vmatprep.mubr.msk.bf16.mxu0 %vm12634_vm2, %v12632_v0 }
  0xb3   : > { %11369 = vmatmul.mubr.msk.bf16.gmra.mrb[76].mxu0 %vm700_vm3, %v12195_v51  ;;  %v12208_v51 = vld [vmem:[%s12749_s27 + $0x100] sm:$0xff]  }
  0xb4   : > { %11372 = vmatprep.mubr.msk.bf16.mxu0 %vm12634_vm2, %v12632_v0 }
  0xbb   : > { %11373 = vmatmul.mubr.msk.bf16.gmra.mrb[80].mxu0 %vm700_vm3, %v12196_v52 }
  0xbc   : > { %11376 = vmatprep.mubr.msk.bf16.mxu0 %vm12634_vm2, %v12632_v0 }
  0xc3   : > { %11377 = vmatmul.mubr.msk.bf16.gmra.mrb[84].mxu0 %vm700_vm3, %v12197_v53  ;;  %v1918_v53 = vld [vmem:[#allocation3] sm:$0xff] }
  0xc4   : > { %11380 = vmatprep.mubr.msk.bf16.mxu0 %vm12634_vm2, %v12632_v0 }
  0xcb   : > { %11381 = vmatmul.mubr.msk.bf16.gmra.mrb[88].mxu0 %vm700_vm3, %v12198_v54 }
  0xcc   : > { %11384 = vmatprep.mubr.msk.bf16.mxu0 %vm12634_vm2, %v12632_v0 }
  0xd3   : > { %11385 = vmatmul.mubr.msk.bf16.gmra.mrb[92].mxu0 %vm700_vm3, %v12199_v55 }
  0xd4   : > { %11388 = vmatprep.mubr.msk.bf16.mxu0 %vm12634_vm2, %v12632_v0 }
  0xdb   : > { %11389 = vmatmul.mubr.msk.bf16.gmra.mrb[96].mxu0 %vm700_vm3, %v12200_v56  ;;  %v9864_v56 = vcombine.low %v1918_v53, %v1918_v53 }
  0xdc   : > { %11392 = vmatprep.mubr.msk.bf16.mxu0 %vm12634_vm2, %v12632_v0 }
  0xdd   : > { %2031 = vst.msk [vmem:[#allocation4] sm:$0xf] %vm2030_vm12, %v9864_v56 }
  0xe3   : > { %11393 = vmatmul.mubr.msk.bf16.gmra.mrb[100].mxu0 %vm700_vm3, %v12201_v57 }
  0xe4   : > { %11396 = vmatprep.mubr.msk.bf16.mxu0 %vm12634_vm2, %v12632_v0 }
  0xeb   : > { %11397 = vmatmul.mubr.msk.bf16.gmra.mrb[104].mxu0 %vm700_vm3, %v12202_v58 }
  0xec   : > { %11400 = vmatprep.mubr.msk.bf16.mxu0 %vm12634_vm2, %v12632_v0 }
  0xee   : > { %v889_v59 = vpop.f32.mrb[0].mxu0 }
  0xef   : > { %1280 = vst.msk [vmem:[#allocation2] sm:$0xff] %vm331_vm4, %v889_v59  ;;  %v11294_v60 = vpop.f32.mrb[1].mxu0  ;;  %v2427_v59 = vpop.permute.xlu0 %2426 }
  0xf0   : > { %v892_v62 = vpop.f32.mrb[2].mxu0  ;;  %2511 = vst.msk [vmem:[#allocation4] sm:$0xf] %vm2510_vm13, %v2427_v59 }
  0xf1   : > { %1281 = vst.msk [vmem:[#allocation2 + $0x8] sm:$0xff] %vm331_vm4, %v892_v62  ;;  %v11295_v63 = vpop.f32.mrb[3].mxu0 }
  0xf2   : > { %2795 = vst.msk [vmem:[#allocation4] sm:$0xf] %vm2794_vm15, %v2711_v45 }
  0xf3   : > { %11401 = vmatmul.mubr.msk.bf16.gmra.mrb[108].mxu0 %vm700_vm3, %v12203_v61  ;;  %v1421_v61 = vld [vmem:[#allocation3 + $0x8] sm:$0xff] }
  0xf4   : > { %11404 = vmatprep.mubr.msk.bf16.mxu0 %vm12634_vm2, %v12632_v0 }
  0xf6   : > { %v897_v1 = vpop.f32.mrb[4].mxu0 }
  0xf7   : > { %1282 = vst.msk [vmem:[#allocation2 + $0x10] sm:$0xff] %vm331_vm4, %v897_v1  ;;  %v11298_v2 = vpop.f32.mrb[5].mxu0  ;;  %v12213_v1 = vld [vmem:[%s12749_s27 + $0x108] sm:$0xff]  }
  0xf8   : > { %v900_v4 = vpop.f32.mrb[6].mxu0  ;;  %v1378_v14 = vld [vmem:[#allocation2] ss:$2 sm:$0xff]  ;;  %v1382_v15 = vld [vmem:[#allocation2 + $0x1] ss:$2 sm:$0xff] }
  0xf9   : > { %1283 = vst.msk [vmem:[#allocation2 + $0x18] sm:$0xff] %vm331_vm4, %v900_v4  ;;  %v11299_v5 = vpop.f32.mrb[7].mxu0  ;;  %v1393_v21 = vmax.f32 %v1378_v14, %v1382_v15 }
  0xfb   : > { %11405 = vmatmul.mubr.msk.bf16.gmra.mrb[112].mxu0 %vm700_vm3, %v12204_v3 }
  0xfc   : > { %11408 = vmatprep.mubr.msk.bf16.mxu0 %vm12634_vm2, %v12632_v0 }
  0xfe   : > { %v905_v6 = vpop.f32.mrb[8].mxu0 }
  0xff   : > { %1284 = vst.msk [vmem:[#allocation2 + $0x20] sm:$0xff] %vm331_vm4, %v905_v6  ;;  %v11302_v7 = vpop.f32.mrb[9].mxu0  ;;  %v9865_v6 = vcombine.high %v1918_v53, %v1918_v53 }
 0x100   : > { %v908_v9 = vpop.f32.mrb[10].mxu0  ;;  %v1380_v22 = vld [vmem:[#allocation2 + $0x10] ss:$2 sm:$0x3f] }
 0x101   : > { %1285 = vst.msk [vmem:[#allocation2 + $0x28] sm:$0xff] %vm331_vm4, %v908_v9  ;;  %v11303_v10 = vpop.f32.mrb[11].mxu0  ;;  %v1384_v23 = vld [vmem:[#allocation2 + $0x11] ss:$2 sm:$0x3f]  ;;  %v2165_v9 = vrot.slane %v2164_v49, 4 }
 0x102   : > { %v1394_v28 = vmax.f32 %v1380_v22, %v1384_v23  ;;  %2032 = vst.msk [vmem:[#allocation4 + $0xc] sm:$0xf] %vm2030_vm12, %v9865_v6  ;;  %v12219_v6 = vld [vmem:[%s12749_s27 + $0x118] sm:$0xff]  }
 0x103   : > { %11409 = vmatmul.mubr.msk.bf16.gmra.mrb[116].mxu0 %vm700_vm3, %v12205_v8 }
 0x104   : > { %11412 = vmatprep.mubr.msk.bf16.mxu0 %vm12634_vm2, %v12632_v0 }
 0x106   : > { %v913_v11 = vpop.f32.mrb[12].mxu0 }
 0x107   : > { %1286 = vst.msk [vmem:[#allocation2 + $0x30] sm:$0xff] %vm331_vm4, %v913_v11  ;;  %v11306_v12 = vpop.f32.mrb[13].mxu0 }
 0x108   : > { %v916_v16 = vpop.f32.mrb[14].mxu0  ;;  %v1386_v17 = vld [vmem:[#allocation2 + $0x1c] ss:$2 sm:$0xff]  ;;  %v1390_v18 = vld [vmem:[#allocation2 + $0x1d] ss:$2 sm:$0xff] }
 0x109   : > { %1287 = vst.msk [vmem:[#allocation2 + $0x38] sm:$0xff] %vm331_vm4, %v916_v16  ;;  %v11307_v19 = vpop.f32.mrb[15].mxu0  ;;  %v1395_v20 = vmax.f32 %v1386_v17, %v1390_v18 }
 0x10b   : > { %11413 = vmatmul.mubr.msk.bf16.gmra.mrb[120].mxu0 %vm700_vm3, %v12206_v13  ;;  %v1397_v25 = vmax.f32 %v1393_v21, %v1395_v20 }
 0x10c   : > { %11416 = vmatprep.mubr.msk.bf16.mxu0 %vm12634_vm2, %v12632_v0 }
 0x10d   : > { %v1405_v33 = vadd.f32 %v12929_v24, %v1397_v25 }
 0x10e   : > { %v1388_v26 = vld [vmem:[#allocation2 + $0x2c] ss:$2 sm:$0x3f]  ;;  %v1392_v27 = vld [vmem:[#allocation2 + $0x2d] ss:$2 sm:$0x3f] }
 0x10f   : > { %v1396_v29 = vmax.f32 %v1388_v26, %v1392_v27  ;;  %v921_v30 = vpop.f32.mrb[16].mxu0  ;;  %v1407_v41 = vmax.f32 %v1405_v33, 0.0 }
 0x110   : > { %1288 = vst.msk [vmem:[#allocation2 + $0x40] sm:$0xff] %vm331_vm4, %v921_v30  ;;  %v11310_v32 = vpop.f32.mrb[17].mxu0 }
 0x111   : > { %v1398_v36 = vmax.f32 %v1394_v28, %v1396_v29  ;;  %v924_v37 = vpop.f32.mrb[18].mxu0 }
 0x112   : > { %1289 = vst.msk [vmem:[#allocation2 + $0x48] sm:$0xff] %vm331_vm4, %v924_v37  ;;  %v11311_v39 = vpop.f32.mrb[19].mxu0 }
 0x113   : > { %v1406_v40 = vadd.f32 %v12929_v24, %v1398_v36  ;;  %11417 = vmatmul.mubr.msk.bf16.gmra.mrb[124].mxu0 %vm700_vm3, %v12207_v31 }
 0x114   : > { %11420 = vmatprep.mubr.msk.bf16.mxu0 %vm12634_vm2, %v12632_v0 }
 0x115   : > { %v1408_v43 = vmax.f32 %v1406_v40, 0.0 }
 0x116   : > { %v929_v46 = vpop.f32.mrb[20].mxu0 }
 0x117   : > { %v1409_v47 = vpack.c.bf16 %v1408_v43, %v1407_v41  ;;  %1290 = vst.msk [vmem:[#allocation2 + $0x50] sm:$0xff] %vm331_vm4, %v929_v46  ;;  %v11314_v50 = vpop.f32.mrb[21].mxu0  ;;  %v1425_v13 = vld [vmem:[#allocation2 + $0x38] ss:$2 sm:$0xff]  ;;  %v1429_v14 = vld [vmem:[#allocation2 + $0x39] ss:$2 sm:$0xff] }
 0x118   : > { %v932_v52 = vpop.f32.mrb[22].mxu0  ;;  %v1440_v22 = vmax.f32 %v1425_v13, %v1429_v14 }
 0x119   : > { %v1411_v54 = vshrl.u32 %v1409_v47, 16  ;;  %1291 = vst.msk [vmem:[#allocation2 + $0x58] sm:$0xff] %vm331_vm4, %v932_v52  ;;  %v11315_v55 = vpop.f32.mrb[23].mxu0  ;;  %v1414_v58 = vshll.u32 %v1409_v47, 16 }
 0x11b   : > { %v1413_v57 = vrot.slane %v1411_v54, 7  ;;  %11421 = vmatmul.mubr.msk.bf16.gmra.mrb[128].mxu0 %vm700_vm3, %v12208_v51 }
 0x11c   : > { %11424 = vmatprep.mubr.msk.bf16.mxu0 %vm12634_vm2, %v12632_v0 }
 0x11d   : > { %v1416_v62 = vor.u32 %v1414_v58, %v1413_v57  ;;  %v2631_v57 = vrot.slane %v12834_v34, 4 }
 0x11e   : > { %v937_v63 = vpop.f32.mrb[24].mxu0  ;;  %v1427_v17 = vld [vmem:[#allocation2 + $0x48] ss:$2 sm:$0x3f] }
 0x11f   : > { %v1422_v2 = vsel %vm12949_vm14, %v1416_v62, %v1421_v61  ;;  %1292 = vst.msk [vmem:[#allocation2 + $0x60] sm:$0xff] %vm331_vm4, %v937_v63  ;;  %v11318_v3 = vpop.f32.mrb[25].mxu0  ;;  %v1431_v48 = vld [vmem:[#allocation2 + $0x49] ss:$2 sm:$0x3f] }
 0x120   : > { %1423 = vst [vmem:[#allocation3 + $0x8] sm:$0xff] %v1422_v2  ;;  %v12959_v4 = vcombine.high %v1422_v2, %v1422_v2  ;;  %v12961_v5 = vcombine.low %v1422_v2, %v1422_v2  ;;  %v940_v7 = vpop.f32.mrb[26].mxu0  ;;  %v1441_v36 = vmax.f32 %v1427_v17, %v1431_v48 }
 0x121   : > { %1293 = vst.msk [vmem:[#allocation2 + $0x68] sm:$0xff] %vm331_vm4, %v940_v7  ;;  %v11319_v8 = vpop.f32.mrb[27].mxu0 }
 0x122   : > { %2910 = vrot.lane.b32.xlu1 %v12959_v4, %s12638_s17  ;;  %2908 = vrot.lane.b32.xlu0 %v12961_v5, %s12638_s17  ;;  %v2167_v10 = vshll.u32 %v12961_v5, 16  ;;  %v2632_v11 = vrot.slane %v12961_v5, 5  ;;  %v2171_v12 = vshrl.u32 %v12961_v5, 16  ;;  %v2635_v20 = vrot.slane %v12959_v4, 5 }
 0x123   : > { %11425 = vmatmul.mubr.msk.bf16.gmra.mrb[132].mxu0 %vm700_vm3, %v12213_v1  ;;  %v2177_v31 = vshll.u32 %v12959_v4, 16  ;;  %v2181_v5 = vshrl.u32 %v12959_v4, 16 }
 0x124   : > { %11428 = vmatprep.mubr.msk.bf16.mxu0 %vm12634_vm2, %v12632_v0  ;;  %v2169_v15 = vrot.slane %v2167_v10, 5  ;;  %v2173_v16 = vrot.slane %v2171_v12, 4  ;;  %v2634_v19 = vrot.slane %v2632_v11, 4  ;;  %v2633_v13 = vsel %vm12836_vm7, %v2631_v57, %v2632_v11 }
 0x125   : > { %v13005_v58 = vrot.slane %v2177_v31, 5 }
 0x126   : > { %v945_v49 = vpop.f32.mrb[28].mxu0  ;;  %v2170_v18 = vsel %vm12848_vm10, %v2165_v9, %v2169_v15  ;;  %v2174_v21 = vor.u32 %v2173_v16, %v2169_v15  ;;  %v1433_v23 = vld [vmem:[#allocation2 + $0x54] ss:$2 sm:$0xff]  ;;  %v1437_v25 = vld [vmem:[#allocation2 + $0x55] ss:$2 sm:$0xff]  ;;  %v2636_v47 = vsel %vm12836_vm7, %v2634_v19, %v2635_v20 }
 0x127   : > { %1294 = vst.msk [vmem:[#allocation2 + $0x70] sm:$0xff] %vm331_vm4, %v945_v49  ;;  %v11322_v26 = vpop.f32.mrb[29].mxu0  ;;  %2428 = vrot.lane.b32.xlu0 %v2170_v18, %s12637_s29  ;;  %v3022_v27 = vld [vmem:[#allocation3 + $0x8] sm:$0xff]  ;;  %v1442_v28 = vmax.f32 %v1433_v23, %v1437_v25  ;;  %v12220_v19 = vld [vmem:[%s12749_s27 + $0x120] sm:$0xff]   ;;  %v2183_v25 = vrot.slane %v2181_v5, 4 }
 0x128   : > { %v948_v29 = vpop.f32.mrb[30].mxu0  ;;  %v3441_v30 = vld [vmem:[#allocation3 + $0x8] sm:$0xfe]  ;;  %v9977_v32 = vcombine.low %v3022_v27, %v3022_v27  ;;  %v12987_v33 = vcombine.high %v3022_v27, %v3022_v27  ;;  %v1435_v37 = vld [vmem:[#allocation2 + $0x64] ss:$2 sm:$0x3f] }
 0x129   : > { %v1439_v39 = vld [vmem:[#allocation2 + $0x65] ss:$2 sm:$0x3f]  ;;  %1295 = vst.msk [vmem:[#allocation2 + $0x78] sm:$0xff] %vm331_vm4, %v948_v29  ;;  %v10005_v40 = vcombine.low %v3441_v30, %v3441_v30  ;;  %v10006_v41 = vcombine.high %v3441_v30, %v3441_v30  ;;  %v1444_v43 = vmax.f32 %v1440_v22, %v1442_v28  ;;  %v11323_v46 = vpop.f32.mrb[31].mxu0  ;;  %v2175_v50 = vrot.slane %v2174_v21, 4 }
 0x12a   : > { %v1443_v45 = vmax.f32 %v1435_v37, %v1439_v39  ;;  %2033 = vst.msk [vmem:[#allocation4 + $0x18] sm:$0xf] %vm2030_vm12, %v9977_v32  ;;  %2034 = vst.msk [vmem:[#allocation4 + $0x24] sm:$0xf] %vm2030_vm12, %v12987_v33  ;;  %v3107_v53 = vshrl.u32 %v9977_v32, 16  ;;  %v3110_v54 = vshll.u32 %v9977_v32, 16 }
 0x12b   : > { %11429 = vmatmul.mubr.msk.bf16.gmra.mrb[136].mxu0 %vm700_vm3, %v12216_v44  ;;  %v10033_v51 = vrot.slane %v10005_v40, 9  ;;  %v12998_v52 = vrot.slane %v10006_v41, 5  ;;  %2714 = vrot.lane.b32.xlu0 %v2636_v47, %s12636_s28  ;;  %v1446_v55 = vadd.f32 %v12929_v24, %v1444_v43  ;;  %v3116_v63 = vshll.u32 %v12987_v33, 16  ;;  %v1459_v21 = vld [vmem:[#allocation3 + $0x10] sm:$0xff]  ;;  %v12221_v37 = vld [vmem:[%s12749_s27 + $0x128] sm:$0xff]  }
 0x12c   : > { %v1445_v56 = vmax.f32 %v1441_v36, %v1443_v45  ;;  %11432 = vmatprep.mubr.msk.bf16.mxu0 %vm12634_vm2, %v12632_v0  ;;  %v3109_v61 = vrot.slane %v3107_v53, 4  ;;  %v3112_v62 = vrot.slane %v3110_v54, 5  ;;  %v2180_v3 = vsel %vm12848_vm10, %v2175_v50, %v13005_v58 }
 0x12d   : > { %v3528_v59 = vsel %vm12836_vm7, %v10033_v51, %v12998_v52  ;;  %v1448_v8 = vmax.f32 %v1446_v55, 0.0  ;;  %v13024_v15 = vrot.slane %v3116_v63, 5  ;;  %v3120_v28 = vshrl.u32 %v12987_v33, 16 }
 0x12e   : > { %v1447_v1 = vadd.f32 %v12929_v24, %v1445_v56  ;;  %3608 = vrot.lane.b32.xlu1 %v3528_v59, %s12637_s29  ;;  %v953_v2 = vpop.f32.mrb[32].mxu0  ;;  %v3113_v7 = vor.u32 %v3112_v62, %v3109_v61  ;;  %v2637_v32 = vrot.slane %v2635_v20, 4  ;;  %v2184_v33 = vor.u32 %v2183_v25, %v13005_v58 }
 0x12f   : > { %1296 = vst.msk [vmem:[#allocation2 + $0x80] sm:$0xff] %vm331_vm4, %v953_v2  ;;  %v11326_v34 = vpop.f32.mrb[33].mxu0  ;;  %2430 = vrot.lane.b32.xlu0 %v2180_v3, %s12637_s29  ;;  %v3529_v39 = vrot.slane %v12998_v52, 4  ;;  %v3122_v43 = vrot.slane %v3120_v28, 4 }
 0x130   : > { %v1449_v9 = vmax.f32 %v1447_v1, 0.0  ;;  %v956_v10 = vpop.f32.mrb[34].mxu0  ;;  %v3114_v14 = vrot.slane %v3113_v7, 4  ;;  %v1463_v45 = vld [vmem:[#allocation2 + $0x70] ss:$2 sm:$0xff]  ;;  %v2185_v58 = vrot.slane %v2184_v33, 4 }
 0x131   : > { %1297 = vst.msk [vmem:[#allocation2 + $0x88] sm:$0xff] %vm331_vm4, %v956_v10  ;;  %v11327_v12 = vpop.f32.mrb[35].mxu0  ;;  %v1467_v46 = vld [vmem:[#allocation2 + $0x71] ss:$2 sm:$0xff]  ;;  %v3123_v61 = vor.u32 %v3122_v43, %v13024_v15 }
 0x132   : > { %v1450_v16 = vpack.c.bf16 %v1449_v9, %v1448_v8  ;;  %2712 = vrot.lane.b32.xlu1 %v2633_v13, %s12636_s28  ;;  %v3119_v17 = vsel %vm12848_vm10, %v3114_v14, %v13024_v15  ;;  %v1478_v62 = vmax.f32 %v1463_v45, %v1467_v46 }
 0x133   : > { %11433 = vmatmul.mubr.msk.bf16.gmra.mrb[140].mxu0 %vm700_vm3, %v12219_v6  ;;  %3413 = vst.msk [vmem:[#allocation4 + $0x4] sm:$0xf] %vm2030_vm12, %v3119_v17  ;;  %v12222_v17 = vld [vmem:[%s12749_s27 + $0x130] sm:$0xff]   ;;  %v3124_v25 = vrot.slane %v3123_v61, 4 }
 0x134   : > { %v1452_v44 = vshrl.u32 %v1450_v16, 16  ;;  %11436 = vmatprep.mubr.msk.bf16.mxu0 %vm12634_vm2, %v12632_v0  ;;  %v1455_v48 = vshll.u32 %v1450_v16, 16 }
 0x136   : > { %v1454_v11 = vrot.slane %v1452_v44, 7  ;;  %v961_v49 = vpop.f32.mrb[36].mxu0 }
 0x137   : > { %1298 = vst.msk [vmem:[#allocation2 + $0x90] sm:$0xff] %vm331_vm4, %v961_v49  ;;  %v11330_v18 = vpop.f32.mrb[37].mxu0 }
 0x138   : > { %v1457_v22 = vor.u32 %v1455_v48, %v1454_v11  ;;  %v964_v23 = vpop.f32.mrb[38].mxu0  ;;  %v1465_v52 = vld [vmem:[#allocation2 + $0x80] ss:$2 sm:$0x3f] }
 0x139   : > { %1299 = vst.msk [vmem:[#allocation2 + $0x98] sm:$0xff] %vm331_vm4, %v964_v23  ;;  %v11331_v26 = vpop.f32.mrb[39].mxu0  ;;  %v1469_v63 = vld [vmem:[#allocation2 + $0x81] ss:$2 sm:$0x3f] }
 0x13a   : > { %v1460_v27 = vsel %vm12949_vm14, %v1457_v22, %v1459_v21  ;;  %v1479_v10 = vmax.f32 %v1465_v52, %v1469_v63  ;;  %v12238_v52 = vld [vmem:[%s15643_s3] sm:$0xff]   ;;  %v1497_v63 = vld [vmem:[#allocation3 + $0x18] sm:$0xff] }
 0x13b   : > { %11437 = vmatmul.mubr.msk.bf16.gmra.mrb[144].mxu0 %vm700_vm3, %v12220_v19  ;;  %1461 = vst [vmem:[#allocation3 + $0x10] sm:$0xff] %v1460_v27  ;;  %v13042_v29 = vcombine.high %v1460_v27, %v1460_v27  ;;  %v10034_v30 = vcombine.low %v1460_v27, %v1460_v27 }
 0x13c   : > { %11440 = vmatprep.mubr.msk.bf16.mxu0 %vm12634_vm2, %v12632_v0 }
 0x13d   : > { %3806 = vrot.lane.b32.xlu1 %v13042_v29, %s12636_s28  ;;  %3804 = vrot.lane.b32.xlu0 %v10034_v30, %s12636_s28  ;;  %v13049_v31 = vrot.slane %v10034_v30, 5  ;;  %v4001_v40 = vshrl.u32 %v10034_v30, 16  ;;  %v4004_v41 = vshll.u32 %v10034_v30, 16  ;;  %v3533_v57 = vrot.slane %v13042_v29, 5 }
 0x13e   : > { %v969_v36 = vpop.f32.mrb[40].mxu0  ;;  %v4010_v7 = vshll.u32 %v13042_v29, 16 }
 0x13f   : > { %1300 = vst.msk [vmem:[#allocation2 + $0xa0] sm:$0xff] %vm331_vm4, %v969_v36  ;;  %v11334_v47 = vpop.f32.mrb[41].mxu0  ;;  %v3532_v51 = vrot.slane %v13049_v31, 4  ;;  %v4003_v53 = vrot.slane %v4001_v40, 4  ;;  %v13058_v4 = vrot.slane %v4004_v41, 5  ;;  %v3531_v1 = vsel %vm12836_vm7, %v3529_v39, %v13049_v31 }
 0x140   : > { %v972_v50 = vpop.f32.mrb[42].mxu0  ;;  %v1471_v20 = vld [vmem:[#allocation2 + $0x8c] ss:$2 sm:$0xff]  ;;  %v1475_v54 = vld [vmem:[#allocation2 + $0x8d] ss:$2 sm:$0xff]  ;;  %v2639_v14 = vsel %vm12836_vm7, %v2637_v32, %v13049_v31  ;;  %v13093_v23 = vrot.slane %v4010_v7, 5 }
 0x141   : > { %1301 = vst.msk [vmem:[#allocation2 + $0xa8] sm:$0xff] %vm331_vm4, %v972_v50  ;;  %v11335_v55 = vpop.f32.mrb[43].mxu0  ;;  %2914 = vrot.lane.b32.xlu1 %v13042_v29, %s12638_s17  ;;  %2912 = vrot.lane.b32.xlu0 %v10034_v30, %s12638_s17  ;;  %v1480_v56 = vmax.f32 %v1471_v20, %v1475_v54  ;;  %v3534_v2 = vsel %vm12836_vm7, %v3532_v51, %v3533_v57  ;;  %v12237_v20 = vld [vmem:[%s15643_s3 + $0x40] sm:$0xff]  }
 0x142   : > { %v3023_v59 = vld [vmem:[#allocation3 + $0x10] sm:$0xff]  ;;  %v4007_v3 = vor.u32 %v13058_v4, %v4003_v53  ;;  %v2190_v32 = vsel %vm12848_vm10, %v2185_v58, %v13058_v4  ;;  %v12223_v4 = vld [vmem:[%s12749_s27 + $0x138] sm:$0xff]   ;;  %10920 = vmatprep.subr.bf16.mxu1 %v12237_v20 }
 0x143   : > { %11441 = vmatmul.mubr.msk.bf16.gmra.mrb[148].mxu0 %vm700_vm3, %v12221_v37  ;;  %v4391_v34 = vld [vmem:[#allocation3 + $0x10] sm:$0xfe]  ;;  %v1482_v6 = vmax.f32 %v1478_v62, %v1480_v56  ;;  %v9979_v8 = vcombine.low %v3023_v59, %v3023_v59  ;;  %v13080_v9 = vcombine.high %v3023_v59, %v3023_v59  ;;  %10921 = vmatpush3.bf16.msra.mxu1 %v12238_v52  ;;  %v12239_v62 = vld [vmem:[%s15643_s3 + $0x48] sm:$0xff]  }
 0x144   : > { %11444 = vmatprep.mubr.msk.bf16.mxu0 %vm12634_vm2, %v12632_v0  ;;  %v10090_v44 = vcombine.low %v4391_v34, %v4391_v34  ;;  %v10091_v5 = vcombine.high %v4391_v34, %v4391_v34  ;;  %v4008_v48 = vrot.slane %v4007_v3, 4  ;;  %10922 = vmatprep.subr.bf16.mxu1 %v12239_v62  ;;  %v4014_v3 = vshrl.u32 %v13042_v29, 16  ;;  %v12245_v29 = vld [vmem:[%s15643_s3 + $0x18] sm:$0xff]  }
 0x145   : > { %3610 = vrot.lane.b32.xlu1 %v3531_v1, %s12637_s29  ;;  %3612 = vrot.lane.b32.xlu0 %v3534_v2, %s12637_s29  ;;  %2035 = vst.msk [vmem:[#allocation4 + $0x30] sm:$0xf] %vm2030_vm12, %v9979_v8  ;;  %2036 = vst.msk [vmem:[#allocation4 + $0x3c] sm:$0xf] %vm2030_vm12, %v13080_v9  ;;  %v3126_v49 = vshll.u32 %v9979_v8, 16  ;;  %v3130_v18 = vshrl.u32 %v9979_v8, 16  ;;  %v1484_v19 = vadd.f32 %v12929_v24, %v1482_v6 }
 0x146   : > { %v1473_v12 = vld [vmem:[#allocation2 + $0x9c] ss:$2 sm:$0x3f]  ;;  %v1477_v13 = vld [vmem:[#allocation2 + $0x9d] ss:$2 sm:$0x3f]  ;;  %v4013_v37 = vsel %vm12848_vm10, %v4008_v48, %v13093_v23 }
 0x147   : > { %v1481_v15 = vmax.f32 %v1473_v12, %v1477_v13  ;;  %v977_v16 = vpop.f32.mrb[44].mxu0  ;;  %v3128_v27 = vrot.slane %v3126_v49, 5  ;;  %v3132_v28 = vrot.slane %v3130_v18, 4  ;;  %v3136_v30 = vshll.u32 %v13080_v9, 16  ;;  %v12240_v1 = vld [vmem:[%s15643_s3 + $0x8] sm:$0xff]   ;;  %v12224_v6 = vld [vmem:[%s12749_s27 + $0x140] sm:$0xff]  }
 0x148   : > { %1302 = vst.msk [vmem:[#allocation2 + $0xb0] sm:$0xff] %vm331_vm4, %v977_v16  ;;  %v11338_v11 = vpop.f32.mrb[45].mxu0  ;;  %v10118_v33 = vrot.slane %v10090_v44, 9  ;;  %v13102_v36 = vrot.slane %v10091_v5, 5  ;;  %v1486_v41 = vmax.f32 %v1484_v19, 0.0  ;;  %10923 = vmatpush3.bf16.msra.mxu1 %v12240_v1  ;;  %v12241_v8 = vld [vmem:[%s15643_s3 + $0x50] sm:$0xff]  }
 0x149   : > { %v1483_v21 = vmax.f32 %v1479_v10, %v1481_v15  ;;  %v980_v22 = vpop.f32.mrb[46].mxu0  ;;  %2718 = vrot.lane.b32.xlu0 %v3534_v2, %s12636_s28  ;;  %2716 = vrot.lane.b32.xlu1 %v2639_v14, %s12636_s28  ;;  %v3129_v39 = vsel %vm12848_vm10, %v3124_v25, %v3128_v27  ;;  %v3133_v40 = vor.u32 %v3132_v28, %v3128_v27  ;;  %v13117_v50 = vrot.slane %v3136_v30, 5  ;;  %v12242_v15 = vld [vmem:[%s15643_s3 + $0x10] sm:$0xff]   ;;  %v12243_v18 = vld [vmem:[%s15643_s3 + $0x58] sm:$0xff]  }
 0x14a   : > { %1303 = vst.msk [vmem:[#allocation2 + $0xb8] sm:$0xff] %vm331_vm4, %v980_v22  ;;  %v11339_v26 = vpop.f32.mrb[47].mxu0  ;;  %v4478_v45 = vsel %vm12836_vm7, %v10118_v33, %v13102_v36  ;;  %v3140_v10 = vshrl.u32 %v13080_v9, 16  ;;  %10924 = vmatprep.subr.bf16.mxu1 %v12241_v8  ;;  %v3535_v9 = vrot.slane %v3533_v57, 4  ;;  %v13163_v5 = vrot.slane %v4014_v3, 4  ;;  %v12225_v22 = vld [vmem:[%s12749_s27 + $0x148] sm:$0xff]  }
 0x14b   : > { %v1485_v31 = vadd.f32 %v12929_v24, %v1483_v21  ;;  %11445 = vmatmul.mubr.msk.bf16.gmra.mrb[152].mxu0 %vm700_vm3, %v12222_v17  ;;  %3414 = vst.msk [vmem:[#allocation4 + $0x10] sm:$0xf] %vm2030_vm12, %v3129_v39  ;;  %v3134_v47 = vrot.slane %v3133_v40, 4  ;;  %4586 = vst.msk [vmem:[#allocation4 + $0x8] sm:$0xf] %vm2030_vm12, %v4478_v45  ;;  %v12248_v1 = vld [vmem:[%s15643_s3 + $0x68] sm:$0xff]  }
 0x14c   : > { %11448 = vmatprep.mubr.msk.bf16.mxu0 %vm12634_vm2, %v12632_v0  ;;  %10925 = vmatpush3.bf16.msra.mxu1 %v12242_v15  ;;  %v3142_v19 = vrot.slane %v3140_v10, 4 }
 0x14d   : > { %v1487_v43 = vmax.f32 %v1485_v31, 0.0  ;;  %4279 = vrot.lane.b32.xlu0 %v4013_v37, %s12638_s17  ;;  %2432 = vrot.lane.b32.xlu1 %v2190_v32, %s12637_s29  ;;  %v3139_v55 = vsel %vm12848_vm10, %v3134_v47, %v13117_v50  ;;  %v4017_v31 = vor.u32 %v13163_v5, %v13093_v23  ;;  %v12246_v23 = vld [vmem:[%s15643_s3 + $0x60] sm:$0xff]  }
 0x14e   : > { %v985_v46 = vpop.f32.mrb[48].mxu0  ;;  %3415 = vst.msk [vmem:[#allocation4 + $0x1c] sm:$0xf] %vm2030_vm12, %v3139_v55  ;;  %10926 = vmatprep.subr.bf16.mxu1 %v12243_v18 }
 0x14f   : > { %v1488_v51 = vpack.c.bf16 %v1487_v43, %v1486_v41  ;;  %1304 = vst.msk [vmem:[#allocation2 + $0xc0] sm:$0xff] %vm331_vm4, %v985_v46  ;;  %v11342_v53 = vpop.f32.mrb[49].mxu0  ;;  %v1501_v11 = vld [vmem:[#allocation2 + $0xa8] ss:$2 sm:$0xff]  ;;  %v1505_v21 = vld [vmem:[#allocation2 + $0xa9] ss:$2 sm:$0xff]  ;;  %v3143_v43 = vor.u32 %v3142_v19, %v13117_v50 }
 0x150   : > { %v988_v54 = vpop.f32.mrb[50].mxu0  ;;  %v1516_v32 = vmax.f32 %v1501_v11, %v1505_v21  ;;  %10927 = vmatpush3.bf16.msra.mxu1 %v12245_v29 }
 0x151   : > { %v1490_v56 = vshrl.u32 %v1488_v51, 16  ;;  %1305 = vst.msk [vmem:[#allocation2 + $0xc8] sm:$0xff] %vm331_vm4, %v988_v54  ;;  %v11343_v58 = vpop.f32.mrb[51].mxu0  ;;  %2434 = vrot.lane.b32.xlu0 %v4013_v37, %s12637_s29  ;;  %v1493_v61 = vshll.u32 %v1488_v51, 16  ;;  %10928 = vmatprep.subr.bf16.mxu1 %v12246_v23 }
 0x153   : > { %v1492_v59 = vrot.slane %v1490_v56, 7  ;;  %11449 = vmatmul.mubr.msk.bf16.gmra.mrb[156].mxu0 %vm700_vm3, %v12223_v4 }
 0x154   : > { %11452 = vmatprep.mubr.msk.bf16.mxu0 %vm12634_vm2, %v12632_v0 }
 0x155   : > { %v1495_v2 = vor.u32 %v1493_v61, %v1492_v59  ;;  %v12247_v59 = vld [vmem:[%s15643_s3 + $0x20] sm:$0xff]  }
 0x156   : > { %v993_v34 = vpop.f32.mrb[52].mxu0  ;;  %v1503_v57 = vld [vmem:[#allocation2 + $0xb8] ss:$2 sm:$0x3f]  ;;  %10929 = vmatpush3.bf16.msra.mxu1 %v12247_v59 }
 0x157   : > { %v1498_v7 = vsel %vm12949_vm14, %v1495_v2, %v1497_v63  ;;  %1306 = vst.msk [vmem:[#allocation2 + $0xd0] sm:$0xff] %vm331_vm4, %v993_v34  ;;  %v11346_v12 = vpop.f32.mrb[53].mxu0  ;;  %v1507_v28 = vld [vmem:[#allocation2 + $0xb9] ss:$2 sm:$0x3f]  ;;  %v3144_v34 = vrot.slane %v3143_v43, 4  ;;  %10930 = vmatprep.subr.bf16.mxu1 %v12248_v1 }
 0x158   : > { %1499 = vst [vmem:[#allocation3 + $0x18] sm:$0xff] %v1498_v7  ;;  %v13152_v13 = vcombine.high %v1498_v7, %v1498_v7  ;;  %v10036_v14 = vcombine.low %v1498_v7, %v1498_v7  ;;  %v996_v16 = vpop.f32.mrb[54].mxu0  ;;  %v1517_v55 = vmax.f32 %v1503_v57, %v1507_v28 }
 0x159   : > { %1307 = vst.msk [vmem:[#allocation2 + $0xd8] sm:$0xff] %vm331_vm4, %v996_v16  ;;  %v11347_v17 = vpop.f32.mrb[55].mxu0  ;;  %v4018_v16 = vrot.slane %v4017_v31, 4 }
 0x15a   : > { %3810 = vrot.lane.b32.xlu1 %v13152_v13, %s12636_s28  ;;  %3808 = vrot.lane.b32.xlu0 %v10036_v14, %s12636_s28  ;;  %v3536_v44 = vrot.slane %v10036_v14, 5  ;;  %v4020_v48 = vshll.u32 %v10036_v14, 16  ;;  %v4024_v49 = vshrl.u32 %v10036_v14, 16  ;;  %v3539_v41 = vrot.slane %v13152_v13, 5 }
 0x15b   : > { %11453 = vmatmul.mubr.msk.bf16.gmra.mrb[160].mxu0 %vm700_vm3, %v12224_v6  ;;  %v4030_v61 = vshll.u32 %v13152_v13, 16  ;;  %v12249_v6 = vld [vmem:[%s15643_s3 + $0x28] sm:$0xff]  }
 0x15c   : > { %11456 = vmatprep.mubr.msk.bf16.mxu0 %vm12634_vm2, %v12632_v0  ;;  %v3538_v25 = vrot.slane %v3536_v44, 4  ;;  %v13175_v26 = vrot.slane %v4020_v48, 5  ;;  %v4026_v27 = vrot.slane %v4024_v49, 4  ;;  %v3537_v40 = vsel %vm12836_vm7, %v3535_v9, %v3536_v44  ;;  %v12226_v44 = vld [vmem:[%s12749_s27 + $0x150] sm:$0xff]   ;;  %10931 = vmatpush3.bf16.msra.mxu1 %v12249_v6 }
 0x15d   : > { %v13223_v5 = vrot.slane %v4030_v61, 5  ;;  %v3541_v6 = vrot.slane %v3539_v41, 4 }
 0x15e   : > { %v1001_v30 = vpop.f32.mrb[56].mxu0  ;;  %2918 = vrot.lane.b32.xlu1 %v13152_v13, %s12638_s17  ;;  %2916 = vrot.lane.b32.xlu0 %v10036_v14, %s12638_s17  ;;  %v1509_v33 = vld [vmem:[#allocation2 + $0xc4] ss:$2 sm:$0xff]  ;;  %v1513_v37 = vld [vmem:[#allocation2 + $0xc5] ss:$2 sm:$0xff]  ;;  %v3540_v4 = vsel %vm12836_vm7, %v3538_v25, %v3539_v41  ;;  %v4027_v20 = vor.u32 %v4026_v27, %v13175_v26  ;;  %v4023_v21 = vsel %vm12848_vm10, %v4018_v16, %v13175_v26 }
 0x15f   : > { %1308 = vst.msk [vmem:[#allocation2 + $0xe0] sm:$0xff] %vm331_vm4, %v1001_v30  ;;  %v11350_v39 = vpop.f32.mrb[57].mxu0  ;;  %v1518_v45 = vmax.f32 %v1509_v33, %v1513_v37  ;;  %v3024_v47 = vld [vmem:[#allocation3 + $0x18] sm:$0xff]  ;;  %v12251_v27 = vld [vmem:[%s15643_s3 + $0x30] sm:$0xff]   ;;  %v4479_v33 = vrot.slane %v13102_v36, 4 }
 0x160   : > { %v1004_v46 = vpop.f32.mrb[58].mxu0  ;;  %v1511_v51 = vld [vmem:[#allocation2 + $0xd4] ss:$2 sm:$0x3f]  ;;  %v9981_v50 = vcombine.low %v3024_v47, %v3024_v47  ;;  %v13196_v54 = vcombine.high %v3024_v47, %v3024_v47  ;;  %v4028_v7 = vrot.slane %v4027_v20, 4  ;;  %v4392_v12 = vld [vmem:[#allocation3 + $0x18] sm:$0xff] }
 0x161   : > { %v1515_v53 = vld [vmem:[#allocation2 + $0xd5] ss:$2 sm:$0x3f]  ;;  %1309 = vst.msk [vmem:[#allocation2 + $0xe8] sm:$0xff] %vm331_vm4, %v1004_v46  ;;  %v1520_v52 = vmax.f32 %v1516_v32, %v1518_v45  ;;  %v11351_v58 = vpop.f32.mrb[59].mxu0  ;;  %v10092_v29 = vcombine.low %v4392_v12, %v4392_v12  ;;  %v10093_v28 = vcombine.high %v4392_v12, %v4392_v12  ;;  %v12228_v12 = vld [vmem:[%s12749_s27 + $0x160] sm:$0xff]  }
 0x162   : > { %v1519_v56 = vmax.f32 %v1511_v51, %v1515_v53  ;;  %3614 = vrot.lane.b32.xlu1 %v3537_v40, %s12637_s29  ;;  %3616 = vrot.lane.b32.xlu0 %v3540_v4, %s12637_s29  ;;  %v3146_v62 = vshll.u32 %v9981_v50, 16  ;;  %v3150_v63 = vshrl.u32 %v9981_v50, 16  ;;  %2037 = vst.msk [vmem:[#allocation4 + $0x48] sm:$0xf] %vm2030_vm12, %v9981_v50  ;;  %2038 = vst.msk [vmem:[#allocation4 + $0x54] sm:$0xf] %vm2030_vm12, %v13196_v54 }
 0x163   : > { %11457 = vmatmul.mubr.msk.bf16.gmra.mrb[164].mxu0 %vm700_vm3, %v12225_v22  ;;  %v1522_v2 = vadd.f32 %v12929_v24, %v1520_v52  ;;  %v3156_v17 = vshll.u32 %v13196_v54, 16  ;;  %v4033_v22 = vsel %vm12848_vm10, %v4028_v7, %v13223_v5  ;;  %v4480_v31 = vrot.slane %v10092_v29, 5  ;;  %v12252_v32 = vld [vmem:[%s15643_s3 + $0x78] sm:$0xff]   ;;  %v1535_v20 = vld [vmem:[#allocation3 + $0x20] sm:$0xff] }
 0x164   : > { %v1521_v3 = vmax.f32 %v1517_v55, %v1519_v56  ;;  %11460 = vmatprep.mubr.msk.bf16.mxu0 %vm12634_vm2, %v12632_v0  ;;  %v3148_v8 = vrot.slane %v3146_v62, 5  ;;  %v3152_v10 = vrot.slane %v3150_v63, 4  ;;  %v13261_v45 = vrot.slane %v10093_v28, 5 }
 0x165   : > { %v1524_v49 = vmax.f32 %v1522_v2, 0.0  ;;  %v13243_v26 = vrot.slane %v3156_v17, 5  ;;  %v4481_v36 = vsel %vm12836_vm7, %v4479_v33, %v4480_v31  ;;  %v4482_v43 = vrot.slane %v4480_v31, 4 }
 0x166   : > { %v1523_v14 = vadd.f32 %v12929_v24, %v1521_v3  ;;  %v1009_v15 = vpop.f32.mrb[60].mxu0  ;;  %2722 = vrot.lane.b32.xlu0 %v3540_v4, %s12636_s28  ;;  %2720 = vrot.lane.b32.xlu1 %v3537_v40, %s12636_s28  ;;  %v3149_v11 = vsel %vm12848_vm10, %v3144_v34, %v3148_v8  ;;  %v3153_v48 = vor.u32 %v3152_v10, %v3148_v8  ;;  %v12250_v24 = vld [vmem:[%s15643_s3 + $0x70] sm:$0xff]   ;;  %v12253_v40 = vld [vmem:[%s15643_s3 + $0x38] sm:$0xff]   ;;  %v4034_v51 = vshrl.u32 %v13152_v13, 16 }
 0x167   : > { %1310 = vst.msk [vmem:[#allocation2 + $0xf0] sm:$0xff] %vm331_vm4, %v1009_v15  ;;  %v11354_v9 = vpop.f32.mrb[61].mxu0  ;;  %10932 = vmatprep.subr.bf16.mxu1 %v12250_v24  ;;  %v12227_v4 = vld [vmem:[%s12749_s27 + $0x158] sm:$0xff]   ;;  %v4484_v50 = vsel %vm12836_vm7, %v4482_v43, %v13261_v45  ;;  %v3160_v63 = vshrl.u32 %v13196_v54, 16 }
 0x168   : > { %v1525_v18 = vmax.f32 %v1523_v14, 0.0  ;;  %v1012_v19 = vpop.f32.mrb[62].mxu0  ;;  %3416 = vst.msk [vmem:[#allocation4 + $0x28] sm:$0xf] %vm2030_vm12, %v3149_v11  ;;  %v3154_v25 = vrot.slane %v3153_v48, 4  ;;  %10933 = vmatpush3.bf16.msra.mxu1 %v12251_v27  ;;  %v4036_v59 = vrot.slane %v4034_v51, 4 }
 0x169   : > { %1311 = vst.msk [vmem:[#allocation2 + $0xf8] sm:$0xff] %vm331_vm4, %v1012_v19  ;;  %v11355_v57 = vpop.f32.mrb[63].mxu0  ;;  %10934 = vmatprep.subr.bf16.mxu1 %v12252_v32  ;;  %v1539_v1 = vld [vmem:[#allocation2 + $0xe0] ss:$2 sm:$0xff]  ;;  %v1543_v3 = vld [vmem:[#allocation2 + $0xe1] ss:$2 sm:$0xff] }
 0x16a   : > { %v1526_v30 = vpack.c.bf16 %v1525_v18, %v1524_v49  ;;  %4283 = vrot.lane.b32.xlu0 %v4033_v22, %s12638_s17  ;;  %4281 = vrot.lane.b32.xlu1 %v4023_v21, %s12638_s17  ;;  %v3159_v39 = vsel %vm12848_vm10, %v3154_v25, %v13243_v26  ;;  %4587 = vst.msk [vmem:[#allocation4 + $0x14] sm:$0xf] %vm2030_vm12, %v4481_v36  ;;  %4588 = vst.msk [vmem:[#allocation4 + $0x20] sm:$0xf] %vm2030_vm12, %v4484_v50  ;;  %v3162_v14 = vrot.slane %v3160_v63, 4  ;;  %v12229_v36 = vld [vmem:[%s12749_s27 + $0x168] sm:$0xff]  }
 0x16b   : > { %11461 = vmatmul.mubr.msk.bf16.gmra.mrb[168].mxu0 %vm700_vm3, %v12226_v44  ;;  %3417 = vst.msk [vmem:[#allocation4 + $0x34] sm:$0xf] %vm2030_vm12, %v3159_v39  ;;  %v4037_v10 = vor.u32 %v4036_v59, %v13223_v5  ;;  %v1554_v44 = vmax.f32 %v1539_v1, %v1543_v3  ;;  %v4485_v19 = vrot.slane %v13261_v45, 4 }
 0x16c   : > { %v1528_v37 = vshrl.u32 %v1526_v30, 16  ;;  %11464 = vmatprep.mubr.msk.bf16.mxu0 %vm12634_vm2, %v12632_v0  ;;  %v1531_v47 = vshll.u32 %v1526_v30, 16  ;;  %10935 = vmatpush3.bf16.msra.mxu1 %v12253_v40 }
 0x16d   : > { %v4038_v49 = vrot.slane %v4037_v10, 4 }
 0x16e   : > { %v1530_v46 = vrot.slane %v1528_v37, 7  ;;  %v1017_v23 = vpop.f32.mrb[64].mxu0  ;;  %2438 = vrot.lane.b32.xlu0 %v4033_v22, %s12637_s29  ;;  %2436 = vrot.lane.b32.xlu1 %v4023_v21, %s12637_s29  ;;  %v3163_v22 = vor.u32 %v3162_v14, %v13243_v26 }
 0x16f   : > { %1312 = vst.msk [vmem:[#allocation2 + $0x100] sm:$0xff] %vm331_vm4, %v1017_v23  ;;  %v11358_v53 = vpop.f32.mrb[65].mxu0 }
 0x170   : > { %v1533_v55 = vor.u32 %v1531_v47, %v1530_v46  ;;  %v1020_v52 = vpop.f32.mrb[66].mxu0  ;;  %v1541_v11 = vld [vmem:[#allocation2 + $0xf0] ss:$2 sm:$0x3f]  ;;  %v13318_v46 = vld [vmem:[%s15642_s2] ss:$0 sm:$0xff] }
 0x171   : > { %1313 = vst.msk [vmem:[#allocation2 + $0x108] sm:$0xff] %vm331_vm4, %v1020_v52  ;;  %v11359_v56 = vpop.f32.mrb[67].mxu0  ;;  %v1545_v21 = vld [vmem:[#allocation2 + $0xf1] ss:$2 sm:$0x3f] }
 0x172   : > { %v1536_v58 = vsel %vm12949_vm14, %v1533_v55, %v1535_v20  ;;  %v1555_v26 = vmax.f32 %v1541_v11, %v1545_v21  ;;  %v3164_v55 = vrot.slane %v3163_v22, 4  ;;  %v12231_v22 = vld [vmem:[%s12749_s27 + $0x178] sm:$0xff]  }
 0x173   : > { %11465 = vmatmul.mubr.msk.bf16.gmra.mrb[172].mxu0 %vm700_vm3, %v12227_v4  ;;  %1537 = vst [vmem:[#allocation3 + $0x20] sm:$0xff] %v1536_v58  ;;  %v13277_v61 = vcombine.high %v1536_v58, %v1536_v58  ;;  %v10038_v62 = vcombine.low %v1536_v58, %v1536_v58 }
 0x174   : > { %11468 = vmatprep.mubr.msk.bf16.mxu0 %vm12634_vm2, %v12632_v0 }
 0x175   : > { %3814 = vrot.lane.b32.xlu1 %v13277_v61, %s12636_s28  ;;  %3812 = vrot.lane.b32.xlu0 %v10038_v62, %s12636_s28  ;;  %v3542_v2 = vrot.slane %v10038_v62, 5  ;;  %v4040_v7 = vshll.u32 %v10038_v62, 16  ;;  %v4044_v8 = vshrl.u32 %v10038_v62, 16  ;;  %v3545_v5 = vrot.slane %v13277_v61, 5 }
 0x176   : > { %v1025_v34 = vpop.f32.mrb[68].mxu0  ;;  %v4050_v30 = vshll.u32 %v13277_v61, 16 }
 0x177   : > { %1314 = vst.msk [vmem:[#allocation2 + $0x110] sm:$0xff] %vm331_vm4, %v1025_v34  ;;  %v11362_v54 = vpop.f32.mrb[69].mxu0  ;;  %v3544_v16 = vrot.slane %v3542_v2, 4  ;;  %v4042_v17 = vrot.slane %v4040_v7, 5  ;;  %v4046_v9 = vrot.slane %v4044_v8, 4  ;;  %v3543_v29 = vsel %vm12836_vm7, %v3541_v6, %v3542_v2 }
 0x178   : > { %v1028_v15 = vpop.f32.mrb[70].mxu0  ;;  %v1547_v48 = vld [vmem:[#allocation2 + $0xfc] ss:$2 sm:$0xff]  ;;  %v1551_v24 = vld [vmem:[#allocation2 + $0xfd] ss:$2 sm:$0xff]  ;;  %v13324_v50 = vrot.slane %v4050_v30, 5 }
 0x179   : > { %1315 = vst.msk [vmem:[#allocation2 + $0x118] sm:$0xff] %vm331_vm4, %v1028_v15  ;;  %v11363_v13 = vpop.f32.mrb[71].mxu0  ;;  %2922 = vrot.lane.b32.xlu1 %v13277_v61, %s12638_s17  ;;  %2920 = vrot.lane.b32.xlu0 %v10038_v62, %s12638_s17  ;;  %v1556_v41 = vmax.f32 %v1547_v48, %v1551_v24  ;;  %v4047_v57 = vor.u32 %v4046_v9, %v4042_v17 }
 0x17a   : > { %v3025_v18 = vld [vmem:[#allocation3 + $0x20] sm:$0xff]  ;;  %v3546_v27 = vsel %vm12836_vm7, %v3544_v16, %v3545_v5  ;;  %v4043_v2 = vsel %vm12848_vm10, %v4038_v49, %v4042_v17 }
 0x17b   : > { %11469 = vmatmul.mubr.msk.bf16.gmra.mrb[176].mxu0 %vm700_vm3, %v12228_v12  ;;  %v1558_v25 = vmax.f32 %v1554_v44, %v1556_v41  ;;  %v4393_v28 = vld [vmem:[#allocation3 + $0x20] sm:$0xff]  ;;  %v9983_v31 = vcombine.low %v3025_v18, %v3025_v18  ;;  %v13309_v32 = vcombine.high %v3025_v18, %v3025_v18  ;;  %v4048_v43 = vrot.slane %v4047_v57, 4 }
 0x17c   : > { %11472 = vmatprep.mubr.msk.bf16.mxu0 %vm12634_vm2, %v12632_v0  ;;  %v10094_v45 = vcombine.low %v4393_v28, %v4393_v28  ;;  %v10095_v52 = vcombine.high %v4393_v28, %v4393_v28  ;;  %v12230_v44 = vld [vmem:[%s12749_s27 + $0x170] sm:$0xff]  }
 0x17d   : > { %3618 = vrot.lane.b32.xlu1 %v3543_v29, %s12637_s29  ;;  %3620 = vrot.lane.b32.xlu0 %v3546_v27, %s12637_s29  ;;  %2039 = vst.msk [vmem:[#allocation4 + $0x60] sm:$0xf] %vm2030_vm12, %v9983_v31  ;;  %2040 = vst.msk [vmem:[#allocation4 + $0x6c] sm:$0xf] %vm2030_vm12, %v13309_v32  ;;  %v1560_v47 = vadd.f32 %v13318_v46, %v1558_v25  ;;  %v3166_v51 = vshll.u32 %v9983_v31, 16  ;;  %v3170_v53 = vshrl.u32 %v9983_v31, 16 }
 0x17e   : > { %v1549_v33 = vld [vmem:[#allocation2 + $0x10c] ss:$2 sm:$0x3f]  ;;  %v1553_v37 = vld [vmem:[#allocation2 + $0x10d] ss:$2 sm:$0x3f]  ;;  %v4053_v1 = vsel %vm12848_vm10, %v4048_v43, %v13324_v50 }
 0x17f   : > { %v1557_v39 = vmax.f32 %v1549_v33, %v1553_v37  ;;  %v1033_v40 = vpop.f32.mrb[72].mxu0  ;;  %v3168_v58 = vrot.slane %v3166_v51, 5  ;;  %v3172_v59 = vrot.slane %v3170_v53, 4  ;;  %v3176_v62 = vshll.u32 %v13309_v32, 16  ;;  %v12233_v53 = vld [vmem:[%s12749_s27 + $0x180] sm:$0xff]   ;;  %s323_s27 = sand.u32 1, %s12622_s10  }
 0x180   : > { %1316 = vst.msk [vmem:[#allocation2 + $0x120] sm:$0xff] %vm331_vm4, %v1033_v40  ;;  %v11366_v23 = vpop.f32.mrb[73].mxu0  ;;  %v4486_v3 = vrot.slane %v10094_v45, 5  ;;  %v1562_v34 = vmax.f32 %v1560_v47, 0.0  ;;  %v13344_v12 = vrot.slane %v10095_v52, 5  ;;  %s324_s26 = scalar_lea.vmem [#allocation7], %s323_s27 }
 0x181   : > { %v1559_v4 = vmax.f32 %v1555_v26, %v1557_v39  ;;  %v1036_v20 = vpop.f32.mrb[74].mxu0  ;;  %2726 = vrot.lane.b32.xlu0 %v3546_v27, %s12636_s28  ;;  %2724 = vrot.lane.b32.xlu1 %v3543_v29, %s12636_s28  ;;  %v3169_v6 = vsel %vm12848_vm10, %v3164_v55, %v3168_v58  ;;  %v3173_v7 = vor.u32 %v3172_v59, %v3168_v58  ;;  %v13346_v16 = vrot.slane %v3176_v62, 5  ;;  %s9704_s14 = sshll.u32 %s324_s26, 4  ;;  %s9692_s13 = scalar_lea.sflag [#allocation8], %s323_s27  ;;  %s15600_s14 = int_to_ptr.vmem [resolvable:$true] %s9704_s14 }
 0x182   : > { %1317 = vst.msk [vmem:[#allocation2 + $0x128] sm:$0xff] %vm331_vm4, %v1036_v20  ;;  %v11367_v56 = vpop.f32.mrb[75].mxu0  ;;  %v4487_v10 = vsel %vm12836_vm7, %v4485_v19, %v4486_v3  ;;  %v4488_v54 = vrot.slane %v4486_v3, 4  ;;  %v1573_v19 = vld [vmem:[#allocation3 + $0x28] sm:$0xff]  ;;  %v4054_v29 = vshrl.u32 %v13277_v61, 16  ;;  %v3180_v27 = vshrl.u32 %v13309_v32, 16 }
 0x183   : > { %v1561_v63 = vadd.f32 %v13318_v46, %v1559_v4  ;;  %11473 = vmatmul.mubr.msk.bf16.gmra.mrb[180].mxu0 %vm700_vm3, %v12229_v36  ;;  %3418 = vst.msk [vmem:[#allocation4 + $0x40] sm:$0xf] %vm2030_vm12, %v3169_v6  ;;  %v3174_v15 = vrot.slane %v3173_v7, 4  ;;  %4589 = vst.msk [vmem:[#allocation4 + $0x2c] sm:$0xf] %vm2030_vm12, %v4487_v10  ;;  %v3547_v39 = vrot.slane %v3545_v5, 4 }
 0x184   : > { %11476 = vmatprep.mubr.msk.bf16.mxu0 %vm12634_vm2, %v12632_v0  ;;  %v4490_v11 = vsel %vm12836_vm7, %v4488_v54, %v13344_v12  ;;  %v13377_v32 = vrot.slane %v4054_v29, 4  ;;  %v3182_v43 = vrot.slane %v3180_v27, 4 }
 0x185   : > { %v1563_v8 = vmax.f32 %v1561_v63, 0.0  ;;  %4287 = vrot.lane.b32.xlu0 %v4053_v1, %s12638_s17  ;;  %4285 = vrot.lane.b32.xlu1 %v4043_v2, %s12638_s17  ;;  %v3179_v24 = vsel %vm12848_vm10, %v3174_v15, %v13346_v16  ;;  %4590 = vst.msk [vmem:[#allocation4 + $0x38] sm:$0xf] %vm2030_vm12, %v4490_v11 }
 0x186   : > { %v1041_v14 = vpop.f32.mrb[76].mxu0  ;;  %3419 = vst.msk [vmem:[#allocation4 + $0x4c] sm:$0xf] %vm2030_vm12, %v3179_v24  ;;  %v4057_v5 = vor.u32 %v13377_v32, %v13324_v50 }
 0x187   : > { %v1564_v17 = vpack.c.bf16 %v1563_v8, %v1562_v34  ;;  %1318 = vst.msk [vmem:[#allocation2 + $0x130] sm:$0xff] %vm331_vm4, %v1041_v14  ;;  %v11370_v9 = vpop.f32.mrb[77].mxu0  ;;  %v1577_v45 = vld [vmem:[#allocation2 + $0x118] ss:$2 sm:$0xff]  ;;  %v1581_v47 = vld [vmem:[#allocation2 + $0x119] ss:$2 sm:$0xff] }
 0x188   : > { %v1044_v48 = vpop.f32.mrb[78].mxu0  ;;  %v1592_v56 = vmax.f32 %v1577_v45, %v1581_v47 }
 0x189   : > { %v1566_v13 = vshrl.u32 %v1564_v17, 16  ;;  %1319 = vst.msk [vmem:[#allocation2 + $0x138] sm:$0xff] %vm331_vm4, %v1044_v48  ;;  %v11371_v41 = vpop.f32.mrb[79].mxu0  ;;  %2442 = vrot.lane.b32.xlu0 %v4053_v1, %s12637_s29  ;;  %2440 = vrot.lane.b32.xlu1 %v4043_v2, %s12637_s29  ;;  %v1569_v18 = vshll.u32 %v1564_v17, 16  ;;  %v3183_v2 = vor.u32 %v3182_v43, %v13346_v16 }
 0x18b   : > { %v1568_v49 = vrot.slane %v1566_v13, 7  ;;  %11477 = vmatmul.mubr.msk.bf16.gmra.mrb[184].mxu0 %vm700_vm3, %v12230_v44  ;;  %v3184_v48 = vrot.slane %v3183_v2, 4 }
 0x18c   : > { %11480 = vmatprep.mubr.msk.bf16.mxu0 %vm12634_vm2, %v12632_v0 }
 0x18d   : > { %v1571_v21 = vor.u32 %v1569_v18, %v1568_v49 }
 0x18e   : > { %v1049_v57 = vpop.f32.mrb[80].mxu0  ;;  %v1579_v51 = vld [vmem:[#allocation2 + $0x128] ss:$2 sm:$0x3f] }
 0x18f   : > { %v1574_v25 = vsel %vm12949_vm14, %v1571_v21, %v1573_v19  ;;  %1320 = vst.msk [vmem:[#allocation2 + $0x140] sm:$0xff] %vm331_vm4, %v1049_v57  ;;  %v11374_v28 = vpop.f32.mrb[81].mxu0  ;;  %v1583_v52 = vld [vmem:[#allocation2 + $0x129] ss:$2 sm:$0x3f] }
 0x190   : > { %1575 = vst [vmem:[#allocation3 + $0x28] sm:$0xff] %v1574_v25  ;;  %v13371_v30 = vcombine.high %v1574_v25, %v1574_v25  ;;  %v10040_v31 = vcombine.low %v1574_v25, %v1574_v25  ;;  %v1052_v26 = vpop.f32.mrb[82].mxu0  ;;  %v1593_v17 = vmax.f32 %v1579_v51, %v1583_v52  ;;  %v4058_v28 = vrot.slane %v4057_v5, 4 }
 0x191   : > { %1321 = vst.msk [vmem:[#allocation2 + $0x148] sm:$0xff] %vm331_vm4, %v1052_v26  ;;  %v11375_v33 = vpop.f32.mrb[83].mxu0  ;;  %v4491_v5 = vrot.slane %v13344_v12, 4 }
 0x192   : > { %3818 = vrot.lane.b32.xlu1 %v13371_v30, %s12636_s28  ;;  %3816 = vrot.lane.b32.xlu0 %v10040_v31, %s12636_s28  ;;  %v3548_v37 = vrot.slane %v10040_v31, 5  ;;  %v4060_v40 = vshll.u32 %v10040_v31, 16  ;;  %v4064_v36 = vshrl.u32 %v10040_v31, 16  ;;  %v3551_v1 = vrot.slane %v13371_v30, 5 }
 0x193   : > { %11481 = vmatmul.mubr.msk.bf16.gmra.mrb[188].mxu0 %vm700_vm3, %v12231_v22  ;;  %v4070_v11 = vshll.u32 %v13371_v30, 16 }
 0x194   : > { %11484 = vmatprep.mubr.msk.bf16.mxu0 %vm12634_vm2, %v12632_v0  ;;  %v2909_v23 = vpop.permute.xlu0 %2908  ;;  %v3550_v4 = vrot.slane %v3548_v37, 4  ;;  %v13386_v20 = vrot.slane %v4060_v40, 5  ;;  %v4066_v55 = vrot.slane %v4064_v36, 4  ;;  %v3549_v63 = vsel %vm12836_vm7, %v3547_v39, %v3548_v37  ;;  %v2911_v19 = vpop.permute.xlu1 %2910 }
 0x195   : > { %2993 = vst.msk [vmem:[#allocation4] sm:$0xf] %vm2992_vm0, %v2909_v23  ;;  %v13422_v37 = vrot.slane %v4070_v11, 5 }
 0x196   : > { %v1057_v61 = vpop.f32.mrb[84].mxu0  ;;  %2926 = vrot.lane.b32.xlu1 %v13371_v30, %s12638_s17  ;;  %2924 = vrot.lane.b32.xlu0 %v10040_v31, %s12638_s17  ;;  %v1585_v58 = vld [vmem:[#allocation2 + $0x134] ss:$2 sm:$0xff]  ;;  %v1589_v59 = vld [vmem:[#allocation2 + $0x135] ss:$2 sm:$0xff]  ;;  %v3552_v10 = vsel %vm12836_vm7, %v3550_v4, %v3551_v1  ;;  %v4067_v54 = vor.u32 %v4066_v55, %v13386_v20  ;;  %v4063_v47 = vsel %vm12848_vm10, %v4058_v28, %v13386_v20 }
 0x197   : > { %1322 = vst.msk [vmem:[#allocation2 + $0x150] sm:$0xff] %vm331_vm4, %v1057_v61  ;;  %v11378_v62 = vpop.f32.mrb[85].mxu0  ;;  %v1594_v3 = vmax.f32 %v1585_v58, %v1589_v59  ;;  %v3026_v6 = vld [vmem:[#allocation3 + $0x28] sm:$0xff] }
 0x198   : > { %v1060_v34 = vpop.f32.mrb[86].mxu0  ;;  %v1587_v7 = vld [vmem:[#allocation2 + $0x144] ss:$2 sm:$0x3f]  ;;  %v9985_v14 = vcombine.low %v3026_v6, %v3026_v6  ;;  %v13404_v15 = vcombine.high %v3026_v6, %v3026_v6  ;;  %v4394_v41 = vld [vmem:[#allocation3 + $0x28] sm:$0xff]  ;;  %v4068_v29 = vrot.slane %v4067_v54, 4 }
 0x199   : > { %v1591_v8 = vld [vmem:[#allocation2 + $0x145] ss:$2 sm:$0x3f]  ;;  %1323 = vst.msk [vmem:[#allocation2 + $0x158] sm:$0xff] %vm331_vm4, %v1060_v34  ;;  %v2429_v50 = vpop.permute.xlu0 %2428  ;;  %v1596_v16 = vmax.f32 %v1592_v56, %v1594_v3  ;;  %v11379_v44 = vpop.f32.mrb[87].mxu0  ;;  %v10096_v26 = vcombine.low %v4394_v41, %v4394_v41  ;;  %v10097_v55 = vcombine.high %v4394_v41, %v4394_v41  ;;  %v4074_v6 = vshrl.u32 %v13371_v30, 16 }
 0x19a   : > { %v1595_v9 = vmax.f32 %v1587_v7, %v1591_v8  ;;  %2512 = vst.msk [vmem:[#allocation4 + $0xc] sm:$0xf] %vm2510_vm13, %v2429_v50  ;;  %3622 = vrot.lane.b32.xlu1 %v3549_v63, %s12637_s29  ;;  %3624 = vrot.lane.b32.xlu0 %v3552_v10, %s12637_s29  ;;  %v3186_v24 = vshll.u32 %v9985_v14, 16  ;;  %v3190_v13 = vshrl.u32 %v9985_v14, 16  ;;  %v3196_v31 = vshll.u32 %v13404_v15, 16  ;;  %v1611_v8 = vld [vmem:[#allocation3 + $0x30] sm:$0xff] }
 0x19b   : > { %11485 = vmatmul.mubr.msk.bf16.gmra.mrb[192].mxu0 %vm700_vm3, %v12233_v53  ;;  %2041 = vst.msk [vmem:[#allocation4 + $0x78] sm:$0xf] %vm2030_vm12, %v9985_v14  ;;  %2042 = vst.msk [vmem:[#allocation4 + $0x84] sm:$0xf] %vm2030_vm12, %v13404_v15  ;;  %v1598_v49 = vadd.f32 %v13318_v46, %v1596_v16  ;;  %v4073_v53 = vsel %vm12848_vm10, %v4068_v29, %v13422_v37  ;;  %v4492_v61 = vrot.slane %v10096_v26, 5  ;;  %v13449_v2 = vrot.slane %v10097_v55, 5 }
 0x19c   : > { %v1597_v18 = vmax.f32 %v1593_v17, %v1595_v9  ;;  %11708 = vmatprep.mubr.msk.bf16.mxu0 %vm12634_vm2, %v12632_v0  ;;  %v3188_v57 = vrot.slane %v3186_v24, 5  ;;  %v3192_v22 = vrot.slane %v3190_v13, 4  ;;  %v13438_v20 = vrot.slane %v3196_v31, 5 }
 0x19d   : > { %v2715_v21 = vpop.permute.xlu0 %2714  ;;  %v1600_v40 = vmax.f32 %v1598_v49, 0.0  ;;  %v4493_v62 = vsel %vm12836_vm7, %v4491_v5, %v4492_v61  ;;  %v4076_v16 = vrot.slane %v4074_v6, 4  ;;  %v3200_v11 = vshrl.u32 %v13404_v15, 16 }
 0x19e   : > { %v1599_v25 = vadd.f32 %v13318_v46, %v1597_v18  ;;  %v1065_v27 = vpop.f32.mrb[88].mxu0  ;;  %2730 = vrot.lane.b32.xlu0 %v3552_v10, %s12636_s28  ;;  %2728 = vrot.lane.b32.xlu1 %v3549_v63, %s12636_s28  ;;  %v3189_v32 = vsel %vm12848_vm10, %v3184_v48, %v3188_v57  ;;  %v3193_v39 = vor.u32 %v3192_v22, %v3188_v57  ;;  %v4494_v63 = vrot.slane %v4492_v61, 4 }
 0x19f   : > { %1324 = vst.msk [vmem:[#allocation2 + $0x160] sm:$0xff] %vm331_vm4, %v1065_v27  ;;  %v11382_v33 = vpop.f32.mrb[89].mxu0  ;;  %v3553_v49 = vrot.slane %v3551_v1, 4  ;;  %v3202_v57 = vrot.slane %v3200_v11, 4  ;;  %vm2538_vm3 = vcmask 518400  }
 0x1a0   : > { %v1601_v36 = vmax.f32 %v1599_v25, 0.0  ;;  %v3609_v43 = vpop.permute.xlu1 %3608  ;;  %v1068_v45 = vpop.f32.mrb[90].mxu0  ;;  %3420 = vst.msk [vmem:[#allocation4 + $0x58] sm:$0xf] %vm2030_vm12, %v3189_v32  ;;  %v3194_v4 = vrot.slane %v3193_v39, 4  ;;  %v4496_v50 = vsel %vm12836_vm7, %v4494_v63, %v13449_v2 }
 0x1a1   : > { %3692 = vst.msk [vmem:[#allocation4 + $0x4] sm:$0xf] %vm2510_vm13, %v3609_v43  ;;  %v11383_v23 = vpop.f32.mrb[91].mxu0  ;;  %v2431_v51 = vpop.permute.xlu0 %2430  ;;  %v1615_v48 = vld [vmem:[#allocation2 + $0x150] ss:$2 sm:$0xff]  ;;  %v4497_v43 = vrot.slane %v13449_v2, 4 }
 0x1a2   : > { %1325 = vst.msk [vmem:[#allocation2 + $0x168] sm:$0xff] %vm331_vm4, %v1068_v45  ;;  %v1602_v52 = vpack.c.bf16 %v1601_v36, %v1600_v40  ;;  %4291 = vrot.lane.b32.xlu0 %v4073_v53, %s12638_s17  ;;  %4289 = vrot.lane.b32.xlu1 %v4063_v47, %s12638_s17  ;;  %v3199_v59 = vsel %vm12848_vm10, %v3194_v4, %v13438_v20  ;;  %v1619_v13 = vld [vmem:[#allocation2 + $0x151] ss:$2 sm:$0xff] }
 0x1a3   : > { %2513 = vst.msk [vmem:[#allocation4 + $0x18] sm:$0xf] %vm2510_vm13, %v2431_v51  ;;  %v1630_v26 = vmax.f32 %v1615_v48, %v1619_v13 }
 0x1a4   : > { %2797 = vst.msk [vmem:[#allocation4 + $0x18] sm:$0xf] %vm2794_vm15, %v2715_v21  ;;  %v1604_v56 = vshrl.u32 %v1602_v52, 16  ;;  %v2713_v58 = vpop.permute.xlu1 %2712  ;;  %v1607_v34 = vshll.u32 %v1602_v52, 16  ;;  %v4077_v21 = vor.u32 %v4076_v16, %v13422_v37 }
 0x1a5   : > { %2796 = vst.msk [vmem:[#allocation4 + $0xc] sm:$0xf] %vm2794_vm15, %v2713_v58 }
 0x1a6   : > { %3421 = vst.msk [vmem:[#allocation4 + $0x64] sm:$0xf] %vm2030_vm12, %v3199_v59  ;;  %v1606_v3 = vrot.slane %v1604_v56, 7  ;;  %v1073_v12 = vpop.f32.mrb[92].mxu0  ;;  %2446 = vrot.lane.b32.xlu0 %v4073_v53, %s12637_s29  ;;  %2444 = vrot.lane.b32.xlu1 %v4063_v47, %s12637_s29  ;;  %4591 = vst.msk [vmem:[#allocation4 + $0x44] sm:$0xf] %vm2030_vm12, %v4493_v62  ;;  %v3203_v53 = vor.u32 %v3202_v57, %v13438_v20 }
 0x1a7   : > { %2994 = vst.msk [vmem:[#allocation4 + $0xc] sm:$0xf] %vm2992_vm0, %v2911_v19  ;;  %v11386_v7 = vpop.f32.mrb[93].mxu0  ;;  %v4078_v40 = vrot.slane %v4077_v21, 4 }
 0x1a8   : > { %1326 = vst.msk [vmem:[#allocation2 + $0x170] sm:$0xff] %vm331_vm4, %v1073_v12  ;;  %v1609_v10 = vor.u32 %v1607_v34, %v1606_v3  ;;  %v1076_v54 = vpop.f32.mrb[94].mxu0  ;;  %v3204_v16 = vrot.slane %v3203_v53, 4 }
 0x1a9   : > { %4592 = vst.msk [vmem:[#allocation4 + $0x50] sm:$0xf] %vm2030_vm12, %v4496_v50  ;;  %v11387_v14 = vpop.f32.mrb[95].mxu0  ;;  %v1617_v33 = vld [vmem:[#allocation2 + $0x160] ss:$2 sm:$0x3f] }
 0x1aa   : > { %1327 = vst.msk [vmem:[#allocation2 + $0x178] sm:$0xff] %vm331_vm4, %v1076_v54  ;;  %v1612_v17 = vsel %vm12949_vm14, %v1609_v10, %v1611_v8  ;;  %v1621_v45 = vld [vmem:[#allocation2 + $0x161] ss:$2 sm:$0x3f] }
 0x1ab   : > { %1613 = vst [vmem:[#allocation3 + $0x30] sm:$0xff] %v1612_v17  ;;  %v13464_v9 = vcombine.high %v1612_v17, %v1612_v17  ;;  %v10042_v44 = vcombine.low %v1612_v17, %v1612_v17  ;;  %v1631_v20 = vmax.f32 %v1617_v33, %v1621_v45 }
 0x1ad   : > { %3822 = vrot.lane.b32.xlu1 %v13464_v9, %s12636_s28  ;;  %3820 = vrot.lane.b32.xlu0 %v10042_v44, %s12636_s28  ;;  %v3554_v24 = vrot.slane %v10042_v44, 5  ;;  %v4080_v18 = vshll.u32 %v10042_v44, 16  ;;  %v4084_v19 = vshrl.u32 %v10042_v44, 16  ;;  %v3557_v39 = vrot.slane %v13464_v9, 5 }
 0x1ae   : > { %v1081_v41 = vpop.f32.mrb[96].mxu0  ;;  %v4090_v5 = vshll.u32 %v13464_v9, 16 }
 0x1af   : > { %1328 = vst.msk [vmem:[#allocation2 + $0x180] sm:$0xff] %vm331_vm4, %v1081_v41  ;;  %v11390_v29 = vpop.f32.mrb[97].mxu0  ;;  %v3807_v15 = vpop.permute.xlu1 %3806  ;;  %v3556_v27 = vrot.slane %v3554_v24, 4  ;;  %v13474_v28 = vrot.slane %v4080_v18, 5  ;;  %v4086_v31 = vrot.slane %v4084_v19, 4  ;;  %v3555_v23 = vsel %vm12836_vm7, %v3553_v49, %v3554_v24 }
 0x1b0   : > { %v1084_v22 = vpop.f32.mrb[98].mxu0  ;;  %v3805_v25 = vpop.permute.xlu0 %3804  ;;  %v13509_v17 = vrot.slane %v4090_v5, 5  ;;  %v4094_v5 = vshrl.u32 %v13464_v9, 16 }
 0x1b1   : > { %v1623_v32 = vld [vmem:[#allocation2 + $0x16c] ss:$2 sm:$0xff]  ;;  %v1627_v30 = vld [vmem:[#allocation2 + $0x16d] ss:$2 sm:$0xff]  ;;  %1329 = vst.msk [vmem:[#allocation2 + $0x188] sm:$0xff] %vm331_vm4, %v1084_v22  ;;  %v11391_v1 = vpop.f32.mrb[99].mxu0  ;;  %2930 = vrot.lane.b32.xlu1 %v13464_v9, %s12638_s17  ;;  %2928 = vrot.lane.b32.xlu0 %v10042_v44, %s12638_s17  ;;  %v4087_v51 = vor.u32 %v4086_v31, %v13474_v28  ;;  %v3558_v52 = vsel %vm12836_vm7, %v3556_v27, %v3557_v39 }
 0x1b2   : > { %3888 = vst.msk [vmem:[#allocation4 + $0x4] sm:$0xf] %vm2794_vm15, %v3805_v25  ;;  %v1632_v37 = vmax.f32 %v1623_v32, %v1627_v30  ;;  %v3027_v36 = vld [vmem:[#allocation3 + $0x30] sm:$0xff]  ;;  %v4083_v19 = vsel %vm12848_vm10, %v4078_v40, %v13474_v28 }
 0x1b3   : > { %v13483_v47 = vpop.permute.xlu1 %2914  ;;  %v4395_v61 = vld [vmem:[#allocation3 + $0x30] sm:$0xff]  ;;  %v9987_v56 = vcombine.low %v3027_v36, %v3027_v36  ;;  %v13497_v58 = vcombine.high %v3027_v36, %v3027_v36  ;;  %v4088_v34 = vrot.slane %v4087_v51, 4 }
 0x1b4   : > { %v1634_v4 = vmax.f32 %v1630_v26, %v1632_v37  ;;  %v2913_v55 = vpop.permute.xlu0 %2912  ;;  %v10098_v12 = vcombine.low %v4395_v61, %v4395_v61  ;;  %v10099_v44 = vcombine.high %v4395_v61, %v4395_v61 }
 0x1b5   : > { %2995 = vst.msk [vmem:[#allocation4 + $0x18] sm:$0xf] %vm2992_vm0, %v2913_v55  ;;  %3626 = vrot.lane.b32.xlu1 %v3555_v23, %s12637_s29  ;;  %3628 = vrot.lane.b32.xlu0 %v3558_v52, %s12637_s29  ;;  %v3206_v50 = vshll.u32 %v9987_v56, 16  ;;  %v3210_v10 = vshrl.u32 %v9987_v56, 16  ;;  %v3216_v13 = vshll.u32 %v13497_v58, 16  ;;  %v4093_v18 = vsel %vm12848_vm10, %v4088_v34, %v13509_v17 }
 0x1b6   : > { %v1625_v59 = vld [vmem:[#allocation2 + $0x17c] ss:$2 sm:$0x3f]  ;;  %v1629_v62 = vld [vmem:[#allocation2 + $0x17d] ss:$2 sm:$0x3f]  ;;  %v1636_v6 = vadd.f32 %v13318_v46, %v1634_v4 }
 0x1b7   : > { %v1633_v63 = vmax.f32 %v1625_v59, %v1629_v62  ;;  %v1089_v2 = vpop.f32.mrb[100].mxu0  ;;  %v3611_v3 = vpop.permute.xlu1 %3610  ;;  %2043 = vst.msk [vmem:[#allocation4 + $0x90] sm:$0xf] %vm2030_vm12, %v9987_v56  ;;  %2044 = vst.msk [vmem:[#allocation4 + $0x9c] sm:$0xf] %vm2030_vm12, %v13497_v58  ;;  %v3208_v48 = vrot.slane %v3206_v50, 5 }
 0x1b8   : > { %1330 = vst.msk [vmem:[#allocation2 + $0x190] sm:$0xff] %vm331_vm4, %v1089_v2  ;;  %v11394_v7 = vpop.f32.mrb[101].mxu0  ;;  %v3613_v8 = vpop.permute.xlu0 %3612  ;;  %v3212_v24 = vrot.slane %v3210_v10, 4  ;;  %v4498_v21 = vrot.slane %v10098_v12, 5  ;;  %v1638_v29 = vmax.f32 %v1636_v6, 0.0  ;;  %v13527_v26 = vrot.slane %v10099_v44, 5 }
 0x1b9   : > { %3693 = vst.msk [vmem:[#allocation4 + $0x10] sm:$0xf] %vm2510_vm13, %v3611_v3  ;;  %v1635_v54 = vmax.f32 %v1631_v20, %v1633_v63  ;;  %v1092_v14 = vpop.f32.mrb[102].mxu0  ;;  %3694 = vst.msk [vmem:[#allocation4 + $0x1c] sm:$0xf] %vm2510_vm13, %v3613_v8  ;;  %2734 = vrot.lane.b32.xlu0 %v3558_v52, %s12636_s28  ;;  %2732 = vrot.lane.b32.xlu1 %v3555_v23, %s12636_s28  ;;  %v3209_v57 = vsel %vm12848_vm10, %v3204_v16, %v3208_v48  ;;  %v13529_v32 = vrot.slane %v3216_v13, 5 }
 0x1ba   : > { %3889 = vst.msk [vmem:[#allocation4 + $0x10] sm:$0xf] %vm2794_vm15, %v3807_v15  ;;  %v11395_v11 = vpop.f32.mrb[103].mxu0  ;;  %v3213_v22 = vor.u32 %v3212_v24, %v3208_v48  ;;  %v4499_v27 = vsel %vm12836_vm7, %v4497_v43, %v4498_v21  ;;  %v4500_v31 = vrot.slane %v4498_v21, 4  ;;  %v1649_v52 = vld [vmem:[#allocation3 + $0x38] sm:$0xff]  ;;  %v3220_v59 = vshrl.u32 %v13497_v58, 16 }
 0x1bb   : > { %1331 = vst.msk [vmem:[#allocation2 + $0x198] sm:$0xff] %vm331_vm4, %v1092_v14  ;;  %v1637_v41 = vadd.f32 %v13318_v46, %v1635_v54  ;;  %v2717_v49 = vpop.permute.xlu1 %2716  ;;  %v13562_v12 = vrot.slane %v4094_v5, 4  ;;  %v3559_v58 = vrot.slane %v3557_v39, 4 }
 0x1bc   : > { %v2719_v15 = vpop.permute.xlu0 %2718  ;;  %3422 = vst.msk [vmem:[#allocation4 + $0x70] sm:$0xf] %vm2030_vm12, %v3209_v57  ;;  %v3214_v33 = vrot.slane %v3213_v22, 4  ;;  %4593 = vst.msk [vmem:[#allocation4 + $0x5c] sm:$0xf] %vm2030_vm12, %v4499_v27  ;;  %v4502_v40 = vsel %vm12836_vm7, %v4500_v31, %v13527_v26  ;;  %v3222_v8 = vrot.slane %v3220_v59, 4 }
 0x1bd   : > { %v1639_v25 = vmax.f32 %v1637_v41, 0.0  ;;  %4295 = vrot.lane.b32.xlu0 %v4093_v18, %s12638_s17  ;;  %4293 = vrot.lane.b32.xlu1 %v4083_v19, %s12638_s17  ;;  %4594 = vst.msk [vmem:[#allocation4 + $0x68] sm:$0xf] %vm2030_vm12, %v4502_v40  ;;  %v4097_v9 = vor.u32 %v13562_v12, %v13509_v17 }
 0x1be   : > { %v1097_v28 = vpop.f32.mrb[104].mxu0  ;;  %v3219_v45 = vsel %vm12848_vm10, %v3214_v33, %v13529_v32 }
 0x1bf   : > { %v1640_v30 = vpack.c.bf16 %v1639_v25, %v1638_v29  ;;  %1332 = vst.msk [vmem:[#allocation2 + $0x1a0] sm:$0xff] %vm331_vm4, %v1097_v28  ;;  %v11398_v1 = vpop.f32.mrb[105].mxu0  ;;  %v2433_v37 = vpop.permute.xlu1 %2432  ;;  %v1653_v50 = vld [vmem:[#allocation2 + $0x188] ss:$2 sm:$0xff]  ;;  %v1657_v10 = vld [vmem:[#allocation2 + $0x189] ss:$2 sm:$0xff]  ;;  %v3223_v29 = vor.u32 %v3222_v8, %v13529_v32 }
 0x1c0   : > { %v1100_v36 = vpop.f32.mrb[106].mxu0  ;;  %v4280_v43 = vpop.permute.xlu0 %4279  ;;  %2514 = vst.msk [vmem:[#allocation4 + $0x24] sm:$0xf] %vm2510_vm13, %v2433_v37  ;;  %v1668_v39 = vmax.f32 %v1653_v50, %v1657_v10 }
 0x1c1   : > { %v1642_v23 = vshrl.u32 %v1640_v30, 16  ;;  %1333 = vst.msk [vmem:[#allocation2 + $0x1a8] sm:$0xff] %vm331_vm4, %v1100_v36  ;;  %v11399_v51 = vpop.f32.mrb[107].mxu0  ;;  %2450 = vrot.lane.b32.xlu0 %v4093_v18, %s12637_s29  ;;  %2448 = vrot.lane.b32.xlu1 %v4083_v19, %s12637_s29  ;;  %v1645_v4 = vshll.u32 %v1640_v30, 16 }
 0x1c2   : > { %4363 = vst.msk [vmem:[#allocation4 + $0x4] sm:$0xf] %vm2992_vm0, %v4280_v43 }
 0x1c3   : > { %2798 = vst.msk [vmem:[#allocation4 + $0x24] sm:$0xf] %vm2794_vm15, %v2717_v49  ;;  %v1644_v53 = vrot.slane %v1642_v23, 7 }
 0x1c4   : > { %3423 = vst.msk [vmem:[#allocation4 + $0x7c] sm:$0xf] %vm2030_vm12, %v3219_v45  ;;  %v2435_v55 = vpop.permute.xlu0 %2434  ;;  %v3224_v45 = vrot.slane %v3223_v29, 4 }
 0x1c5   : > { %2996 = vst.msk [vmem:[#allocation4 + $0x24] sm:$0xf] %vm2992_vm0, %v13483_v47  ;;  %v1647_v61 = vor.u32 %v1645_v4, %v1644_v53 }
 0x1c6   : > { %2515 = vst.msk [vmem:[#allocation4 + $0x30] sm:$0xf] %vm2510_vm13, %v2435_v55  ;;  %v1105_v56 = vpop.f32.mrb[108].mxu0  ;;  %v1655_v16 = vld [vmem:[#allocation2 + $0x198] ss:$2 sm:$0x3f] }
 0x1c7   : > { %2799 = vst.msk [vmem:[#allocation4 + $0x30] sm:$0xf] %vm2794_vm15, %v2719_v15  ;;  %v1650_v20 = vsel %vm12949_vm14, %v1647_v61, %v1649_v52  ;;  %v11402_v47 = vpop.f32.mrb[109].mxu0  ;;  %v1659_v24 = vld [vmem:[#allocation2 + $0x199] ss:$2 sm:$0x3f] }
 0x1c8   : > { %1334 = vst.msk [vmem:[#allocation2 + $0x1b0] sm:$0xff] %vm331_vm4, %v1105_v56  ;;  %1651 = vst [vmem:[#allocation3 + $0x38] sm:$0xff] %v1650_v20  ;;  %v13556_v62 = vcombine.high %v1650_v20, %v1650_v20  ;;  %v10044_v63 = vcombine.low %v1650_v20, %v1650_v20  ;;  %v1108_v2 = vpop.f32.mrb[110].mxu0  ;;  %v1669_v32 = vmax.f32 %v1655_v16, %v1659_v24 }
 0x1c9   : > { %1335 = vst.msk [vmem:[#allocation2 + $0x1b8] sm:$0xff] %vm331_vm4, %v1108_v2  ;;  %v11403_v3 = vpop.f32.mrb[111].mxu0 }
 0x1ca   : > { %3826 = vrot.lane.b32.xlu1 %v13556_v62, %s12636_s28  ;;  %3824 = vrot.lane.b32.xlu0 %v10044_v63, %s12636_s28  ;;  %v3560_v34 = vrot.slane %v10044_v63, 5  ;;  %v4100_v6 = vshll.u32 %v10044_v63, 16  ;;  %v4104_v7 = vshrl.u32 %v10044_v63, 16  ;;  %v3563_v21 = vrot.slane %v13556_v62, 5 }
 0x1cb   : > { %v4110_v43 = vshll.u32 %v13556_v62, 16 }
 0x1cc   : > { %v3811_v54 = vpop.permute.xlu1 %3810  ;;  %v3809_v14 = vpop.permute.xlu0 %3808  ;;  %v3562_v44 = vrot.slane %v3560_v34, 4  ;;  %v13567_v11 = vrot.slane %v4100_v6, 5  ;;  %v4106_v48 = vrot.slane %v4104_v7, 4  ;;  %v3561_v19 = vsel %vm12836_vm7, %v3559_v58, %v3560_v34 }
 0x1cd   : > { %3890 = vst.msk [vmem:[#allocation4 + $0x1c] sm:$0xf] %vm2794_vm15, %v3809_v14  ;;  %v13605_v12 = vrot.slane %v4110_v43, 5 }
 0x1ce   : > { %v1113_v13 = vpop.f32.mrb[112].mxu0  ;;  %2934 = vrot.lane.b32.xlu1 %v13556_v62, %s12638_s17  ;;  %2932 = vrot.lane.b32.xlu0 %v10044_v63, %s12638_s17  ;;  %v3564_v28 = vsel %vm12836_vm7, %v3562_v44, %v3563_v21  ;;  %v4107_v33 = vor.u32 %v4106_v48, %v13567_v11  ;;  %v4098_v63 = vrot.slane %v4097_v9, 4  ;;  %v4114_v9 = vshrl.u32 %v13556_v62, 16 }
 0x1cf   : > { %v1661_v41 = vld [vmem:[#allocation2 + $0x1a4] ss:$2 sm:$0xff]  ;;  %v1665_v49 = vld [vmem:[#allocation2 + $0x1a5] ss:$2 sm:$0xff]  ;;  %1336 = vst.msk [vmem:[#allocation2 + $0x1c0] sm:$0xff] %vm331_vm4, %v1113_v13  ;;  %v11406_v18 = vpop.f32.mrb[113].mxu0 }
 0x1d0   : > { %v1670_v15 = vmax.f32 %v1661_v41, %v1665_v49  ;;  %v1116_v57 = vpop.f32.mrb[114].mxu0  ;;  %v13579_v22 = vpop.permute.xlu1 %2918  ;;  %v3028_v25 = vld [vmem:[#allocation3 + $0x38] sm:$0xff]  ;;  %v1663_v27 = vld [vmem:[#allocation2 + $0x1b4] ss:$2 sm:$0x3f]  ;;  %v4108_v5 = vrot.slane %v4107_v33, 4  ;;  %v4103_v10 = vsel %vm12848_vm10, %v4098_v63, %v13567_v11 }
 0x1d1   : > { %v1667_v17 = vld [vmem:[#allocation2 + $0x1b5] ss:$2 sm:$0x3f]  ;;  %1337 = vst.msk [vmem:[#allocation2 + $0x1c8] sm:$0xff] %vm331_vm4, %v1116_v57  ;;  %v2917_v31 = vpop.permute.xlu0 %2916  ;;  %v9989_v30 = vcombine.low %v3028_v25, %v3028_v25  ;;  %v13587_v1 = vcombine.high %v3028_v25, %v3028_v25  ;;  %v11407_v36 = vpop.f32.mrb[115].mxu0  ;;  %v4396_v53 = vld [vmem:[#allocation3 + $0x38] sm:$0xff] }
 0x1d2   : > { %v1672_v37 = vmax.f32 %v1668_v39, %v1670_v15  ;;  %v1671_v40 = vmax.f32 %v1663_v27, %v1667_v17  ;;  %2997 = vst.msk [vmem:[#allocation4 + $0x30] sm:$0xf] %vm2992_vm0, %v2917_v31  ;;  %3630 = vrot.lane.b32.xlu1 %v3561_v19, %s12637_s29  ;;  %3632 = vrot.lane.b32.xlu0 %v3564_v28, %s12637_s29  ;;  %v4503_v39 = vrot.slane %v13527_v26, 4  ;;  %v1687_v31 = vld [vmem:[#allocation3 + $0x40] sm:$0xff] }
 0x1d3   : > { %v3226_v23 = vshll.u32 %v9989_v30, 16  ;;  %v3230_v51 = vshrl.u32 %v9989_v30, 16  ;;  %2045 = vst.msk [vmem:[#allocation4 + $0xa8] sm:$0xf] %vm2030_vm12, %v9989_v30  ;;  %2046 = vst.msk [vmem:[#allocation4 + $0xb4] sm:$0xf] %vm2030_vm12, %v13587_v1  ;;  %v10100_v3 = vcombine.low %v4396_v53, %v4396_v53  ;;  %v4113_v16 = vsel %vm12848_vm10, %v4108_v5, %v13605_v12 }
 0x1d4   : > { %v1674_v4 = vadd.f32 %v13318_v46, %v1672_v37  ;;  %v1673_v55 = vmax.f32 %v1669_v32, %v1671_v40  ;;  %v3615_v52 = vpop.permute.xlu1 %3614  ;;  %v3236_v2 = vshll.u32 %v13587_v1, 16  ;;  %v10101_v48 = vcombine.high %v4396_v53, %v4396_v53 }
 0x1d5   : > { %3695 = vst.msk [vmem:[#allocation4 + $0x28] sm:$0xf] %vm2510_vm13, %v3615_v52  ;;  %v3617_v61 = vpop.permute.xlu0 %3616  ;;  %v3228_v56 = vrot.slane %v3226_v23, 5  ;;  %v3232_v20 = vrot.slane %v3230_v51, 4  ;;  %v4504_v11 = vrot.slane %v10100_v3, 5  ;;  %v3240_v53 = vshrl.u32 %v13587_v1, 16 }
 0x1d6   : > { %v1675_v59 = vadd.f32 %v13318_v46, %v1673_v55  ;;  %v1121_v47 = vpop.f32.mrb[116].mxu0  ;;  %3891 = vst.msk [vmem:[#allocation4 + $0x28] sm:$0xf] %vm2794_vm15, %v3811_v54  ;;  %2738 = vrot.lane.b32.xlu0 %v3564_v28, %s12636_s28  ;;  %2736 = vrot.lane.b32.xlu1 %v3561_v19, %s12636_s28  ;;  %v1676_v6 = vmax.f32 %v1674_v4, 0.0  ;;  %v13619_v13 = vrot.slane %v3236_v2, 5  ;;  %v13630_v57 = vrot.slane %v10101_v48, 5 }
 0x1d7   : > { %3696 = vst.msk [vmem:[#allocation4 + $0x34] sm:$0xf] %vm2510_vm13, %v3617_v61  ;;  %v11410_v34 = vpop.f32.mrb[117].mxu0  ;;  %v3229_v46 = vsel %vm12848_vm10, %v3224_v45, %v3228_v56  ;;  %v3233_v58 = vor.u32 %v3232_v20, %v3228_v56  ;;  %v4505_v29 = vsel %vm12836_vm7, %v4503_v39, %v4504_v11  ;;  %v4506_v15 = vrot.slane %v4504_v11, 4  ;;  %v12254_v4 = vld [vmem:[#allocation4] ss:$12 sps:$4 sm:$0xff]  }
 0x1d8   : > { %1338 = vst.msk [vmem:[#allocation2 + $0x1d0] sm:$0xff] %vm331_vm4, %v1121_v47  ;;  %v1677_v7 = vmax.f32 %v1675_v59, 0.0  ;;  %v1124_v8 = vpop.f32.mrb[118].mxu0  ;;  %v2721_v50 = vpop.permute.xlu1 %2720  ;;  %v4116_v28 = vrot.slane %v4114_v9, 4  ;;  %v1691_v52 = vld [vmem:[#allocation2 + $0x1c0] ss:$2 sm:$0xff] }
 0x1d9   : > { %3424 = vst.msk [vmem:[#allocation4 + $0x88] sm:$0xf] %vm2030_vm12, %v3229_v46  ;;  %v11411_v54 = vpop.f32.mrb[119].mxu0  ;;  %v2723_v14 = vpop.permute.xlu0 %2722  ;;  %v3234_v44 = vrot.slane %v3233_v58, 4  ;;  %4595 = vst.msk [vmem:[#allocation4 + $0x74] sm:$0xf] %vm2030_vm12, %v4505_v29  ;;  %v4508_v33 = vsel %vm12836_vm7, %v4506_v15, %v13630_v57 }
 0x1da   : > { %1339 = vst.msk [vmem:[#allocation2 + $0x1d8] sm:$0xff] %vm331_vm4, %v1124_v8  ;;  %v1678_v24 = vpack.c.bf16 %v1677_v7, %v1676_v6  ;;  %4299 = vrot.lane.b32.xlu0 %v4113_v16, %s12638_s17  ;;  %4297 = vrot.lane.b32.xlu1 %v4103_v10, %s12638_s17  ;;  %v4117_v51 = vor.u32 %v4116_v28, %v13605_v12  ;;  %v3565_v61 = vrot.slane %v3563_v21, 4  ;;  %v1695_v5 = vld [vmem:[#allocation2 + $0x1c1] ss:$2 sm:$0xff]  ;;  %v3242_v2 = vrot.slane %v3240_v53, 4 }
 0x1db   : > { %v3239_v18 = vsel %vm12848_vm10, %v3234_v44, %v13619_v13  ;;  %4596 = vst.msk [vmem:[#allocation4 + $0x80] sm:$0xf] %vm2030_vm12, %v4508_v33  ;;  %v1706_v7 = vmax.f32 %v1691_v52, %v1695_v5  ;;  %v13686_v33 = vld [vmem:[%s15642_s2] ss:$0 sm:$0xff] }
 0x1dc   : > { %v1680_v41 = vshrl.u32 %v1678_v24, 16  ;;  %v4282_v49 = vpop.permute.xlu1 %4281  ;;  %3425 = vst.msk [vmem:[#allocation4 + $0x94] sm:$0xf] %vm2030_vm12, %v3239_v18  ;;  %v1683_v27 = vshll.u32 %v1678_v24, 16  ;;  %v4118_v63 = vrot.slane %v4117_v51, 4 }
 0x1dd   : > { %v4284_v19 = vpop.permute.xlu0 %4283  ;;  %4364 = vst.msk [vmem:[#allocation4 + $0x10] sm:$0xf] %vm2992_vm0, %v4282_v49 }
 0x1de   : > { %v1682_v25 = vrot.slane %v1680_v41, 7  ;;  %v1129_v26 = vpop.f32.mrb[120].mxu0  ;;  %4365 = vst.msk [vmem:[#allocation4 + $0x1c] sm:$0xf] %vm2992_vm0, %v4284_v19  ;;  %2454 = vrot.lane.b32.xlu0 %v4113_v16, %s12637_s29  ;;  %2452 = vrot.lane.b32.xlu1 %v4103_v10, %s12637_s29  ;;  %v3243_v19 = vor.u32 %v3242_v2, %v13619_v13 }
 0x1df   : > { %1340 = vst.msk [vmem:[#allocation2 + $0x1e0] sm:$0xff] %vm331_vm4, %v1129_v26  ;;  %v11414_v17 = vpop.f32.mrb[121].mxu0 }
 0x1e0   : > { %v2437_v30 = vpop.permute.xlu1 %2436  ;;  %v1685_v32 = vor.u32 %v1683_v27, %v1682_v25  ;;  %v1132_v37 = vpop.f32.mrb[122].mxu0  ;;  %v3244_v53 = vrot.slane %v3243_v19, 4 }
 0x1e1   : > { %v2439_v40 = vpop.permute.xlu0 %2438  ;;  %2516 = vst.msk [vmem:[#allocation4 + $0x3c] sm:$0xf] %vm2510_vm13, %v2437_v30  ;;  %v11415_v36 = vpop.f32.mrb[123].mxu0  ;;  %v1693_v8 = vld [vmem:[#allocation2 + $0x1d0] ss:$2 sm:$0x3f] }
 0x1e2   : > { %1341 = vst.msk [vmem:[#allocation2 + $0x1e8] sm:$0xff] %vm331_vm4, %v1132_v37  ;;  %v1688_v43 = vsel %vm12949_vm14, %v1685_v32, %v1687_v31  ;;  %v1697_v16 = vld [vmem:[#allocation2 + $0x1d1] ss:$2 sm:$0x3f] }
 0x1e3   : > { %2517 = vst.msk [vmem:[#allocation4 + $0x48] sm:$0xf] %vm2510_vm13, %v2439_v40  ;;  %1689 = vst [vmem:[#allocation3 + $0x40] sm:$0xff] %v1688_v43  ;;  %v13650_v45 = vcombine.high %v1688_v43, %v1688_v43  ;;  %v10046_v23 = vcombine.low %v1688_v43, %v1688_v43  ;;  %v1707_v29 = vmax.f32 %v1693_v8, %v1697_v16 }
 0x1e4   : > { %2800 = vst.msk [vmem:[#allocation4 + $0x3c] sm:$0xf] %vm2794_vm15, %v2721_v50  ;;  %2801 = vst.msk [vmem:[#allocation4 + $0x48] sm:$0xf] %vm2794_vm15, %v2723_v14  ;;  %v12256_v55 = vld [vmem:[#allocation4 + $0x4] ss:$12 sps:$4 sm:$0xff]  }
 0x1e5   : > { %2998 = vst.msk [vmem:[#allocation4 + $0x3c] sm:$0xf] %vm2992_vm0, %v13579_v22  ;;  %3830 = vrot.lane.b32.xlu1 %v13650_v45, %s12636_s28  ;;  %3828 = vrot.lane.b32.xlu0 %v10046_v23, %s12636_s28  ;;  %v3566_v22 = vrot.slane %v10046_v23, 5  ;;  %v4120_v20 = vshll.u32 %v10046_v23, 16  ;;  %v4124_v59 = vshrl.u32 %v10046_v23, 16  ;;  %v3569_v10 = vrot.slane %v13650_v45, 5 }
 0x1e6   : > { %v1137_v56 = vpop.f32.mrb[124].mxu0  ;;  %5098 = vmatprep.mubr.bf16.mxu1 %v12256_v55  ;;  %v4509_v14 = vrot.slane %v13630_v57, 4  ;;  %v4130_v49 = vshll.u32 %v13650_v45, 16  ;;  %v2321_v19 = vshrl.u32 %v13650_v45, 16 }
 0x1e7   : > { %1342 = vst.msk [vmem:[#allocation2 + $0x1f0] sm:$0xff] %vm331_vm4, %v1137_v56  ;;  %v11418_v1 = vpop.f32.mrb[125].mxu0  ;;  %v3815_v47 = vpop.permute.xlu1 %3814  ;;  %5099 = vmatmul.mubr.bf16.vlgmr.msra.gmra.mrb[0].mxu1 %v12254_v4  ;;  %v3568_v12 = vrot.slane %v3566_v22, 4  ;;  %v4122_v46 = vrot.slane %v4120_v20, 5  ;;  %v4126_v58 = vrot.slane %v4124_v59, 4  ;;  %v3567_v48 = vsel %vm12836_vm7, %v3565_v61, %v3566_v22 }
 0x1e8   : > { %v1140_v3 = vpop.f32.mrb[126].mxu0  ;;  %v3813_v34 = vpop.permute.xlu0 %3812 }
 0x1e9   : > { %v1699_v62 = vld [vmem:[#allocation2 + $0x1dc] ss:$2 sm:$0xff]  ;;  %v1703_v21 = vld [vmem:[#allocation2 + $0x1dd] ss:$2 sm:$0xff]  ;;  %1343 = vst.msk [vmem:[#allocation2 + $0x1f8] sm:$0xff] %vm331_vm4, %v1140_v3  ;;  %v11419_v6 = vpop.f32.mrb[127].mxu0  ;;  %2938 = vrot.lane.b32.xlu1 %v13650_v45, %s12638_s17  ;;  %2936 = vrot.lane.b32.xlu0 %v10046_v23, %s12638_s17  ;;  %v4127_v24 = vor.u32 %v4126_v58, %v4122_v46  ;;  %v3570_v39 = vsel %vm12836_vm7, %v3568_v12, %v3569_v10 }
 0x1ea   : > { %3892 = vst.msk [vmem:[#allocation4 + $0x34] sm:$0xf] %vm2794_vm15, %v3813_v34  ;;  %v1708_v50 = vmax.f32 %v1699_v62, %v1703_v21  ;;  %v3029_v54 = vld [vmem:[#allocation3 + $0x40] sm:$0xff]  ;;  %v13697_v23 = vrot.slane %v4130_v49, 5  ;;  %v4123_v51 = vsel %vm12848_vm10, %v4118_v63, %v4122_v46  ;;  %v1725_v49 = vld [vmem:[#allocation3 + $0x48] sm:$0xff] }
 0x1eb   : > { %v13667_v44 = vpop.permute.xlu1 %2922  ;;  %v4397_v41 = vld [vmem:[#allocation3 + $0x40] sm:$0xff]  ;;  %v9991_v18 = vcombine.low %v3029_v54, %v3029_v54  ;;  %v13680_v25 = vcombine.high %v3029_v54, %v3029_v54  ;;  %v4128_v31 = vrot.slane %v4127_v24, 4 }
 0x1ec   : > { %v1710_v11 = vmax.f32 %v1706_v7, %v1708_v50  ;;  %v2921_v9 = vpop.permute.xlu0 %2920  ;;  %v10102_v28 = vcombine.low %v4397_v41, %v4397_v41  ;;  %v10103_v59 = vcombine.high %v4397_v41, %v4397_v41 }
 0x1ed   : > { %2999 = vst.msk [vmem:[#allocation4 + $0x48] sm:$0xf] %vm2992_vm0, %v2921_v9  ;;  %3634 = vrot.lane.b32.xlu1 %v3567_v48, %s12637_s29  ;;  %3636 = vrot.lane.b32.xlu0 %v3570_v39, %s12637_s29  ;;  %v3246_v37 = vshll.u32 %v9991_v18, 16  ;;  %v3250_v40 = vshrl.u32 %v9991_v18, 16  ;;  %v3256_v61 = vshll.u32 %v13680_v25, 16  ;;  %v4133_v56 = vsel %vm12848_vm10, %v4128_v31, %v13697_v23 }
 0x1ee   : > { %v1701_v15 = vld [vmem:[#allocation2 + $0x1ec] ss:$2 sm:$0x3f]  ;;  %v1705_v57 = vld [vmem:[#allocation2 + $0x1ed] ss:$2 sm:$0x3f]  ;;  %v1712_v30 = vadd.f32 %v13686_v33, %v1710_v11 }
 0x1ef   : > { %v1709_v27 = vmax.f32 %v1701_v15, %v1705_v57  ;;  %v1145_v26 = vpop.f32.mrb[128].mxu0  ;;  %v3619_v17 = vpop.permute.xlu1 %3618  ;;  %2047 = vst.msk [vmem:[#allocation4 + $0xc0] sm:$0xf] %vm2030_vm12, %v9991_v18  ;;  %2048 = vst.msk [vmem:[#allocation4 + $0xcc] sm:$0xf] %vm2030_vm12, %v13680_v25  ;;  %v3248_v55 = vrot.slane %v3246_v37, 5 }
 0x1f0   : > { %1344 = vst.msk [vmem:[#allocation2 + $0x200] sm:$0xff] %vm331_vm4, %v1145_v26  ;;  %v11422_v13 = vpop.f32.mrb[129].mxu0  ;;  %v3621_v32 = vpop.permute.xlu0 %3620  ;;  %v3252_v52 = vrot.slane %v3250_v40, 4  ;;  %v4510_v20 = vrot.slane %v10102_v28, 5  ;;  %v1714_v1 = vmax.f32 %v1712_v30, 0.0  ;;  %v13714_v46 = vrot.slane %v10103_v59, 5 }
 0x1f1   : > { %3697 = vst.msk [vmem:[#allocation4 + $0x40] sm:$0xf] %vm2510_vm13, %v3619_v17  ;;  %v1711_v36 = vmax.f32 %v1707_v29, %v1709_v27  ;;  %v1148_v43 = vpop.f32.mrb[130].mxu0  ;;  %3698 = vst.msk [vmem:[#allocation4 + $0x4c] sm:$0xf] %vm2510_vm13, %v3621_v32  ;;  %2742 = vrot.lane.b32.xlu0 %v3570_v39, %s12636_s28  ;;  %2740 = vrot.lane.b32.xlu1 %v3567_v48, %s12636_s28  ;;  %v3249_v63 = vsel %vm12848_vm10, %v3244_v53, %v3248_v55  ;;  %v13716_v21 = vrot.slane %v3256_v61, 5 }
 0x1f2   : > { %3893 = vst.msk [vmem:[#allocation4 + $0x40] sm:$0xf] %vm2794_vm15, %v3815_v47  ;;  %v11423_v4 = vpop.f32.mrb[131].mxu0  ;;  %v3253_v2 = vor.u32 %v3252_v52, %v3248_v55  ;;  %v4511_v34 = vsel %vm12836_vm7, %v4509_v14, %v4510_v20  ;;  %v4512_v12 = vrot.slane %v4510_v20, 4  ;;  %v3260_v29 = vshrl.u32 %v13680_v25, 16 }
 0x1f3   : > { %1345 = vst.msk [vmem:[#allocation2 + $0x208] sm:$0xff] %vm331_vm4, %v1148_v43  ;;  %v1713_v22 = vadd.f32 %v13686_v33, %v1711_v36  ;;  %v2725_v5 = vpop.permute.xlu1 %2724  ;;  %v12260_v27 = vld [vmem:[#allocation4 + $0x18] ss:$12 sps:$4 sm:$0xff]   ;;  %v13746_v13 = vrot.slane %v2321_v19, 4  ;;  %v3571_v52 = vrot.slane %v3569_v10, 4 }
 0x1f4   : > { %v2727_v47 = vpop.permute.xlu0 %2726  ;;  %3426 = vst.msk [vmem:[#allocation4 + $0xa0] sm:$0xf] %vm2030_vm12, %v3249_v63  ;;  %v3254_v62 = vrot.slane %v3253_v2, 4  ;;  %4597 = vst.msk [vmem:[#allocation4 + $0x8c] sm:$0xf] %vm2030_vm12, %v4511_v34  ;;  %v4514_v50 = vsel %vm12836_vm7, %v4512_v12, %v13714_v46  ;;  %v3262_v32 = vrot.slane %v3260_v29, 4 }
 0x1f5   : > { %v1715_v3 = vmax.f32 %v1713_v22, 0.0  ;;  %4303 = vrot.lane.b32.xlu0 %v4133_v56, %s12638_s17  ;;  %4301 = vrot.lane.b32.xlu1 %v4123_v51, %s12638_s17  ;;  %4598 = vst.msk [vmem:[#allocation4 + $0x98] sm:$0xf] %vm2030_vm12, %v4514_v50 }
 0x1f6   : > { %v1153_v58 = vpop.f32.mrb[132].mxu0  ;;  %v3259_v16 = vsel %vm12848_vm10, %v3254_v62, %v13716_v21  ;;  %v3263_v10 = vor.u32 %v3262_v32, %v13716_v21 }
 0x1f7   : > { %v1716_v6 = vpack.c.bf16 %v1715_v3, %v1714_v1  ;;  %1346 = vst.msk [vmem:[#allocation2 + $0x210] sm:$0xff] %vm331_vm4, %v1153_v58  ;;  %v11426_v7 = vpop.f32.mrb[133].mxu0  ;;  %v4286_v8 = vpop.permute.xlu1 %4285  ;;  %v1729_v37 = vld [vmem:[#allocation2 + $0x1f8] ss:$2 sm:$0xff]  ;;  %v1733_v40 = vld [vmem:[#allocation2 + $0x1f9] ss:$2 sm:$0xff] }
 0x1f8   : > { %v1156_v54 = vpop.f32.mrb[134].mxu0  ;;  %v4288_v14 = vpop.permute.xlu0 %4287  ;;  %4366 = vst.msk [vmem:[#allocation4 + $0x28] sm:$0xf] %vm2992_vm0, %v4286_v8  ;;  %v1744_v20 = vmax.f32 %v1729_v37, %v1733_v40 }
 0x1f9   : > { %v1718_v48 = vshrl.u32 %v1716_v6, 16  ;;  %1347 = vst.msk [vmem:[#allocation2 + $0x218] sm:$0xff] %vm331_vm4, %v1156_v54  ;;  %v11427_v24 = vpop.f32.mrb[135].mxu0  ;;  %2458 = vrot.lane.b32.xlu0 %v4133_v56, %s12637_s29  ;;  %2456 = vrot.lane.b32.xlu1 %v4123_v51, %s12637_s29  ;;  %v1721_v9 = vshll.u32 %v1716_v6, 16 }
 0x1fa   : > { %4367 = vst.msk [vmem:[#allocation4 + $0x34] sm:$0xf] %vm2992_vm0, %v4288_v14 }
 0x1fb   : > { %3427 = vst.msk [vmem:[#allocation4 + $0xac] sm:$0xf] %vm2030_vm12, %v3259_v16  ;;  %v1720_v11 = vrot.slane %v1718_v48, 7  ;;  %v2441_v39 = vpop.permute.xlu1 %2440 }
 0x1fc   : > { %v2443_v41 = vpop.permute.xlu0 %2442  ;;  %2518 = vst.msk [vmem:[#allocation4 + $0x54] sm:$0xf] %vm2510_vm13, %v2441_v39 }
 0x1fd   : > { %2519 = vst.msk [vmem:[#allocation4 + $0x60] sm:$0xf] %vm2510_vm13, %v2443_v41  ;;  %v1723_v18 = vor.u32 %v1721_v9, %v1720_v11 }
 0x1fe   : > { %2802 = vst.msk [vmem:[#allocation4 + $0x54] sm:$0xf] %vm2794_vm15, %v2725_v5  ;;  %2803 = vst.msk [vmem:[#allocation4 + $0x60] sm:$0xf] %vm2794_vm15, %v2727_v47  ;;  %v1161_v15 = vpop.f32.mrb[136].mxu0  ;;  %v2324_v47 = vor.u32 %v13697_v23, %v13746_v13 }
 0x1ff   : > { %3000 = vst.msk [vmem:[#allocation4 + $0x54] sm:$0xf] %vm2992_vm0, %v13667_v44  ;;  %v12258_v57 = vld [vmem:[#allocation4 + $0x1c] ss:$12 sps:$4 sm:$0xff]   ;;  %v1726_v26 = vsel %vm12949_vm14, %v1723_v18, %v1725_v49  ;;  %v11430_v17 = vpop.f32.mrb[137].mxu0  ;;  %v3264_v18 = vrot.slane %v3263_v10, 4 }
 0x200   : > { %1348 = vst.msk [vmem:[#allocation2 + $0x220] sm:$0xff] %vm331_vm4, %v1161_v15  ;;  %1727 = vst [vmem:[#allocation3 + $0x48] sm:$0xff] %v1726_v26  ;;  %v13744_v31 = vcombine.high %v1726_v26, %v1726_v26  ;;  %v10048_v28 = vcombine.low %v1726_v26, %v1726_v26  ;;  %v1164_v30 = vpop.f32.mrb[138].mxu0  ;;  %5106 = vmatprep.mubr.bf16.mxu1 %v12258_v57  ;;  %v1731_v51 = vld [vmem:[#allocation2 + $0x208] ss:$2 sm:$0x3f] }
 0x201   : > { %1349 = vst.msk [vmem:[#allocation2 + $0x228] sm:$0xff] %vm331_vm4, %v1164_v30  ;;  %v11431_v44 = vpop.f32.mrb[139].mxu0  ;;  %5107 = vmatmul.mubr.bf16.gmra.mrb[4].mxu1 %v12260_v27  ;;  %v1735_v55 = vld [vmem:[#allocation2 + $0x209] ss:$2 sm:$0x3f]  ;;  %v4138_v13 = vrot.slane %v2324_v47, 4 }
 0x202   : > { %3834 = vrot.lane.b32.xlu1 %v13744_v31, %s12636_s28  ;;  %v3572_v25 = vrot.slane %v10048_v28, 5  ;;  %3832 = vrot.lane.b32.xlu0 %v10048_v28, %s12636_s28  ;;  %v4140_v36 = vshll.u32 %v10048_v28, 16  ;;  %v4144_v43 = vshrl.u32 %v10048_v28, 16  ;;  %v3575_v45 = vrot.slane %v13744_v31, 5 }
 0x203   : > { %v1745_v2 = vmax.f32 %v1731_v51, %v1735_v55  ;;  %v4150_v49 = vshll.u32 %v13744_v31, 16 }
 0x204   : > { %v3819_v53 = vpop.permute.xlu1 %3818  ;;  %v3817_v4 = vpop.permute.xlu0 %3816  ;;  %v3574_v61 = vrot.slane %v3572_v25, 4  ;;  %v13757_v5 = vrot.slane %v4140_v36, 5  ;;  %v4146_v56 = vrot.slane %v4144_v43, 4  ;;  %v3573_v7 = vsel %vm12836_vm7, %v3571_v52, %v3572_v25 }
 0x205   : > { %3894 = vst.msk [vmem:[#allocation4 + $0x4c] sm:$0xf] %vm2794_vm15, %v3817_v4  ;;  %v13795_v51 = vrot.slane %v4150_v49, 5 }
 0x206   : > { %v1169_v22 = vpop.f32.mrb[140].mxu0  ;;  %2942 = vrot.lane.b32.xlu1 %v13744_v31, %s12638_s17  ;;  %2940 = vrot.lane.b32.xlu0 %v10048_v28, %s12638_s17  ;;  %v3576_v8 = vsel %vm12836_vm7, %v3574_v61, %v3575_v45  ;;  %v4147_v48 = vor.u32 %v4146_v56, %v13757_v5  ;;  %v4143_v55 = vsel %vm12848_vm10, %v4138_v13, %v13757_v5 }
 0x207   : > { %v1737_v59 = vld [vmem:[#allocation2 + $0x214] ss:$2 sm:$0xff]  ;;  %v1741_v1 = vld [vmem:[#allocation2 + $0x215] ss:$2 sm:$0xff]  ;;  %1350 = vst.msk [vmem:[#allocation2 + $0x230] sm:$0xff] %vm331_vm4, %v1169_v22  ;;  %v11434_v63 = vpop.f32.mrb[141].mxu0 }
 0x208   : > { %v1746_v3 = vmax.f32 %v1737_v59, %v1741_v1  ;;  %v1172_v34 = vpop.f32.mrb[142].mxu0  ;;  %v13765_v12 = vpop.permute.xlu1 %2926  ;;  %v3030_v58 = vld [vmem:[#allocation3 + $0x48] sm:$0xff]  ;;  %v1739_v62 = vld [vmem:[#allocation2 + $0x224] ss:$2 sm:$0x3f]  ;;  %v4148_v17 = vrot.slane %v4147_v48, 4 }
 0x209   : > { %v1743_v6 = vld [vmem:[#allocation2 + $0x225] ss:$2 sm:$0x3f]  ;;  %1351 = vst.msk [vmem:[#allocation2 + $0x238] sm:$0xff] %vm331_vm4, %v1172_v34  ;;  %v2925_v23 = vpop.permute.xlu0 %2924  ;;  %v9993_v21 = vcombine.low %v3030_v58, %v3030_v58  ;;  %v13774_v50 = vcombine.high %v3030_v58, %v3030_v58  ;;  %v11435_v16 = vpop.f32.mrb[143].mxu0  ;;  %v4398_v19 = vld [vmem:[#allocation3 + $0x48] sm:$0xff] }
 0x20a   : > { %v1748_v54 = vmax.f32 %v1744_v20, %v1746_v3  ;;  %v1747_v14 = vmax.f32 %v1739_v62, %v1743_v6  ;;  %3001 = vst.msk [vmem:[#allocation4 + $0x60] sm:$0xf] %vm2992_vm0, %v2925_v23  ;;  %3638 = vrot.lane.b32.xlu1 %v3573_v7, %s12637_s29  ;;  %3640 = vrot.lane.b32.xlu0 %v3576_v8, %s12637_s29  ;;  %v4515_v59 = vrot.slane %v13714_v46, 4  ;;  %v4154_v6 = vshrl.u32 %v13744_v31, 16 }
 0x20b   : > { %v3266_v24 = vshll.u32 %v9993_v21, 16  ;;  %v3270_v11 = vshrl.u32 %v9993_v21, 16  ;;  %2049 = vst.msk [vmem:[#allocation4 + $0xd8] sm:$0xf] %vm2030_vm12, %v9993_v21  ;;  %2050 = vst.msk [vmem:[#allocation4 + $0xe4] sm:$0xf] %vm2030_vm12, %v13774_v50  ;;  %v10104_v32 = vcombine.low %v4398_v19, %v4398_v19  ;;  %v10105_v61 = vcombine.high %v4398_v19, %v4398_v19 }
 0x20c   : > { %v1750_v9 = vadd.f32 %v13686_v33, %v1748_v54  ;;  %v1749_v39 = vmax.f32 %v1745_v2, %v1747_v14  ;;  %v3623_v41 = vpop.permute.xlu1 %3622  ;;  %v3276_v28 = vshll.u32 %v13774_v50, 16  ;;  %v4153_v56 = vsel %vm12848_vm10, %v4148_v17, %v13795_v51 }
 0x20d   : > { %3699 = vst.msk [vmem:[#allocation4 + $0x58] sm:$0xf] %vm2510_vm13, %v3623_v41  ;;  %v3625_v29 = vpop.permute.xlu0 %3624  ;;  %v3268_v15 = vrot.slane %v3266_v24, 5  ;;  %v3272_v57 = vrot.slane %v3270_v11, 4  ;;  %v4516_v1 = vrot.slane %v10104_v32, 5  ;;  %v13817_v34 = vrot.slane %v10105_v61, 5 }
 0x20e   : > { %v1751_v27 = vadd.f32 %v13686_v33, %v1749_v39  ;;  %v1177_v26 = vpop.f32.mrb[144].mxu0  ;;  %3895 = vst.msk [vmem:[#allocation4 + $0x58] sm:$0xf] %vm2794_vm15, %v3819_v53  ;;  %2744 = vrot.lane.b32.xlu1 %v3573_v7, %s12636_s28  ;;  %2746 = vrot.lane.b32.xlu0 %v3576_v8, %s12636_s28  ;;  %v1752_v37 = vmax.f32 %v1750_v9, 0.0  ;;  %v13806_v20 = vrot.slane %v3276_v28, 5  ;;  %v1763_v7 = vld [vmem:[#allocation3 + $0x50] sm:$0xff] }
 0x20f   : > { %3700 = vst.msk [vmem:[#allocation4 + $0x64] sm:$0xf] %vm2510_vm13, %v3625_v29  ;;  %v11438_v30 = vpop.f32.mrb[145].mxu0  ;;  %v3269_v44 = vsel %vm12848_vm10, %v3264_v18, %v3268_v15  ;;  %v3273_v25 = vor.u32 %v3272_v57, %v3268_v15  ;;  %v4517_v2 = vsel %vm12836_vm7, %v4515_v59, %v4516_v1  ;;  %v4518_v3 = vrot.slane %v4516_v1, 4  ;;  %v12264_v18 = vld [vmem:[#allocation4 + $0x30] ss:$12 sps:$4 sm:$0xff]  }
 0x210   : > { %1352 = vst.msk [vmem:[#allocation2 + $0x240] sm:$0xff] %vm331_vm4, %v1177_v26  ;;  %v1753_v40 = vmax.f32 %v1751_v27, 0.0  ;;  %v1180_v36 = vpop.f32.mrb[146].mxu0  ;;  %v2729_v43 = vpop.permute.xlu1 %2728  ;;  %v4156_v11 = vrot.slane %v4154_v6, 4  ;;  %v3280_v41 = vshrl.u32 %v13774_v50, 16  ;;  %v3577_v29 = vrot.slane %v3575_v45, 4 }
 0x211   : > { %3428 = vst.msk [vmem:[#allocation4 + $0xb8] sm:$0xf] %vm2030_vm12, %v3269_v44  ;;  %v11439_v53 = vpop.f32.mrb[147].mxu0  ;;  %v2731_v4 = vpop.permute.xlu0 %2730  ;;  %v3274_v52 = vrot.slane %v3273_v25, 4  ;;  %4599 = vst.msk [vmem:[#allocation4 + $0xa4] sm:$0xf] %vm2030_vm12, %v4517_v2  ;;  %v4520_v8 = vsel %vm12836_vm7, %v4518_v3, %v13817_v34 }
 0x212   : > { %1353 = vst.msk [vmem:[#allocation2 + $0x248] sm:$0xff] %vm331_vm4, %v1180_v36  ;;  %v1754_v22 = vpack.c.bf16 %v1753_v40, %v1752_v37  ;;  %4305 = vrot.lane.b32.xlu1 %v4143_v55, %s12638_s17  ;;  %4307 = vrot.lane.b32.xlu0 %v4153_v56, %s12638_s17  ;;  %v1767_v19 = vld [vmem:[#allocation2 + $0x230] ss:$2 sm:$0xff]  ;;  %v1771_v57 = vld [vmem:[#allocation2 + $0x231] ss:$2 sm:$0xff]  ;;  %v4157_v17 = vor.u32 %v4156_v11, %v13795_v51  ;;  %v3282_v30 = vrot.slane %v3280_v41, 4 }
 0x213   : > { %v3279_v5 = vsel %vm12848_vm10, %v3274_v52, %v13806_v20  ;;  %4600 = vst.msk [vmem:[#allocation4 + $0xb0] sm:$0xf] %vm2030_vm12, %v4520_v8 }
 0x214   : > { %v1756_v47 = vshrl.u32 %v1754_v22, 16  ;;  %v4290_v63 = vpop.permute.xlu1 %4289  ;;  %3429 = vst.msk [vmem:[#allocation4 + $0xc4] sm:$0xf] %vm2030_vm12, %v3279_v5  ;;  %v1759_v46 = vshll.u32 %v1754_v22, 16 }
 0x215   : > { %v4292_v10 = vpop.permute.xlu0 %4291  ;;  %4368 = vst.msk [vmem:[#allocation4 + $0x40] sm:$0xf] %vm2992_vm0, %v4290_v63 }
 0x216   : > { %v1758_v58 = vrot.slane %v1756_v47, 7  ;;  %v1185_v62 = vpop.f32.mrb[148].mxu0  ;;  %4369 = vst.msk [vmem:[#allocation4 + $0x4c] sm:$0xf] %vm2992_vm0, %v4292_v10  ;;  %2460 = vrot.lane.b32.xlu1 %v4143_v55, %s12637_s29  ;;  %2462 = vrot.lane.b32.xlu0 %v4153_v56, %s12637_s29  ;;  %v4158_v55 = vrot.slane %v4157_v17, 4  ;;  %v3283_v56 = vor.u32 %v3282_v30, %v13806_v20 }
 0x217   : > { %1354 = vst.msk [vmem:[#allocation2 + $0x250] sm:$0xff] %vm331_vm4, %v1185_v62  ;;  %v11442_v23 = vpop.f32.mrb[149].mxu0 }
 0x218   : > { %v1761_v21 = vor.u32 %v1759_v46, %v1758_v58  ;;  %v2445_v54 = vpop.permute.xlu1 %2444  ;;  %v1188_v14 = vpop.f32.mrb[150].mxu0  ;;  %v3284_v23 = vrot.slane %v3283_v56, 4 }
 0x219   : > { %v2447_v16 = vpop.permute.xlu0 %2446  ;;  %2520 = vst.msk [vmem:[#allocation4 + $0x6c] sm:$0xf] %vm2510_vm13, %v2445_v54  ;;  %v11443_v48 = vpop.f32.mrb[151].mxu0  ;;  %v1769_v45 = vld [vmem:[#allocation2 + $0x240] ss:$2 sm:$0x3f] }
 0x21a   : > { %1355 = vst.msk [vmem:[#allocation2 + $0x258] sm:$0xff] %vm331_vm4, %v1188_v14  ;;  %v1764_v24 = vsel %vm12949_vm14, %v1761_v21, %v1763_v7  ;;  %v1773_v51 = vld [vmem:[#allocation2 + $0x241] ss:$2 sm:$0x3f] }
 0x21b   : > { %2521 = vst.msk [vmem:[#allocation4 + $0x78] sm:$0xf] %vm2510_vm13, %v2447_v16  ;;  %1765 = vst [vmem:[#allocation3 + $0x50] sm:$0xff] %v1764_v24  ;;  %v13838_v9 = vcombine.high %v1764_v24, %v1764_v24  ;;  %v10050_v39 = vcombine.low %v1764_v24, %v1764_v24  ;;  %v1783_v20 = vmax.f32 %v1769_v45, %v1773_v51 }
 0x21c   : > { %2804 = vst.msk [vmem:[#allocation4 + $0x6c] sm:$0xf] %vm2794_vm15, %v2729_v43  ;;  %2805 = vst.msk [vmem:[#allocation4 + $0x78] sm:$0xf] %vm2794_vm15, %v2731_v4  ;;  %v12262_v49 = vld [vmem:[#allocation4 + $0x34] ss:$12 sps:$4 sm:$0xff]   ;;  %v1782_v43 = vmax.f32 %v1767_v19, %v1771_v57 }
 0x21d   : > { %3002 = vst.msk [vmem:[#allocation4 + $0x6c] sm:$0xf] %vm2992_vm0, %v13765_v12  ;;  %3838 = vrot.lane.b32.xlu1 %v13838_v9, %s12636_s28  ;;  %3836 = vrot.lane.b32.xlu0 %v10050_v39, %s12636_s28  ;;  %v3578_v15 = vrot.slane %v10050_v39, 5  ;;  %v4160_v27 = vshll.u32 %v10050_v39, 16  ;;  %v4164_v26 = vshrl.u32 %v10050_v39, 16  ;;  %v3581_v4 = vrot.slane %v13838_v9, 5 }
 0x21e   : > { %v1193_v12 = vpop.f32.mrb[152].mxu0  ;;  %5114 = vmatprep.mubr.bf16.mxu1 %v12262_v49  ;;  %v4170_v5 = vshll.u32 %v13838_v9, 16 }
 0x21f   : > { %1356 = vst.msk [vmem:[#allocation2 + $0x260] sm:$0xff] %vm331_vm4, %v1193_v12  ;;  %v11446_v50 = vpop.f32.mrb[153].mxu0  ;;  %v3823_v28 = vpop.permute.xlu1 %3822  ;;  %5115 = vmatmul.mubr.bf16.gmra.mrb[8].mxu1 %v12264_v18  ;;  %v3580_v25 = vrot.slane %v3578_v15, 4  ;;  %v13848_v32 = vrot.slane %v4160_v27, 5  ;;  %v4166_v31 = vrot.slane %v4164_v26, 4  ;;  %v3579_v22 = vsel %vm12836_vm7, %v3577_v29, %v3578_v15 }
 0x220   : > { %v1196_v13 = vpop.f32.mrb[154].mxu0  ;;  %v3821_v44 = vpop.permute.xlu0 %3820 }
 0x221   : > { %v1775_v37 = vld [vmem:[#allocation2 + $0x24c] ss:$2 sm:$0xff]  ;;  %v1779_v40 = vld [vmem:[#allocation2 + $0x24d] ss:$2 sm:$0xff]  ;;  %1357 = vst.msk [vmem:[#allocation2 + $0x268] sm:$0xff] %vm331_vm4, %v1196_v13  ;;  %v11447_v36 = vpop.f32.mrb[155].mxu0  ;;  %2946 = vrot.lane.b32.xlu1 %v13838_v9, %s12638_s17  ;;  %2944 = vrot.lane.b32.xlu0 %v10050_v39, %s12638_s17  ;;  %v3582_v1 = vsel %vm12836_vm7, %v3580_v25, %v3581_v4  ;;  %v4167_v47 = vor.u32 %v4166_v31, %v13848_v32 }
 0x222   : > { %3896 = vst.msk [vmem:[#allocation4 + $0x64] sm:$0xf] %vm2794_vm15, %v3821_v44  ;;  %v1784_v53 = vmax.f32 %v1775_v37, %v1779_v40  ;;  %v3031_v52 = vld [vmem:[#allocation3 + $0x50] sm:$0xff]  ;;  %v13882_v39 = vrot.slane %v4170_v5, 5  ;;  %v4163_v12 = vsel %vm12848_vm10, %v4158_v55, %v13848_v32  ;;  %v4521_v36 = vrot.slane %v13817_v34, 4 }
 0x223   : > { %v13856_v61 = vpop.permute.xlu1 %2930  ;;  %v9995_v10 = vcombine.low %v3031_v52, %v3031_v52  ;;  %v13870_v2 = vcombine.high %v3031_v52, %v3031_v52  ;;  %v4399_v7 = vld [vmem:[#allocation3 + $0x50] sm:$0xff]  ;;  %v4168_v54 = vrot.slane %v4167_v47, 4 }
 0x224   : > { %v2929_v59 = vpop.permute.xlu0 %2928  ;;  %v1786_v63 = vmax.f32 %v1782_v43, %v1784_v53  ;;  %v10106_v29 = vcombine.low %v4399_v7, %v4399_v7  ;;  %v10107_v13 = vcombine.high %v4399_v7, %v4399_v7 }
 0x225   : > { %3003 = vst.msk [vmem:[#allocation4 + $0x78] sm:$0xf] %vm2992_vm0, %v2929_v59  ;;  %3642 = vrot.lane.b32.xlu1 %v3579_v22, %s12637_s29  ;;  %3644 = vrot.lane.b32.xlu0 %v3582_v1, %s12637_s29  ;;  %v3286_v14 = vshll.u32 %v9995_v10, 16  ;;  %v3290_v16 = vshrl.u32 %v9995_v10, 16  ;;  %v3296_v19 = vshll.u32 %v13870_v2, 16  ;;  %v4173_v26 = vsel %vm12848_vm10, %v4168_v54, %v13882_v39 }
 0x226   : > { %v1777_v3 = vld [vmem:[#allocation2 + $0x25c] ss:$2 sm:$0x3f]  ;;  %v1781_v58 = vld [vmem:[#allocation2 + $0x25d] ss:$2 sm:$0x3f]  ;;  %v1788_v48 = vadd.f32 %v13686_v33, %v1786_v63 }
 0x227   : > { %v1785_v46 = vmax.f32 %v1777_v3, %v1781_v58  ;;  %v1201_v62 = vpop.f32.mrb[156].mxu0  ;;  %v3627_v6 = vpop.permute.xlu1 %3626  ;;  %2051 = vst.msk [vmem:[#allocation4 + $0xf0] sm:$0xf] %vm2030_vm12, %v9995_v10  ;;  %2052 = vst.msk [vmem:[#allocation4 + $0xfc] sm:$0xf] %vm2030_vm12, %v13870_v2  ;;  %v3288_v49 = vrot.slane %v3286_v14, 5 }
 0x228   : > { %1358 = vst.msk [vmem:[#allocation2 + $0x270] sm:$0xff] %vm331_vm4, %v1201_v62  ;;  %v11450_v8 = vpop.f32.mrb[157].mxu0  ;;  %v3629_v21 = vpop.permute.xlu0 %3628  ;;  %v3292_v18 = vrot.slane %v3290_v16, 4  ;;  %v13898_v32 = vrot.slane %v3296_v19, 5  ;;  %v4522_v31 = vrot.slane %v10106_v29, 5  ;;  %v13913_v56 = vrot.slane %v10107_v13, 5 }
 0x229   : > { %3701 = vst.msk [vmem:[#allocation4 + $0x70] sm:$0xf] %vm2510_vm13, %v3627_v6  ;;  %v1787_v24 = vmax.f32 %v1783_v20, %v1785_v46  ;;  %v1204_v11 = vpop.f32.mrb[158].mxu0  ;;  %3702 = vst.msk [vmem:[#allocation4 + $0x7c] sm:$0xf] %vm2510_vm13, %v3629_v21  ;;  %2750 = vrot.lane.b32.xlu0 %v3582_v1, %s12636_s28  ;;  %2748 = vrot.lane.b32.xlu1 %v3579_v22, %s12636_s28  ;;  %v3289_v17 = vsel %vm12848_vm10, %v3284_v23, %v3288_v49  ;;  %v1801_v10 = vld [vmem:[#allocation3 + $0x58] sm:$0xff] }
 0x22a   : > { %3897 = vst.msk [vmem:[#allocation4 + $0x70] sm:$0xf] %vm2794_vm15, %v3823_v28  ;;  %v11451_v41 = vpop.f32.mrb[159].mxu0  ;;  %v3293_v50 = vor.u32 %v3292_v18, %v3288_v49  ;;  %v1790_v28 = vmax.f32 %v1788_v48, 0.0  ;;  %v4523_v34 = vsel %vm12836_vm7, %v4521_v36, %v4522_v31  ;;  %v4524_v22 = vrot.slane %v4522_v31, 4 }
 0x22b   : > { %1359 = vst.msk [vmem:[#allocation2 + $0x278] sm:$0xff] %vm331_vm4, %v1204_v11  ;;  %v1789_v15 = vadd.f32 %v13686_v33, %v1787_v24  ;;  %v2733_v57 = vpop.permute.xlu1 %2732  ;;  %v4174_v3 = vshrl.u32 %v13838_v9, 16  ;;  %v3300_v58 = vshrl.u32 %v13870_v2, 16  ;;  %v12268_v6 = vld [vmem:[#allocation4 + $0x48] ss:$12 sps:$4 sm:$0xff]  }
 0x22c   : > { %v2735_v27 = vpop.permute.xlu0 %2734  ;;  %3430 = vst.msk [vmem:[#allocation4 + $0xd0] sm:$0xf] %vm2030_vm12, %v3289_v17  ;;  %v3294_v25 = vrot.slane %v3293_v50, 4  ;;  %4601 = vst.msk [vmem:[#allocation4 + $0xbc] sm:$0xf] %vm2030_vm12, %v4523_v34  ;;  %v4526_v63 = vsel %vm12836_vm7, %v4524_v22, %v13913_v56 }
 0x22d   : > { %v1791_v30 = vmax.f32 %v1789_v15, 0.0  ;;  %4311 = vrot.lane.b32.xlu0 %v4173_v26, %s12638_s17  ;;  %4309 = vrot.lane.b32.xlu1 %v4163_v12, %s12638_s17  ;;  %4602 = vst.msk [vmem:[#allocation4 + $0xc8] sm:$0xf] %vm2030_vm12, %v4526_v63  ;;  %v13933_v14 = vrot.slane %v4174_v3, 4  ;;  %v3302_v24 = vrot.slane %v3300_v58, 4  ;;  %v3583_v15 = vrot.slane %v3581_v4, 4 }
 0x22e   : > { %v1209_v44 = vpop.f32.mrb[160].mxu0  ;;  %v3299_v53 = vsel %vm12848_vm10, %v3294_v25, %v13898_v32  ;;  %v12289_v63 = vld [vmem:[%s15643_s3 + $0x80] sm:$0xff]  }
 0x22f   : > { %v1792_v45 = vpack.c.bf16 %v1791_v30, %v1790_v28  ;;  %1360 = vst.msk [vmem:[#allocation2 + $0x280] sm:$0xff] %vm331_vm4, %v1209_v44  ;;  %v11454_v37 = vpop.f32.mrb[161].mxu0  ;;  %v4294_v40 = vpop.permute.xlu1 %4293  ;;  %v1809_v11 = vld [vmem:[#allocation2 + $0x269] ss:$2 sm:$0xff]  ;;  %v4177_v9 = vor.u32 %v13933_v14, %v13882_v39  ;;  %v3303_v4 = vor.u32 %v3302_v24, %v13898_v32  ;;  %11488 = vmatprep.subr.bf16.mxu1 %v12289_v63 }
 0x230   : > { %v1212_v43 = vpop.f32.mrb[162].mxu0  ;;  %v4296_v51 = vpop.permute.xlu0 %4295  ;;  %4370 = vst.msk [vmem:[#allocation4 + $0x58] sm:$0xf] %vm2992_vm0, %v4294_v40  ;;  %11489 = vmatpush3.bf16.msra.mxu1 %v12289_v63 }
 0x231   : > { %v1794_v55 = vshrl.u32 %v1792_v45, 16  ;;  %1361 = vst.msk [vmem:[#allocation2 + $0x288] sm:$0xff] %vm331_vm4, %v1212_v43  ;;  %v11455_v52 = vpop.f32.mrb[163].mxu0  ;;  %2466 = vrot.lane.b32.xlu0 %v4173_v26, %s12637_s29  ;;  %2464 = vrot.lane.b32.xlu1 %v4163_v12, %s12637_s29  ;;  %v1797_v1 = vshll.u32 %v1792_v45, 16  ;;  %v3304_v3 = vrot.slane %v3303_v4, 4 }
 0x232   : > { %4371 = vst.msk [vmem:[#allocation4 + $0x64] sm:$0xf] %vm2992_vm0, %v4296_v51 }
 0x233   : > { %3431 = vst.msk [vmem:[#allocation4 + $0xdc] sm:$0xf] %vm2030_vm12, %v3299_v53  ;;  %v1796_v59 = vrot.slane %v1794_v55, 7  ;;  %v2449_v47 = vpop.permute.xlu1 %2448 }
 0x234   : > { %v2451_v5 = vpop.permute.xlu0 %2450  ;;  %2522 = vst.msk [vmem:[#allocation4 + $0x84] sm:$0xf] %vm2510_vm13, %v2449_v47 }
 0x235   : > { %v1799_v20 = vor.u32 %v1797_v1, %v1796_v59  ;;  %2523 = vst.msk [vmem:[#allocation4 + $0x90] sm:$0xf] %vm2510_vm13, %v2451_v5 }
 0x236   : > { %2806 = vst.msk [vmem:[#allocation4 + $0x84] sm:$0xf] %vm2794_vm15, %v2733_v57  ;;  %2807 = vst.msk [vmem:[#allocation4 + $0x90] sm:$0xf] %vm2794_vm15, %v2735_v27  ;;  %v1217_v46 = vpop.f32.mrb[164].mxu0 }
 0x237   : > { %3004 = vst.msk [vmem:[#allocation4 + $0x84] sm:$0xf] %vm2992_vm0, %v13856_v61  ;;  %v12266_v62 = vld [vmem:[#allocation4 + $0x4c] ss:$12 sps:$4 sm:$0xff]   ;;  %v1802_v23 = vsel %vm12949_vm14, %v1799_v20, %v1801_v10  ;;  %v11458_v7 = vpop.f32.mrb[165].mxu0 }
 0x238   : > { %1362 = vst.msk [vmem:[#allocation2 + $0x290] sm:$0xff] %vm331_vm4, %v1217_v46  ;;  %1803 = vst [vmem:[#allocation3 + $0x58] sm:$0xff] %v1802_v23  ;;  %v13931_v8 = vcombine.high %v1802_v23, %v1802_v23  ;;  %v10052_v21 = vcombine.low %v1802_v23, %v1802_v23  ;;  %v1220_v54 = vpop.f32.mrb[166].mxu0  ;;  %5122 = vmatprep.mubr.bf16.mxu1 %v12266_v62  ;;  %v1805_v61 = vld [vmem:[#allocation2 + $0x268] ss:$2 sm:$0xff] }
 0x239   : > { %v1807_v16 = vld [vmem:[#allocation2 + $0x278] ss:$2 sm:$0x3f]  ;;  %1363 = vst.msk [vmem:[#allocation2 + $0x298] sm:$0xff] %vm331_vm4, %v1220_v54  ;;  %v11459_v2 = vpop.f32.mrb[167].mxu0  ;;  %5123 = vmatmul.mubr.bf16.gmra.mrb[12].mxu1 %v12268_v6  ;;  %v1820_v17 = vmax.f32 %v1805_v61, %v1809_v11  ;;  %v4178_v61 = vrot.slane %v4177_v9, 4 }
 0x23a   : > { %3842 = vrot.lane.b32.xlu1 %v13931_v8, %s12636_s28  ;;  %v3584_v48 = vrot.slane %v10052_v21, 5  ;;  %3840 = vrot.lane.b32.xlu0 %v10052_v21, %s12636_s28  ;;  %v4180_v41 = vshll.u32 %v10052_v21, 16  ;;  %v4184_v49 = vshrl.u32 %v10052_v21, 16  ;;  %v1811_v18 = vld [vmem:[#allocation2 + $0x279] ss:$2 sm:$0x3f] }
 0x23b   : > { %v1821_v50 = vmax.f32 %v1807_v16, %v1811_v18  ;;  %v3587_v45 = vrot.slane %v13931_v8, 5  ;;  %v4190_v59 = vshll.u32 %v13931_v8, 16 }
 0x23c   : > { %v3827_v19 = vpop.permute.xlu1 %3826  ;;  %v3825_v29 = vpop.permute.xlu0 %3824  ;;  %v13942_v57 = vrot.slane %v4180_v41, 5  ;;  %v4186_v12 = vrot.slane %v4184_v49, 4  ;;  %v3586_v26 = vrot.slane %v3584_v48, 4  ;;  %v3585_v51 = vsel %vm12836_vm7, %v3583_v15, %v3584_v48 }
 0x23d   : > { %3898 = vst.msk [vmem:[#allocation4 + $0x7c] sm:$0xf] %vm2794_vm15, %v3825_v29  ;;  %v13988_v14 = vrot.slane %v4190_v59, 5 }
 0x23e   : > { %v1225_v27 = vpop.f32.mrb[168].mxu0  ;;  %2950 = vrot.lane.b32.xlu1 %v13931_v8, %s12638_s17  ;;  %2948 = vrot.lane.b32.xlu0 %v10052_v21, %s12638_s17  ;;  %v4187_v53 = vor.u32 %v4186_v12, %v13942_v57  ;;  %v3588_v22 = vsel %vm12836_vm7, %v3586_v26, %v3587_v45  ;;  %v4527_v26 = vrot.slane %v13913_v56, 4 }
 0x23f   : > { %v1813_v28 = vld [vmem:[#allocation2 + $0x284] ss:$2 sm:$0xff]  ;;  %v1817_v30 = vld [vmem:[#allocation2 + $0x285] ss:$2 sm:$0xff]  ;;  %1364 = vst.msk [vmem:[#allocation2 + $0x2a0] sm:$0xff] %vm331_vm4, %v1225_v27  ;;  %v11462_v13 = vpop.f32.mrb[169].mxu0 }
 0x240   : > { %v1822_v44 = vmax.f32 %v1813_v28, %v1817_v30  ;;  %v1228_v25 = vpop.f32.mrb[170].mxu0  ;;  %v13951_v31 = vpop.permute.xlu1 %2934  ;;  %v3032_v37 = vld [vmem:[#allocation3 + $0x58] sm:$0xff]  ;;  %v1815_v40 = vld [vmem:[#allocation2 + $0x294] ss:$2 sm:$0x3f]  ;;  %v4188_v46 = vrot.slane %v4187_v53, 4 }
 0x241   : > { %v1819_v36 = vld [vmem:[#allocation2 + $0x295] ss:$2 sm:$0x3f]  ;;  %1365 = vst.msk [vmem:[#allocation2 + $0x2a8] sm:$0xff] %vm331_vm4, %v1228_v25  ;;  %v2933_v43 = vpop.permute.xlu0 %2932  ;;  %v13958_v39 = vcombine.low %v3032_v37, %v3032_v37  ;;  %v13960_v32 = vcombine.high %v3032_v37, %v3032_v37  ;;  %v11463_v34 = vpop.f32.mrb[171].mxu0 }
 0x242   : > { %v1824_v55 = vmax.f32 %v1820_v17, %v1822_v44  ;;  %v1823_v52 = vmax.f32 %v1815_v40, %v1819_v36  ;;  %3005 = vst.msk [vmem:[#allocation4 + $0x90] sm:$0xf] %vm2992_vm0, %v2933_v43  ;;  %3646 = vrot.lane.b32.xlu1 %v3585_v51, %s12637_s29  ;;  %3648 = vrot.lane.b32.xlu0 %v3588_v22, %s12637_s29  ;;  %v1839_v37 = vld [vmem:[#allocation3 + $0x60] sm:$0xff]  ;;  %v4194_v34 = vshrl.u32 %v13931_v8, 16 }
 0x243   : > { %v3306_v1 = vshll.u32 %v13958_v39, 16  ;;  %v3310_v47 = vshrl.u32 %v13958_v39, 16  ;;  %2053 = vst.msk [vmem:[#allocation4 + $0x108] sm:$0xf] %vm2030_vm12, %v13958_v39  ;;  %2054 = vst.msk [vmem:[#allocation4 + $0x114] sm:$0xf] %vm2030_vm12, %v13960_v32  ;;  %v4193_v18 = vsel %vm12848_vm10, %v4188_v46, %v13988_v14 }
 0x244   : > { %v1826_v5 = vadd.f32 %v13686_v33, %v1824_v55  ;;  %v1825_v10 = vmax.f32 %v1821_v50, %v1823_v52  ;;  %v3631_v20 = vpop.permute.xlu1 %3630  ;;  %v3316_v21 = vshll.u32 %v13960_v32, 16  ;;  %v4528_v27 = vrot.slane %v13958_v39, 5 }
 0x245   : > { %3703 = vst.msk [vmem:[#allocation4 + $0x88] sm:$0xf] %vm2510_vm13, %v3631_v20  ;;  %v3633_v58 = vpop.permute.xlu0 %3632  ;;  %v3308_v62 = vrot.slane %v3306_v1, 5  ;;  %v3312_v6 = vrot.slane %v3310_v47, 4  ;;  %v4531_v9 = vrot.slane %v13960_v32, 5 }
 0x246   : > { %v1827_v23 = vadd.f32 %v13686_v33, %v1825_v10  ;;  %v1233_v7 = vpop.f32.mrb[172].mxu0  ;;  %3899 = vst.msk [vmem:[#allocation4 + $0x88] sm:$0xf] %vm2794_vm15, %v3827_v19  ;;  %2752 = vrot.lane.b32.xlu1 %v3585_v51, %s12636_s28  ;;  %2754 = vrot.lane.b32.xlu0 %v3588_v22, %s12636_s28  ;;  %v1828_v2 = vmax.f32 %v1826_v5, 0.0  ;;  %v4183_v19 = vsel %vm12848_vm10, %v4178_v61, %v13942_v57  ;;  %v14001_v12 = vrot.slane %v3316_v21, 5 }
 0x247   : > { %3704 = vst.msk [vmem:[#allocation4 + $0x94] sm:$0xf] %vm2510_vm13, %v3633_v58  ;;  %v11466_v54 = vpop.f32.mrb[173].mxu0  ;;  %v3309_v33 = vsel %vm12848_vm10, %v3304_v3, %v3308_v62  ;;  %v3313_v16 = vor.u32 %v3312_v6, %v3308_v62  ;;  %v4529_v57 = vsel %vm12836_vm7, %v4527_v26, %v4528_v27  ;;  %v4530_v13 = vrot.slane %v4528_v27, 4  ;;  %v12272_v47 = vld [vmem:[#allocation4 + $0x60] ss:$12 sps:$4 sm:$0xff]  }
 0x248   : > { %1366 = vst.msk [vmem:[#allocation2 + $0x2b0] sm:$0xff] %vm331_vm4, %v1233_v7  ;;  %v1829_v48 = vmax.f32 %v1827_v23, 0.0  ;;  %v1236_v24 = vpop.f32.mrb[174].mxu0  ;;  %v2737_v11 = vpop.permute.xlu1 %2736  ;;  %v3320_v51 = vshrl.u32 %v13960_v32, 16  ;;  %v1843_v5 = vld [vmem:[#allocation2 + $0x2a0] ss:$2 sm:$0xff] }
 0x249   : > { %3432 = vst.msk [vmem:[#allocation4 + $0xe8] sm:$0xf] %vm2030_vm12, %v3309_v33  ;;  %v11467_v41 = vpop.f32.mrb[175].mxu0  ;;  %v2739_v49 = vpop.permute.xlu0 %2738  ;;  %v3314_v29 = vrot.slane %v3313_v16, 4  ;;  %4603 = vst.msk [vmem:[#allocation4 + $0xd4] sm:$0xf] %vm2030_vm12, %v4529_v57  ;;  %v4532_v40 = vsel %vm12836_vm7, %v4530_v13, %v4531_v9 }
 0x24a   : > { %1367 = vst.msk [vmem:[#allocation2 + $0x2b8] sm:$0xff] %vm331_vm4, %v1236_v24  ;;  %v1830_v15 = vpack.c.bf16 %v1829_v48, %v1828_v2  ;;  %4313 = vrot.lane.b32.xlu1 %v4183_v19, %s12638_s17  ;;  %4315 = vrot.lane.b32.xlu0 %v4193_v18, %s12638_s17  ;;  %v3322_v63 = vrot.slane %v3320_v51, 4  ;;  %v3589_v10 = vrot.slane %v3587_v45, 4  ;;  %v1847_v3 = vld [vmem:[#allocation2 + $0x2a1] ss:$2 sm:$0xff]  ;;  %v4196_v62 = vrot.slane %v4194_v34, 4 }
 0x24b   : > { %v3319_v28 = vsel %vm12848_vm10, %v3314_v29, %v14001_v12  ;;  %4604 = vst.msk [vmem:[#allocation4 + $0xe0] sm:$0xf] %vm2030_vm12, %v4532_v40  ;;  %v1858_v24 = vmax.f32 %v1843_v5, %v1847_v3  ;;  %v14068_v40 = vld [vmem:[%s15642_s2] ss:$0 sm:$0xff] }
 0x24c   : > { %v1832_v17 = vshrl.u32 %v1830_v15, 16  ;;  %v4298_v50 = vpop.permute.xlu1 %4297  ;;  %3433 = vst.msk [vmem:[#allocation4 + $0xf4] sm:$0xf] %vm2030_vm12, %v3319_v28  ;;  %v1835_v44 = vshll.u32 %v1830_v15, 16  ;;  %v3323_v8 = vor.u32 %v3322_v63, %v14001_v12 }
 0x24d   : > { %v4300_v30 = vpop.permute.xlu0 %4299  ;;  %4372 = vst.msk [vmem:[#allocation4 + $0x70] sm:$0xf] %vm2992_vm0, %v4298_v50 }
 0x24e   : > { %v1834_v4 = vrot.slane %v1832_v17, 7  ;;  %v1241_v56 = vpop.f32.mrb[176].mxu0  ;;  %4373 = vst.msk [vmem:[#allocation4 + $0x7c] sm:$0xf] %vm2992_vm0, %v4300_v30  ;;  %2468 = vrot.lane.b32.xlu1 %v4183_v19, %s12637_s29  ;;  %2470 = vrot.lane.b32.xlu0 %v4193_v18, %s12637_s29  ;;  %v4197_v18 = vor.u32 %v4196_v62, %v13988_v14  ;;  %v3324_v50 = vrot.slane %v3323_v8, 4 }
 0x24f   : > { %1368 = vst.msk [vmem:[#allocation2 + $0x2c0] sm:$0xff] %vm331_vm4, %v1241_v56  ;;  %v11470_v25 = vpop.f32.mrb[177].mxu0 }
 0x250   : > { %v1837_v36 = vor.u32 %v1835_v44, %v1834_v4  ;;  %v2453_v43 = vpop.permute.xlu1 %2452  ;;  %v1244_v53 = vpop.f32.mrb[178].mxu0 }
 0x251   : > { %v2455_v39 = vpop.permute.xlu0 %2454  ;;  %2524 = vst.msk [vmem:[#allocation4 + $0x9c] sm:$0xf] %vm2510_vm13, %v2453_v43  ;;  %v11471_v55 = vpop.f32.mrb[179].mxu0  ;;  %v1845_v45 = vld [vmem:[#allocation2 + $0x2b0] ss:$2 sm:$0x3f] }
 0x252   : > { %1369 = vst.msk [vmem:[#allocation2 + $0x2c8] sm:$0xff] %vm331_vm4, %v1244_v53  ;;  %v1840_v52 = vsel %vm12949_vm14, %v1837_v36, %v1839_v37 }
 0x253   : > { %2525 = vst.msk [vmem:[#allocation4 + $0xa8] sm:$0xf] %vm2510_vm13, %v2455_v39  ;;  %1841 = vst [vmem:[#allocation3 + $0x60] sm:$0xff] %v1840_v52  ;;  %v14035_v22 = vcombine.high %v1840_v52, %v1840_v52  ;;  %v10054_v59 = vcombine.low %v1840_v52, %v1840_v52  ;;  %v4198_v52 = vrot.slane %v4197_v18, 4 }
 0x254   : > { %2808 = vst.msk [vmem:[#allocation4 + $0x9c] sm:$0xf] %vm2794_vm15, %v2737_v11  ;;  %2809 = vst.msk [vmem:[#allocation4 + $0xa8] sm:$0xf] %vm2794_vm15, %v2739_v49  ;;  %v12270_v1 = vld [vmem:[#allocation4 + $0x64] ss:$12 sps:$4 sm:$0xff]  }
 0x255   : > { %3006 = vst.msk [vmem:[#allocation4 + $0x9c] sm:$0xf] %vm2992_vm0, %v13951_v31  ;;  %3846 = vrot.lane.b32.xlu1 %v14035_v22, %s12636_s28  ;;  %3844 = vrot.lane.b32.xlu0 %v10054_v59, %s12636_s28  ;;  %v3590_v20 = vrot.slane %v10054_v59, 5  ;;  %v4200_v31 = vshll.u32 %v10054_v59, 16  ;;  %v4204_v46 = vshrl.u32 %v10054_v59, 16  ;;  %v3593_v49 = vrot.slane %v14035_v22, 5 }
 0x256   : > { %v1249_v58 = vpop.f32.mrb[180].mxu0  ;;  %5130 = vmatprep.mubr.bf16.mxu1 %v12270_v1  ;;  %v1849_v11 = vld [vmem:[#allocation2 + $0x2b1] ss:$2 sm:$0x3f]  ;;  %v4210_v14 = vshll.u32 %v14035_v22, 16  ;;  %v4533_v1 = vrot.slane %v4531_v9, 4 }
 0x257   : > { %1370 = vst.msk [vmem:[#allocation2 + $0x2d0] sm:$0xff] %vm331_vm4, %v1249_v58  ;;  %v11474_v6 = vpop.f32.mrb[181].mxu0  ;;  %v3831_v23 = vpop.permute.xlu1 %3830  ;;  %5131 = vmatmul.mubr.bf16.gmra.mrb[16].mxu1 %v12272_v47  ;;  %v3592_v54 = vrot.slane %v3590_v20, 4  ;;  %v4202_v61 = vrot.slane %v4200_v31, 5  ;;  %v4206_v33 = vrot.slane %v4204_v46, 4  ;;  %v3591_v26 = vsel %vm12836_vm7, %v3589_v10, %v3590_v20 }
 0x258   : > { %v1252_v7 = vpop.f32.mrb[182].mxu0  ;;  %v3829_v21 = vpop.permute.xlu0 %3828  ;;  %v1859_v28 = vmax.f32 %v1845_v45, %v1849_v11  ;;  %v14080_v55 = vrot.slane %v4210_v14, 5  ;;  %v3929_v45 = vld [vmem:[#allocation3 + $0x78] sm:$0xff]  ;;  %v1877_v11 = vld [vmem:[#allocation3 + $0x68] sm:$0xff] }
 0x259   : > { %v1851_v16 = vld [vmem:[#allocation2 + $0x2bc] ss:$2 sm:$0xff]  ;;  %v1855_v2 = vld [vmem:[#allocation2 + $0x2bd] ss:$2 sm:$0xff]  ;;  %1371 = vst.msk [vmem:[#allocation2 + $0x2d8] sm:$0xff] %vm331_vm4, %v1252_v7  ;;  %v11475_v48 = vpop.f32.mrb[183].mxu0  ;;  %2954 = vrot.lane.b32.xlu1 %v14035_v22, %s12638_s17  ;;  %2952 = vrot.lane.b32.xlu0 %v10054_v59, %s12638_s17  ;;  %v4207_v29 = vor.u32 %v4206_v33, %v4202_v61  ;;  %v3594_v17 = vsel %vm12836_vm7, %v3592_v54, %v3593_v49 }
 0x25a   : > { %3900 = vst.msk [vmem:[#allocation4 + $0x94] sm:$0xf] %vm2794_vm15, %v3829_v21  ;;  %v1860_v41 = vmax.f32 %v1851_v16, %v1855_v2  ;;  %v1930_v15 = vld [vmem:[#allocation3 + $0x60] sm:$0xff]  ;;  %v3329_v59 = vsel %vm12848_vm10, %v3324_v50, %v4202_v61  ;;  %v4203_v10 = vsel %vm12848_vm10, %v4198_v52, %v4202_v61  ;;  %v14115_v18 = vcombine.low %v3929_v45, %v3929_v45 }
 0x25b   : > { %v14051_v19 = vpop.permute.xlu1 %2938  ;;  %v9888_v13 = vcombine.low %v1930_v15, %v1930_v15  ;;  %v14063_v4 = vcombine.high %v1930_v15, %v1930_v15  ;;  %v4208_v37 = vrot.slane %v4207_v29, 4  ;;  %3434 = vst.msk [vmem:[#allocation4 + $0x100] sm:$0xf] %vm2030_vm12, %v3329_v59  ;;  %v4214_v29 = vshrl.u32 %v14035_v22, 16 }
 0x25c   : > { %v1862_v12 = vmax.f32 %v1858_v24, %v1860_v41  ;;  %v2937_v27 = vpop.permute.xlu0 %2936 }
 0x25d   : > { %3007 = vst.msk [vmem:[#allocation4 + $0xa8] sm:$0xf] %vm2992_vm0, %v2937_v27  ;;  %3650 = vrot.lane.b32.xlu1 %v3591_v26, %s12637_s29  ;;  %3652 = vrot.lane.b32.xlu0 %v3594_v17, %s12637_s29  ;;  %v4213_v5 = vsel %vm12848_vm10, %v4208_v37, %v14080_v55  ;;  %v4534_v20 = vrot.slane %v9888_v13, 5  ;;  %v4537_v46 = vrot.slane %v14063_v4, 5  ;;  %v12276_v27 = vld [vmem:[#allocation4 + $0x78] ss:$12 sps:$4 sm:$0xff]  }
 0x25e   : > { %v1853_v30 = vld [vmem:[#allocation2 + $0x2cc] ss:$2 sm:$0x3f]  ;;  %v1857_v57 = vld [vmem:[#allocation2 + $0x2cd] ss:$2 sm:$0x3f]  ;;  %v1864_v36 = vadd.f32 %v14068_v40, %v1862_v12 }
 0x25f   : > { %v1861_v44 = vmax.f32 %v1853_v30, %v1857_v57  ;;  %v1257_v56 = vpop.f32.mrb[184].mxu0  ;;  %v3635_v25 = vpop.permute.xlu1 %3634  ;;  %2055 = vst.msk [vmem:[#allocation4 + $0x120] sm:$0xf] %vm2030_vm12, %v9888_v13  ;;  %2056 = vst.msk [vmem:[#allocation4 + $0x12c] sm:$0xf] %vm2030_vm12, %v14063_v4  ;;  %v4535_v32 = vsel %vm12836_vm7, %v4533_v1, %v4534_v20  ;;  %v4536_v9 = vrot.slane %v4534_v20, 4 }
 0x260   : > { %1372 = vst.msk [vmem:[#allocation2 + $0x2e0] sm:$0xff] %vm331_vm4, %v1257_v56  ;;  %v11478_v43 = vpop.f32.mrb[185].mxu0  ;;  %v3637_v51 = vpop.permute.xlu0 %3636  ;;  %v1866_v3 = vmax.f32 %v1864_v36, 0.0  ;;  %v4552_v30 = vrot.slane %v14115_v18, 5  ;;  %v4216_v56 = vrot.slane %v4214_v29, 4 }
 0x261   : > { %3705 = vst.msk [vmem:[#allocation4 + $0xa0] sm:$0xf] %vm2510_vm13, %v3635_v25  ;;  %v1863_v53 = vmax.f32 %v1859_v28, %v1861_v44  ;;  %v1260_v39 = vpop.f32.mrb[186].mxu0  ;;  %3706 = vst.msk [vmem:[#allocation4 + $0xac] sm:$0xf] %vm2510_vm13, %v3637_v51  ;;  %2758 = vrot.lane.b32.xlu0 %v3594_v17, %s12636_s28  ;;  %2756 = vrot.lane.b32.xlu1 %v3591_v26, %s12636_s28  ;;  %v4538_v21 = vsel %vm12836_vm7, %v4536_v9, %v4537_v46 }
 0x262   : > { %3901 = vst.msk [vmem:[#allocation4 + $0xa0] sm:$0xf] %vm2794_vm15, %v3831_v23  ;;  %v11479_v34 = vpop.f32.mrb[187].mxu0  ;;  %v14135_v51 = vcombine.high %v3929_v45, %v3929_v45  ;;  %v4217_v59 = vor.u32 %v4216_v56, %v14080_v55  ;;  %v4539_v45 = vrot.slane %v4537_v46, 4 }
 0x263   : > { %1373 = vst.msk [vmem:[#allocation2 + $0x2e8] sm:$0xff] %vm331_vm4, %v1260_v39  ;;  %v1865_v47 = vadd.f32 %v14068_v40, %v1863_v53  ;;  %v2741_v63 = vpop.permute.xlu1 %2740 }
 0x264   : > { %v2743_v58 = vpop.permute.xlu0 %2742  ;;  %4605 = vst.msk [vmem:[#allocation4 + $0xec] sm:$0xf] %vm2030_vm12, %v4535_v32  ;;  %3435 = vst.msk [vmem:[#allocation4 + $0x10c] sm:$0xf] %vm2030_vm12, %v4213_v5 }
 0x265   : > { %v1867_v31 = vmax.f32 %v1865_v47, 0.0  ;;  %4319 = vrot.lane.b32.xlu0 %v4213_v5, %s12638_s17  ;;  %4317 = vrot.lane.b32.xlu1 %v4203_v10, %s12638_s17  ;;  %4606 = vst.msk [vmem:[#allocation4 + $0xf8] sm:$0xf] %vm2030_vm12, %v4538_v21 }
 0x266   : > { %v1265_v62 = vpop.f32.mrb[188].mxu0 }
 0x267   : > { %v1868_v6 = vpack.c.bf16 %v1867_v31, %v1866_v3  ;;  %1374 = vst.msk [vmem:[#allocation2 + $0x2f0] sm:$0xff] %vm331_vm4, %v1265_v62  ;;  %v11482_v23 = vpop.f32.mrb[189].mxu0  ;;  %v4302_v7 = vpop.permute.xlu1 %4301  ;;  %v1881_v57 = vld [vmem:[#allocation2 + $0x2d8] ss:$2 sm:$0xff] }
 0x268   : > { %v1268_v54 = vpop.f32.mrb[190].mxu0  ;;  %v4304_v61 = vpop.permute.xlu0 %4303  ;;  %4374 = vst.msk [vmem:[#allocation4 + $0x88] sm:$0xf] %vm2992_vm0, %v4302_v7 }
 0x269   : > { %v1870_v33 = vshrl.u32 %v1868_v6, 16  ;;  %1375 = vst.msk [vmem:[#allocation2 + $0x2f8] sm:$0xff] %vm331_vm4, %v1268_v54  ;;  %v11483_v8 = vpop.f32.mrb[191].mxu0  ;;  %2474 = vrot.lane.b32.xlu0 %v4213_v5, %s12637_s29  ;;  %2472 = vrot.lane.b32.xlu1 %v4203_v10, %s12637_s29  ;;  %v1873_v2 = vshll.u32 %v1868_v6, 16 }
 0x26a   : > { %4375 = vst.msk [vmem:[#allocation4 + $0x94] sm:$0xf] %vm2992_vm0, %v4304_v61  ;;  %v12298_v8 = vld [vmem:[%s15643_s3 + $0x88] sm:$0xff]  }
 0x26b   : > { %v1872_v16 = vrot.slane %v1870_v33, 7  ;;  %v2457_v48 = vpop.permute.xlu1 %2456  ;;  %v4218_v33 = vrot.slane %v4217_v59, 4  ;;  %11490 = vmatprep.subr.bf16.mxu1 %v12298_v8 }
 0x26c   : > { %v2459_v24 = vpop.permute.xlu0 %2458  ;;  %2526 = vst.msk [vmem:[#allocation4 + $0xb4] sm:$0xf] %vm2510_vm13, %v2457_v48  ;;  %11491 = vmatpush3.bf16.msra.mxu1 %v12298_v8 }
 0x26d   : > { %v1875_v41 = vor.u32 %v1873_v2, %v1872_v16  ;;  %2527 = vst.msk [vmem:[#allocation4 + $0xc0] sm:$0xf] %vm2510_vm13, %v2459_v24  ;;  %11520 = vmatprep.subr.bf16.mxu1 %v12632_v0 }
 0x26e   : > { %2810 = vst.msk [vmem:[#allocation4 + $0xb4] sm:$0xf] %vm2794_vm15, %v2741_v63  ;;  %2811 = vst.msk [vmem:[#allocation4 + $0xc0] sm:$0xf] %vm2794_vm15, %v2743_v58  ;;  %v1273_v15 = vpop.f32.mrb[192].mxu0 }
 0x26f   : > { %3008 = vst.msk [vmem:[#allocation4 + $0xb4] sm:$0xf] %vm2992_vm0, %v14051_v19  ;;  %v12274_v12 = vld [vmem:[#allocation4 + $0x7c] ss:$12 sps:$4 sm:$0xff]   ;;  %v1878_v26 = vsel %vm12949_vm14, %v1875_v41, %v1877_v11  ;;  %v11486_v17 = vpop.f32.mrb[193].mxu0  ;;  %v3595_v19 = vrot.slane %v3593_v49, 4 }
 0x270   : > { %1376 = vst.msk [vmem:[#allocation2 + $0x300] sm:$0xff] %vm331_vm4, %v1273_v15  ;;  %1879 = vst [vmem:[#allocation3 + $0x68] sm:$0xff] %v1878_v26  ;;  %v14124_v50 = vcombine.high %v1878_v26, %v1878_v26  ;;  %v10056_v14 = vcombine.low %v1878_v26, %v1878_v26  ;;  %v1276_v28 = vpop.f32.mrb[194].mxu0  ;;  %5138 = vmatprep.mubr.bf16.mxu1 %v12274_v12  ;;  %v1883_v25 = vld [vmem:[#allocation2 + $0x2e8] ss:$2 sm:$0x3f] }
 0x271   : > { %1377 = vst.msk [vmem:[#allocation2 + $0x308] sm:$0xff] %vm331_vm4, %v1276_v28  ;;  %v11487_v13 = vpop.f32.mrb[195].mxu0  ;;  %5139 = vmatmul.mubr.bf16.gmra.mrb[20].mxu1 %v12276_v27  ;;  %v1885_v49 = vld [vmem:[#allocation2 + $0x2d9] ss:$2 sm:$0xff] }
 0x272   : > { %3850 = vrot.lane.b32.xlu1 %v14124_v50, %s12636_s28  ;;  %v14132_v44 = vrot.slane %v10056_v14, 5  ;;  %3848 = vrot.lane.b32.xlu0 %v10056_v14, %s12636_s28  ;;  %v4220_v37 = vshll.u32 %v10056_v14, 16  ;;  %v4224_v22 = vshrl.u32 %v10056_v14, 16  ;;  %v1887_v36 = vld [vmem:[#allocation2 + $0x2e9] ss:$2 sm:$0x3f]  ;;  %v1896_v1 = vmax.f32 %v1881_v57, %v1885_v49 }
 0x273   : > { %v1897_v47 = vmax.f32 %v1883_v25, %v1887_v36  ;;  %v3599_v10 = vrot.slane %v14124_v50, 5  ;;  %v4230_v31 = vshll.u32 %v14124_v50, 16  ;;  %v2421_v27 = vshrl.u32 %v14124_v50, 16 }
 0x274   : > { %v3835_v43 = vpop.permute.xlu1 %3834  ;;  %v3833_v53 = vpop.permute.xlu0 %3832  ;;  %v3598_v39 = vrot.slane %v14132_v44, 4  ;;  %v4222_v52 = vrot.slane %v4220_v37, 5  ;;  %v4226_v34 = vrot.slane %v4224_v22, 4  ;;  %v3597_v58 = vsel %vm12836_vm7, %v3595_v19, %v14132_v44 }
 0x275   : > { %3902 = vst.msk [vmem:[#allocation4 + $0xac] sm:$0xf] %vm2794_vm15, %v3833_v53  ;;  %v4232_v29 = vrot.slane %v4230_v31, 5  ;;  %v14169_v4 = vrot.slane %v3599_v10, 4  ;;  %v4555_v19 = vrot.slane %v14135_v51, 5  ;;  %v2423_v56 = vrot.slane %v2421_v27, 4 }
 0x276   : > { %2958 = vrot.lane.b32.xlu1 %v14124_v50, %s12638_s17  ;;  %2956 = vrot.lane.b32.xlu0 %v10056_v14, %s12638_s17  ;;  %v3600_v6 = vsel %vm12836_vm7, %v3598_v39, %v3599_v10  ;;  %v4227_v23 = vor.u32 %v4226_v34, %v4222_v52  ;;  %v3349_v46 = vsel %vm12848_vm10, %v4218_v33, %v4222_v52  ;;  %v4554_v14 = vrot.slane %v4552_v30, 4  ;;  %v12280_v31 = vld [vmem:[#allocation4 + $0x90] ss:$12 sps:$4 sm:$0xff]  }
 0x277   : > { %v1889_v63 = vld [vmem:[#allocation2 + $0x2f4] ss:$2 sm:$0xff]  ;;  %v1893_v5 = vld [vmem:[#allocation2 + $0x2f5] ss:$2 sm:$0xff]  ;;  %3436 = vst.msk [vmem:[#allocation4 + $0x118] sm:$0xf] %vm2030_vm12, %v3349_v46  ;;  %v4541_v50 = vsel %vm12836_vm7, %v4539_v45, %v14132_v44  ;;  %v2424_v34 = vor.u32 %v4232_v29, %v2423_v56 }
 0x278   : > { %v1898_v20 = vmax.f32 %v1889_v63, %v1893_v5  ;;  %v14144_v3 = vpop.permute.xlu1 %2942  ;;  %v1931_v32 = vld [vmem:[#allocation3 + $0x68] sm:$0x7f]  ;;  %v1891_v9 = vld [vmem:[#allocation2 + $0x304] ss:$2 sm:$0x3f]  ;;  %v2941_v62 = vpop.permute.xlu0 %2940  ;;  %v4228_v11 = vrot.slane %v4227_v23, 4  ;;  %v4556_v25 = vsel %vm12836_vm7, %v4554_v14, %v4555_v19 }
 0x279   : > { %v1895_v55 = vld [vmem:[#allocation2 + $0x305] ss:$2 sm:$0x3f]  ;;  %v9890_v7 = vcombine.low %v1931_v32, %v1931_v32  ;;  %v9891_v21 = vcombine.high %v1931_v32, %v1931_v32  ;;  %3009 = vst.msk [vmem:[#allocation4 + $0xc0] sm:$0xf] %vm2992_vm0, %v2941_v62  ;;  %v4557_v37 = vrot.slane %v4555_v19, 4 }
 0x27a   : > { %v1900_v54 = vmax.f32 %v1896_v1, %v1898_v20  ;;  %v1899_v61 = vmax.f32 %v1891_v9, %v1895_v55  ;;  %3654 = vrot.lane.b32.xlu1 %v3597_v58, %s12637_s29  ;;  %3656 = vrot.lane.b32.xlu0 %v3600_v6, %s12637_s29  ;;  %v4233_v17 = vsel %vm12848_vm10, %v4228_v11, %v4232_v29  ;;  %v4260_v49 = vshll.u32 %v14115_v18, 16  ;;  %v1915_v44 = vld [vmem:[#allocation3 + $0x70] sm:$0xff] }
 0x27b   : > { %2057 = vst.msk [vmem:[#allocation4 + $0x138] sm:$0xf] %vm2030_vm12, %v9890_v7  ;;  %4607 = vst.msk [vmem:[#allocation4 + $0x104] sm:$0xf] %vm2030_vm12, %v4541_v50  ;;  %v4264_v53 = vshrl.u32 %v14115_v18, 16  ;;  %v2425_v20 = vrot.slane %v2424_v34, 4 }
 0x27c   : > { %2059 = vst.msk [vmem:[#allocation4 + $0x144] sm:$0x7] %vm2058_vm1, %v9891_v21  ;;  %v1902_v16 = vadd.f32 %v14068_v40, %v1900_v54  ;;  %v1901_v2 = vmax.f32 %v1897_v47, %v1899_v61  ;;  %v3639_v48 = vpop.permute.xlu1 %3638  ;;  %v3641_v24 = vpop.permute.xlu0 %3640  ;;  %4613 = vst.msk [vmem:[#allocation4 + $0x14c] sm:$0x7] %vm2058_vm1, %v4557_v37  ;;  %v14206_v47 = vrot.slane %v4260_v49, 5  ;;  %v4270_v33 = vshll.u32 %v14135_v51, 16 }
 0x27d   : > { %3707 = vst.msk [vmem:[#allocation4 + $0xb8] sm:$0xf] %vm2510_vm13, %v3639_v48  ;;  %3708 = vst.msk [vmem:[#allocation4 + $0xc4] sm:$0xf] %vm2510_vm13, %v3641_v24  ;;  %v4266_v10 = vrot.slane %v4264_v53, 4 }
 0x27e   : > { %v1903_v41 = vadd.f32 %v14068_v40, %v1901_v2  ;;  %3903 = vst.msk [vmem:[#allocation4 + $0xb8] sm:$0xf] %vm2794_vm15, %v3835_v43  ;;  %2760 = vrot.lane.b32.xlu1 %v3597_v58, %s12636_s28  ;;  %2762 = vrot.lane.b32.xlu0 %v3600_v6, %s12636_s28  ;;  %v1904_v15 = vmax.f32 %v1902_v16, 0.0  ;;  %v12566_v50 = vld [vmem:[#allocation3 + $0x78] sm:$0x7f] }
 0x27f   : > { %4612 = vst.msk [vmem:[#allocation4 + $0x140] sm:$0xf] %vm2030_vm12, %v4556_v25  ;;  %3437 = vst.msk [vmem:[#allocation4 + $0x124] sm:$0xf] %vm2030_vm12, %v4233_v17  ;;  %v4267_v61 = vor.u32 %v4266_v10, %v14206_v47 }
 0x280   : > { %v1905_v12 = vmax.f32 %v1903_v41, 0.0  ;;  %v2745_v40 = vpop.permute.xlu1 %2744  ;;  %v2747_v26 = vpop.permute.xlu0 %2746  ;;  %4608 = vst.msk [vmem:[#allocation4 + $0x110] sm:$0xf] %vm2030_vm12, %v3600_v6 }
 0x282   : > { %v1906_v28 = vpack.c.bf16 %v1905_v12, %v1904_v15  ;;  %2764 = vrot.lane.b32.xlu1 %v14169_v4, %s12636_s28  ;;  %4323 = vrot.lane.b32.xlu0 %v4233_v17, %s12638_s17  ;;  %v4268_v15 = vrot.slane %v4267_v61, 4  ;;  %v4272_v12 = vrot.slane %v4270_v33, 5 }
 0x284   : > { %v1908_v57 = vshrl.u32 %v1906_v28, 16  ;;  %v4306_v13 = vpop.permute.xlu1 %4305  ;;  %v4308_v22 = vpop.permute.xlu0 %4307  ;;  %v1911_v43 = vshll.u32 %v1906_v28, 16  ;;  %v4273_v28 = vsel %vm12848_vm10, %v4268_v15, %v4272_v12 }
 0x285   : > { %4376 = vst.msk [vmem:[#allocation4 + $0xa0] sm:$0xf] %vm2992_vm0, %v4306_v13  ;;  %4377 = vst.msk [vmem:[#allocation4 + $0xac] sm:$0xf] %vm2992_vm0, %v4308_v22  ;;  %v4274_v13 = vshrl.u32 %v14135_v51, 16 }
 0x286   : > { %v1910_v36 = vrot.slane %v1908_v57, 7  ;;  %4321 = vrot.lane.b32.xlu1 %v3349_v46, %s12638_s17  ;;  %2478 = vrot.lane.b32.xlu0 %v4233_v17, %s12637_s29  ;;  %v10061_v57 = vcombine.high %v12566_v50, %v12566_v50 }
 0x287   : > { %v4276_v37 = vrot.slane %v4274_v13, 4 }
 0x288   : > { %v1913_v39 = vor.u32 %v1911_v43, %v1910_v36  ;;  %v2461_v52 = vpop.permute.xlu1 %2460  ;;  %v2463_v59 = vpop.permute.xlu0 %2462 }
 0x289   : > { %2528 = vst.msk [vmem:[#allocation4 + $0xcc] sm:$0xf] %vm2510_vm13, %v2461_v52  ;;  %2529 = vst.msk [vmem:[#allocation4 + $0xd8] sm:$0xf] %vm2510_vm13, %v2463_v59  ;;  %v4277_v36 = vor.u32 %v4276_v37, %v4272_v12 }
 0x28a   : > { %2812 = vst.msk [vmem:[#allocation4 + $0xcc] sm:$0xf] %vm2794_vm15, %v2745_v40  ;;  %2476 = vrot.lane.b32.xlu1 %v3349_v46, %s12637_s29  ;;  %v1916_v1 = vsel %vm12949_vm14, %v1913_v39, %v1915_v44  ;;  %2813 = vst.msk [vmem:[#allocation4 + $0xd8] sm:$0xf] %vm2794_vm15, %v2747_v26  ;;  %v12287_v44 = vld [vmem:[#allocation4 + $0xa8] ss:$12 sps:$4 sm:$0xff]  }
 0x28b   : > { %3010 = vst.msk [vmem:[#allocation4 + $0xcc] sm:$0xf] %vm2992_vm0, %v14144_v3  ;;  %1917 = vst [vmem:[#allocation3 + $0x70] sm:$0xff] %v1916_v1  ;;  %v10058_v63 = vcombine.low %v1916_v1, %v1916_v1  ;;  %v10032_v5 = vcombine.high %v1916_v1, %v1916_v1  ;;  %v4278_v39 = vrot.slane %v4277_v36, 4 }
 0x28c   : > { %v12278_v58 = vld [vmem:[#allocation4 + $0x94] ss:$12 sps:$4 sm:$0xff]  }
 0x28d   : > { %3852 = vrot.lane.b32.xlu0 %v10058_v63, %s12636_s28  ;;  %v3602_v32 = vrot.slane %v10058_v63, 5  ;;  %v3605_v9 = vrot.slane %v10032_v5, 5  ;;  %v4240_v60 = vshll.u32 %v10058_v63, 16  ;;  %v4244_v55 = vshrl.u32 %v10058_v63, 16  ;;  %5146 = vmatprep.mubr.bf16.mxu1 %v12278_v58 }
 0x28e   : > { %2480 = vrot.lane.b32.xlu1 %v2425_v20, %s12637_s29  ;;  %5147 = vmatmul.mubr.bf16.gmra.mrb[24].mxu1 %v12280_v31  ;;  %v4250_v21 = vshll.u32 %v10032_v5, 16  ;;  %v4254_v46 = vshrl.u32 %v10032_v5, 16 }
 0x28f   : > { %v3839_v62 = vpop.permute.xlu1 %3838  ;;  %v3837_v6 = vpop.permute.xlu0 %3836  ;;  %v3604_v3 = vrot.slane %v3602_v32, 4  ;;  %v4242_v23 = vrot.slane %v4240_v60, 5  ;;  %v4246_v7 = vrot.slane %v4244_v55, 4  ;;  %v3607_v54 = vrot.slane %v3605_v9, 4 }
 0x290   : > { %3904 = vst.msk [vmem:[#allocation4 + $0xc4] sm:$0xf] %vm2794_vm15, %v3837_v6  ;;  %v4547_v8 = vsel %vm12836_vm7, %v14169_v4, %v3602_v32  ;;  %v4252_v41 = vrot.slane %v4250_v21, 5  ;;  %v3382_v40 = vrot.slane %v4254_v46, 4 }
 0x291   : > { %v3606_v45 = vsel %vm12836_vm7, %v3604_v3, %v3605_v9  ;;  %v4247_v16 = vor.u32 %v4246_v7, %v4242_v23  ;;  %4609 = vst.msk [vmem:[#allocation4 + $0x11c] sm:$0xf] %vm2030_vm12, %v4547_v8  ;;  %v4553_v2 = vsel %vm12836_vm7, %v3607_v54, %v4552_v30  ;;  %v3369_v29 = vsel %vm12848_vm10, %v2425_v20, %v4242_v23 }
 0x292   : > { %3660 = vrot.lane.b32.xlu0 %v3606_v45, %s12637_s29  ;;  %3854 = vrot.lane.b32.xlu1 %v10032_v5, %s12636_s28  ;;  %4611 = vst.msk [vmem:[#allocation4 + $0x134] sm:$0xf] %vm2030_vm12, %v4553_v2  ;;  %4610 = vst.msk [vmem:[#allocation4 + $0x128] sm:$0xf] %vm2030_vm12, %v3606_v45  ;;  %v2837_v18 = vld [vmem:[#allocation3 + $0x70] sm:$0x7f]  ;;  %v3383_v26 = vor.u32 %v4252_v41, %v3382_v40 }
 0x293   : > { %v2947_v48 = vpop.permute.xlu1 %2946  ;;  %v2945_v24 = vpop.permute.xlu0 %2944  ;;  %v4248_v11 = vrot.slane %v4247_v16, 4  ;;  %3438 = vst.msk [vmem:[#allocation4 + $0x130] sm:$0xf] %vm2030_vm12, %v3369_v29  ;;  %v9975_v27 = vcombine.low %v2837_v18, %v2837_v18  ;;  %v9976_v53 = vcombine.high %v2837_v18, %v2837_v18  ;;  %v12292_v23 = vld [vmem:[#allocation4 + $0xc0] ss:$12 sps:$4 sm:$0xff]   ;;  %vm5405_vm7 = vcmask 519168  }
 0x294   : > { %3011 = vst.msk [vmem:[#allocation4 + $0xd8] sm:$0xf] %vm2992_vm0, %v2945_v24  ;;  %v3384_v19 = vrot.slane %v3383_v26, 4  ;;  %vm5406_vm9 = vmand %vm5405_vm7, %vm2144_vm8  ;;  %vm5438_vm8 = vcmask 519171  }
 0x295   : > { %v4253_v4 = vsel %vm12848_vm10, %v4248_v11, %v4252_v41 }
 0x296   : > { %4327 = vrot.lane.b32.xlu0 %v4253_v4, %s12638_s17  ;;  %3658 = vrot.lane.b32.xlu1 %v4547_v8, %s12637_s29  ;;  %3439 = vst.msk [vmem:[#allocation4 + $0x13c] sm:$0xf] %vm2030_vm12, %v4253_v4  ;;  %v4263_v51 = vsel %vm12848_vm10, %v3384_v19, %v14206_v47  ;;  %vm5439_vm10 = vsmask.f32 7950  ;;  %vm5470_vm12 = vsmask.f32 2304 }
 0x297   : > { %v3643_v35 = vpop.permute.xlu1 %3642  ;;  %v3645_v30 = vpop.permute.xlu0 %3644  ;;  %3440 = vst.msk [vmem:[#allocation4 + $0x148] sm:$0x7] %vm2058_vm1, %v3384_v19  ;;  %vm14462_vm11 = vmand %vm5438_vm8, %vm5439_vm10  ;;  %vm5384_vm1 = vcmask 521216   ;;  %vm5569_vm8 = vsmask.f32 7942 }
 0x298   : > { %3709 = vst.msk [vmem:[#allocation4 + $0xd0] sm:$0xf] %vm2510_vm13, %v3643_v35  ;;  %3710 = vst.msk [vmem:[#allocation4 + $0xdc] sm:$0xf] %vm2510_vm13, %v3645_v30 }
 0x299   : > { %3905 = vst.msk [vmem:[#allocation4 + $0xd0] sm:$0xf] %vm2794_vm15, %v3839_v62 }
 0x29a   : > { %2960 = vrot.lane.b32.xlu0 %v9975_v27, %s12638_s17  ;;  %3662 = vrot.lane.b32.xlu1 %v3607_v54, %s12637_s29  ;;  %s12568_s29 = scalar_lea.vmem %s15600_s14, 16 }
 0x29b   : > { %v2751_v17 = vpop.permute.xlu0 %2750  ;;  %v2749_v14 = vpop.permute.xlu1 %2748  ;;  %p12569_p11 = scmp.ne.s32.totalorder %s15600_s14, %s12568_s29 }
 0x29d   : > { %p12570_p12 = pnand %p12569_p11, %p12728_p5 }
 0x29e   : > { %4331 = vrot.lane.b32.xlu0 %v4273_v28, %s12638_s17  ;;  %4325 = vrot.lane.b32.xlu1 %v3369_v29, %s12638_s17 }
 0x29f   : > { %v4312_v56 = vpop.permute.xlu0 %4311  ;;  %v4310_v25 = vpop.permute.xlu1 %4309  ;;  %p12571_p13 = pneg %p12570_p12 }
 0x2a0   : > { %4379 = vst.msk [vmem:[#allocation4 + $0xc4] sm:$0xf] %vm2992_vm0, %v4312_v56  ;;  %4378 = vst.msk [vmem:[#allocation4 + $0xb8] sm:$0xf] %vm2992_vm0, %v4310_v25 }
 0x2a2   : > { %3858 = vrot.lane.b32.xlu1 %v10061_v57, %s12636_s28  ;;  %s15598_s28 = scalar_lea.hbm %s15649_s9, %s10861_s25 }
 0x2a3   : > { %v2467_v22 = vpop.permute.xlu0 %2466  ;;  %v2465_v49 = vpop.permute.xlu1 %2464 }
 0x2a4   : > { %2531 = vst.msk [vmem:[#allocation4 + $0xf0] sm:$0xf] %vm2510_vm13, %v2467_v22  ;;  %2530 = vst.msk [vmem:[#allocation4 + $0xe4] sm:$0xf] %vm2510_vm13, %v2465_v49 }
 0x2a5   : > { %2815 = vst.msk [vmem:[#allocation4 + $0xf0] sm:$0xf] %vm2794_vm15, %v2751_v17  ;;  %2814 = vst.msk [vmem:[#allocation4 + $0xe4] sm:$0xf] %vm2794_vm15, %v2749_v14 }
 0x2a6   : > { %3012 = vst.msk [vmem:[#allocation4 + $0xe4] sm:$0xf] %vm2992_vm0, %v2947_v48  ;;  %4329 = vrot.lane.b32.xlu1 %v4263_v51, %s12638_s17 }
 0x2a7   : > { %v12285_v43 = vld [vmem:[#allocation4 + $0xac] ss:$12 sps:$4 sm:$0xff]  }
 0x2a8   : > { %5154 = vmatprep.mubr.bf16.mxu1 %v12285_v43 }
 0x2a9   : > { %5155 = vmatmul.mubr.bf16.gmra.mrb[28].mxu1 %v12287_v44 }
 0x2aa   : > { %2962 = vrot.lane.b32.xlu1 %v9976_v53, %s12638_s17 }
 0x2ac   : > { %v3843_v52 = vpop.permute.xlu1 %3842  ;;  %v3841_v34 = vpop.permute.xlu0 %3840 }
 0x2ad   : > { %3906 = vst.msk [vmem:[#allocation4 + $0xdc] sm:$0xf] %vm2794_vm15, %v3841_v34  ;;  %v12296_v15 = vld [vmem:[#allocation4 + $0xd8] ss:$12 sps:$4 sm:$0xff]  }
 0x2ae   : > { %4333 = vrot.lane.b32.xlu1 %v4278_v39, %s12638_s17  ;;  %s12639_s17 = smov [#allocation7]  }
 0x2af   : > { %s12572_s22 = sshll.u32 %s12639_s17, 4  ;;  %s12573_s22 = int_to_ptr.vmem [resolvable:$false] %s12572_s22 }
 0x2b0   : > { %v2951_v42 = vpop.permute.xlu1 %2950  ;;  %v2949_v59 = vpop.permute.xlu0 %2948  ;;  %s12574_s23 = scalar_lea.vmem %s12573_s22, 32  ;;  %p12575_p0 = scmp.lt.s32.totalorder %s15600_s14, %s12573_s22 }
 0x2b1   : > { %3013 = vst.msk [vmem:[#allocation4 + $0xf0] sm:$0xf] %vm2992_vm0, %v2949_v59  ;;  %v12335_v59 = vld [vmem:[%s15645_s5 + $0x1e0] sm:$0xff]   ;;  %p12576_p1 = scmp.lt.s32.totalorder %s12574_s23, %s12568_s29 }
 0x2b2   : > { %11701 = vmatpush3.bf16.msra.mxu0 %v12335_v59  ;;  %v12336_v59 = vld [vmem:[%s15645_s5 + $0x20] sm:$0xff]  }
 0x2b3   : > { %11702 = vmatprep.subr.bf16.mxu0 %v12632_v0  ;;  %p12577_p2 = por %p12576_p1, %p12575_p0 }
 0x2b4   : > { %v3647_v1 = vpop.permute.xlu1 %3646  ;;  %v3649_v47 = vpop.permute.xlu0 %3648 }
 0x2b5   : > { %3711 = vst.msk [vmem:[#allocation4 + $0xe8] sm:$0xf] %vm2510_vm13, %v3647_v1  ;;  %3712 = vst.msk [vmem:[#allocation4 + $0xf4] sm:$0xf] %vm2510_vm13, %v3649_v47  ;;  %p12578_p3 = pnand %p12577_p2, %p12571_p13 }
 0x2b6   : > { %3907 = vst.msk [vmem:[#allocation4 + $0xe8] sm:$0xf] %vm2794_vm15, %v3843_v52 }
 0x2b8   : > { %v2753_v63 = vpop.permute.xlu1 %2752  ;;  %v2755_v5 = vpop.permute.xlu0 %2754 }
 0x2ba   : > { %v10936_v10 = vpop.f32.mrb[0].mxu1 }
 0x2bb   : > { %v10937_v20 = vpop.f32.mrb[1].mxu1 }
 0x2bc   : > { %v14269_v58 = vadd.f32 %v10937_v20, %v10936_v10  ;;  %v4314_v31 = vpop.permute.xlu1 %4313  ;;  %v10939_v32 = vpop.f32.mrb[2].mxu1 }
 0x2bd   : > { %v4316_v9 = vpop.permute.xlu0 %4315  ;;  %4380 = vst.msk [vmem:[#allocation4 + $0xd0] sm:$0xf] %vm2992_vm0, %v4314_v31  ;;  %v10940_v60 = vpop.f32.mrb[3].mxu1 }
 0x2be   : > { %4381 = vst.msk [vmem:[#allocation4 + $0xdc] sm:$0xf] %vm2992_vm0, %v4316_v9  ;;  %v14273_v55 = vadd.f32 %v10940_v60, %v10939_v32 }
 0x2c0   : > { %v2469_v62 = vpop.permute.xlu1 %2468 }
 0x2c1   : > { %v2471_v6 = vpop.permute.xlu0 %2470  ;;  %2532 = vst.msk [vmem:[#allocation4 + $0xfc] sm:$0xf] %vm2510_vm13, %v2469_v62 }
 0x2c2   : > { %2533 = vst.msk [vmem:[#allocation4 + $0x108] sm:$0xf] %vm2510_vm13, %v2471_v6 }
 0x2c3   : > { %2816 = vst.msk [vmem:[#allocation4 + $0xfc] sm:$0xf] %vm2794_vm15, %v2753_v63  ;;  %2817 = vst.msk [vmem:[#allocation4 + $0x108] sm:$0xf] %vm2794_vm15, %v2755_v5 }
 0x2c4   : > { %3014 = vst.msk [vmem:[#allocation4 + $0xfc] sm:$0xf] %vm2992_vm0, %v2951_v42  ;;  %v12290_v3 = vld [vmem:[#allocation4 + $0xc4] ss:$12 sps:$4 sm:$0xff]  }
 0x2c5   : > { %5162 = vmatprep.mubr.bf16.mxu1 %v12290_v3 }
 0x2c6   : > { %5163 = vmatmul.mubr.bf16.gmra.mrb[32].mxu1 %v12292_v23 }
 0x2c7   : > { %v3847_v7 = vpop.permute.xlu1 %3846  ;;  %v3845_v21 = vpop.permute.xlu0 %3844 }
 0x2c8   : > { %3908 = vst.msk [vmem:[#allocation4 + $0xf4] sm:$0xf] %vm2794_vm15, %v3845_v21 }
 0x2cb   : > { %v2955_v54 = vpop.permute.xlu1 %2954  ;;  %v2953_v61 = vpop.permute.xlu0 %2952 }
 0x2cc   : > { %3015 = vst.msk [vmem:[#allocation4 + $0x108] sm:$0xf] %vm2992_vm0, %v2953_v61 }
 0x2cf   : > { %v3651_v33 = vpop.permute.xlu1 %3650  ;;  %v3653_v8 = vpop.permute.xlu0 %3652 }
 0x2d0   : > { %3713 = vst.msk [vmem:[#allocation4 + $0x100] sm:$0xf] %vm2510_vm13, %v3651_v33  ;;  %3714 = vst.msk [vmem:[#allocation4 + $0x10c] sm:$0xf] %vm2510_vm13, %v3653_v8 }
 0x2d1   : > { %3909 = vst.msk [vmem:[#allocation4 + $0x100] sm:$0xf] %vm2794_vm15, %v3847_v7 }
 0x2d3   : > { %v2759_v45 = vpop.permute.xlu0 %2758  ;;  %v2757_v16 = vpop.permute.xlu1 %2756 }
 0x2d4   : > { %v10942_v2 = vpop.f32.mrb[4].mxu1 }
 0x2d5   : > { %v10943_v48 = vpop.f32.mrb[5].mxu1 }
 0x2d6   : > { %v14285_v24 = vadd.f32 %v10943_v48, %v10942_v2  ;;  %v10945_v29 = vpop.f32.mrb[6].mxu1 }
 0x2d7   : > { %v4320_v11 = vpop.permute.xlu0 %4319  ;;  %v4318_v41 = vpop.permute.xlu1 %4317 }
 0x2d8   : > { %4383 = vst.msk [vmem:[#allocation4 + $0xf4] sm:$0xf] %vm2992_vm0, %v4320_v11  ;;  %4382 = vst.msk [vmem:[#allocation4 + $0xe8] sm:$0xf] %vm2992_vm0, %v4318_v41  ;;  %v10946_v4 = vpop.f32.mrb[7].mxu1 }
 0x2d9   : > { %v14289_v18 = vadd.f32 %v10946_v4, %v10945_v29  ;;  %v12314_v41 = vld [vmem:[#allocation4 + $0x8] ss:$12 sps:$4 sm:$0xff]  }
 0x2db   : > { %v2475_v46 = vpop.permute.xlu0 %2474  ;;  %v2473_v35 = vpop.permute.xlu1 %2472 }
 0x2dc   : > { %2535 = vst.msk [vmem:[#allocation4 + $0x120] sm:$0xf] %vm2510_vm13, %v2475_v46  ;;  %2534 = vst.msk [vmem:[#allocation4 + $0x114] sm:$0xf] %vm2510_vm13, %v2473_v35 }
 0x2dd   : > { %2819 = vst.msk [vmem:[#allocation4 + $0x120] sm:$0xf] %vm2794_vm15, %v2759_v45  ;;  %2818 = vst.msk [vmem:[#allocation4 + $0x114] sm:$0xf] %vm2794_vm15, %v2757_v16 }
 0x2de   : > { %3016 = vst.msk [vmem:[#allocation4 + $0x114] sm:$0xf] %vm2992_vm0, %v2955_v54 }
 0x2df   : > { %v12294_v30 = vld [vmem:[#allocation4 + $0xdc] ss:$12 sps:$4 sm:$0xff]   ;;  %v4654_v39 = vld [vmem:[#allocation4 + $0xf0] sm:$0xff] }
 0x2e0   : > { %5170 = vmatprep.mubr.bf16.mxu1 %v12294_v30  ;;  %v12316_v30 = vld [vmem:[#allocation4 + $0x20] ss:$12 sps:$4 sm:$0xff]  }
 0x2e1   : > { %5171 = vmatmul.mubr.bf16.gmra.mrb[36].mxu1 %v12296_v15  ;;  %v12318_v15 = vld [vmem:[#allocation4 + $0x38] ss:$12 sps:$4 sm:$0xff]  }
 0x2e4   : > { %v3851_v12 = vpop.permute.xlu1 %3850  ;;  %v3849_v40 = vpop.permute.xlu0 %3848 }
 0x2e5   : > { %3910 = vst.msk [vmem:[#allocation4 + $0x10c] sm:$0xf] %vm2794_vm15, %v3849_v40  ;;  %v12303_v54 = vld [vmem:[#allocation4 + $0x108] ss:$12 sps:$4 sm:$0xff]  }
 0x2e6   : > { %v12322_v40 = vld [vmem:[#allocation4 + $0x68] ss:$12 sps:$4 sm:$0xff]  }
 0x2e8   : > { %v2959_v27 = vpop.permute.xlu1 %2958  ;;  %v2957_v26 = vpop.permute.xlu0 %2956 }
 0x2e9   : > { %3017 = vst.msk [vmem:[#allocation4 + $0x120] sm:$0xf] %vm2992_vm0, %v2957_v26  ;;  %v12326_v26 = vld [vmem:[#allocation4 + $0x98] ss:$12 sps:$4 sm:$0xff]  }
 0x2ec   : > { %v3655_v17 = vpop.permute.xlu1 %3654  ;;  %v3657_v14 = vpop.permute.xlu0 %3656 }
 0x2ed   : > { %3715 = vst.msk [vmem:[#allocation4 + $0x118] sm:$0xf] %vm2510_vm13, %v3655_v17  ;;  %3716 = vst.msk [vmem:[#allocation4 + $0x124] sm:$0xf] %vm2510_vm13, %v3657_v14 }
 0x2ee   : > { %3911 = vst.msk [vmem:[#allocation4 + $0x118] sm:$0xf] %vm2794_vm15, %v3851_v12  ;;  %v12320_v12 = vld [vmem:[#allocation4 + $0x50] ss:$12 sps:$4 sm:$0xff]  }
 0x2f0   : > { %v2761_v28 = vpop.permute.xlu1 %2760  ;;  %v2763_v19 = vpop.permute.xlu0 %2762 }
 0x2f2   : > { %v10948_v50 = vpop.f32.mrb[8].mxu1 }
 0x2f3   : > { %v10949_v57 = vpop.f32.mrb[9].mxu1 }
 0x2f4   : > { %v14301_v13 = vadd.f32 %v10949_v57, %v10948_v50  ;;  %v2765_v56 = vpop.permute.xlu1 %2764  ;;  %v10951_v25 = vpop.f32.mrb[10].mxu1 }
 0x2f5   : > { %v4324_v37 = vpop.permute.xlu0 %4323  ;;  %v10952_v22 = vpop.f32.mrb[11].mxu1 }
 0x2f6   : > { %4385 = vst.msk [vmem:[#allocation4 + $0x10c] sm:$0xf] %vm2992_vm0, %v4324_v37  ;;  %v14304_v49 = vadd.f32 %v10952_v22, %v10951_v25  ;;  %v12329_v25 = vld [vmem:[#allocation4 + $0xc8] ss:$12 sps:$4 sm:$0xff]   ;;  %v12330_v37 = vld [vmem:[#allocation4 + $0xe0] ss:$12 sps:$4 sm:$0xff]  }
 0x2f7   : > { %v12331_v22 = vld [vmem:[#allocation4 + $0xf8] ss:$12 sps:$4 sm:$0xff]  }
 0x2f8   : > { %v4322_v51 = vpop.permute.xlu1 %4321 }
 0x2f9   : > { %4384 = vst.msk [vmem:[#allocation4 + $0x100] sm:$0xf] %vm2992_vm0, %v4322_v51  ;;  %v2479_v36 = vpop.permute.xlu0 %2478  ;;  %v12332_v51 = vld [vmem:[#allocation4 + $0x110] ss:$12 sps:$4 sm:$0xff]  }
 0x2fa   : > { %2537 = vst.msk [vmem:[#allocation4 + $0x138] sm:$0xf] %vm2510_vm13, %v2479_v36  ;;  %v12333_v36 = vld [vmem:[#allocation4 + $0x128] ss:$12 sps:$4 sm:$0xff]  }
 0x2fb   : > { %2821 = vst.msk [vmem:[#allocation4 + $0x138] sm:$0xf] %vm2794_vm15, %v2763_v19 }
 0x2fc   : > { %v2477_v43 = vpop.permute.xlu1 %2476 }
 0x2fd   : > { %2536 = vst.msk [vmem:[#allocation4 + $0x12c] sm:$0xf] %vm2510_vm13, %v2477_v43  ;;  %v12334_v43 = vld [vmem:[#allocation4 + $0x140] ss:$12 sps:$4 sm:$0x7f]  }
 0x2fe   : > { %2820 = vst.msk [vmem:[#allocation4 + $0x12c] sm:$0xf] %vm2794_vm15, %v2761_v28 }
 0x2ff   : > { %3018 = vst.msk [vmem:[#allocation4 + $0x12c] sm:$0xf] %vm2992_vm0, %v2959_v27  ;;  %v3853_v44 = vpop.permute.xlu0 %3852  ;;  %v12324_v27 = vld [vmem:[#allocation4 + $0x80] ss:$12 sps:$4 sm:$0xff]  }
 0x300   : > { %3912 = vst.msk [vmem:[#allocation4 + $0x124] sm:$0xf] %vm2794_vm15, %v3853_v44  ;;  %v2481_v53 = vpop.permute.xlu1 %2480  ;;  %v4656_v52 = vld [vmem:[#allocation4 + $0xfc] sm:$0xff] }
 0x301   : > { %v12299_v34 = vld [vmem:[#allocation4 + $0xf4] ss:$12 sps:$4 sm:$0xff]   ;;  %2539 = vst.msk [vmem:[#allocation4 + $0x144] sm:$0x7] %vm2538_vm3, %v2481_v53  ;;  %v10149_v42 = vcombine.low %v4654_v39, %v4656_v52 }
 0x302   : > { %5178 = vmatprep.mubr.bf16.mxu1 %v12299_v34  ;;  %2823 = vst.msk [vmem:[#allocation4 + $0x144] sm:$0x7] %vm2822_vm5, %v2765_v56  ;;  %v12328_v56 = vld [vmem:[#allocation4 + $0xb0] ss:$12 sps:$4 sm:$0xff]  }
 0x303   : > { %5179 = vmatmul.mubr.bf16.gmra.mrb[40].mxu1 %v10149_v42 }
 0x304   : > { %v3661_v1 = vpop.permute.xlu0 %3660  ;;  %v3855_v47 = vpop.permute.xlu1 %3854 }
 0x305   : > { %3718 = vst.msk [vmem:[#allocation4 + $0x13c] sm:$0xf] %vm2510_vm13, %v3661_v1  ;;  %v12337_v1 = vld [vmem:[%s15645_s5 + $0x1e8] sm:$0xff]  }
 0x306   : > { %3914 = vst.msk [vmem:[#allocation4 + $0x13c] sm:$0xf] %vm2794_vm15, %v12934_v38  ;;  %v12306_v45 = vld [vmem:[#allocation4 + $0x120] ss:$12 sps:$4 sm:$0xff]   ;;  %11703 = vmatpush3.bf16.msra.mxu0 %v12337_v1 }
 0x307   : > { %11704 = vmatprep.subr.bf16.mxu0 %v12632_v0 }
 0x308   : > { %v4328_v63 = vpop.permute.xlu0 %4327  ;;  %v3659_v5 = vpop.permute.xlu1 %3658 }
 0x309   : > { %4387 = vst.msk [vmem:[#allocation4 + $0x124] sm:$0xf] %vm2992_vm0, %v4328_v63 }
 0x30a   : > { %3717 = vst.msk [vmem:[#allocation4 + $0x130] sm:$0xf] %vm2510_vm13, %v3659_v5  ;;  %vm5444_vm13 = vcmask 518144  }
 0x30b   : > { %3913 = vst.msk [vmem:[#allocation4 + $0x130] sm:$0xf] %vm2794_vm15, %v3855_v47  ;;  %vm14494_vm14 = vmand %vm5444_vm13, %vm5470_vm12  ;;  %vm5503_vm15 = vcmask 519170   ;;  %vm5600_vm12 = vsmask.f32 256 }
 0x30c   : > { %v2961_v10 = vpop.permute.xlu0 %2960  ;;  %v3663_v20 = vpop.permute.xlu1 %3662 }
 0x30d   : > { %3019 = vst.msk [vmem:[#allocation4 + $0x138] sm:$0xf] %vm2992_vm0, %v2961_v10  ;;  %v10954_v31 = vpop.f32.mrb[12].mxu1 }
 0x30e   : > { %3719 = vst.msk [vmem:[#allocation4 + $0x148] sm:$0x7] %vm2538_vm3, %v3663_v20  ;;  %v10955_v32 = vpop.f32.mrb[13].mxu1 }
 0x30f   : > { %v14327_v9 = vadd.f32 %v10955_v32, %v10954_v31  ;;  %v10957_v60 = vpop.f32.mrb[14].mxu1  ;;  %v12338_v32 = vld [vmem:[%s15645_s5 + $0x28] sm:$0xff]  }
 0x310   : > { %v4332_v38 = vpop.permute.xlu0 %4331  ;;  %v10958_v62 = vpop.f32.mrb[15].mxu1 }
 0x311   : > { %4389 = vst.msk [vmem:[#allocation4 + $0x13c] sm:$0xf] %vm2992_vm0, %v4332_v38  ;;  %v14330_v6 = vadd.f32 %v10958_v62, %v10957_v60  ;;  %v4326_v3 = vpop.permute.xlu1 %4325 }
 0x312   : > { %4386 = vst.msk [vmem:[#allocation4 + $0x118] sm:$0xf] %vm2992_vm0, %v4326_v3 }
 0x315   : > { %v3859_v23 = vpop.permute.xlu1 %3858 }
 0x316   : > { %3915 = vst.msk [vmem:[#allocation4 + $0x148] sm:$0x7] %vm2822_vm5, %v3859_v23  ;;  %vm5509_vm5 = vcmask 517120  }
 0x319   : > { %v4330_v7 = vpop.permute.xlu1 %4329  ;;  %v12301_v21 = vld [vmem:[#allocation4 + $0x10c] ss:$12 sps:$4 sm:$0xff]  }
 0x31a   : > { %4388 = vst.msk [vmem:[#allocation4 + $0x130] sm:$0xf] %vm2992_vm0, %v4330_v7  ;;  %5186 = vmatprep.mubr.bf16.mxu1 %v12301_v21  ;;  %v12339_v21 = vld [vmem:[%s15645_s5 + $0x30] sm:$0xff]   ;;  %vm5504_vm0 = vsmask.f32 7946 }
 0x31b   : > { %5187 = vmatmul.mubr.bf16.gmra.mrb[44].mxu1 %v12303_v54  ;;  %v12340_v54 = vld [vmem:[%s15645_s5 + $0x38] sm:$0xff]   ;;  %vm14529_vm3 = vmand %vm5503_vm15, %vm5504_vm0 }
 0x31d   : > { %v2963_v61 = vpop.permute.xlu1 %2962 }
 0x31e   : > { %3021 = vst.msk [vmem:[#allocation4 + $0x144] sm:$0x7] %vm3020_vm6, %v2963_v61 }
 0x321   : > { %v4334_v33 = vpop.permute.xlu1 %4333  ;;  %v12304_v8 = vld [vmem:[#allocation4 + $0x124] ss:$12 sps:$4 sm:$0xff]  }
 0x322   : > { %4390 = vst.msk [vmem:[#allocation4 + $0x148] sm:$0x7] %vm3020_vm6, %v4334_v33  ;;  %5194 = vmatprep.mubr.bf16.mxu1 %v12304_v8  ;;  %vm5535_vm6 = vsmask.f32 1280 }
 0x323   : > { %5195 = vmatmul.mubr.bf16.gmra.mrb[48].mxu1 %v12306_v45  ;;  %vm14558_vm7 = vmand %vm5509_vm5, %vm5535_vm6 }
 0x325   : > { %v12309_v48 = vld [vmem:[#allocation4 + $0x138] ss:$12 sps:$4 sm:$0x7f]  }
 0x329   : > { %v12307_v16 = vld [vmem:[#allocation4 + $0x13c] ss:$12 sps:$4 sm:$0x7f]  }
 0x32a   : > { %v10960_v2 = vpop.f32.mrb[16].mxu1  ;;  %5202 = vmatprep.mubr.bf16.mxu1 %v12307_v16 }
 0x32b   : > { %v10961_v11 = vpop.f32.mrb[17].mxu1  ;;  %5203 = vmatmul.mubr.bf16.gmra.mrb[52].mxu1 %v12309_v48  ;;  %v12345_v48 = vld [vmem:[%s15645_s5 + $0x1f0] sm:$0xff]  }
 0x32c   : > { %v14335_v29 = vadd.f32 %v10961_v11, %v10960_v2  ;;  %v10963_v4 = vpop.f32.mrb[18].mxu1  ;;  %11492 = vmatprep.mubr.msk.bf16.mxu1 %vm331_vm4, %v12314_v41  ;;  %11705 = vmatpush3.bf16.msra.mxu0 %v12345_v48  ;;  %v12347_v11 = vld [vmem:[%s15645_s5 + $0x1f8] sm:$0xff]  }
 0x32d   : > { %v10964_v46 = vpop.f32.mrb[19].mxu1  ;;  %11706 = vmatprep.subr.bf16.mxu0 %v12632_v0 }
 0x32e   : > { %v14338_v35 = vadd.f32 %v10964_v46, %v10963_v4 }
 0x330   : > { %11707 = vmatpush3.bf16.msra.mxu0 %v12347_v11 }
 0x331   : > { %11724 = vmatprep.subr.bf16.mxu0 %v12632_v0 }
 0x333   : > { %11493 = vmatmul.mubr.msk.bf16.vlgmr.msra.gmra.mrb[56].mxu1 %vm331_vm4, %v12316_v30 }
 0x334   : > { %11496 = vmatprep.mubr.msk.bf16.mxu1 %vm331_vm4, %v12318_v15  ;;  %11521 = vmatpush3.bf16.msra.mxu1 %v12336_v59 }
 0x335   : > { %11522 = vmatprep.subr.bf16.mxu1 %v12632_v0 }
 0x338   : > { %11523 = vmatpush3.bf16.msra.mxu1 %v12338_v32 }
 0x339   : > { %11524 = vmatprep.subr.bf16.mxu1 %v12632_v0 }
 0x33b   : > { %11497 = vmatmul.mubr.msk.bf16.gmra.mrb[60].mxu1 %vm331_vm4, %v12320_v12 }
 0x33c   : > { %11500 = vmatprep.mubr.msk.bf16.mxu1 %vm331_vm4, %v12322_v40  ;;  %11525 = vmatpush3.bf16.msra.mxu1 %v12339_v21 }
 0x33d   : > { %11526 = vmatprep.subr.bf16.mxu1 %v12632_v0 }
 0x340   : > { %11527 = vmatpush3.bf16.msra.mxu1 %v12340_v54 }
 0x341   : > { %11532 = vmatprep.subr.bf16.mxu1 %v12632_v0 }
 0x343   : > { %11501 = vmatmul.mubr.msk.bf16.gmra.mrb[64].mxu1 %vm331_vm4, %v12324_v27 }
 0x344   : > { %v10966_v17 = vpop.f32.mrb[20].mxu1  ;;  %11504 = vmatprep.mubr.msk.bf16.mxu1 %vm331_vm4, %v12326_v26 }
 0x345   : > { %v10967_v14 = vpop.f32.mrb[21].mxu1 }
 0x346   : > { %v14346_v28 = vadd.f32 %v10967_v14, %v10966_v17  ;;  %v10969_v19 = vpop.f32.mrb[22].mxu1 }
 0x347   : > { %v10970_v50 = vpop.f32.mrb[23].mxu1 }
 0x348   : > { %v14348_v57 = vadd.f32 %v10970_v50, %v10969_v19 }
 0x34b   : > { %11505 = vmatmul.mubr.msk.bf16.gmra.mrb[68].mxu1 %vm331_vm4, %v12328_v56 }
 0x34c   : > { %11508 = vmatprep.mubr.msk.bf16.mxu1 %vm331_vm4, %v12329_v25 }
 0x353   : > { %11509 = vmatmul.mubr.msk.bf16.gmra.mrb[72].mxu1 %vm331_vm4, %v12330_v37 }
 0x354   : > { %11512 = vmatprep.mubr.msk.bf16.mxu1 %vm331_vm4, %v12331_v22 }
 0x35b   : > { %11513 = vmatmul.mubr.msk.bf16.gmra.mrb[76].mxu1 %vm331_vm4, %v12332_v51 }
 0x35c   : > { %11516 = vmatprep.mubr.msk.bf16.mxu1 %vm331_vm4, %v12333_v36 }
 0x361   : > { %v10972_v44 = vpop.f32.mrb[24].mxu1 }
 0x362   : > { %v10973_v53 = vpop.f32.mrb[25].mxu1 }
 0x363   : > { %v14356_v39 = vadd.f32 %v10973_v53, %v10972_v44  ;;  %11517 = vmatmul.mubr.msk.bf16.gmra.mrb[80].mxu1 %vm331_vm4, %v12334_v43  ;;  %v10975_v52 = vpop.f32.mrb[26].mxu1  ;;  %vm5356_vm4 = vcmask 523264  }
 0x364   : > { %v10976_v34 = vpop.f32.mrb[27].mxu1  ;;  %11528 = vmatprep.mubr.msk.bf16.mxu1 %vm12634_vm2, %v12632_v0 }
 0x365   : > { %v14361_v42 = vadd.f32 %v10976_v34, %v10975_v52 }
 0x37c   : > { %v10978_v47 = vpop.f32.mrb[28].mxu1 }
 0x37d   : > { %v10979_v63 = vpop.f32.mrb[29].mxu1 }
 0x37e   : > { %v14371_v5 = vadd.f32 %v10979_v63, %v10978_v47  ;;  %v10981_v10 = vpop.f32.mrb[30].mxu1 }
 0x37f   : > { %v10982_v20 = vpop.f32.mrb[31].mxu1 }
 0x380   : > { %v14373_v31 = vadd.f32 %v10982_v20, %v10981_v10 }
 0x399   : > { %v10984_v60 = vpop.f32.mrb[32].mxu1 }
 0x39a   : > { %v10985_v38 = vpop.f32.mrb[33].mxu1 }
 0x39b   : > { %v14379_v62 = vadd.f32 %v10985_v38, %v10984_v60  ;;  %v10987_v3 = vpop.f32.mrb[34].mxu1 }
 0x39c   : > { %v10988_v23 = vpop.f32.mrb[35].mxu1 }
 0x39d   : > { %v14381_v7 = vadd.f32 %v10988_v23, %v10987_v3 }
 0x3b4   : > { %v10990_v61 = vpop.f32.mrb[36].mxu1 }
 0x3b5   : > { %v10991_v33 = vpop.f32.mrb[37].mxu1 }
 0x3b6   : > { %v14391_v8 = vadd.f32 %v10991_v33, %v10990_v61  ;;  %v10993_v45 = vpop.f32.mrb[38].mxu1 }
 0x3b7   : > { %v10994_v16 = vpop.f32.mrb[39].mxu1 }
 0x3b8   : > { %v14393_v2 = vadd.f32 %v10994_v16, %v10993_v45 }
 0x3d6   : > { %v10996_v41 = vpop.f32.mrb[40].mxu1 }
 0x3d7   : > { %v10997_v4 = vpop.f32.mrb[41].mxu1 }
 0x3d8   : > { %v14403_v46 = vadd.f32 %v10997_v4, %v10996_v41  ;;  %v10999_v30 = vpop.f32.mrb[42].mxu1 }
 0x3d9   : > { %v11000_v15 = vpop.f32.mrb[43].mxu1 }
 0x3da   : > { %v14405_v12 = vadd.f32 %v11000_v15, %v10999_v30 }
 0x3ee   : > { %v11002_v40 = vpop.f32.mrb[44].mxu1 }
 0x3ef   : > { %v11003_v27 = vpop.f32.mrb[45].mxu1 }
 0x3f0   : > { %v14407_v26 = vadd.f32 %v11003_v27, %v11002_v40  ;;  %v11005_v17 = vpop.f32.mrb[46].mxu1 }
 0x3f1   : > { %v11006_v14 = vpop.f32.mrb[47].mxu1 }
 0x3f2   : > { %v14409_v19 = vadd.f32 %v11006_v14, %v11005_v17  ;;  %v5407_v17 = vld [vmem:[#allocation6] sm:$0xf] }
 0x3f6   : > { %v11008_v50 = vpop.f32.mrb[48].mxu1 }
 0x3f7   : > { %v11009_v56 = vpop.f32.mrb[49].mxu1 }
 0x3f8   : > { %v14411_v25 = vadd.f32 %v11009_v56, %v11008_v50  ;;  %v11011_v37 = vpop.f32.mrb[50].mxu1 }
 0x3f9   : > { %v11012_v22 = vpop.f32.mrb[51].mxu1 }
 0x3fa   : > { %v14413_v51 = vadd.f32 %v11012_v22, %v11011_v37 }
 0x3fe   : > { %v11014_v36 = vpop.f32.mrb[52].mxu1 }
 0x3ff   : > { %v11015_v43 = vpop.f32.mrb[53].mxu1 }
 0x400   : > { %v14415_v44 = vadd.f32 %v11015_v43, %v11014_v36  ;;  %v11017_v53 = vpop.f32.mrb[54].mxu1 }
 0x401   : > { %v11018_v52 = vpop.f32.mrb[55].mxu1 }
 0x402   : > { %v14417_v34 = vadd.f32 %v11018_v52, %v11017_v53 }
 0x406   : > { %v11494_v59 = vpop.f32.mrb[56].mxu1 }
 0x407   : > { %v5254_v1 = vadd.f32 %v11494_v59, %v14285_v24  ;;  %v5245_v47 = vpop.f32.mrb[57].mxu1 }
 0x408   : > { %v5246_v63 = vadd.f32 %v14269_v58, %v5245_v47  ;;  %v11495_v10 = vpop.f32.mrb[58].mxu1 }
 0x409   : > { %5359 = vst.msk [vmem:[#allocation5 + $0x10] sm:$0xff] %vm5356_vm4, %v5254_v1  ;;  %v5257_v20 = vadd.f32 %v11495_v10, %v14289_v18  ;;  %v5248_v32 = vpop.f32.mrb[59].mxu1 }
 0x40a   : > { %5357 = vst.msk [vmem:[#allocation5] sm:$0xff] %vm5356_vm4, %v5246_v63  ;;  %v5249_v60 = vadd.f32 %v14273_v55, %v5248_v32 }
 0x40b   : > { %5360 = vst.msk [vmem:[#allocation5 + $0x18] sm:$0xff] %vm5356_vm4, %v5257_v20 }
 0x40c   : > { %5358 = vst.msk [vmem:[#allocation5 + $0x8] sm:$0xff] %vm5356_vm4, %v5249_v60 }
 0x40e   : > { %v11498_v38 = vpop.f32.mrb[60].mxu1 }
 0x40f   : > { %v5270_v24 = vadd.f32 %v11498_v38, %v14327_v9  ;;  %v5261_v3 = vpop.f32.mrb[61].mxu1 }
 0x410   : > { %v5262_v58 = vadd.f32 %v14301_v13, %v5261_v3  ;;  %v11499_v23 = vpop.f32.mrb[62].mxu1  ;;  %v14438_v13 = vld [vmem:[%s15644_s4] ss:$0 sm:$0xff] }
 0x411   : > { %5363 = vst.msk [vmem:[#allocation5 + $0x30] sm:$0xff] %vm5356_vm4, %v5270_v24  ;;  %v5273_v18 = vadd.f32 %v11499_v23, %v14330_v6  ;;  %v5264_v21 = vpop.f32.mrb[63].mxu1 }
 0x412   : > { %v5390_v54 = vld [vmem:[#allocation5 + $0x10] ss:$2 sm:$0x7f]  ;;  %v5392_v61 = vld [vmem:[#allocation5 + $0x11] ss:$2 sm:$0x7f]  ;;  %v5265_v55 = vadd.f32 %v14304_v49, %v5264_v21 }
 0x413   : > { %5361 = vst.msk [vmem:[#allocation5 + $0x20] sm:$0xff] %vm5356_vm4, %v5262_v58  ;;  %v5394_v33 = vmax.f32 %v5390_v54, %v5392_v61  ;;  %v5386_v45 = vld [vmem:[#allocation5] ss:$2 sm:$0x7f]  ;;  %5364 = vst.msk [vmem:[#allocation5 + $0x38] sm:$0xff] %vm5356_vm4, %v5273_v18 }
 0x414   : > { %v5388_v16 = vld [vmem:[#allocation5 + $0x1] ss:$2 sm:$0x7f]  ;;  %5362 = vst.msk [vmem:[#allocation5 + $0x28] sm:$0xff] %vm5356_vm4, %v5265_v55 }
 0x415   : > { %v5393_v9 = vmax.f32 %v5386_v45, %v5388_v16 }
 0x416   : > { %v11502_v48 = vpop.f32.mrb[64].mxu1 }
 0x417   : > { %v5395_v6 = vmax.f32 %v5393_v9, %v5394_v33  ;;  %v5286_v11 = vadd.f32 %v11502_v48, %v14346_v28  ;;  %v5277_v41 = vpop.f32.mrb[65].mxu1 }
 0x418   : > { %v5278_v4 = vadd.f32 %v14335_v29, %v5277_v41  ;;  %v11503_v30 = vpop.f32.mrb[66].mxu1  ;;  %v12342_v41 = vld [vmem:[%s15645_s5] sm:$0xff]  }
 0x419   : > { %v5402_v49 = vadd.f32 %v14438_v13, %v5395_v6  ;;  %5367 = vst.msk [vmem:[#allocation5 + $0x50] sm:$0xff] %vm5356_vm4, %v5286_v11  ;;  %v5289_v15 = vadd.f32 %v11503_v30, %v14348_v57  ;;  %v5280_v40 = vpop.f32.mrb[67].mxu1 }
 0x41a   : > { %v5415_v14 = vld [vmem:[#allocation5 + $0x30] ss:$2 sm:$0x7f]  ;;  %5365 = vst.msk [vmem:[#allocation5 + $0x40] sm:$0xff] %vm5356_vm4, %v5278_v4  ;;  %v5281_v50 = vadd.f32 %v14338_v35, %v5280_v40 }
 0x41b   : > { %v5403_v27 = vmax.f32 %v5402_v49, 0.0  ;;  %v5417_v28 = vld [vmem:[#allocation5 + $0x31] ss:$2 sm:$0x7f]  ;;  %5368 = vst.msk [vmem:[#allocation5 + $0x58] sm:$0xff] %vm5356_vm4, %v5289_v15 }
 0x41c   : > { %v5411_v56 = vld [vmem:[#allocation5 + $0x20] ss:$2 sm:$0x7f]  ;;  %v5419_v37 = vmax.f32 %v5415_v14, %v5417_v28  ;;  %v5413_v22 = vld [vmem:[#allocation5 + $0x21] ss:$2 sm:$0x7f] }
 0x41d   : > { %v5404_v29 = vpack.c.bf16 %v5403_v27, %v5403_v27  ;;  %5366 = vst.msk [vmem:[#allocation5 + $0x48] sm:$0xff] %vm5356_vm4, %v5281_v50  ;;  %v5418_v57 = vmax.f32 %v5411_v56, %v5413_v22  ;;  %v12343_v56 = vld [vmem:[%s15645_s5 + $0x8] sm:$0xff]  }
 0x41e   : > { %v11506_v43 = vpop.f32.mrb[68].mxu1 }
 0x41f   : > { %v5408_v36 = vsel %vm5406_vm9, %v5404_v29, %v5407_v17  ;;  %v5420_v53 = vmax.f32 %v5418_v57, %v5419_v37  ;;  %v5302_v52 = vadd.f32 %v11506_v43, %v14371_v5  ;;  %v5293_v59 = vpop.f32.mrb[69].mxu1  ;;  %vm5568_vm9 = vcmask 519169  }
 0x420   : > { %5409 = vst [vmem:[#allocation6] sm:$0xf] %v5408_v36  ;;  %v5294_v35 = vadd.f32 %v14356_v39, %v5293_v59  ;;  %v11507_v1 = vpop.f32.mrb[70].mxu1  ;;  %vm14595_vm10 = vmand %vm5568_vm9, %vm5569_vm8 }
 0x421   : > { %v5421_v47 = vadd.f32 %v14438_v13, %v5420_v53  ;;  %5371 = vst.msk [vmem:[#allocation5 + $0x70] sm:$0xff] %vm5356_vm4, %v5302_v52  ;;  %v5305_v63 = vadd.f32 %v11507_v1, %v14373_v31  ;;  %v5296_v10 = vpop.f32.mrb[71].mxu1  ;;  %v5472_v52 = vld [vmem:[#allocation6 + $0x8] sm:$0x7] }
 0x422   : > { %v5451_v20 = vld [vmem:[#allocation5 + $0x50] ss:$2 sm:$0x7f]  ;;  %v5453_v32 = vld [vmem:[#allocation5 + $0x51] ss:$2 sm:$0x7f]  ;;  %v5297_v60 = vadd.f32 %v14361_v42, %v5296_v10 }
 0x423   : > { %5369 = vst.msk [vmem:[#allocation5 + $0x60] sm:$0xff] %vm5356_vm4, %v5294_v35  ;;  %v5422_v38 = vmax.f32 %v5421_v47, 0.0  ;;  %v5455_v24 = vmax.f32 %v5451_v20, %v5453_v32  ;;  %5372 = vst.msk [vmem:[#allocation5 + $0x78] sm:$0xff] %vm5356_vm4, %v5305_v63  ;;  %v12344_v47 = vld [vmem:[%s15645_s5 + $0x10] sm:$0xff]  }
 0x424   : > { %v5447_v5 = vld [vmem:[#allocation5 + $0x40] ss:$2 sm:$0x7f]  ;;  %v5449_v39 = vld [vmem:[#allocation5 + $0x41] ss:$2 sm:$0x7f] }
 0x425   : > { %5370 = vst.msk [vmem:[#allocation5 + $0x68] sm:$0xff] %vm5356_vm4, %v5297_v60  ;;  %v10864_v3 = vpack.c.bf16 %v5422_v38, %v5422_v38  ;;  %v5454_v58 = vmax.f32 %v5447_v5, %v5449_v39 }
 0x426   : > { %v11510_v31 = vpop.f32.mrb[72].mxu1 }
 0x427   : > { %v14459_v23 = vld [vmem:[#allocation6] sm:$0x1]  ;;  %v5428_v18 = vshll.u32 %v10864_v3, 16  ;;  %v5456_v21 = vmax.f32 %v5454_v58, %v5455_v24  ;;  %v5318_v54 = vadd.f32 %v11510_v31, %v14391_v8  ;;  %v5309_v42 = vpop.f32.mrb[73].mxu1  ;;  %v5431_v9 = vshrl.u32 %v10864_v3, 16  ;;  %v12346_v58 = vld [vmem:[%s15645_s5 + $0x18] sm:$0xff]  }
 0x428   : > { %v5310_v55 = vadd.f32 %v14379_v62, %v5309_v42  ;;  %v11511_v33 = vpop.f32.mrb[74].mxu1  ;;  %v10208_v45 = vcombine.low %v14459_v23, %v14459_v23  ;;  %v5441_v6 = vld [vmem:[#allocation6] sm:$0x8] }
 0x429   : > { %v14469_v16 = vrot.slane %v5428_v18, 5  ;;  %v5457_v48 = vadd.f32 %v14438_v13, %v5456_v21  ;;  %5375 = vst.msk [vmem:[#allocation5 + $0x90] sm:$0xff] %vm5356_vm4, %v5318_v54  ;;  %v5321_v8 = vadd.f32 %v11511_v33, %v14393_v2  ;;  %v5312_v11 = vpop.f32.mrb[75].mxu1  ;;  %v12349_v33 = vld [vmem:[#allocation6 + $0x4] ss:$0 sps:$4 sm:$0x88]  }
 0x42a   : > { %v5480_v62 = vld [vmem:[#allocation5 + $0x70] ss:$2 sm:$0x7f]  ;;  %v5482_v49 = vld [vmem:[#allocation5 + $0x71] ss:$2 sm:$0x7f]  ;;  %v5313_v4 = vadd.f32 %v14381_v7, %v5312_v11 }
 0x42b   : > { %5373 = vst.msk [vmem:[#allocation5 + $0x80] sm:$0xff] %vm5356_vm4, %v5310_v55  ;;  %v5442_v30 = vsel %vm14462_vm11, %v14469_v16, %v5441_v6  ;;  %v5458_v15 = vmax.f32 %v5457_v48, 0.0  ;;  %v5484_v40 = vmax.f32 %v5480_v62, %v5482_v49  ;;  %5376 = vst.msk [vmem:[#allocation5 + $0x98] sm:$0xff] %vm5356_vm4, %v5321_v8  ;;  %v5627_v2 = vshrl.u32 %v10208_v45, 16  ;;  %v12365_v62 = vld [vmem:[%s15645_s5 + $0x78] sm:$0xff]  }
 0x42c   : > { %v5476_v27 = vld [vmem:[#allocation5 + $0x60] ss:$2 sm:$0x7f]  ;;  %5443 = vst [vmem:[#allocation6] sm:$0x8] %v5442_v30  ;;  %5374 = vst.msk [vmem:[#allocation5 + $0x88] sm:$0xff] %vm5356_vm4, %v5313_v4 }
 0x42d   : > { %v5478_v17 = vld [vmem:[#allocation5 + $0x61] ss:$2 sm:$0x7f]  ;;  %v10865_v14 = vpack.c.bf16 %v5458_v15, %v5458_v15  ;;  %11529 = vmatmul.mubr.msk.bf16.vlgmr.msra.gmra.mrb[84].mxu1 %vm5356_vm4, %v5627_v2  ;;  %v5433_v7 = vrot.slane %v5431_v9, 4  ;;  %v6831_v30 = vshrl.u32 %v12349_v33, 16  ;;  %vm5574_vm11 = vcmask 516096  }
 0x42e   : > { %v5483_v50 = vmax.f32 %v5476_v27, %v5478_v17  ;;  %11533 = vmatpush3.bf16.msra.mxu1 %v12342_v41  ;;  %v11514_v28 = vpop.f32.mrb[76].mxu1  ;;  %11540 = vmatprep.mubr.msk.bf16.mxu1 %vm12634_vm2, %v12632_v0  ;;  %v12350_v15 = vld [vmem:[%s15645_s5 + $0x220] sm:$0xff]   ;;  %v12361_v33 = vld [vmem:[%s15645_s5 + $0x68] sm:$0xff]  }
 0x42f   : > { %v5463_v29 = vrot.slane %v10865_v14, 5  ;;  %v5334_v22 = vadd.f32 %v11514_v28, %v14407_v26  ;;  %11534 = vmatprep.subr.bf16.mxu1 %v12632_v0  ;;  %v5325_v57 = vpop.f32.mrb[77].mxu1  ;;  %v6833_v17 = vrot.slane %v6831_v30, 3  ;;  %v12367_v30 = vld [vmem:[%s15645_s5 + $0x80] sm:$0xff]  }
 0x430   : > { %v5485_v37 = vmax.f32 %v5483_v50, %v5484_v40  ;;  %v5326_v36 = vadd.f32 %v14403_v46, %v5325_v57  ;;  %v11515_v43 = vpop.f32.mrb[78].mxu1  ;;  %v5434_v46 = vor.u32 %v5433_v7, %v14469_v16  ;;  %v12351_v50 = vld [vmem:[%s15645_s5 + $0x48] sm:$0xff]  }
 0x431   : > { %v5464_v59 = vrot.slane %v5463_v29, 4  ;;  %5379 = vst.msk [vmem:[#allocation5 + $0xb0] sm:$0xff] %vm5356_vm4, %v5334_v22  ;;  %v5337_v26 = vadd.f32 %v11515_v43, %v14409_v19  ;;  %v5328_v1 = vpop.f32.mrb[79].mxu1  ;;  %11709 = vmatmul.mubr.msk.bf16.vlgmr.msra.gmra.mrb[196].mxu0 %vm5356_vm4, %v6833_v17  ;;  %v12372_v17 = vld [vmem:[%s15645_s5 + $0x90] sm:$0xff]   ;;  %v12377_v29 = vld [vmem:[%s15645_s5 + $0xa0] sm:$0xff]  }
 0x432   : > { %v5486_v35 = vadd.f32 %v14438_v13, %v5485_v37  ;;  %v5516_v63 = vld [vmem:[#allocation5 + $0x90] ss:$2 sm:$0x7f]  ;;  %v5518_v10 = vld [vmem:[#allocation5 + $0x91] ss:$2 sm:$0x7f]  ;;  %11535 = vmatpush3.bf16.msra.mxu1 %v12343_v56  ;;  %v5329_v20 = vadd.f32 %v14405_v12, %v5328_v1  ;;  %11725 = vmatpush3.bf16.msra.mxu0 %v12350_v15 }
 0x433   : > { %5377 = vst.msk [vmem:[#allocation5 + $0xa0] sm:$0xff] %vm5356_vm4, %v5326_v36  ;;  %v5520_v60 = vmax.f32 %v5516_v63, %v5518_v10  ;;  %v5512_v38 = vld [vmem:[#allocation5 + $0x80] ss:$2 sm:$0x7f]  ;;  %5380 = vst.msk [vmem:[#allocation5 + $0xb8] sm:$0xff] %vm5356_vm4, %v5337_v26  ;;  %11536 = vmatprep.subr.bf16.mxu1 %v12632_v0  ;;  %v5473_v19 = vsel %vm14494_vm14, %v5464_v59, %v5472_v52  ;;  %v5435_v3 = vrot.slane %v5434_v46, 4  ;;  %11732 = vmatprep.mubr.msk.bf16.mxu0 %vm12634_vm2, %v12632_v0 }
 0x434   : > { %v5487_v32 = vmax.f32 %v5486_v35, 0.0  ;;  %v5514_v24 = vld [vmem:[#allocation5 + $0x81] ss:$2 sm:$0x7f]  ;;  %5378 = vst.msk [vmem:[#allocation5 + $0xa8] sm:$0xff] %vm5356_vm4, %v5329_v20  ;;  %11726 = vmatprep.subr.bf16.mxu0 %v12632_v0  ;;  %v12353_v36 = vld [vmem:[%s15645_s5 + $0x50] sm:$0xff]  }
 0x435   : > { %5474 = vst [vmem:[#allocation6 + $0x8] sm:$0x7] %v5473_v19  ;;  %v5519_v39 = vmax.f32 %v5512_v38, %v5514_v24  ;;  %5445 = vst.msk [vmem:[#allocation6 + $0x4] sm:$0x7] %vm5444_vm13, %v5435_v3  ;;  %v5537_v37 = vld [vmem:[#allocation6 + $0x10] sm:$0x3] }
 0x436   : > { %v10866_v5 = vpack.c.bf16 %v5487_v32, %v5487_v32  ;;  %11537 = vmatpush3.bf16.msra.mxu1 %v12344_v47  ;;  %v11518_v12 = vpop.f32.mrb[80].mxu1  ;;  %v12354_v47 = vld [vmem:[%s15645_s5 + $0x230] sm:$0xff]   ;;  %v14574_v10 = vld [vmem:[#allocation6] ss:$0 sps:$4 sm:$0x22]   ;;  %v12355_v20 = vld [vmem:[%s15645_s5 + $0x58] sm:$0xff]  }
 0x437   : > { %v5521_v21 = vmax.f32 %v5519_v39, %v5520_v60  ;;  %v5350_v54 = vadd.f32 %v11518_v12, %v14415_v44  ;;  %11538 = vmatprep.subr.bf16.mxu1 %v12632_v0  ;;  %v5341_v42 = vpop.f32.mrb[81].mxu1  ;;  %v12348_v44 = vld [vmem:[%s15645_s5 + $0x40] sm:$0xff]   ;;  %v12357_v24 = vld [vmem:[%s15645_s5 + $0x238] sm:$0xff]   ;;  %vm5601_vm13 = vmand %vm5574_vm11, %vm5600_vm12 }
 0x438   : > { %v5493_v31 = vshrl.u32 %v10866_v5, 16  ;;  %v5496_v18 = vshll.u32 %v10866_v5, 16  ;;  %v5342_v61 = vadd.f32 %v14411_v25, %v5341_v42  ;;  %v11519_v55 = vpop.f32.mrb[82].mxu1 }
 0x439   : > { %v5522_v9 = vadd.f32 %v14438_v13, %v5521_v21  ;;  %5383 = vst.msk [vmem:[#allocation5 + $0xd0] sm:$0xff] %vm5356_vm4, %v5350_v54  ;;  %v5353_v6 = vadd.f32 %v11519_v55, %v14417_v34  ;;  %v5344_v48 = vpop.f32.mrb[83].mxu1  ;;  %v5776_v21 = vrot.slane %v14574_v10, 1 }
 0x43a   : > { %v5495_v45 = vrot.slane %v5493_v31, 5  ;;  %v5498_v16 = vrot.slane %v5496_v18, 6  ;;  %v5545_v8 = vld [vmem:[#allocation5 + $0xb0] ss:$2 sm:$0x7f]  ;;  %5381 = vst.msk [vmem:[#allocation5 + $0xc0] sm:$0xff] %vm5356_vm4, %v5342_v61  ;;  %11539 = vmatpush3.bf16.msra.mxu1 %v12346_v58  ;;  %v5345_v25 = vadd.f32 %v14413_v51, %v5344_v48 }
 0x43b   : > { %v5547_v11 = vld [vmem:[#allocation5 + $0xb1] ss:$2 sm:$0x7f]  ;;  %v5523_v34 = vmax.f32 %v5522_v9, 0.0  ;;  %5385 = vst.msk [vmem:[#allocation5 + $0xd8] sm:$0x3f] %vm5384_vm1, %v5353_v6  ;;  %11544 = vmatprep.subr.bf16.mxu1 %v12632_v0 }
 0x43c   : > { %v5499_v41 = vor.u32 %v5498_v16, %v5495_v45  ;;  %v5549_v49 = vmax.f32 %v5545_v8, %v5547_v11  ;;  %v5541_v4 = vld [vmem:[#allocation5 + $0xa0] ss:$2 sm:$0x7f]  ;;  %v5543_v51 = vld [vmem:[#allocation5 + $0xa1] ss:$2 sm:$0x7f] }
 0x43d   : > { %5382 = vst.msk [vmem:[#allocation5 + $0xc8] sm:$0xff] %vm5356_vm4, %v5345_v25  ;;  %v10867_v27 = vpack.c.bf16 %v5523_v34, %v5523_v34  ;;  %v5548_v2 = vmax.f32 %v5541_v4, %v5543_v51  ;;  %11541 = vmatmul.mubr.msk.bf16.vlgmr.msra.gmra.mrb[88].mxu1 %vm5356_vm4, %v14459_v23  ;;  %v5506_v14 = vld [vmem:[#allocation6 + $0x8] sm:$0xc]  ;;  %v14579_v32 = vld [vmem:[#allocation6 + $0x8] sm:$0x1]  ;;  %v12358_v58 = vld [vmem:[%s15645_s5 + $0x60] sm:$0xff]  }
 0x43e   : > { %v5500_v40 = vrot.slane %v5499_v41, 4  ;;  %11545 = vmatpush3.bf16.msra.mxu1 %v12348_v44  ;;  %11552 = vmatprep.mubr.msk.bf16.mxu1 %vm12634_vm2, %v12632_v0  ;;  %v5507_v7 = vsel %vm14529_vm3, %v5499_v41, %v5506_v14  ;;  %v12352_v23 = vld [vmem:[%s15645_s5 + $0x228] sm:$0xff]   ;;  %v10429_v12 = vcombine.low %v14579_v32, %v14579_v32  ;;  %v5602_v48 = vld [vmem:[#allocation6 + $0x18] sm:$0x1]  ;;  %v12363_v8 = vld [vmem:[%s15645_s5 + $0x70] sm:$0xff]   ;;  %v5855_v34 = vshrl.u32 %v14574_v10, 16 }
 0x43f   : > { %v5528_v28 = vrot.slane %v10867_v27, 6  ;;  %v5550_v56 = vmax.f32 %v5548_v2, %v5549_v49  ;;  %11546 = vmatprep.subr.bf16.mxu1 %v12632_v0  ;;  %5508 = vst [vmem:[#allocation6 + $0x8] sm:$0xc] %v5507_v7  ;;  %11727 = vmatpush3.bf16.msra.mxu0 %v12352_v23  ;;  %v12362_v6 = vld [vmem:[%s15645_s5 + $0x268] sm:$0xff]   ;;  %v12364_v25 = vld [vmem:[%s15645_s5 + $0x270] sm:$0xff]   ;;  %v12366_v49 = vld [vmem:[%s15645_s5 + $0x278] sm:$0xff]  }
 0x440   : > { %5510 = vst.msk [vmem:[#allocation6 + $0xc] sm:$0x3] %vm5509_vm5, %v5500_v40  ;;  %11728 = vmatprep.subr.bf16.mxu0 %v12632_v0  ;;  %v6993_v55 = vshrl.u32 %v10429_v12, 16  ;;  %v14629_v41 = vld [vmem:[#allocation6 + $0x8] ss:$0 sps:$4 sm:$0x22]  }
 0x441   : > { %v5529_v22 = vrot.slane %v5528_v28, 4  ;;  %v5551_v57 = vadd.f32 %v14438_v13, %v5550_v56  ;;  %v7155_v4 = vshrl.u32 %v14629_v41, 16  ;;  %v5857_v15 = vrot.slane %v5855_v34, 1  ;;  %v12369_v51 = vld [vmem:[%s15645_s5 + $0x2a0] sm:$0xff]   ;;  %v12370_v27 = vld [vmem:[%s15645_s5 + $0x88] sm:$0xff]   ;;  %v12373_v14 = vld [vmem:[%s15645_s5 + $0x2b0] sm:$0xff]  }
 0x442   : > { %v5581_v43 = vld [vmem:[#allocation5 + $0xd0] ss:$2 sm:$0x7f]  ;;  %v5583_v53 = vld [vmem:[#allocation5 + $0xd1] ss:$2 sm:$0x7f]  ;;  %11547 = vmatpush3.bf16.msra.mxu1 %v12351_v50 }
 0x443   : > { %v5552_v52 = vmax.f32 %v5551_v57, 0.0  ;;  %v5585_v59 = vmax.f32 %v5581_v43, %v5583_v53  ;;  %11548 = vmatprep.subr.bf16.mxu1 %v12632_v0  ;;  %v5538_v26 = vsel %vm14558_vm7, %v5529_v22, %v5537_v37  ;;  %11729 = vmatpush3.bf16.msra.mxu0 %v12354_v47  ;;  %v7157_v40 = vrot.slane %v7155_v4, 1  ;;  %v12371_v2 = vld [vmem:[%s15645_s5 + $0x2a8] sm:$0xff]   ;;  %v12374_v7 = vld [vmem:[%s15645_s5 + $0x98] sm:$0xff]   ;;  %v12379_v22 = vld [vmem:[%s15645_s5 + $0x2e0] sm:$0xff]  }
 0x444   : > { %v5577_v35 = vld [vmem:[#allocation5 + $0xc0] ss:$2 sm:$0x7f]  ;;  %v5579_v1 = vld [vmem:[#allocation5 + $0xc1] ss:$2 sm:$0x7f]  ;;  %11730 = vmatprep.subr.bf16.mxu0 %v12632_v0 }
 0x445   : > { %5539 = vst [vmem:[#allocation6 + $0x10] sm:$0x3] %v5538_v26  ;;  %v10868_v46 = vpack.c.bf16 %v5552_v52, %v5552_v52  ;;  %v5584_v63 = vmax.f32 %v5577_v35, %v5579_v1  ;;  %v14671_v50 = vld [vmem:[#allocation6 + $0x8] ss:$0 sps:$4 sm:$0x44]   ;;  %v12376_v56 = vld [vmem:[%s15645_s5 + $0x2b8] sm:$0xff]  }
 0x446   : > { %11549 = vmatpush3.bf16.msra.mxu1 %v12353_v36  ;;  %v12375_v28 = vld [vmem:[#allocation6] ss:$0 sps:$4 sm:$0x44]   ;;  %v7318_v23 = vshrl.u32 %v14671_v50, 16  ;;  %v12380_v36 = vld [vmem:[%s15645_s5 + $0xa8] sm:$0xff]   ;;  %v12382_v53 = vld [vmem:[%s15645_s5 + $0xb0] sm:$0xff]  }
 0x447   : > { %v5558_v60 = vshrl.u32 %v10868_v46, 16  ;;  %v5561_v38 = vshll.u32 %v10868_v46, 16  ;;  %v5586_v19 = vmax.f32 %v5584_v63, %v5585_v59  ;;  %11550 = vmatprep.subr.bf16.mxu1 %v12632_v0  ;;  %11731 = vmatpush3.bf16.msra.mxu0 %v12357_v24  ;;  %v5939_v37 = vrot.slane %v12375_v28, 2  ;;  %v12381_v43 = vld [vmem:[%s15645_s5 + $0x2e8] sm:$0xff]   ;;  %v12383_v52 = vld [vmem:[%s15645_s5 + $0x2f0] sm:$0xff]   ;;  %v12384_v35 = vld [vmem:[%s15645_s5 + $0xb8] sm:$0xff]  }
 0x448   : > { %11748 = vmatprep.subr.bf16.mxu0 %v12632_v0  ;;  %v7320_v57 = vrot.slane %v7318_v23, 2  ;;  %v14712_v59 = vld [vmem:[#allocation6 + $0x8] ss:$0 sps:$4 sm:$0x88]   ;;  %v6018_v26 = vshrl.u32 %v12375_v28, 16  ;;  %v12385_v1 = vld [vmem:[%s15645_s5 + $0x2f8] sm:$0xff]  }
 0x449   : > { %v5560_v5 = vrot.slane %v5558_v60, 6  ;;  %v5563_v39 = vrot.slane %v5561_v38, 7  ;;  %v5587_v3 = vadd.f32 %v14438_v13, %v5586_v19  ;;  %v12360_v13 = vld [vmem:[%s15645_s5 + $0x260] sm:$0xff]   ;;  %v7481_v47 = vshrl.u32 %v14712_v59, 16  ;;  %v12389_v60 = vld [vmem:[%s15645_s5 + $0xc8] sm:$0xff]   ;;  %v12391_v19 = vld [vmem:[%s15645_s5 + $0xd0] sm:$0xff]  }
 0x44a   : > { %11551 = vmatpush3.bf16.msra.mxu1 %v12355_v20  ;;  %11733 = vmatmul.mubr.msk.bf16.vlgmr.msra.gmra.mrb[200].mxu0 %vm5356_vm4, %v6993_v55  ;;  %v12386_v46 = vld [vmem:[%s15645_s5 + $0xc0] sm:$0xff]   ;;  %v6020_v63 = vrot.slane %v6018_v26, 2  ;;  %v12390_v38 = vld [vmem:[%s15645_s5 + $0x328] sm:$0xff]   ;;  %v12392_v24 = vld [vmem:[%s15645_s5 + $0x330] sm:$0xff]  }
 0x44b   : > { %v5564_v31 = vor.u32 %v5563_v39, %v5560_v5  ;;  %v5588_v18 = vmax.f32 %v5587_v3, 0.0  ;;  %11556 = vmatprep.subr.bf16.mxu1 %v12632_v0  ;;  %11749 = vmatpush3.bf16.msra.mxu0 %v12360_v13  ;;  %v12388_v10 = vld [vmem:[%s15645_s5 + $0x320] sm:$0xff]   ;;  %v7483_v20 = vrot.slane %v7481_v47, 3  ;;  %v12393_v5 = vld [vmem:[%s15645_s5 + $0xd8] sm:$0xff]   ;;  %v14756_v39 = vld [vmem:[#allocation6 + $0xc] sm:$0x1] }
 0x44c   : > { %v5571_v45 = vld [vmem:[#allocation6 + $0x10] sm:$0xe]  ;;  %11756 = vmatprep.mubr.msk.bf16.mxu0 %vm12634_vm2, %v12632_v0  ;;  %11750 = vmatprep.subr.bf16.mxu0 %v12632_v0  ;;  %v12394_v3 = vld [vmem:[#allocation6] ss:$0 sps:$4 sm:$0x88]   ;;  %v12395_v12 = vld [vmem:[%s15645_s5 + $0x338] sm:$0xff]  }
 0x44d   : > { %v5565_v42 = vrot.slane %v5564_v31, 4  ;;  %v10869_v61 = vpack.c.bf16 %v5588_v18, %v5588_v18  ;;  %11553 = vmatmul.mubr.msk.bf16.vlgmr.msra.gmra.mrb[92].mxu1 %vm5356_vm4, %v5776_v21  ;;  %v5572_v9 = vsel %vm14595_vm10, %v5564_v31, %v5571_v45  ;;  %v12396_v31 = vld [vmem:[%s15645_s5 + $0xe0] sm:$0xff]   ;;  %v6102_v18 = vrot.slane %v12394_v3, 3  ;;  %v12399_v13 = vld [vmem:[%s15645_s5 + $0xe8] sm:$0xff]   ;;  %v12402_v55 = vld [vmem:[%s15645_s5 + $0x370] sm:$0xff]  }
 0x44e   : > { %11557 = vmatpush3.bf16.msra.mxu1 %v12358_v58  ;;  %11564 = vmatprep.mubr.msk.bf16.mxu1 %vm12634_vm2, %v12632_v0  ;;  %5573 = vst [vmem:[#allocation6 + $0x10] sm:$0xe] %v5572_v9  ;;  %v10537_v58 = vcombine.low %v14756_v39, %v14756_v39  ;;  %v12398_v21 = vld [vmem:[%s15645_s5 + $0x360] sm:$0xff]   ;;  %v12403_v45 = vld [vmem:[%s15645_s5 + $0xf8] sm:$0xff]   ;;  %v12410_v34 = vld [vmem:[%s15645_s5 + $0x110] sm:$0xff]  }
 0x44f   : > { %v5593_v16 = vrot.slane %v10869_v61, 7  ;;  %11558 = vmatprep.subr.bf16.mxu1 %v12632_v0  ;;  %5575 = vst.msk [vmem:[#allocation6 + $0x14] sm:$0x1] %vm5574_vm11, %v5565_v42  ;;  %11751 = vmatpush3.bf16.msra.mxu0 %v12362_v6  ;;  %v12400_v42 = vld [vmem:[%s15645_s5 + $0x368] sm:$0xff]   ;;  %v12401_v61 = vld [vmem:[%s15645_s5 + $0xf0] sm:$0xff]   ;;  %v12404_v9 = vld [vmem:[%s15645_s5 + $0x378] sm:$0xff]  }
 0x450   : > { %11752 = vmatprep.subr.bf16.mxu0 %v12632_v0  ;;  %v7643_v54 = vshrl.u32 %v10537_v58, 16  ;;  %v14836_v4 = vld [vmem:[#allocation6 + $0xc] ss:$0 sps:$4 sm:$0x44]   ;;  %v12420_v28 = vld [vmem:[%s15645_s5 + $0x130] sm:$0xff]  }
 0x451   : > { %v5594_v44 = vrot.slane %v5593_v16, 4  ;;  %v6181_v16 = vshrl.u32 %v12394_v3, 16  ;;  %v14877_v23 = vld [vmem:[#allocation6 + $0xc] ss:$0 sps:$4 sm:$0x88]   ;;  %v12430_v47 = vld [vmem:[%s15645_s5 + $0x430] sm:$0xff]  }
 0x452   : > { %11559 = vmatpush3.bf16.msra.mxu1 %v12361_v33  ;;  %v14795_v33 = vld [vmem:[#allocation6 + $0xc] ss:$0 sps:$4 sm:$0x22]   ;;  %v12439_v58 = vld [vmem:[%s15645_s5 + $0x170] sm:$0xff]  }
 0x453   : > { %11560 = vmatprep.subr.bf16.mxu1 %v12632_v0  ;;  %v5603_v11 = vsel %vm5601_vm13, %v5594_v44, %v5602_v48  ;;  %11753 = vmatpush3.bf16.msra.mxu0 %v12364_v25  ;;  %v7805_v6 = vshrl.u32 %v14795_v33, 16  ;;  %v12405_v48 = vld [vmem:[%s15645_s5 + $0x100] sm:$0xff]   ;;  %v6183_v44 = vrot.slane %v6181_v16, 3  ;;  %v12408_v25 = vld [vmem:[%s15645_s5 + $0x108] sm:$0xff]  }
 0x454   : > { %5604 = vst [vmem:[#allocation6 + $0x18] sm:$0x1] %v5603_v11  ;;  %11754 = vmatprep.subr.bf16.mxu0 %v12632_v0  ;;  %v12428_v26 = vld [vmem:[%s15645_s5 + $0x428] sm:$0xff]  }
 0x455   : > { %v7807_v11 = vrot.slane %v7805_v6, 1  ;;  %v12437_v3 = vld [vmem:[%s15645_s5 + $0x168] sm:$0xff]  }
 0x456   : > { %11561 = vmatpush3.bf16.msra.mxu1 %v12363_v8  ;;  %v12407_v8 = vld [vmem:[%s15645_s5 + $0x3a0] sm:$0xff]   ;;  %v12447_v6 = vld [vmem:[%s15645_s5 + $0x4a8] sm:$0xff]  }
 0x457   : > { %11562 = vmatprep.subr.bf16.mxu1 %v12632_v0  ;;  %11755 = vmatpush3.bf16.msra.mxu0 %v12366_v49  ;;  %v12411_v49 = vld [vmem:[%s15645_s5 + $0x3b0] sm:$0xff]  }
 0x458   : > { %11772 = vmatprep.subr.bf16.mxu0 %v12632_v0 }
 0x45a   : > { %11563 = vmatpush3.bf16.msra.mxu1 %v12365_v62  ;;  %11757 = vmatmul.mubr.msk.bf16.vlgmr.msra.gmra.mrb[204].mxu0 %vm5356_vm4, %v7157_v40  ;;  %v12409_v62 = vld [vmem:[%s15645_s5 + $0x3a8] sm:$0xff]   ;;  %v12415_v40 = vld [vmem:[%s15645_s5 + $0x120] sm:$0xff]  }
 0x45b   : > { %11568 = vmatprep.subr.bf16.mxu1 %v12632_v0  ;;  %11773 = vmatpush3.bf16.msra.mxu0 %v12369_v51  ;;  %v7968_v51 = vshrl.u32 %v14836_v4, 16 }
 0x45c   : > { %11780 = vmatprep.mubr.msk.bf16.mxu0 %vm12634_vm2, %v12632_v0  ;;  %11774 = vmatprep.subr.bf16.mxu0 %v12632_v0 }
 0x45d   : > { %11565 = vmatmul.mubr.msk.bf16.vlgmr.msra.gmra.mrb[96].mxu1 %vm5356_vm4, %v5857_v15  ;;  %v12414_v15 = vld [vmem:[%s15645_s5 + $0x3b8] sm:$0xff]  }
 0x45e   : > { %11569 = vmatpush3.bf16.msra.mxu1 %v12367_v30  ;;  %11576 = vmatprep.mubr.msk.bf16.mxu1 %vm12634_vm2, %v12632_v0  ;;  %v12412_v30 = vld [vmem:[%s15645_s5 + $0x118] sm:$0xff]  }
 0x45f   : > { %11570 = vmatprep.subr.bf16.mxu1 %v12632_v0  ;;  %11775 = vmatpush3.bf16.msra.mxu0 %v12371_v2  ;;  %v12417_v2 = vld [vmem:[%s15645_s5 + $0x3e0] sm:$0xff]  }
 0x460   : > { %11776 = vmatprep.subr.bf16.mxu0 %v12632_v0 }
 0x462   : > { %11571 = vmatpush3.bf16.msra.mxu1 %v12370_v27  ;;  %v6252_v27 = vld [vmem:[#allocation6 + $0x4] sm:$0x1] }
 0x463   : > { %11572 = vmatprep.subr.bf16.mxu1 %v12632_v0  ;;  %11777 = vmatpush3.bf16.msra.mxu0 %v12373_v14  ;;  %v12418_v14 = vld [vmem:[%s15645_s5 + $0x128] sm:$0xff]  }
 0x464   : > { %11778 = vmatprep.subr.bf16.mxu0 %v12632_v0 }
 0x466   : > { %11573 = vmatpush3.bf16.msra.mxu1 %v12372_v17  ;;  %v7970_v17 = vrot.slane %v7968_v51, 2 }
 0x467   : > { %11574 = vmatprep.subr.bf16.mxu1 %v12632_v0  ;;  %11779 = vmatpush3.bf16.msra.mxu0 %v12376_v56  ;;  %v12421_v56 = vld [vmem:[%s15645_s5 + $0x3f0] sm:$0xff]  }
 0x468   : > { %11796 = vmatprep.subr.bf16.mxu0 %v12632_v0 }
 0x46a   : > { %11575 = vmatpush3.bf16.msra.mxu1 %v12374_v7  ;;  %11781 = vmatmul.mubr.msk.bf16.vlgmr.msra.gmra.mrb[208].mxu0 %vm5356_vm4, %v7320_v57  ;;  %v12419_v7 = vld [vmem:[%s15645_s5 + $0x3e8] sm:$0xff]   ;;  %v8131_v57 = vshrl.u32 %v14877_v23, 16 }
 0x46b   : > { %11580 = vmatprep.subr.bf16.mxu1 %v12632_v0  ;;  %11797 = vmatpush3.bf16.msra.mxu0 %v12379_v22  ;;  %v12423_v22 = vld [vmem:[%s15645_s5 + $0x3f8] sm:$0xff]  }
 0x46c   : > { %11804 = vmatprep.mubr.msk.bf16.mxu0 %vm12634_vm2, %v12632_v0  ;;  %11798 = vmatprep.subr.bf16.mxu0 %v12632_v0 }
 0x46d   : > { %11577 = vmatmul.mubr.msk.bf16.vlgmr.msra.gmra.mrb[100].mxu1 %vm5356_vm4, %v5939_v37  ;;  %v10321_v37 = vcombine.low %v6252_v27, %v6252_v27 }
 0x46e   : > { %11581 = vmatpush3.bf16.msra.mxu1 %v12377_v29  ;;  %11588 = vmatprep.mubr.msk.bf16.mxu1 %vm12634_vm2, %v12632_v0  ;;  %v12422_v29 = vld [vmem:[%s15645_s5 + $0x138] sm:$0xff]  }
 0x46f   : > { %11582 = vmatprep.subr.bf16.mxu1 %v12632_v0  ;;  %11799 = vmatpush3.bf16.msra.mxu0 %v12381_v43  ;;  %v6343_v43 = vshrl.u32 %v10321_v37, 16  ;;  %v12462_v37 = vld [vmem:[%s15645_s5 + $0x1c0] sm:$0xff]  }
 0x470   : > { %11800 = vmatprep.subr.bf16.mxu0 %v12632_v0 }
 0x472   : > { %11583 = vmatpush3.bf16.msra.mxu1 %v12380_v36  ;;  %v12424_v36 = vld [vmem:[%s15645_s5 + $0x140] sm:$0xff]  }
 0x473   : > { %11584 = vmatprep.subr.bf16.mxu1 %v12632_v0  ;;  %11801 = vmatpush3.bf16.msra.mxu0 %v12383_v52  ;;  %v8133_v52 = vrot.slane %v8131_v57, 3  ;;  %v12464_v57 = vld [vmem:[%s15645_s5 + $0x520] sm:$0xff]  }
 0x474   : > { %11802 = vmatprep.subr.bf16.mxu0 %v12632_v0 }
 0x476   : > { %11585 = vmatpush3.bf16.msra.mxu1 %v12382_v53  ;;  %v12426_v53 = vld [vmem:[%s15645_s5 + $0x420] sm:$0xff]  }
 0x477   : > { %11586 = vmatprep.subr.bf16.mxu1 %v12632_v0  ;;  %11803 = vmatpush3.bf16.msra.mxu0 %v12385_v1  ;;  %v12429_v1 = vld [vmem:[%s15645_s5 + $0x150] sm:$0xff]  }
 0x478   : > { %11820 = vmatprep.subr.bf16.mxu0 %v12632_v0 }
 0x47a   : > { %11587 = vmatpush3.bf16.msra.mxu1 %v12384_v35  ;;  %11805 = vmatmul.mubr.msk.bf16.vlgmr.msra.gmra.mrb[212].mxu0 %vm5356_vm4, %v7483_v20  ;;  %v12427_v35 = vld [vmem:[%s15645_s5 + $0x148] sm:$0xff]   ;;  %v12433_v20 = vld [vmem:[%s15645_s5 + $0x438] sm:$0xff]  }
 0x47b   : > { %11592 = vmatprep.subr.bf16.mxu1 %v12632_v0  ;;  %11821 = vmatpush3.bf16.msra.mxu0 %v12388_v10  ;;  %v12432_v10 = vld [vmem:[#allocation6 + $0x4] ss:$0 sps:$4 sm:$0x22]  }
 0x47c   : > { %11828 = vmatprep.mubr.msk.bf16.mxu0 %vm12634_vm2, %v12632_v0  ;;  %11822 = vmatprep.subr.bf16.mxu0 %v12632_v0 }
 0x47d   : > { %11589 = vmatmul.mubr.msk.bf16.vlgmr.msra.gmra.mrb[104].mxu1 %vm5356_vm4, %v6020_v63  ;;  %v14921_v63 = vld [vmem:[#allocation6 + $0x10] sm:$0x1] }
 0x47e   : > { %11593 = vmatpush3.bf16.msra.mxu1 %v12386_v46  ;;  %11600 = vmatprep.mubr.msk.bf16.mxu1 %vm12634_vm2, %v12632_v0  ;;  %v12431_v46 = vld [vmem:[%s15645_s5 + $0x158] sm:$0xff]  }
 0x47f   : > { %11594 = vmatprep.subr.bf16.mxu1 %v12632_v0  ;;  %11823 = vmatpush3.bf16.msra.mxu0 %v12390_v38  ;;  %v12434_v38 = vld [vmem:[%s15645_s5 + $0x160] sm:$0xff]  }
 0x480   : > { %11824 = vmatprep.subr.bf16.mxu0 %v12632_v0 }
 0x482   : > { %11595 = vmatpush3.bf16.msra.mxu1 %v12389_v60  ;;  %v10645_v60 = vcombine.low %v14921_v63, %v14921_v63 }
 0x483   : > { %11596 = vmatprep.subr.bf16.mxu1 %v12632_v0  ;;  %11825 = vmatpush3.bf16.msra.mxu0 %v12392_v24  ;;  %v12436_v24 = vld [vmem:[%s15645_s5 + $0x460] sm:$0xff]  }
 0x484   : > { %11826 = vmatprep.subr.bf16.mxu0 %v12632_v0 }
 0x486   : > { %11597 = vmatpush3.bf16.msra.mxu1 %v12391_v19  ;;  %v6426_v19 = vrot.slane %v12432_v10, 1 }
 0x487   : > { %11598 = vmatprep.subr.bf16.mxu1 %v12632_v0  ;;  %11827 = vmatpush3.bf16.msra.mxu0 %v12395_v12  ;;  %v12438_v12 = vld [vmem:[%s15645_s5 + $0x468] sm:$0xff]  }
 0x488   : > { %11844 = vmatprep.subr.bf16.mxu0 %v12632_v0 }
 0x48a   : > { %11599 = vmatpush3.bf16.msra.mxu1 %v12393_v5  ;;  %11829 = vmatmul.mubr.msk.bf16.vlgmr.msra.gmra.mrb[216].mxu0 %vm5356_vm4, %v7643_v54  ;;  %v8293_v5 = vshrl.u32 %v10645_v60, 16  ;;  %v6505_v54 = vshrl.u32 %v12432_v10, 16  ;;  %v12469_v10 = vld [vmem:[%s15645_s5 + $0x1d8] sm:$0xff]  }
 0x48b   : > { %11604 = vmatprep.subr.bf16.mxu1 %v12632_v0  ;;  %11845 = vmatpush3.bf16.msra.mxu0 %v12398_v21  ;;  %v12441_v21 = vld [vmem:[%s15645_s5 + $0x178] sm:$0xff]  }
 0x48c   : > { %11852 = vmatprep.mubr.msk.bf16.mxu0 %vm12634_vm2, %v12632_v0  ;;  %11846 = vmatprep.subr.bf16.mxu0 %v12632_v0  ;;  %v12470_v60 = vld [vmem:[%s15645_s5 + $0x538] sm:$0xff]  }
 0x48d   : > { %11601 = vmatmul.mubr.msk.bf16.vlgmr.msra.gmra.mrb[108].mxu1 %vm5356_vm4, %v6102_v18  ;;  %v14960_v18 = vld [vmem:[#allocation6 + $0x10] ss:$0 sps:$4 sm:$0x22]  }
 0x48e   : > { %11605 = vmatpush3.bf16.msra.mxu1 %v12396_v31  ;;  %11612 = vmatprep.mubr.msk.bf16.mxu1 %vm12634_vm2, %v12632_v0  ;;  %v12440_v31 = vld [vmem:[%s15645_s5 + $0x470] sm:$0xff]  }
 0x48f   : > { %11606 = vmatprep.subr.bf16.mxu1 %v12632_v0  ;;  %11847 = vmatpush3.bf16.msra.mxu0 %v12400_v42  ;;  %v8455_v42 = vshrl.u32 %v14960_v18, 16 }
 0x490   : > { %11848 = vmatprep.subr.bf16.mxu0 %v12632_v0 }
 0x491   : > { %v8457_v16 = vrot.slane %v8455_v42, 1 }
 0x492   : > { %11607 = vmatpush3.bf16.msra.mxu1 %v12399_v13  ;;  %v12442_v13 = vld [vmem:[%s15645_s5 + $0x478] sm:$0xff]  }
 0x493   : > { %11608 = vmatprep.subr.bf16.mxu1 %v12632_v0  ;;  %11849 = vmatpush3.bf16.msra.mxu0 %v12402_v55  ;;  %v6507_v55 = vrot.slane %v6505_v54, 1 }
 0x494   : > { %11850 = vmatprep.subr.bf16.mxu0 %v12632_v0 }
 0x496   : > { %11609 = vmatpush3.bf16.msra.mxu1 %v12401_v61  ;;  %v12443_v61 = vld [vmem:[%s15645_s5 + $0x180] sm:$0xff]  }
 0x497   : > { %11610 = vmatprep.subr.bf16.mxu1 %v12632_v0  ;;  %11851 = vmatpush3.bf16.msra.mxu0 %v12404_v9  ;;  %v12446_v9 = vld [vmem:[%s15645_s5 + $0x188] sm:$0xff]  }
 0x498   : > { %11868 = vmatprep.subr.bf16.mxu0 %v12632_v0 }
 0x49a   : > { %11611 = vmatpush3.bf16.msra.mxu1 %v12403_v45  ;;  %11853 = vmatmul.mubr.msk.bf16.vlgmr.msra.gmra.mrb[220].mxu0 %vm5356_vm4, %v7807_v11  ;;  %v12445_v45 = vld [vmem:[%s15645_s5 + $0x4a0] sm:$0xff]   ;;  %v12450_v11 = vld [vmem:[%s15645_s5 + $0x198] sm:$0xff]  }
 0x49b   : > { %11616 = vmatprep.subr.bf16.mxu1 %v12632_v0  ;;  %11869 = vmatpush3.bf16.msra.mxu0 %v12407_v8  ;;  %v15001_v8 = vld [vmem:[#allocation6 + $0x10] ss:$0 sps:$4 sm:$0x44]  }
 0x49c   : > { %11876 = vmatprep.mubr.msk.bf16.mxu0 %vm12634_vm2, %v12632_v0  ;;  %11870 = vmatprep.subr.bf16.mxu0 %v12632_v0 }
 0x49d   : > { %11613 = vmatmul.mubr.msk.bf16.vlgmr.msra.gmra.mrb[112].mxu1 %vm5356_vm4, %v6183_v44  ;;  %v12449_v44 = vld [vmem:[%s15645_s5 + $0x4b0] sm:$0xff]  }
 0x49e   : > { %11617 = vmatpush3.bf16.msra.mxu1 %v12405_v48  ;;  %11624 = vmatprep.mubr.msk.bf16.mxu1 %vm12634_vm2, %v12632_v0  ;;  %v12448_v48 = vld [vmem:[%s15645_s5 + $0x190] sm:$0xff]  }
 0x49f   : > { %11618 = vmatprep.subr.bf16.mxu1 %v12632_v0  ;;  %11871 = vmatpush3.bf16.msra.mxu0 %v12409_v62  ;;  %v12452_v62 = vld [vmem:[%s15645_s5 + $0x4b8] sm:$0xff]  }
 0x4a0   : > { %11872 = vmatprep.subr.bf16.mxu0 %v12632_v0 }
 0x4a2   : > { %11619 = vmatpush3.bf16.msra.mxu1 %v12408_v25  ;;  %v12451_v25 = vld [vmem:[#allocation6 + $0x4] ss:$0 sps:$4 sm:$0x44]  }
 0x4a3   : > { %11620 = vmatprep.subr.bf16.mxu1 %v12632_v0  ;;  %11873 = vmatpush3.bf16.msra.mxu0 %v12411_v49  ;;  %v12453_v49 = vld [vmem:[%s15645_s5 + $0x1a0] sm:$0xff]  }
 0x4a4   : > { %11874 = vmatprep.subr.bf16.mxu0 %v12632_v0 }
 0x4a6   : > { %11621 = vmatpush3.bf16.msra.mxu1 %v12410_v34  ;;  %v8618_v34 = vshrl.u32 %v15001_v8, 16 }
 0x4a7   : > { %11622 = vmatprep.subr.bf16.mxu1 %v12632_v0  ;;  %11875 = vmatpush3.bf16.msra.mxu0 %v12414_v15  ;;  %v12455_v15 = vld [vmem:[%s15645_s5 + $0x4e0] sm:$0xff]  }
 0x4a8   : > { %11892 = vmatprep.subr.bf16.mxu0 %v12632_v0  ;;  %v8620_v51 = vrot.slane %v8618_v34, 2  ;;  %v12480_v34 = vld [vmem:[%s15645_s5 + $0x240] sm:$0xff]  }
 0x4aa   : > { %11623 = vmatpush3.bf16.msra.mxu1 %v12412_v30  ;;  %11877 = vmatmul.mubr.msk.bf16.vlgmr.msra.gmra.mrb[224].mxu0 %vm5356_vm4, %v7970_v17  ;;  %v6589_v30 = vrot.slane %v12451_v25, 2  ;;  %v12459_v17 = vld [vmem:[%s15645_s5 + $0x4f0] sm:$0xff]  }
 0x4ab   : > { %11628 = vmatprep.subr.bf16.mxu1 %v12632_v0  ;;  %11893 = vmatpush3.bf16.msra.mxu0 %v12417_v2  ;;  %v12458_v2 = vld [vmem:[%s15645_s5 + $0x1b0] sm:$0xff]  }
 0x4ac   : > { %11900 = vmatprep.mubr.msk.bf16.mxu0 %vm12634_vm2, %v12632_v0  ;;  %11894 = vmatprep.subr.bf16.mxu0 %v12632_v0 }
 0x4ad   : > { %11625 = vmatmul.mubr.msk.bf16.vlgmr.msra.gmra.mrb[116].mxu1 %vm5356_vm4, %v6252_v27  ;;  %v12457_v27 = vld [vmem:[%s15645_s5 + $0x4e8] sm:$0xff]  }
 0x4ae   : > { %11629 = vmatpush3.bf16.msra.mxu1 %v12415_v40  ;;  %11636 = vmatprep.mubr.msk.bf16.mxu1 %vm12634_vm2, %v12632_v0  ;;  %v12456_v40 = vld [vmem:[%s15645_s5 + $0x1a8] sm:$0xff]  }
 0x4af   : > { %11630 = vmatprep.subr.bf16.mxu1 %v12632_v0  ;;  %11895 = vmatpush3.bf16.msra.mxu0 %v12419_v7  ;;  %v12460_v7 = vld [vmem:[%s15645_s5 + $0x1b8] sm:$0xff]  }
 0x4b0   : > { %11896 = vmatprep.subr.bf16.mxu0 %v12632_v0 }
 0x4b2   : > { %11631 = vmatpush3.bf16.msra.mxu1 %v12418_v14  ;;  %v15042_v14 = vld [vmem:[#allocation6 + $0x10] ss:$0 sps:$4 sm:$0x88]  }
 0x4b3   : > { %11632 = vmatprep.subr.bf16.mxu1 %v12632_v0  ;;  %11897 = vmatpush3.bf16.msra.mxu0 %v12421_v56  ;;  %v12461_v56 = vld [vmem:[%s15645_s5 + $0x4f8] sm:$0xff]  }
 0x4b4   : > { %11898 = vmatprep.subr.bf16.mxu0 %v12632_v0 }
 0x4b6   : > { %11633 = vmatpush3.bf16.msra.mxu1 %v12420_v28  ;;  %v6668_v28 = vshrl.u32 %v12451_v25, 16  ;;  %v12479_v25 = vld [vmem:[%s15645_s5 + $0x578] sm:$0xff]  }
 0x4b7   : > { %11634 = vmatprep.subr.bf16.mxu1 %v12632_v0  ;;  %11899 = vmatpush3.bf16.msra.mxu0 %v12423_v22 }
 0x4b8   : > { %11916 = vmatprep.subr.bf16.mxu0 %v12632_v0  ;;  %v6670_v22 = vrot.slane %v6668_v28, 2 }
 0x4ba   : > { %11635 = vmatpush3.bf16.msra.mxu1 %v12422_v29  ;;  %11901 = vmatmul.mubr.msk.bf16.vlgmr.msra.gmra.mrb[228].mxu0 %vm5356_vm4, %v8133_v52  ;;  %v8781_v29 = vshrl.u32 %v15042_v14, 16  ;;  %v12466_v52 = vld [vmem:[%s15645_s5 + $0x528] sm:$0xff]  }
 0x4bb   : > { %11640 = vmatprep.subr.bf16.mxu1 %v12632_v0  ;;  %11917 = vmatpush3.bf16.msra.mxu0 %v12426_v53 }
 0x4bc   : > { %11924 = vmatprep.mubr.msk.bf16.mxu0 %vm12634_vm2, %v12632_v0  ;;  %11918 = vmatprep.subr.bf16.mxu0 %v12632_v0 }
 0x4bd   : > { %11637 = vmatmul.mubr.msk.bf16.vlgmr.msra.gmra.mrb[120].mxu1 %vm5356_vm4, %v6343_v43  ;;  %v12465_v43 = vld [vmem:[%s15645_s5 + $0x1c8] sm:$0xff]  }
 0x4be   : > { %11641 = vmatpush3.bf16.msra.mxu1 %v12424_v36  ;;  %11648 = vmatprep.mubr.msk.bf16.mxu1 %vm12634_vm2, %v12632_v0  ;;  %v8783_v36 = vrot.slane %v8781_v29, 3 }
 0x4bf   : > { %11642 = vmatprep.subr.bf16.mxu1 %v12632_v0  ;;  %11919 = vmatpush3.bf16.msra.mxu0 %v12428_v26 }
 0x4c0   : > { %11920 = vmatprep.subr.bf16.mxu0 %v12632_v0 }
 0x4c2   : > { %11643 = vmatpush3.bf16.msra.mxu1 %v12427_v35 }
 0x4c3   : > { %11644 = vmatprep.subr.bf16.mxu1 %v12632_v0  ;;  %11921 = vmatpush3.bf16.msra.mxu0 %v12430_v47 }
 0x4c4   : > { %11922 = vmatprep.subr.bf16.mxu0 %v12632_v0 }
 0x4c6   : > { %11645 = vmatpush3.bf16.msra.mxu1 %v12429_v1  ;;  %v12467_v1 = vld [vmem:[%s15645_s5 + $0x1d0] sm:$0xff]  }
 0x4c7   : > { %11646 = vmatprep.subr.bf16.mxu1 %v12632_v0  ;;  %11923 = vmatpush3.bf16.msra.mxu0 %v12433_v20  ;;  %v15086_v20 = vld [vmem:[#allocation6 + $0x14] sm:$0x1] }
 0x4c8   : > { %11940 = vmatprep.subr.bf16.mxu0 %v12632_v0 }
 0x4ca   : > { %11647 = vmatpush3.bf16.msra.mxu1 %v12431_v46  ;;  %11925 = vmatmul.mubr.msk.bf16.vlgmr.msra.gmra.mrb[232].mxu0 %vm5356_vm4, %v8293_v5  ;;  %v12468_v46 = vld [vmem:[%s15645_s5 + $0x530] sm:$0xff]  }
 0x4cb   : > { %11652 = vmatprep.subr.bf16.mxu1 %v12632_v0  ;;  %11941 = vmatpush3.bf16.msra.mxu0 %v12436_v24  ;;  %v12567_v24 = vld [vmem:[#allocation6 + $0x4] ss:$0 sps:$4 sm:$0x88]  }
 0x4cc   : > { %11948 = vmatprep.mubr.msk.bf16.mxu0 %vm12634_vm2, %v12632_v0  ;;  %11942 = vmatprep.subr.bf16.mxu0 %v12632_v0  ;;  %v6752_v5 = vrot.slane %v12567_v24, 3  ;;  %v12494_v24 = vld [vmem:[%s15645_s5 + $0x290] sm:$0xff]  }
 0x4cd   : > { %11649 = vmatmul.mubr.msk.bf16.vlgmr.msra.gmra.mrb[124].mxu1 %vm5356_vm4, %v6426_v19  ;;  %v12471_v19 = vld [vmem:[%s15645_s5 + $0x200] sm:$0xff]  }
 0x4ce   : > { %11653 = vmatpush3.bf16.msra.mxu1 %v12434_v38  ;;  %11660 = vmatprep.mubr.msk.bf16.mxu1 %vm12634_vm2, %v12632_v0  ;;  %v10753_v38 = vcombine.low %v15086_v20, %v15086_v20 }
 0x4cf   : > { %11654 = vmatprep.subr.bf16.mxu1 %v12632_v0  ;;  %11943 = vmatpush3.bf16.msra.mxu0 %v12438_v12 }
 0x4d0   : > { %11944 = vmatprep.subr.bf16.mxu0 %v12632_v0  ;;  %v8943_v12 = vshrl.u32 %v10753_v38, 16 }
 0x4d2   : > { %11655 = vmatpush3.bf16.msra.mxu1 %v12437_v3  ;;  %v12473_v3 = vld [vmem:[%s15645_s5 + $0x560] sm:$0xff]  }
 0x4d3   : > { %11656 = vmatprep.subr.bf16.mxu1 %v12632_v0  ;;  %11945 = vmatpush3.bf16.msra.mxu0 %v12440_v31 }
 0x4d4   : > { %11946 = vmatprep.subr.bf16.mxu0 %v12632_v0 }
 0x4d6   : > { %11657 = vmatpush3.bf16.msra.mxu1 %v12439_v58  ;;  %v12474_v58 = vld [vmem:[%s15645_s5 + $0x208] sm:$0xff]  }
 0x4d7   : > { %11658 = vmatprep.subr.bf16.mxu1 %v12632_v0  ;;  %11947 = vmatpush3.bf16.msra.mxu0 %v12442_v13 }
 0x4d8   : > { %11964 = vmatprep.subr.bf16.mxu0 %v12632_v0 }
 0x4da   : > { %11659 = vmatpush3.bf16.msra.mxu1 %v12441_v21  ;;  %11949 = vmatmul.mubr.msk.bf16.vlgmr.msra.gmra.mrb[236].mxu0 %vm5356_vm4, %v8457_v16  ;;  %v12475_v21 = vld [vmem:[%s15645_s5 + $0x568] sm:$0xff]  }
 0x4db   : > { %11664 = vmatprep.subr.bf16.mxu1 %v12632_v0  ;;  %11965 = vmatpush3.bf16.msra.mxu0 %v12445_v45 }
 0x4dc   : > { %11972 = vmatprep.mubr.msk.bf16.mxu0 %vm12634_vm2, %v12632_v0  ;;  %11966 = vmatprep.subr.bf16.mxu0 %v12632_v0 }
 0x4dd   : > { %11661 = vmatmul.mubr.msk.bf16.vlgmr.msra.gmra.mrb[128].mxu1 %vm5356_vm4, %v6507_v55  ;;  %v12476_v55 = vld [vmem:[%s15645_s5 + $0x210] sm:$0xff]  }
 0x4de   : > { %11665 = vmatpush3.bf16.msra.mxu1 %v12443_v61  ;;  %11672 = vmatprep.mubr.msk.bf16.mxu1 %vm12634_vm2, %v12632_v0 }
 0x4df   : > { %11666 = vmatprep.subr.bf16.mxu1 %v12632_v0  ;;  %11967 = vmatpush3.bf16.msra.mxu0 %v12447_v6  ;;  %v12477_v6 = vld [vmem:[%s15645_s5 + $0x570] sm:$0xff]  }
 0x4e0   : > { %11968 = vmatprep.subr.bf16.mxu0 %v12632_v0 }
 0x4e2   : > { %11667 = vmatpush3.bf16.msra.mxu1 %v12446_v9 }
 0x4e3   : > { %11668 = vmatprep.subr.bf16.mxu1 %v12632_v0  ;;  %11969 = vmatpush3.bf16.msra.mxu0 %v12449_v44  ;;  %v15127_v44 = vld [vmem:[#allocation6 + $0x14] ss:$0 sps:$4 sm:$0x22]  }
 0x4e4   : > { %11970 = vmatprep.subr.bf16.mxu0 %v12632_v0 }
 0x4e6   : > { %11669 = vmatpush3.bf16.msra.mxu1 %v12448_v48 }
 0x4e7   : > { %11670 = vmatprep.subr.bf16.mxu1 %v12632_v0  ;;  %11971 = vmatpush3.bf16.msra.mxu0 %v12452_v62  ;;  %v9105_v62 = vshrl.u32 %v15127_v44, 16 }
 0x4e8   : > { %11988 = vmatprep.subr.bf16.mxu0 %v12632_v0 }
 0x4ea   : > { %11671 = vmatpush3.bf16.msra.mxu1 %v12450_v11  ;;  %11973 = vmatmul.mubr.msk.bf16.vlgmr.msra.gmra.mrb[240].mxu0 %vm5356_vm4, %v8620_v51  ;;  %v12478_v11 = vld [vmem:[%s15645_s5 + $0x218] sm:$0xff]  }
 0x4eb   : > { %11676 = vmatprep.subr.bf16.mxu1 %v12632_v0  ;;  %11989 = vmatpush3.bf16.msra.mxu0 %v12455_v15  ;;  %v12483_v15 = vld [vmem:[%s15645_s5 + $0x248] sm:$0xff]  }
 0x4ec   : > { %11996 = vmatprep.mubr.msk.bf16.mxu0 %vm12634_vm2, %v12632_v0  ;;  %11990 = vmatprep.subr.bf16.mxu0 %v12632_v0 }
 0x4ed   : > { %11673 = vmatmul.mubr.msk.bf16.vlgmr.msra.gmra.mrb[132].mxu1 %vm5356_vm4, %v6589_v30  ;;  %v9107_v30 = vrot.slane %v9105_v62, 1  ;;  %v12501_v62 = vld [vmem:[%s15645_s5 + $0x2d0] sm:$0xff]  }
 0x4ee   : > { %11677 = vmatpush3.bf16.msra.mxu1 %v12453_v49  ;;  %11684 = vmatprep.mubr.msk.bf16.mxu1 %vm12634_vm2, %v12632_v0  ;;  %v12482_v49 = vld [vmem:[%s15645_s5 + $0x5a0] sm:$0xff]  }
 0x4ef   : > { %11678 = vmatprep.subr.bf16.mxu1 %v12632_v0  ;;  %11991 = vmatpush3.bf16.msra.mxu0 %v12457_v27 }
 0x4f0   : > { %11992 = vmatprep.subr.bf16.mxu0 %v12632_v0 }
 0x4f2   : > { %11679 = vmatpush3.bf16.msra.mxu1 %v12456_v40 }
 0x4f3   : > { %11680 = vmatprep.subr.bf16.mxu1 %v12632_v0  ;;  %11993 = vmatpush3.bf16.msra.mxu0 %v12459_v17 }
 0x4f4   : > { %11994 = vmatprep.subr.bf16.mxu0 %v12632_v0 }
 0x4f6   : > { %11681 = vmatpush3.bf16.msra.mxu1 %v12458_v2 }
 0x4f7   : > { %11682 = vmatprep.subr.bf16.mxu1 %v12632_v0  ;;  %11995 = vmatpush3.bf16.msra.mxu0 %v12461_v56 }
 0x4f8   : > { %12012 = vmatprep.subr.bf16.mxu0 %v12632_v0 }
 0x4fa   : > { %11683 = vmatpush3.bf16.msra.mxu1 %v12460_v7  ;;  %11997 = vmatmul.mubr.msk.bf16.vlgmr.msra.gmra.mrb[244].mxu0 %vm5356_vm4, %v8783_v36  ;;  %v12485_v7 = vld [vmem:[%s15645_s5 + $0x250] sm:$0xff]   ;;  %v12487_v36 = vld [vmem:[%s15645_s5 + $0x258] sm:$0xff]  }
 0x4fb   : > { %11688 = vmatprep.subr.bf16.mxu1 %v12632_v0  ;;  %12013 = vmatpush3.bf16.msra.mxu0 %v12464_v57  ;;  %v15171_v57 = vld [vmem:[#allocation6 + $0x14] ss:$0 sps:$4 sm:$0x44]  }
 0x4fc   : > { %12020 = vmatprep.mubr.msk.bf16.mxu0 %vm12634_vm2, %v12632_v0  ;;  %12014 = vmatprep.subr.bf16.mxu0 %v12632_v0 }
 0x4fd   : > { %11685 = vmatmul.mubr.msk.bf16.vlgmr.msra.gmra.mrb[136].mxu1 %vm5356_vm4, %v6670_v22 }
 0x4fe   : > { %11689 = vmatpush3.bf16.msra.mxu1 %v12462_v37  ;;  %11696 = vmatprep.mubr.msk.bf16.mxu1 %vm12634_vm2, %v12632_v0  ;;  %v12486_v37 = vld [vmem:[%s15645_s5 + $0x5b0] sm:$0xff]  }
 0x4ff   : > { %11690 = vmatprep.subr.bf16.mxu1 %v12632_v0  ;;  %12015 = vmatpush3.bf16.msra.mxu0 %v12466_v52  ;;  %v12489_v52 = vld [vmem:[%s15645_s5 + $0x280] sm:$0xff]  }
 0x500   : > { %v5690_v53 = vpop.f32.mrb[84].mxu1  ;;  %12016 = vmatprep.subr.bf16.mxu0 %v12632_v0 }
 0x501   : > { %v11530_v35 = vpop.f32.mrb[85].mxu1 }
 0x502   : > { %11691 = vmatpush3.bf16.msra.mxu1 %v12465_v43  ;;  %v5693_v26 = vpop.f32.mrb[86].mxu1  ;;  %v12488_v43 = vld [vmem:[%s15645_s5 + $0x5b8] sm:$0xff]   ;;  %v7076_v35 = vrot.slane %v14629_v41, 1 }
 0x503   : > { %v11531_v47 = vpop.f32.mrb[87].mxu1  ;;  %11692 = vmatprep.subr.bf16.mxu1 %v12632_v0  ;;  %12017 = vmatpush3.bf16.msra.mxu0 %v12468_v46  ;;  %v12491_v26 = vld [vmem:[%s15645_s5 + $0x5e0] sm:$0xff]   ;;  %v12493_v46 = vld [vmem:[%s15645_s5 + $0x5e8] sm:$0xff]  }
 0x504   : > { %12018 = vmatprep.subr.bf16.mxu0 %v12632_v0  ;;  %v15117_v61 = vpop.f32.mrb[196].mxu0  ;;  %v12492_v47 = vld [vmem:[%s15645_s5 + $0x288] sm:$0xff]  }
 0x505   : > { %v11710_v16 = vpop.f32.mrb[197].mxu0 }
 0x506   : > { %11693 = vmatpush3.bf16.msra.mxu1 %v12467_v1  ;;  %v6898_v9 = vpop.f32.mrb[198].mxu0 }
 0x507   : > { %11694 = vmatprep.subr.bf16.mxu1 %v12632_v0  ;;  %12019 = vmatpush3.bf16.msra.mxu0 %v12470_v60  ;;  %v11711_v48 = vpop.f32.mrb[199].mxu0  ;;  %v12500_v9 = vld [vmem:[%s15645_s5 + $0x2c8] sm:$0xff]  }
 0x508   : > { %12036 = vmatprep.subr.bf16.mxu0 %v12632_v0 }
 0x50a   : > { %11695 = vmatpush3.bf16.msra.mxu1 %v12469_v10  ;;  %12021 = vmatmul.mubr.msk.bf16.vlgmr.msra.gmra.mrb[248].mxu0 %vm5356_vm4, %v8943_v12 }
 0x50b   : > { %11712 = vmatprep.subr.bf16.mxu1 %v12632_v0  ;;  %12037 = vmatpush3.bf16.msra.mxu0 %v12473_v3 }
 0x50c   : > { %12044 = vmatprep.mubr.msk.bf16.mxu0 %vm12634_vm2, %v12632_v0  ;;  %12038 = vmatprep.subr.bf16.mxu0 %v12632_v0 }
 0x50d   : > { %11697 = vmatmul.mubr.msk.bf16.vlgmr.msra.gmra.mrb[140].mxu1 %vm5356_vm4, %v6752_v5 }
 0x50e   : > { %11713 = vmatpush3.bf16.msra.mxu1 %v12471_v19  ;;  %11720 = vmatprep.mubr.msk.bf16.mxu1 %vm12634_vm2, %v12632_v0 }
 0x50f   : > { %11714 = vmatprep.subr.bf16.mxu1 %v12632_v0  ;;  %12039 = vmatpush3.bf16.msra.mxu0 %v12475_v21  ;;  %v15215_v21 = vld [vmem:[#allocation6 + $0x14] ss:$0 sps:$4 sm:$0x88]  }
 0x510   : > { %v5757_v31 = vpop.f32.mrb[88].mxu1  ;;  %12040 = vmatprep.subr.bf16.mxu0 %v12632_v0 }
 0x511   : > { %v5758_v54 = vadd.f32 %v5757_v31, %v5690_v53  ;;  %v11542_v13 = vpop.f32.mrb[89].mxu1  ;;  %v9268_v53 = vshrl.u32 %v15171_v57, 16 }
 0x512   : > { %v5760_v42 = vpop.f32.mrb[90].mxu1  ;;  %11715 = vmatpush3.bf16.msra.mxu1 %v12474_v58  ;;  %v12495_v58 = vld [vmem:[%s15645_s5 + $0x5f0] sm:$0xff]   ;;  %v12497_v13 = vld [vmem:[%s15645_s5 + $0x5f8] sm:$0xff]  }
 0x513   : > { %v11543_v45 = vpop.f32.mrb[91].mxu1  ;;  %11716 = vmatprep.subr.bf16.mxu1 %v12632_v0  ;;  %12041 = vmatpush3.bf16.msra.mxu0 %v12477_v6  ;;  %v9270_v1 = vrot.slane %v9268_v53, 2  ;;  %v9431_v42 = vshrl.u32 %v15215_v21, 16  ;;  %v12506_v53 = vld [vmem:[%s15645_s5 + $0x318] sm:$0xff]  }
 0x514   : > { %12042 = vmatprep.subr.bf16.mxu0 %v12632_v0  ;;  %v7239_v45 = vrot.slane %v14671_v50, 2 }
 0x515   : > { %v9433_v16 = vrot.slane %v9431_v42, 3 }
 0x516   : > { %11717 = vmatpush3.bf16.msra.mxu1 %v12476_v55  ;;  %v12498_v55 = vld [vmem:[%s15645_s5 + $0x2c0] sm:$0xff]  }
 0x517   : > { %11718 = vmatprep.subr.bf16.mxu1 %v12632_v0  ;;  %12043 = vmatpush3.bf16.msra.mxu0 %v12479_v25 }
 0x518   : > { %12060 = vmatprep.subr.bf16.mxu0 %v12632_v0 }
 0x51a   : > { %11719 = vmatpush3.bf16.msra.mxu1 %v12478_v11  ;;  %12045 = vmatmul.mubr.msk.bf16.vlgmr.msra.gmra.mrb[252].mxu0 %vm5356_vm4, %v9107_v30 }
 0x51b   : > { %11736 = vmatprep.subr.bf16.mxu1 %v12632_v0  ;;  %12061 = vmatpush3.bf16.msra.mxu0 %v12482_v49 }
 0x51c   : > { %12068 = vmatprep.mubr.msk.bf16.mxu0 %vm12634_vm2, %v12632_v0  ;;  %12062 = vmatprep.subr.bf16.mxu0 %v12632_v0 }
 0x51d   : > { %11721 = vmatmul.mubr.msk.bf16.vlgmr.msra.gmra.mrb[144].mxu1 %vm5356_vm4, %v14579_v32  ;;  %v12484_v32 = vld [vmem:[%s15645_s5 + $0x5a8] sm:$0xff]   ;;  %v15161_v17 = vpop.f32.mrb[200].mxu0 }
 0x51e   : > { %11737 = vmatpush3.bf16.msra.mxu1 %v12480_v34  ;;  %11744 = vmatprep.mubr.msk.bf16.mxu1 %vm12634_vm2, %v12632_v0  ;;  %v11734_v56 = vpop.f32.mrb[201].mxu0 }
 0x51f   : > { %11738 = vmatprep.subr.bf16.mxu1 %v12632_v0  ;;  %v7059_v29 = vpop.f32.mrb[202].mxu0  ;;  %12063 = vmatpush3.bf16.msra.mxu0 %v12484_v32  ;;  %v12503_v32 = vld [vmem:[%s15645_s5 + $0x300] sm:$0xff]  }
 0x520   : > { %v5838_v51 = vpop.f32.mrb[92].mxu1  ;;  %v11735_v22 = vpop.f32.mrb[203].mxu0  ;;  %12064 = vmatprep.subr.bf16.mxu0 %v12632_v0  ;;  %v12505_v29 = vld [vmem:[%s15645_s5 + $0x310] sm:$0xff]  }
 0x521   : > { %v5844_v40 = vadd.f32 %v5838_v51, %v5758_v54  ;;  %v11554_v27 = vpop.f32.mrb[93].mxu1  ;;  %v12496_v54 = vld [vmem:[%s15645_s5 + $0x298] sm:$0xff]  }
 0x522   : > { %v5841_v2 = vpop.f32.mrb[94].mxu1  ;;  %11739 = vmatpush3.bf16.msra.mxu1 %v12483_v15  ;;  %v12502_v51 = vld [vmem:[%s15645_s5 + $0x2d8] sm:$0xff]   ;;  %v12504_v27 = vld [vmem:[%s15645_s5 + $0x308] sm:$0xff]  }
 0x523   : > { %v11555_v28 = vpop.f32.mrb[95].mxu1  ;;  %11740 = vmatprep.subr.bf16.mxu1 %v12632_v0  ;;  %12065 = vmatpush3.bf16.msra.mxu0 %v12486_v37 }
 0x524   : > { %12066 = vmatprep.subr.bf16.mxu0 %v12632_v0 }
 0x526   : > { %11741 = vmatpush3.bf16.msra.mxu1 %v12485_v7 }
 0x527   : > { %11742 = vmatprep.subr.bf16.mxu1 %v12632_v0  ;;  %12067 = vmatpush3.bf16.msra.mxu0 %v12488_v43 }
 0x528   : > { %12084 = vmatprep.subr.bf16.mxu0 %v12632_v0 }
 0x52a   : > { %11743 = vmatpush3.bf16.msra.mxu1 %v12487_v36  ;;  %12069 = vmatmul.mubr.msk.bf16.vlgmr.msra.gmra.mrb[0].mxu0 %vm5356_vm4, %v9270_v1 }
 0x52b   : > { %11760 = vmatprep.subr.bf16.mxu1 %v12632_v0  ;;  %12085 = vmatpush3.bf16.msra.mxu0 %v12491_v26 }
 0x52c   : > { %12092 = vmatprep.mubr.msk.bf16.mxu0 %vm12634_vm2, %v12632_v0  ;;  %12086 = vmatprep.subr.bf16.mxu0 %v12632_v0 }
 0x52d   : > { %11745 = vmatmul.mubr.msk.bf16.vlgmr.msra.gmra.mrb[148].mxu1 %vm5356_vm4, %v7076_v35  ;;  %v15205_v19 = vpop.f32.mrb[204].mxu0  ;;  %v12508_v35 = vld [vmem:[%s15645_s5 + $0x348] sm:$0xff]  }
 0x52e   : > { %11761 = vmatpush3.bf16.msra.mxu1 %v12489_v52  ;;  %11768 = vmatprep.mubr.msk.bf16.mxu1 %vm12634_vm2, %v12632_v0  ;;  %v11758_v3 = vpop.f32.mrb[205].mxu0  ;;  %v12507_v52 = vld [vmem:[%s15645_s5 + $0x340] sm:$0xff]  }
 0x52f   : > { %11762 = vmatprep.subr.bf16.mxu1 %v12632_v0  ;;  %v7222_v12 = vpop.f32.mrb[206].mxu0  ;;  %12087 = vmatpush3.bf16.msra.mxu0 %v12493_v46  ;;  %v12511_v3 = vld [vmem:[%s15645_s5 + $0x380] sm:$0xff]  }
 0x530   : > { %v5919_v41 = vpop.f32.mrb[96].mxu1  ;;  %v11759_v31 = vpop.f32.mrb[207].mxu0  ;;  %12088 = vmatprep.subr.bf16.mxu0 %v12632_v0  ;;  %v7726_v12 = vrot.slane %v14795_v33, 1 }
 0x531   : > { %v5925_v10 = vadd.f32 %v5919_v41, %v5844_v40  ;;  %v11566_v60 = vpop.f32.mrb[97].mxu1  ;;  %v7402_v40 = vrot.slane %v14712_v59, 3 }
 0x532   : > { %v5922_v38 = vpop.f32.mrb[98].mxu1  ;;  %11763 = vmatpush3.bf16.msra.mxu1 %v12492_v47 }
 0x533   : > { %v11567_v5 = vpop.f32.mrb[99].mxu1  ;;  %11764 = vmatprep.subr.bf16.mxu1 %v12632_v0  ;;  %12089 = vmatpush3.bf16.msra.mxu0 %v12495_v58  ;;  %v12512_v58 = vld [vmem:[%s15645_s5 + $0x388] sm:$0xff]  }
 0x534   : > { %12090 = vmatprep.subr.bf16.mxu0 %v12632_v0  ;;  %v12510_v5 = vld [vmem:[%s15645_s5 + $0x358] sm:$0xff]  }
 0x536   : > { %11765 = vmatpush3.bf16.msra.mxu1 %v12494_v24 }
 0x537   : > { %11766 = vmatprep.subr.bf16.mxu1 %v12632_v0  ;;  %12091 = vmatpush3.bf16.msra.mxu0 %v12497_v13 }
 0x538   : > { %12108 = vmatprep.subr.bf16.mxu0 %v12632_v0 }
 0x53a   : > { %11767 = vmatpush3.bf16.msra.mxu1 %v12496_v54  ;;  %12093 = vmatmul.mubr.msk.bf16.vlgmr.msra.gmra.mrb[4].mxu0 %vm5356_vm4, %v9433_v16 }
 0x53b   : > { %11784 = vmatprep.subr.bf16.mxu1 %v12632_v0  ;;  %12124 = vmatprep.mubr.msk.bf16.mxu0 %vm12634_vm2, %v12632_v0 }
 0x53d   : > { %11769 = vmatmul.mubr.msk.bf16.vlgmr.msra.gmra.mrb[152].mxu1 %vm5356_vm4, %v7239_v45  ;;  %v15242_v25 = vpop.f32.mrb[208].mxu0 }
 0x53e   : > { %11785 = vmatpush3.bf16.msra.mxu1 %v12498_v55  ;;  %11792 = vmatprep.mubr.msk.bf16.mxu1 %vm12634_vm2, %v12632_v0  ;;  %v11782_v49 = vpop.f32.mrb[209].mxu0  ;;  %v12513_v55 = vld [vmem:[%s15645_s5 + $0x390] sm:$0xff]  }
 0x53f   : > { %11786 = vmatprep.subr.bf16.mxu1 %v12632_v0  ;;  %v7385_v30 = vpop.f32.mrb[210].mxu0 }
 0x540   : > { %v6001_v50 = vpop.f32.mrb[100].mxu1  ;;  %v11783_v15 = vpop.f32.mrb[211].mxu0 }
 0x541   : > { %v6007_v6 = vadd.f32 %v6001_v50, %v5925_v10  ;;  %v11578_v48 = vpop.f32.mrb[101].mxu1 }
 0x542   : > { %v6004_v11 = vpop.f32.mrb[102].mxu1  ;;  %11787 = vmatpush3.bf16.msra.mxu1 %v12500_v9  ;;  %v12515_v48 = vld [vmem:[%s15645_s5 + $0x3c0] sm:$0xff]  }
 0x543   : > { %v11579_v34 = vpop.f32.mrb[103].mxu1  ;;  %11788 = vmatprep.subr.bf16.mxu1 %v12632_v0  ;;  %v7889_v11 = vrot.slane %v14836_v4, 2 }
 0x546   : > { %11789 = vmatpush3.bf16.msra.mxu1 %v12501_v62  ;;  %v12516_v62 = vld [vmem:[%s15645_s5 + $0x3c8] sm:$0xff]  }
 0x547   : > { %11790 = vmatprep.subr.bf16.mxu1 %v12632_v0 }
 0x54a   : > { %11791 = vmatpush3.bf16.msra.mxu1 %v12502_v51  ;;  %v12517_v51 = vld [vmem:[%s15645_s5 + $0x3d0] sm:$0xff]  }
 0x54b   : > { %11808 = vmatprep.subr.bf16.mxu1 %v12632_v0 }
 0x54d   : > { %11793 = vmatmul.mubr.msk.bf16.vlgmr.msra.gmra.mrb[156].mxu1 %vm5356_vm4, %v7402_v40  ;;  %v15264_v59 = vpop.f32.mrb[212].mxu0 }
 0x54e   : > { %11809 = vmatpush3.bf16.msra.mxu1 %v12503_v32  ;;  %11816 = vmatprep.mubr.msk.bf16.mxu1 %vm12634_vm2, %v12632_v0  ;;  %v11806_v22 = vpop.f32.mrb[213].mxu0 }
 0x54f   : > { %11810 = vmatprep.subr.bf16.mxu1 %v12632_v0  ;;  %v7548_v36 = vpop.f32.mrb[214].mxu0 }
 0x550   : > { %v6082_v2 = vpop.f32.mrb[104].mxu1  ;;  %v11807_v43 = vpop.f32.mrb[215].mxu0 }
 0x551   : > { %v6088_v7 = vadd.f32 %v6082_v2, %v6007_v6  ;;  %v11590_v28 = vpop.f32.mrb[105].mxu1  ;;  %v12514_v6 = vld [vmem:[%s15645_s5 + $0x398] sm:$0xff]  }
 0x552   : > { %v6085_v56 = vpop.f32.mrb[106].mxu1  ;;  %11811 = vmatpush3.bf16.msra.mxu1 %v12504_v27  ;;  %v12519_v28 = vld [vmem:[%s15645_s5 + $0x400] sm:$0xff]  }
 0x553   : > { %v11591_v37 = vpop.f32.mrb[107].mxu1  ;;  %11812 = vmatprep.subr.bf16.mxu1 %v12632_v0  ;;  %v8052_v56 = vrot.slane %v14877_v23, 3 }
 0x556   : > { %11813 = vmatpush3.bf16.msra.mxu1 %v12505_v29  ;;  %v12520_v29 = vld [vmem:[%s15645_s5 + $0x408] sm:$0xff]  }
 0x557   : > { %11814 = vmatprep.subr.bf16.mxu1 %v12632_v0 }
 0x55a   : > { %11815 = vmatpush3.bf16.msra.mxu1 %v12506_v53  ;;  %v12521_v53 = vld [vmem:[%s15645_s5 + $0x410] sm:$0xff]  }
 0x55b   : > { %11832 = vmatprep.subr.bf16.mxu1 %v12632_v0 }
 0x55d   : > { %11817 = vmatmul.mubr.msk.bf16.vlgmr.msra.gmra.mrb[160].mxu1 %vm5356_vm4, %v14756_v39  ;;  %v15286_v46 = vpop.f32.mrb[216].mxu0  ;;  %v12509_v39 = vld [vmem:[%s15645_s5 + $0x350] sm:$0xff]  }
 0x55e   : > { %11833 = vmatpush3.bf16.msra.mxu1 %v12507_v52  ;;  %11840 = vmatprep.mubr.msk.bf16.mxu1 %vm12634_vm2, %v12632_v0  ;;  %v11830_v60 = vpop.f32.mrb[217].mxu0 }
 0x55f   : > { %11834 = vmatprep.subr.bf16.mxu1 %v12632_v0  ;;  %v7709_v38 = vpop.f32.mrb[218].mxu0 }
 0x560   : > { %v6164_v26 = vpop.f32.mrb[108].mxu1  ;;  %v11831_v24 = vpop.f32.mrb[219].mxu0 }
 0x561   : > { %v6170_v1 = vadd.f32 %v6164_v26, %v6088_v7  ;;  %v11602_v47 = vpop.f32.mrb[109].mxu1  ;;  %v12518_v7 = vld [vmem:[%s15645_s5 + $0x3d8] sm:$0xff]  }
 0x562   : > { %v6167_v41 = vpop.f32.mrb[110].mxu1  ;;  %11835 = vmatpush3.bf16.msra.mxu1 %v12508_v35  ;;  %v12522_v47 = vld [vmem:[%s15645_s5 + $0x418] sm:$0xff]  }
 0x563   : > { %v11603_v10 = vpop.f32.mrb[111].mxu1  ;;  %11836 = vmatprep.subr.bf16.mxu1 %v12632_v0  ;;  %v12523_v41 = vld [vmem:[%s15645_s5 + $0x440] sm:$0xff]  }
 0x566   : > { %11837 = vmatpush3.bf16.msra.mxu1 %v12509_v39  ;;  %v12524_v39 = vld [vmem:[%s15645_s5 + $0x448] sm:$0xff]  }
 0x567   : > { %11838 = vmatprep.subr.bf16.mxu1 %v12632_v0 }
 0x56a   : > { %11839 = vmatpush3.bf16.msra.mxu1 %v12510_v5 }
 0x56b   : > { %11856 = vmatprep.subr.bf16.mxu1 %v12632_v0 }
 0x56d   : > { %11841 = vmatmul.mubr.msk.bf16.vlgmr.msra.gmra.mrb[164].mxu1 %vm5356_vm4, %v7726_v12  ;;  %v15308_v33 = vpop.f32.mrb[220].mxu0 }
 0x56e   : > { %11857 = vmatpush3.bf16.msra.mxu1 %v12511_v3  ;;  %11864 = vmatprep.mubr.msk.bf16.mxu1 %vm12634_vm2, %v12632_v0  ;;  %v11854_v16 = vpop.f32.mrb[221].mxu0 }
 0x56f   : > { %11858 = vmatprep.subr.bf16.mxu1 %v12632_v0  ;;  %v7872_v9 = vpop.f32.mrb[222].mxu0 }
 0x570   : > { %v6245_v31 = vpop.f32.mrb[112].mxu1  ;;  %v11855_v50 = vpop.f32.mrb[223].mxu0 }
 0x571   : > { %v6251_v54 = vadd.f32 %v6245_v31, %v6170_v1  ;;  %v11614_v13 = vpop.f32.mrb[113].mxu1 }
 0x572   : > { %v6248_v42 = vpop.f32.mrb[114].mxu1  ;;  %11859 = vmatpush3.bf16.msra.mxu1 %v12512_v58  ;;  %v12527_v13 = vld [vmem:[%s15645_s5 + $0x480] sm:$0xff]  }
 0x573   : > { %v11615_v45 = vpop.f32.mrb[115].mxu1  ;;  %11860 = vmatprep.subr.bf16.mxu1 %v12632_v0  ;;  %v8376_v42 = vrot.slane %v14960_v18, 1 }
 0x576   : > { %11861 = vmatpush3.bf16.msra.mxu1 %v12513_v55  ;;  %v12528_v55 = vld [vmem:[%s15645_s5 + $0x488] sm:$0xff]  }
 0x577   : > { %11862 = vmatprep.subr.bf16.mxu1 %v12632_v0 }
 0x57a   : > { %11863 = vmatpush3.bf16.msra.mxu1 %v12514_v6  ;;  %v12529_v6 = vld [vmem:[%s15645_s5 + $0x490] sm:$0xff]  }
 0x57b   : > { %11880 = vmatprep.subr.bf16.mxu1 %v12632_v0 }
 0x57d   : > { %11865 = vmatmul.mubr.msk.bf16.vlgmr.msra.gmra.mrb[168].mxu1 %vm5356_vm4, %v7889_v11  ;;  %v15330_v4 = vpop.f32.mrb[224].mxu0 }
 0x57e   : > { %11881 = vmatpush3.bf16.msra.mxu1 %v12515_v48  ;;  %11888 = vmatprep.mubr.msk.bf16.mxu1 %vm12634_vm2, %v12632_v0  ;;  %v11878_v40 = vpop.f32.mrb[225].mxu0 }
 0x57f   : > { %11882 = vmatprep.subr.bf16.mxu1 %v12632_v0  ;;  %v8035_v27 = vpop.f32.mrb[226].mxu0 }
 0x580   : > { %v6323_v34 = vpop.f32.mrb[116].mxu1  ;;  %v11879_v2 = vpop.f32.mrb[227].mxu0 }
 0x581   : > { %v6329_v49 = vadd.f32 %v6323_v34, %v6251_v54  ;;  %v11626_v30 = vpop.f32.mrb[117].mxu1  ;;  %v12526_v54 = vld [vmem:[%s15645_s5 + $0x458] sm:$0xff]  }
 0x582   : > { %v6326_v15 = vpop.f32.mrb[118].mxu1  ;;  %11883 = vmatpush3.bf16.msra.mxu1 %v12516_v62  ;;  %v12531_v30 = vld [vmem:[%s15645_s5 + $0x4c0] sm:$0xff]  }
 0x583   : > { %v11627_v32 = vpop.f32.mrb[119].mxu1  ;;  %11884 = vmatprep.subr.bf16.mxu1 %v12632_v0  ;;  %v8539_v15 = vrot.slane %v15001_v8, 2 }
 0x586   : > { %11885 = vmatpush3.bf16.msra.mxu1 %v12517_v51  ;;  %v12532_v51 = vld [vmem:[%s15645_s5 + $0x4c8] sm:$0xff]  }
 0x587   : > { %11886 = vmatprep.subr.bf16.mxu1 %v12632_v0 }
 0x58a   : > { %11887 = vmatpush3.bf16.msra.mxu1 %v12518_v7  ;;  %v12533_v7 = vld [vmem:[%s15645_s5 + $0x4d0] sm:$0xff]  }
 0x58b   : > { %11904 = vmatprep.subr.bf16.mxu1 %v12632_v0 }
 0x58d   : > { %11889 = vmatmul.mubr.msk.bf16.vlgmr.msra.gmra.mrb[172].mxu1 %vm5356_vm4, %v8052_v56  ;;  %v15352_v23 = vpop.f32.mrb[228].mxu0 }
 0x58e   : > { %11905 = vmatpush3.bf16.msra.mxu1 %v12519_v28  ;;  %11912 = vmatprep.mubr.msk.bf16.mxu1 %vm12634_vm2, %v12632_v0  ;;  %v11902_v35 = vpop.f32.mrb[229].mxu0 }
 0x58f   : > { %11906 = vmatprep.subr.bf16.mxu1 %v12632_v0  ;;  %v8198_v26 = vpop.f32.mrb[230].mxu0 }
 0x590   : > { %v6406_v37 = vpop.f32.mrb[120].mxu1  ;;  %v11903_v1 = vpop.f32.mrb[231].mxu0 }
 0x591   : > { %v6412_v22 = vadd.f32 %v6406_v37, %v6329_v49  ;;  %v11638_v36 = vpop.f32.mrb[121].mxu1  ;;  %v12530_v49 = vld [vmem:[%s15645_s5 + $0x498] sm:$0xff]  }
 0x592   : > { %v6409_v43 = vpop.f32.mrb[122].mxu1  ;;  %11907 = vmatpush3.bf16.msra.mxu1 %v12520_v29  ;;  %v12535_v36 = vld [vmem:[%s15645_s5 + $0x500] sm:$0xff]  }
 0x593   : > { %v11639_v52 = vpop.f32.mrb[123].mxu1  ;;  %11908 = vmatprep.subr.bf16.mxu1 %v12632_v0  ;;  %v8702_v43 = vrot.slane %v15042_v14, 3 }
 0x596   : > { %11909 = vmatpush3.bf16.msra.mxu1 %v12521_v53  ;;  %v12536_v53 = vld [vmem:[%s15645_s5 + $0x508] sm:$0xff]  }
 0x597   : > { %11910 = vmatprep.subr.bf16.mxu1 %v12632_v0 }
 0x59a   : > { %11911 = vmatpush3.bf16.msra.mxu1 %v12522_v47  ;;  %v12537_v47 = vld [vmem:[%s15645_s5 + $0x510] sm:$0xff]  }
 0x59b   : > { %11928 = vmatprep.subr.bf16.mxu1 %v12632_v0 }
 0x59d   : > { %11913 = vmatmul.mubr.msk.bf16.vlgmr.msra.gmra.mrb[176].mxu1 %vm5356_vm4, %v14921_v63  ;;  %v15374_v5 = vpop.f32.mrb[232].mxu0  ;;  %v12525_v63 = vld [vmem:[%s15645_s5 + $0x450] sm:$0xff]  }
 0x59e   : > { %11929 = vmatpush3.bf16.msra.mxu1 %v12523_v41  ;;  %11936 = vmatprep.mubr.msk.bf16.mxu1 %vm12634_vm2, %v12632_v0  ;;  %v11926_v12 = vpop.f32.mrb[233].mxu0 }
 0x59f   : > { %11930 = vmatprep.subr.bf16.mxu1 %v12632_v0  ;;  %v8359_v58 = vpop.f32.mrb[234].mxu0 }
 0x5a0   : > { %v6488_v10 = vpop.f32.mrb[124].mxu1  ;;  %v11927_v31 = vpop.f32.mrb[235].mxu0 }
 0x5a1   : > { %v6494_v60 = vadd.f32 %v6488_v10, %v6412_v22  ;;  %v11650_v38 = vpop.f32.mrb[125].mxu1  ;;  %v12534_v22 = vld [vmem:[%s15645_s5 + $0x4d8] sm:$0xff]  }
 0x5a2   : > { %v6491_v24 = vpop.f32.mrb[126].mxu1  ;;  %11931 = vmatpush3.bf16.msra.mxu1 %v12524_v39  ;;  %v12538_v38 = vld [vmem:[%s15645_s5 + $0x518] sm:$0xff]  }
 0x5a3   : > { %v11651_v3 = vpop.f32.mrb[127].mxu1  ;;  %11932 = vmatprep.subr.bf16.mxu1 %v12632_v0  ;;  %v12539_v24 = vld [vmem:[%s15645_s5 + $0x540] sm:$0xff]  }
 0x5a6   : > { %11933 = vmatpush3.bf16.msra.mxu1 %v12525_v63  ;;  %v12540_v63 = vld [vmem:[%s15645_s5 + $0x548] sm:$0xff]  }
 0x5a7   : > { %11934 = vmatprep.subr.bf16.mxu1 %v12632_v0 }
 0x5aa   : > { %11935 = vmatpush3.bf16.msra.mxu1 %v12526_v54 }
 0x5ab   : > { %11952 = vmatprep.subr.bf16.mxu1 %v12632_v0 }
 0x5ad   : > { %11937 = vmatmul.mubr.msk.bf16.vlgmr.msra.gmra.mrb[180].mxu1 %vm5356_vm4, %v8376_v42  ;;  %v15396_v18 = vpop.f32.mrb[236].mxu0 }
 0x5ae   : > { %11953 = vmatpush3.bf16.msra.mxu1 %v12527_v13  ;;  %11960 = vmatprep.mubr.msk.bf16.mxu1 %vm12634_vm2, %v12632_v0  ;;  %v11950_v11 = vpop.f32.mrb[237].mxu0 }
 0x5af   : > { %11954 = vmatprep.subr.bf16.mxu1 %v12632_v0  ;;  %v8522_v62 = vpop.f32.mrb[238].mxu0 }
 0x5b0   : > { %v6569_v45 = vpop.f32.mrb[128].mxu1  ;;  %v11951_v34 = vpop.f32.mrb[239].mxu0 }
 0x5b1   : > { %v6575_v16 = vadd.f32 %v6569_v45, %v6494_v60  ;;  %v11662_v9 = vpop.f32.mrb[129].mxu1 }
 0x5b2   : > { %v6572_v50 = vpop.f32.mrb[130].mxu1  ;;  %11955 = vmatpush3.bf16.msra.mxu1 %v12528_v55  ;;  %v12542_v9 = vld [vmem:[%s15645_s5 + $0x558] sm:$0xff]  }
 0x5b3   : > { %v11663_v48 = vpop.f32.mrb[131].mxu1  ;;  %11956 = vmatprep.subr.bf16.mxu1 %v12632_v0  ;;  %v12543_v50 = vld [vmem:[%s15645_s5 + $0x580] sm:$0xff]  }
 0x5b6   : > { %11957 = vmatpush3.bf16.msra.mxu1 %v12529_v6  ;;  %v9026_v6 = vrot.slane %v15127_v44, 1 }
 0x5b7   : > { %11958 = vmatprep.subr.bf16.mxu1 %v12632_v0 }
 0x5ba   : > { %11959 = vmatpush3.bf16.msra.mxu1 %v12530_v49  ;;  %v12545_v49 = vld [vmem:[%s15645_s5 + $0x590] sm:$0xff]  }
 0x5bb   : > { %11976 = vmatprep.subr.bf16.mxu1 %v12632_v0 }
 0x5bd   : > { %11961 = vmatmul.mubr.msk.bf16.vlgmr.msra.gmra.mrb[184].mxu1 %vm5356_vm4, %v8539_v15  ;;  %v15418_v8 = vpop.f32.mrb[240].mxu0 }
 0x5be   : > { %11977 = vmatpush3.bf16.msra.mxu1 %v12531_v30  ;;  %11984 = vmatprep.mubr.msk.bf16.mxu1 %vm12634_vm2, %v12632_v0  ;;  %v11974_v56 = vpop.f32.mrb[241].mxu0 }
 0x5bf   : > { %11978 = vmatprep.subr.bf16.mxu1 %v12632_v0  ;;  %v8685_v29 = vpop.f32.mrb[242].mxu0 }
 0x5c0   : > { %v6651_v32 = vpop.f32.mrb[132].mxu1  ;;  %v11975_v37 = vpop.f32.mrb[243].mxu0 }
 0x5c1   : > { %v6657_v40 = vadd.f32 %v6651_v32, %v6575_v16  ;;  %v11674_v27 = vpop.f32.mrb[133].mxu1 }
 0x5c2   : > { %v6654_v2 = vpop.f32.mrb[134].mxu1  ;;  %11979 = vmatpush3.bf16.msra.mxu1 %v12532_v51  ;;  %v12546_v27 = vld [vmem:[%s15645_s5 + $0x598] sm:$0xff]  }
 0x5c3   : > { %v11675_v28 = vpop.f32.mrb[135].mxu1  ;;  %11980 = vmatprep.subr.bf16.mxu1 %v12632_v0  ;;  %v12547_v2 = vld [vmem:[%s15645_s5 + $0x5c0] sm:$0xff]  }
 0x5c6   : > { %11981 = vmatpush3.bf16.msra.mxu1 %v12533_v7  ;;  %v9189_v7 = vrot.slane %v15171_v57, 2 }
 0x5c7   : > { %11982 = vmatprep.subr.bf16.mxu1 %v12632_v0 }
 0x5ca   : > { %11983 = vmatpush3.bf16.msra.mxu1 %v12534_v22  ;;  %v12549_v22 = vld [vmem:[%s15645_s5 + $0x5d0] sm:$0xff]  }
 0x5cb   : > { %12000 = vmatprep.subr.bf16.mxu1 %v12632_v0 }
 0x5cd   : > { %11985 = vmatmul.mubr.msk.bf16.vlgmr.msra.gmra.mrb[188].mxu1 %vm5356_vm4, %v8702_v43  ;;  %v15440_v14 = vpop.f32.mrb[244].mxu0 }
 0x5ce   : > { %12001 = vmatpush3.bf16.msra.mxu1 %v12535_v36  ;;  %12008 = vmatprep.mubr.msk.bf16.mxu1 %vm12634_vm2, %v12632_v0  ;;  %v11998_v39 = vpop.f32.mrb[245].mxu0 }
 0x5cf   : > { %12002 = vmatprep.subr.bf16.mxu1 %v12632_v0  ;;  %v8848_v10 = vpop.f32.mrb[246].mxu0 }
 0x5d0   : > { %v6732_v52 = vpop.f32.mrb[136].mxu1  ;;  %v11999_v60 = vpop.f32.mrb[247].mxu0 }
 0x5d1   : > { %v6738_v35 = vadd.f32 %v6732_v52, %v6657_v40  ;;  %v11686_v26 = vpop.f32.mrb[137].mxu1 }
 0x5d2   : > { %v6735_v1 = vpop.f32.mrb[138].mxu1  ;;  %12003 = vmatpush3.bf16.msra.mxu1 %v12536_v53  ;;  %v12550_v26 = vld [vmem:[%s15645_s5 + $0x5d8] sm:$0xff]  }
 0x5d3   : > { %v11687_v41 = vpop.f32.mrb[139].mxu1  ;;  %12004 = vmatprep.subr.bf16.mxu1 %v12632_v0  ;;  %v12551_v1 = vld [vmem:[%s15645_s5 + $0x600] sm:$0xff]  }
 0x5d6   : > { %12005 = vmatpush3.bf16.msra.mxu1 %v12537_v47  ;;  %v9352_v47 = vrot.slane %v15215_v21, 3 }
 0x5d7   : > { %12006 = vmatprep.subr.bf16.mxu1 %v12632_v0 }
 0x5da   : > { %12007 = vmatpush3.bf16.msra.mxu1 %v12538_v38  ;;  %v12553_v38 = vld [vmem:[%s15645_s5 + $0x610] sm:$0xff]  }
 0x5db   : > { %12024 = vmatprep.subr.bf16.mxu1 %v12632_v0 }
 0x5dd   : > { %12009 = vmatmul.mubr.msk.bf16.vlgmr.msra.gmra.mrb[192].mxu1 %vm5356_vm4, %v15086_v20  ;;  %v15462_v54 = vpop.f32.mrb[248].mxu0  ;;  %v12541_v20 = vld [vmem:[%s15645_s5 + $0x550] sm:$0xff]  }
 0x5de   : > { %12025 = vmatpush3.bf16.msra.mxu1 %v12539_v24  ;;  %12032 = vmatprep.mubr.msk.bf16.mxu1 %vm12634_vm2, %v12632_v0  ;;  %v12022_v42 = vpop.f32.mrb[249].mxu0 }
 0x5df   : > { %12026 = vmatprep.subr.bf16.mxu1 %v12632_v0  ;;  %v9009_v45 = vpop.f32.mrb[250].mxu0 }
 0x5e0   : > { %v6814_v3 = vpop.f32.mrb[140].mxu1  ;;  %v12023_v16 = vpop.f32.mrb[251].mxu0 }
 0x5e1   : > { %v6820_v12 = vadd.f32 %v6814_v3, %v6738_v35  ;;  %v11698_v58 = vpop.f32.mrb[141].mxu1 }
 0x5e2   : > { %v6817_v31 = vpop.f32.mrb[142].mxu1  ;;  %12027 = vmatpush3.bf16.msra.mxu1 %v12540_v63 }
 0x5e3   : > { %v11699_v13 = vpop.f32.mrb[143].mxu1  ;;  %12028 = vmatprep.subr.bf16.mxu1 %v12632_v0  ;;  %v6901_v55 = vadd.f32 %v15117_v61, %v6820_v12  ;;  %v12544_v61 = vld [vmem:[%s15645_s5 + $0x588] sm:$0xff]   ;;  %v12554_v31 = vld [vmem:[%s15645_s5 + $0x618] sm:$0xff]  }
 0x5e6   : > { %12029 = vmatpush3.bf16.msra.mxu1 %v12541_v20  ;;  %v9502_v20 = vld [vmem:[#allocation6 + $0x18] sm:$0x1] }
 0x5e7   : > { %12030 = vmatprep.subr.bf16.mxu1 %v12632_v0 }
 0x5ea   : > { %12031 = vmatpush3.bf16.msra.mxu1 %v12542_v9 }
 0x5eb   : > { %12048 = vmatprep.subr.bf16.mxu1 %v12632_v0 }
 0x5ed   : > { %12033 = vmatmul.mubr.msk.bf16.vlgmr.msra.gmra.mrb[196].mxu1 %vm5356_vm4, %v9026_v6  ;;  %v15485_v44 = vpop.f32.mrb[252].mxu0 }
 0x5ee   : > { %12049 = vmatpush3.bf16.msra.mxu1 %v12543_v50  ;;  %12056 = vmatprep.mubr.msk.bf16.mxu1 %vm12634_vm2, %v12632_v0  ;;  %v12046_v15 = vpop.f32.mrb[253].mxu0 }
 0x5ef   : > { %12050 = vmatprep.subr.bf16.mxu1 %v12632_v0  ;;  %v9172_v32 = vpop.f32.mrb[254].mxu0 }
 0x5f0   : > { %v6973_v48 = vpop.f32.mrb[144].mxu1  ;;  %v12047_v40 = vpop.f32.mrb[255].mxu0 }
 0x5f1   : > { %v6979_v11 = vadd.f32 %v6973_v48, %v6901_v55  ;;  %v11722_v62 = vpop.f32.mrb[145].mxu1 }
 0x5f2   : > { %v6976_v34 = vpop.f32.mrb[146].mxu1  ;;  %12051 = vmatpush3.bf16.msra.mxu1 %v12544_v61 }
 0x5f3   : > { %v11723_v30 = vpop.f32.mrb[147].mxu1  ;;  %12052 = vmatprep.subr.bf16.mxu1 %v12632_v0  ;;  %v7062_v51 = vadd.f32 %v15161_v17, %v6979_v11  ;;  %v12548_v17 = vld [vmem:[%s15645_s5 + $0x5c8] sm:$0xff]  }
 0x5f6   : > { %12053 = vmatpush3.bf16.msra.mxu1 %v12545_v49 }
 0x5f7   : > { %12054 = vmatprep.subr.bf16.mxu1 %v12632_v0 }
 0x5fa   : > { %12055 = vmatpush3.bf16.msra.mxu1 %v12546_v27 }
 0x5fb   : > { %12072 = vmatprep.subr.bf16.mxu1 %v12632_v0 }
 0x5fd   : > { %12057 = vmatmul.mubr.msk.bf16.vlgmr.msra.gmra.mrb[200].mxu1 %vm5356_vm4, %v9189_v7  ;;  %v15508_v57 = vpop.f32.mrb[0].mxu0 }
 0x5fe   : > { %12073 = vmatpush3.bf16.msra.mxu1 %v12547_v2  ;;  %12080 = vmatprep.mubr.msk.bf16.mxu1 %vm12634_vm2, %v12632_v0  ;;  %v12070_v43 = vpop.f32.mrb[1].mxu0 }
 0x5ff   : > { %12074 = vmatprep.subr.bf16.mxu1 %v12632_v0  ;;  %v9335_v52 = vpop.f32.mrb[2].mxu0  ;;  %v12559_v43 = vld [vmem:[%s15647_s7 + $0x20] sm:$0xff]  }
 0x600   : > { %v7138_v28 = vpop.f32.mrb[148].mxu1  ;;  %v12071_v35 = vpop.f32.mrb[3].mxu0 }
 0x601   : > { %v7144_v56 = vadd.f32 %v7138_v28, %v7062_v51  ;;  %v11746_v29 = vpop.f32.mrb[149].mxu1 }
 0x602   : > { %v7141_v37 = vpop.f32.mrb[150].mxu1  ;;  %12075 = vmatpush3.bf16.msra.mxu1 %v12548_v17  ;;  %v12555_v17 = vld [vmem:[%s15647_s7] sm:$0xff]  }
 0x603   : > { %v11747_v36 = vpop.f32.mrb[151].mxu1  ;;  %12076 = vmatprep.subr.bf16.mxu1 %v12632_v0  ;;  %v7225_v53 = vadd.f32 %v15205_v19, %v7144_v56  ;;  %v12552_v19 = vld [vmem:[%s15645_s5 + $0x608] sm:$0xff]   ;;  %12109 = vmatpush3.bf16.msra.mxu0 %v12555_v17 }
 0x604   : > { %12110 = vmatprep.subr.bf16.mxu0 %v12632_v0  ;;  %v12558_v36 = vld [vmem:[%s15647_s7 + $0x18] sm:$0xff]  }
 0x606   : > { %12077 = vmatpush3.bf16.msra.mxu1 %v12549_v22 }
 0x607   : > { %12078 = vmatprep.subr.bf16.mxu1 %v12632_v0 }
 0x60a   : > { %12079 = vmatpush3.bf16.msra.mxu1 %v12550_v26 }
 0x60b   : > { %12096 = vmatprep.subr.bf16.mxu1 %v12632_v0 }
 0x60d   : > { %12081 = vmatmul.mubr.msk.bf16.vlgmr.msra.gmra.mrb[204].mxu1 %vm5356_vm4, %v9352_v47  ;;  %v15531_v21 = vpop.f32.mrb[4].mxu0 }
 0x60e   : > { %12097 = vmatpush3.bf16.msra.mxu1 %v12551_v1  ;;  %12104 = vmatprep.mubr.msk.bf16.mxu1 %vm12634_vm2, %v12632_v0  ;;  %v12094_v63 = vpop.f32.mrb[5].mxu0  ;;  %vm9689_vm2 = vcmask 73728  }
 0x60f   : > { %12098 = vmatprep.subr.bf16.mxu1 %v12632_v0  ;;  %v9498_v12 = vpop.f32.mrb[6].mxu0 }
 0x610   : > { %v7301_v41 = vpop.f32.mrb[152].mxu1  ;;  %v12095_v58 = vpop.f32.mrb[7].mxu0 }
 0x611   : > { %v7307_v39 = vadd.f32 %v7301_v41, %v7225_v53  ;;  %v11770_v10 = vpop.f32.mrb[153].mxu1  ;;  %v12560_v53 = vld [vmem:[%s15647_s7 + $0x28] sm:$0xff]   ;;  %v12562_v41 = vld [vmem:[%s15647_s7 + $0x38] sm:$0xff]  }
 0x612   : > { %v7304_v60 = vpop.f32.mrb[154].mxu1  ;;  %12099 = vmatpush3.bf16.msra.mxu1 %v12552_v19  ;;  %v12561_v19 = vld [vmem:[%s15647_s7 + $0x30] sm:$0xff]  }
 0x613   : > { %v11771_v24 = vpop.f32.mrb[155].mxu1  ;;  %12100 = vmatprep.subr.bf16.mxu1 %v12632_v0  ;;  %v7388_v3 = vadd.f32 %v15242_v25, %v7307_v39 }
 0x616   : > { %12101 = vmatpush3.bf16.msra.mxu1 %v12553_v38 }
 0x617   : > { %12102 = vmatprep.subr.bf16.mxu1 %v12632_v0 }
 0x61a   : > { %12103 = vmatpush3.bf16.msra.mxu1 %v12554_v31 }
 0x61d   : > { %12105 = vmatmul.mubr.msk.bf16.vlgmr.msra.gmra.mrb[208].mxu1 %vm5356_vm4, %v9502_v20 }
 0x620   : > { %v7464_v13 = vpop.f32.mrb[156].mxu1 }
 0x621   : > { %v7470_v42 = vadd.f32 %v7464_v13, %v7388_v3  ;;  %v11794_v55 = vpop.f32.mrb[157].mxu1 }
 0x622   : > { %v7467_v45 = vpop.f32.mrb[158].mxu1 }
 0x623   : > { %v11795_v16 = vpop.f32.mrb[159].mxu1  ;;  %v7551_v25 = vadd.f32 %v15264_v59, %v7470_v42 }
 0x630   : > { %v7623_v9 = vpop.f32.mrb[160].mxu1 }
 0x631   : > { %v7629_v50 = vadd.f32 %v7623_v9, %v7551_v25  ;;  %v11818_v6 = vpop.f32.mrb[161].mxu1 }
 0x632   : > { %v7626_v61 = vpop.f32.mrb[162].mxu1 }
 0x633   : > { %v11819_v48 = vpop.f32.mrb[163].mxu1  ;;  %v7712_v11 = vadd.f32 %v15286_v46, %v7629_v50  ;;  %v12556_v46 = vld [vmem:[%s15647_s7 + $0x8] sm:$0xff]  }
 0x634   : > { %12111 = vmatpush3.bf16.msra.mxu0 %v12556_v46 }
 0x635   : > { %12112 = vmatprep.subr.bf16.mxu0 %v12632_v0 }
 0x640   : > { %v7788_v62 = vpop.f32.mrb[164].mxu1 }
 0x641   : > { %v7794_v34 = vadd.f32 %v7788_v62, %v7712_v11  ;;  %v11842_v49 = vpop.f32.mrb[165].mxu1 }
 0x642   : > { %v7791_v30 = vpop.f32.mrb[166].mxu1 }
 0x643   : > { %v11843_v15 = vpop.f32.mrb[167].mxu1  ;;  %v7875_v51 = vadd.f32 %v15308_v33, %v7794_v34 }
 0x650   : > { %v7951_v32 = vpop.f32.mrb[168].mxu1 }
 0x651   : > { %v7957_v40 = vadd.f32 %v7951_v32, %v7875_v51  ;;  %v11866_v27 = vpop.f32.mrb[169].mxu1 }
 0x652   : > { %v7954_v2 = vpop.f32.mrb[170].mxu1 }
 0x653   : > { %v11867_v7 = vpop.f32.mrb[171].mxu1  ;;  %v8038_v59 = vadd.f32 %v15330_v4, %v7957_v40  ;;  %v12557_v4 = vld [vmem:[%s15647_s7 + $0x10] sm:$0xff]  }
 0x654   : > { %12113 = vmatpush3.bf16.msra.mxu0 %v12557_v4 }
 0x655   : > { %12114 = vmatprep.subr.bf16.mxu0 %v12632_v0 }
 0x658   : > { %12115 = vmatpush3.bf16.msra.mxu0 %v12558_v36 }
 0x659   : > { %12116 = vmatprep.subr.bf16.mxu0 %v12632_v0 }
 0x65c   : > { %12117 = vmatpush3.bf16.msra.mxu0 %v12559_v43 }
 0x65d   : > { %12118 = vmatprep.subr.bf16.mxu0 %v12632_v0 }
 0x660   : > { %v8114_v33 = vpop.f32.mrb[172].mxu1  ;;  %12119 = vmatpush3.bf16.msra.mxu0 %v12560_v53 }
 0x661   : > { %v8120_v28 = vadd.f32 %v8114_v33, %v8038_v59  ;;  %v11890_v56 = vpop.f32.mrb[173].mxu1  ;;  %12120 = vmatprep.subr.bf16.mxu0 %v12632_v0 }
 0x662   : > { %v8117_v29 = vpop.f32.mrb[174].mxu1 }
 0x663   : > { %v11891_v37 = vpop.f32.mrb[175].mxu1  ;;  %v8201_v22 = vadd.f32 %v15352_v23, %v8120_v28 }
 0x664   : > { %12121 = vmatpush3.bf16.msra.mxu0 %v12561_v19 }
 0x665   : > { %12122 = vmatprep.subr.bf16.mxu0 %v12632_v0 }
 0x668   : > { %12123 = vmatpush3.bf16.msra.mxu0 %v12562_v41 }
 0x670   : > { %v8273_v23 = vpop.f32.mrb[176].mxu1 }
 0x671   : > { %v8279_v52 = vadd.f32 %v8273_v23, %v8201_v22  ;;  %v11914_v35 = vpop.f32.mrb[177].mxu1  ;;  %v9600_v22 = vld [vmem:[%s15648_s8] sm:$0x1] }
 0x672   : > { %v8276_v26 = vpop.f32.mrb[178].mxu1 }
 0x673   : > { %v11915_v1 = vpop.f32.mrb[179].mxu1  ;;  %v8362_v47 = vadd.f32 %v15374_v5, %v8279_v52 }
 0x680   : > { %v8438_v39 = vpop.f32.mrb[180].mxu1 }
 0x681   : > { %v8444_v10 = vadd.f32 %v8438_v39, %v8362_v47  ;;  %v11938_v60 = vpop.f32.mrb[181].mxu1 }
 0x682   : > { %v8441_v38 = vpop.f32.mrb[182].mxu1 }
 0x683   : > { %v11939_v24 = vpop.f32.mrb[183].mxu1  ;;  %v8525_v63 = vadd.f32 %v15396_v18, %v8444_v10 }
 0x690   : > { %v8601_v5 = vpop.f32.mrb[184].mxu1 }
 0x691   : > { %v8607_v3 = vadd.f32 %v8601_v5, %v8525_v63  ;;  %v11962_v12 = vpop.f32.mrb[185].mxu1 }
 0x692   : > { %v8604_v58 = vpop.f32.mrb[186].mxu1 }
 0x693   : > { %v11963_v31 = vpop.f32.mrb[187].mxu1  ;;  %v8688_v20 = vadd.f32 %v15418_v8, %v8607_v3 }
 0x6a0   : > { %v8764_v13 = vpop.f32.mrb[188].mxu1 }
 0x6a1   : > { %v8770_v42 = vadd.f32 %v8764_v13, %v8688_v20  ;;  %v11986_v55 = vpop.f32.mrb[189].mxu1 }
 0x6a2   : > { %v8767_v45 = vpop.f32.mrb[190].mxu1 }
 0x6a3   : > { %v11987_v0 = vpop.f32.mrb[191].mxu1  ;;  %v8851_v16 = vadd.f32 %v15440_v14, %v8770_v42 }
 0x6b0   : > { %v8923_v25 = vpop.f32.mrb[192].mxu1 }
 0x6b1   : > { %v8929_v9 = vadd.f32 %v8923_v25, %v8851_v16  ;;  %v12010_v50 = vpop.f32.mrb[193].mxu1 }
 0x6b2   : > { %v8926_v6 = vpop.f32.mrb[194].mxu1 }
 0x6b3   : > { %v12011_v61 = vpop.f32.mrb[195].mxu1  ;;  %v9012_v18 = vadd.f32 %v15462_v54, %v8929_v9 }
 0x6c0   : > { %v9088_v48 = vpop.f32.mrb[196].mxu1 }
 0x6c1   : > { %v9094_v11 = vadd.f32 %v9088_v48, %v9012_v18  ;;  %v12034_v62 = vpop.f32.mrb[197].mxu1 }
 0x6c2   : > { %v9091_v34 = vpop.f32.mrb[198].mxu1 }
 0x6c3   : > { %v12035_v49 = vpop.f32.mrb[199].mxu1  ;;  %v9175_v8 = vadd.f32 %v15485_v44, %v9094_v11  ;;  %v9580_v44 = vld [vmem:[%s15646_s6] sm:$0x1] }
 0x6d0   : > { %v9251_v30 = vpop.f32.mrb[200].mxu1 }
 0x6d1   : > { %v9257_v15 = vadd.f32 %v9251_v30, %v9175_v8  ;;  %v12058_v51 = vpop.f32.mrb[201].mxu1 }
 0x6d2   : > { %v9254_v32 = vpop.f32.mrb[202].mxu1 }
 0x6d3   : > { %v12059_v40 = vpop.f32.mrb[203].mxu1  ;;  %v9338_v14 = vadd.f32 %v15508_v57, %v9257_v15 }
 0x6e0   : > { %v9414_v27 = vpop.f32.mrb[204].mxu1 }
 0x6e1   : > { %v9420_v2 = vadd.f32 %v9414_v27, %v9338_v14  ;;  %v12082_v7 = vpop.f32.mrb[205].mxu1 }
 0x6e2   : > { %v9417_v54 = vpop.f32.mrb[206].mxu1 }
 0x6e3   : > { %v12083_v59 = vpop.f32.mrb[207].mxu1  ;;  %v9501_v17 = vadd.f32 %v15531_v21, %v9420_v2 }
 0x6f0   : > { %v9573_v46 = vpop.f32.mrb[208].mxu1 }
 0x6f1   : > { %v9579_v33 = vadd.f32 %v9573_v46, %v9501_v17  ;;  %v12106_v28 = vpop.f32.mrb[209].mxu1 }
 0x6f2   : > { %v9576_v56 = vpop.f32.mrb[210].mxu1 }
 0x6f3   : > { %v9581_v29 = vadd.f32 %v9580_v44, %v9579_v33  ;;  %v12107_v4 = vpop.f32.mrb[211].mxu1 }
 0x6f5   : > { %v9582_v57 = vmax.f32 %v9581_v29, 0.0 }
 0x6f7   : > { %v9583_v37 = vpack.c.bf16 %v9582_v57, %v9582_v57 }
 0x6f9   : > { %12125 = vmatmul.mubr.bf16.vlgmr.msra.gmra.mrb[8].mxu0 %v9583_v37 }
 0x7cc   : > { %v9683_v21 = vpop.f32.mrb[8].mxu0 }
 0x7cd   : > { %v9684_v36 = vadd.f32 %v9683_v21, %v9600_v22  ;;  %v12126_v43 = vpop.f32.mrb[9].mxu0 }
 0x7ce   : > { %v9686_v53 = vpop.f32.mrb[10].mxu0 }
 0x7cf   : > { %v12127_v23 = vpop.f32.mrb[11].mxu0  ;;  %9690 = vst.msk [vmem:[%s324_s26] sm:$0x1] %vm9689_vm2, %v9684_v36 }
 0x7d0   : > { %12581 = shalt.err (!%p12578_p3)
}
 0x7d1   : > { %s12582_s27 = scalar_lea.hbm %s15598_s28, 16  ;;  %s12586_s26 = scalar_lea.hbm %s15649_s9, 32 }
 0x7d2   : > { %p12583_p4 = scmp.ne.s32.totalorder %s15598_s28, %s12582_s27  ;;  %p12587_p9 = scmp.lt.u32.totalorder %s15598_s28, %s15649_s9 }
 0x7d3   : > { %p12588_p10 = scmp.lt.u32.totalorder %s12586_s26, %s12582_s27  ;;  %p12590_p12 = scmp.lt.u32.totalorder %s12582_s27, %s15598_s28 }
 0x7d4   : > { %p12584_p7 = pnand %p12583_p4, %p12728_p5 }
 0x7d5   : > { %p12589_p11 = por %p12588_p10, %p12587_p9 }
 0x7d6   : > { %p12585_p8 = pneg %p12584_p7 }
 0x7d7   : > { %p12591_p13 = por %p12590_p12, %p12589_p11 }
 0x7d9   : > { %p12592_p0 = pnand %p12591_p13, %p12585_p8 }
 0x7db   : > { %12595 = shalt.err (!%p12592_p0)
}
 0x7dc   : > { %12129 = dma.vmem_to_hbm [thread:$0]  (%p12728_p5), %s15600_s14, 16, %s15598_s28, %s9692_s13  }
 0x7dd PF: > { %p12135_p1 = scmp.ge.s32.totalorder %s12630_s12, 2  ;;  %s9716_s29 = sand.u32 1, %s12618_s30  }
 0x7de   : > { %s9717_s17 = scalar_lea.sflag [#allocation8], %s9716_s29 }
 0x7df   : > { %p12132_p2 = pnand %p12135_p1, %p12732_p6 }
 0x7e1   : > { %12613 = dma.done.wait (!%p12132_p2), %s9717_s17, 16  }
 0x7e2   : > { %12615 = vsyncadd (!%p12132_p2), %s9717_s17, 4294967280  ;;  %p19_p3 = scmp.ge.s32.totalorder %s12715_s15, 4   ;;  %s15668_s30 = smov %s12622_s10 }
 0x7e3   : > { %s15669_s10 = smov %s12626_s11  ;;  %s15670_s11 = smov %s12726_s18 }
 0x7e4   : > { %s15671_s12 = smov %s12715_s15  ;;  %21 = sbr.rel (!%p19_p3) target bundleno = 3 (0x3), region = 277 }
 0x7eb   :  { %9721 = vsyncpa [#allocation8], 1 }
 0x7ec   :  { %9723 = vsyncpa [#allocation8 + $0x1], 1 }

</bundles_post_ra>
